<compile_context>
chip_gen: v5e
topology: v5e:2x2
jax: 0.10.0
libtpu: 0.0.40
codegen_flags: <defaults>
</compile_context>

<pallas_src>
import functools
import numpy as np
import jax
import jax.numpy as jnp
from jax import lax
from jax.experimental import pallas as pl
from jax.experimental.pallas import tpu as pltpu

# ----------------------------- model configuration ---------------------------
CHW = (4, 16, 16)                    # (C, H, W)
N_PATCHES = 4                        # 16 / 4 = 4 (patch size divides spatial dims)
N_BLOCKS = 2
HIDDEN_D = 32
N_HEADS = 2
OUT_D = 10
MLP_RATIO = 4

C, H, W = CHW
PATCH = H // N_PATCHES
INPUT_D = C * PATCH * PATCH          # 64
SEQ = N_PATCHES * N_PATCHES + 1      # 17 (class token + 16 patches)
SEQ_P = 24                           # sequence padded to a sublane multiple (8 | 24)
D_HEAD = HIDDEN_D // N_HEADS         # 16
MLP_D = MLP_RATIO * HIDDEN_D         # 128
OUT_PAD = 128                        # lane-dense output width
LN_EPS = 1e-5
NEG_INF = -1e30

# -------------------- packed parameter slab layout (P_ROWS, 128) -------------
R_WMAP = 0                           # (INPUT_D, HIDDEN_D) patch mapper weight
R_POS = R_WMAP + INPUT_D             # (SEQ_P, HIDDEN_D) pos + class-token + b_map folds
R_WOUT = R_POS + SEQ_P               # (HIDDEN_D, OUT_PAD) head weight, cols>=10 zero
R_BOUT = R_WOUT + HIDDEN_D           # 1 row: head bias, cols>=10 = -1e30 (softmax mask)
R_BLK0 = 128                         # per-block sections, 8-row aligned
BR_QKVW = 0                          # (HIDDEN_D, 3*HIDDEN_D) block-diag fused QKV weight
BR_W1 = BR_QKVW + HIDDEN_D           # (HIDDEN_D, MLP_D)
BR_W2 = BR_W1 + HIDDEN_D             # (MLP_D, HIDDEN_D)
BR_VEC = BR_W2 + MLP_D               # 7 rows: ln1_g, ln1_b, ln2_g, ln2_b, qkv_b, b1, b2
BLOCK_ROWS = 200                     # 192 weight rows + 7 vector rows, padded to x8
P_ROWS = R_BLK0 + N_BLOCKS * BLOCK_ROWS   # 528


# ------------------------------- shared math ----------------------------------
def _gelu_tanh(x):
    # TODO(synk): torch nn.GELU defaults to exact erf; tanh approximation used
    # here so the transcendental runs on the EUP slot (max abs err ~1e-3).
    return 0.5 * x * (1.0 + jnp.tanh(0.7978845608028654 * (x + 0.044715 * x * x * x)))


def _layer_norm(x, g, b):
    mu = jnp.mean(x, axis=-1, keepdims=True)
    xc = x - mu
    var = jnp.mean(xc * xc, axis=-1, keepdims=True)
    return xc * lax.rsqrt(var + LN_EPS) * g + b


def _softmax(x, *, approx):
    m = jnp.max(x, axis=-1, keepdims=True)
    e = jnp.exp(x - m)
    s = jnp.sum(e, axis=-1, keepdims=True)
    if approx:
        return e * pl.reciprocal(s, approx=True)     # EUP vrcp, off the VALU slot
    return e / s


def _mm(a, b):
    return jnp.dot(a, b, preferred_element_type=jnp.float32)


# ---------------------------------- kernel ------------------------------------
def vit_kernel(patches_ref, p_ref, out_ref):
    # patches_ref: (B, SEQ_P, INPUT_D); row 0 per image is zeros (class slot),
    #              rows >= SEQ are zero padding.
    # p_ref:       (P_ROWS, 128) packed parameter slab (resident in VMEM).
    # out_ref:     (B, OUT_PAD) lane-dense class probabilities.
    B = patches_ref.shape[0]
    M = B * SEQ_P

    x = patches_ref[...].reshape(M, INPUT_D)                       # (M, 64)

    w_map = p_ref[R_WMAP:R_WMAP + INPUT_D, 0:HIDDEN_D]             # (64, 32)
    pos = p_ref[R_POS:R_POS + SEQ_P, 0:HIDDEN_D]                   # (24, 32)

    # Patch mapper (bias folded into pos rows 1..16; class token folded into
    # pos row 0; padded rows stay 0).  One big (M, 64) x (64, 32) matmul.
    tok = _mm(x, w_map)                                            # (M, 32)
    seq = (tok.reshape(B, SEQ_P, HIDDEN_D) + pos).reshape(M, HIDDEN_D)

    # Key mask: padded sequence positions (>= SEQ) are removed from softmax.
    kidx = lax.broadcasted_iota(jnp.int32, (1, SEQ_P), 1)
    kmask = jnp.where(kidx < SEQ, 0.0, NEG_INF)                    # (1, 24)

    scale = 1.0 / np.sqrt(D_HEAD)

    for blk in range(N_BLOCKS):                                    # static unroll
        base = R_BLK0 + blk * BLOCK_ROWS
        vrow = base + BR_VEC
        ln1_g = p_ref[vrow + 0:vrow + 1, 0:HIDDEN_D]
        ln1_b = p_ref[vrow + 1:vrow + 2, 0:HIDDEN_D]
        ln2_g = p_ref[vrow + 2:vrow + 3, 0:HIDDEN_D]
        ln2_b = p_ref[vrow + 3:vrow + 4, 0:HIDDEN_D]
        qkv_b = p_ref[vrow + 4:vrow + 5, 0:3 * HIDDEN_D]
        b1 = p_ref[vrow + 5:vrow + 6, 0:MLP_D]
        b2 = p_ref[vrow + 6:vrow + 7, 0:HIDDEN_D]
        qkv_w = p_ref[base + BR_QKVW:base + BR_QKVW + HIDDEN_D, 0:3 * HIDDEN_D]
        w1 = p_ref[base + BR_W1:base + BR_W1 + HIDDEN_D, 0:MLP_D]
        w2 = p_ref[base + BR_W2:base + BR_W2 + MLP_D, 0:HIDDEN_D]

        # ---------------- MSA sublayer ----------------
        h1 = _layer_norm(seq, ln1_g, ln1_b)                        # (M, 32)
        qkv = _mm(h1, qkv_w) + qkv_b                               # (M, 96) fused Q|K|V
        heads = []
        for hd in range(N_HEADS):                                  # static unroll
            lo = hd * D_HEAD
            qh = qkv[:, lo:lo + D_HEAD].reshape(B, SEQ_P, D_HEAD)
            kh = qkv[:, HIDDEN_D + lo:HIDDEN_D + lo + D_HEAD].reshape(B, SEQ_P, D_HEAD)
            vh = qkv[:, 2 * HIDDEN_D + lo:2 * HIDDEN_D + lo + D_HEAD].reshape(B, SEQ_P, D_HEAD)
            s = jnp.einsum('bqd,bkd->bqk', qh, kh,
                           preferred_element_type=jnp.float32) * scale + kmask
            a = _softmax(s, approx=True)                           # (B, 24, 24)
            heads.append(jnp.einsum('bqk,bkd->bqd', a, vh,
                                    preferred_element_type=jnp.float32))
        att = jnp.concatenate(heads, axis=-1)                      # (B, 24, 32)
        seq = seq + att.reshape(M, HIDDEN_D)

        # ---------------- MLP sublayer ----------------
        h2 = _layer_norm(seq, ln2_g, ln2_b)
        hid = _gelu_tanh(_mm(h2, w1) + b1)                         # (M, 128)
        seq = seq + _mm(hid, w2) + b2

    # ---------------- classification head on class tokens ----------------
    cls = seq.reshape(B, SEQ_P, HIDDEN_D)[:, 0:1, :].reshape(B, HIDDEN_D)
    w_out = p_ref[R_WOUT:R_WOUT + HIDDEN_D, :]                     # (32, 128) zero-padded
    b_out = p_ref[R_BOUT:R_BOUT + 1, :]                            # (1, 128), lanes>=10 = -1e30
    logits = _mm(cls, w_out) + b_out                               # (B, 128)
    out_ref[...] = _softmax(logits, approx=False)                  # padded lanes -> exactly 0


# ------------------------------ host-side glue ---------------------------------
def get_positional_embeddings(seq_len, d):
    i = np.arange(seq_len, dtype=np.float64)[:, None]
    j = np.arange(d, dtype=np.float64)[None, :]
    je = j - (j % 2)
    angle = i / np.power(10000.0, je / d)
    return np.where(j % 2 == 0, np.sin(angle), np.cos(angle)).astype(np.float32)


def patchify(images):
    # images: (N, C, H, W) -> (N, n_patches^2, C*ps*ps), same order as torch flatten
    n, c, h, w = images.shape
    x = images.reshape(n, c, N_PATCHES, PATCH, N_PATCHES, PATCH)
    x = x.transpose(0, 2, 4, 1, 3, 5)
    return x.reshape(n, N_PATCHES * N_PATCHES, c * PATCH * PATCH)


def init_params(key):
    """Builds the packed (P_ROWS, 128) slab and a raw-parameter pytree for the
    pure-JAX reference."""
    keys = iter(jax.random.split(key, 64))

    def linear(fan_in, fan_out):
        bound = 1.0 / np.sqrt(fan_in)
        w = np.asarray(jax.random.uniform(next(keys), (fan_in, fan_out),
                                          jnp.float32, -bound, bound))
        b = np.asarray(jax.random.uniform(next(keys), (fan_out,),
                                          jnp.float32, -bound, bound))
        return w, b

    slab = np.zeros((P_ROWS, 128), np.float32)
    raw = {}

    w_map, b_map = linear(INPUT_D, HIDDEN_D)
    cls = np.asarray(jax.random.uniform(next(keys), (HIDDEN_D,), jnp.float32))  # ~torch.rand
    pos = get_positional_embeddings(SEQ, HIDDEN_D)                               # (17, 32)
    raw.update(w_map=w_map, b_map=b_map, cls=cls, pos=pos)

    slab[R_WMAP:R_WMAP + INPUT_D, :HIDDEN_D] = w_map
    # Fold mapper bias + class token into the positional table (kernel patch
    # row 0 is zero, so the class slot gets exactly pos[0] + cls).
    pos_adj = np.zeros((SEQ_P, HIDDEN_D), np.float32)
    pos_adj[0] = pos[0] + cls
    pos_adj[1:SEQ] = pos[1:SEQ] + b_map
    slab[R_POS:R_POS + SEQ_P, :HIDDEN_D] = pos_adj

    blocks = []
    for blk in range(N_BLOCKS):
        base = R_BLK0 + blk * BLOCK_ROWS
        vrow = base + BR_VEC
        bp = {"ln1_g": np.ones(HIDDEN_D, np.float32),
              "ln1_b": np.zeros(HIDDEN_D, np.float32),
              "ln2_g": np.ones(HIDDEN_D, np.float32),
              "ln2_b": np.zeros(HIDDEN_D, np.float32)}
        slab[vrow + 0, :HIDDEN_D] = bp["ln1_g"]
        slab[vrow + 1, :HIDDEN_D] = bp["ln1_b"]
        slab[vrow + 2, :HIDDEN_D] = bp["ln2_g"]
        slab[vrow + 3, :HIDDEN_D] = bp["ln2_b"]
        # Fused block-diagonal QKV: output cols [0:32]=Q, [32:64]=K, [64:96]=V,
        # head h uses input rows / output cols [h*16:(h+1)*16] within each.
        for p_idx, name in enumerate(("q", "k", "v")):
            ws, bs = [], []
            for h in range(N_HEADS):
                w, b = linear(D_HEAD, D_HEAD)
                ws.append(w)
                bs.append(b)
                r0 = base + BR_QKVW + h * D_HEAD
                c0 = p_idx * HIDDEN_D + h * D_HEAD
                slab[r0:r0 + D_HEAD, c0:c0 + D_HEAD] = w
                slab[vrow + 4, c0:c0 + D_HEAD] = b
            bp["w" + name] = np.stack(ws)
            bp["b" + name] = np.stack(bs)
        w1, b1 = linear(HIDDEN_D, MLP_D)
        w2, b2 = linear(MLP_D, HIDDEN_D)
        bp.update(w1=w1, b1=b1, w2=w2, b2=b2)
        slab[base + BR_W1:base + BR_W1 + HIDDEN_D, :MLP_D] = w1
        slab[vrow + 5, :MLP_D] = b1
        slab[base + BR_W2:base + BR_W2 + MLP_D, :HIDDEN_D] = w2
        slab[vrow + 6, :HIDDEN_D] = b2
        blocks.append(bp)
    raw["blocks"] = blocks

    w_out, b_out = linear(HIDDEN_D, OUT_D)
    raw.update(w_out=w_out, b_out=b_out)
    slab[R_WOUT:R_WOUT + HIDDEN_D, :OUT_D] = w_out
    slab[R_BOUT, :OUT_D] = b_out
    slab[R_BOUT, OUT_D:] = NEG_INF        # mask padded logit lanes pre-softmax
    return jnp.asarray(slab), raw


def _round_up(x, m):
    return ((x + m - 1) // m) * m


@functools.partial(jax.jit, static_argnames=("b_tile",))
def _vit_pallas(patches, param_slab, *, b_tile):
    n_pad = patches.shape[0]
    grid = (n_pad // b_tile,)
    return pl.pallas_call(
        vit_kernel,
        out_shape=jax.ShapeDtypeStruct((n_pad, OUT_PAD), jnp.float32),
        grid_spec=pltpu.PrefetchScalarGridSpec(
            num_scalar_prefetch=0,
            grid=grid,
            in_specs=[
                pl.BlockSpec((b_tile, SEQ_P, INPUT_D), lambda b: (b, 0, 0)),
                pl.BlockSpec((P_ROWS, 128), lambda b: (0, 0)),   # resident params
            ],
            out_specs=pl.BlockSpec((b_tile, OUT_PAD), lambda b: (b, 0)),
        ),
        compiler_params=pltpu.CompilerParams(
            dimension_semantics=("parallel",),          # v7x: shard batch over both TCs
            vmem_limit_bytes=32 * 1024 * 1024,
        ),
    )(patches, param_slab)


def vit_forward(images, param_slab, b_tile=128):
    n = images.shape[0]
    bt = min(b_tile, _round_up(n, 8))          # multiple of 8 (lane-dense out block)
    n_pad = _round_up(n, bt)
    patches = patchify(images)                                   # (n, 16, 64)
    padded = jnp.zeros((n_pad, SEQ_P, INPUT_D), jnp.float32)
    padded = padded.at[:n, 1:1 + N_PATCHES * N_PATCHES, :].set(patches)
    out = _vit_pallas(padded, param_slab, b_tile=bt)
    return out[:n, :OUT_D]


# --------------------------- pure-JAX reference --------------------------------
def vit_reference(images, raw):
    n = images.shape[0]
    patches = patchify(images)                                    # (n, 16, 64)
    tokens = patches @ raw["w_map"] + raw["b_map"]
    cls = jnp.broadcast_to(jnp.asarray(raw["cls"]), (n, 1, HIDDEN_D))
    x = jnp.concatenate([cls, tokens], axis=1) + jnp.asarray(raw["pos"])[None]
    for bp in raw["blocks"]:
        h = _layer_norm(x, bp["ln1_g"], bp["ln1_b"])
        heads = []
        for hd in range(N_HEADS):
            seg = h[:, :, hd * D_HEAD:(hd + 1) * D_HEAD]
            q = seg @ bp["wq"][hd] + bp["bq"][hd]
            k = seg @ bp["wk"][hd] + bp["bk"][hd]
            v = seg @ bp["wv"][hd] + bp["bv"][hd]
            att = jax.nn.softmax(
                jnp.einsum('bqd,bkd->bqk', q, k) / np.sqrt(D_HEAD), axis=-1)
            heads.append(jnp.einsum('bqk,bkd->bqd', att, v))
        x = x + jnp.concatenate(heads, axis=-1)
        h2 = _layer_norm(x, bp["ln2_g"], bp["ln2_b"])
        x = x + _gelu_tanh(h2 @ bp["w1"] + bp["b1"]) @ bp["w2"] + bp["b2"]
    logits = x[:, 0] @ raw["w_out"] + raw["b_out"]
    return jax.nn.softmax(logits, axis=-1)


if __name__ == "__main__":
    key = jax.random.PRNGKey(0)
    pkey, ikey = jax.random.split(key)
    param_slab, raw_params = init_params(pkey)

    batch = 2
    images = jax.random.normal(ikey, (batch, C, H, W), jnp.float32)   # NCHW

    out = vit_forward(images, param_slab)
    out = jax.block_until_ready(out)
    out_np = np.asarray(out)

    ref_np = np.asarray(vit_reference(images, raw_params))

    assert out_np.shape == (batch, OUT_D)
    assert np.all(np.isfinite(out_np))
    assert np.allclose(out_np.sum(-1), 1.0, atol=1e-4)          # final softmax rows
    assert np.allclose(out_np, ref_np, atol=2e-2), float(np.abs(out_np - ref_np).max())
    print("KERNEL_OK")
</pallas_src>

<mosaic_0001>
module attributes {stable_mosaic.version = 11 : i64} {
  func.func @vit_kernel(%arg0: i32, %arg1: memref<8x24x64xf32, #tpu.memory_space<vmem>>, %arg2: memref<528x128xf32, #tpu.memory_space<vmem>>, %arg3: memref<8x128xf32, #tpu.memory_space<vmem>>) attributes {dimension_semantics = [#tpu.dimension_semantics<parallel>], iteration_bounds = array<i64: 1>, scalar_prefetch = 0 : i64, scratch_operands = 0 : i64, tpu.core_type = #tpu.core_type<tc>, window_params = [{transform_indices = @transform_0, window_bounds = array<i64: 8, 24, 64>}, {pipeline_mode = #tpu.pipeline_mode<synchronous>, transform_indices = @transform_1, window_bounds = array<i64: 528, 128>}, {transform_indices = @transform_2, window_bounds = array<i64: 8, 128>}]} {
    %c0 = arith.constant 0 : index
    %c0_0 = arith.constant 0 : index
    %c0_1 = arith.constant 0 : index
    %0 = vector.load %arg1[%c0, %c0_0, %c0_1] : memref<8x24x64xf32, #tpu.memory_space<vmem>>, vector<8x24x64xf32>
    %1 = vector.shape_cast %0 : vector<8x24x64xf32> to vector<192x64xf32>
    %c0_2 = arith.constant 0 : index
    %c0_3 = arith.constant 0 : index
    %2 = vector.load %arg2[%c0_2, %c0_3] : memref<528x128xf32, #tpu.memory_space<vmem>>, vector<64x32xf32>
    %c64 = arith.constant 64 : index
    %c0_4 = arith.constant 0 : index
    %3 = vector.load %arg2[%c64, %c0_4] : memref<528x128xf32, #tpu.memory_space<vmem>>, vector<24x32xf32>
    %cst = arith.constant dense<0.000000e+00> : vector<192x32xf32>
    %4 = tpu.matmul %1, %2, %cst {dimension_numbers = #tpu.dot_dimension_numbers<[1], [0], [0], [1], [0, 0, 1, 1], [], []>} : vector<192x64xf32>, vector<64x32xf32>, vector<192x32xf32> -> vector<192x32xf32>
    %5 = vector.shape_cast %4 : vector<192x32xf32> to vector<8x24x32xf32>
    %6 = vector.shape_cast %3 : vector<24x32xf32> to vector<1x24x32xf32>
    %7 = vector.broadcast %6 : vector<1x24x32xf32> to vector<8x24x32xf32>
    %8 = arith.addf %5, %7 : vector<8x24x32xf32>
    %9 = vector.shape_cast %8 : vector<8x24x32xf32> to vector<192x32xf32>
    %10 = tpu.iota {dimensions = array<i32: 1>} : vector<1x24xi32>
    %c17_i32 = arith.constant 17 : i32
    %11 = vector.broadcast %c17_i32 : i32 to vector<1x24xi32>
    %12 = arith.cmpi slt, %10, %11 : vector<1x24xi32>
    %cst_5 = arith.constant 0.000000e+00 : f32
    %cst_6 = arith.constant -1.000000e+30 : f32
    %13 = vector.broadcast %cst_5 : f32 to vector<1x24xf32>
    %14 = vector.broadcast %cst_6 : f32 to vector<1x24xf32>
    %15 = arith.select %12, %13, %14 : vector<1x24xi1>, vector<1x24xf32>
    %c320 = arith.constant 320 : index
    %c0_7 = arith.constant 0 : index
    %16 = vector.load %arg2[%c320, %c0_7] : memref<528x128xf32, #tpu.memory_space<vmem>>, vector<1x32xf32>
    %c321 = arith.constant 321 : index
    %c0_8 = arith.constant 0 : index
    %17 = vector.load %arg2[%c321, %c0_8] : memref<528x128xf32, #tpu.memory_space<vmem>>, vector<1x32xf32>
    %c322 = arith.constant 322 : index
    %c0_9 = arith.constant 0 : index
    %18 = vector.load %arg2[%c322, %c0_9] : memref<528x128xf32, #tpu.memory_space<vmem>>, vector<1x32xf32>
    %c323 = arith.constant 323 : index
    %c0_10 = arith.constant 0 : index
    %19 = vector.load %arg2[%c323, %c0_10] : memref<528x128xf32, #tpu.memory_space<vmem>>, vector<1x32xf32>
    %c324 = arith.constant 324 : index
    %c0_11 = arith.constant 0 : index
    %20 = vector.load %arg2[%c324, %c0_11] : memref<528x128xf32, #tpu.memory_space<vmem>>, vector<1x96xf32>
    %c325 = arith.constant 325 : index
    %c0_12 = arith.constant 0 : index
    %21 = vector.load %arg2[%c325, %c0_12] : memref<528x128xf32, #tpu.memory_space<vmem>>, vector<1x128xf32>
    %c326 = arith.constant 326 : index
    %c0_13 = arith.constant 0 : index
    %22 = vector.load %arg2[%c326, %c0_13] : memref<528x128xf32, #tpu.memory_space<vmem>>, vector<1x32xf32>
    %c128 = arith.constant 128 : index
    %c0_14 = arith.constant 0 : index
    %23 = vector.load %arg2[%c128, %c0_14] : memref<528x128xf32, #tpu.memory_space<vmem>>, vector<32x96xf32>
    %c160 = arith.constant 160 : index
    %c0_15 = arith.constant 0 : index
    %24 = vector.load %arg2[%c160, %c0_15] : memref<528x128xf32, #tpu.memory_space<vmem>>, vector<32x128xf32>
    %c192 = arith.constant 192 : index
    %c0_16 = arith.constant 0 : index
    %25 = vector.load %arg2[%c192, %c0_16] : memref<528x128xf32, #tpu.memory_space<vmem>>, vector<128x32xf32>
    %cst_17 = arith.constant dense<0.000000e+00> : vector<192xf32>
    %26 = vector.multi_reduction <add>, %9, %cst_17 [1] : vector<192x32xf32> to vector<192xf32>
    %27 = vector.shape_cast %26 : vector<192xf32> to vector<192x1xf32>
    %cst_18 = arith.constant 3.200000e+01 : f32
    %28 = vector.broadcast %cst_18 : f32 to vector<192x1xf32>
    %29 = arith.divf %27, %28 : vector<192x1xf32>
    %30 = vector.broadcast %29 : vector<192x1xf32> to vector<192x32xf32>
    %31 = arith.subf %9, %30 : vector<192x32xf32>
    %32 = arith.mulf %31, %31 : vector<192x32xf32>
    %cst_19 = arith.constant dense<0.000000e+00> : vector<192xf32>
    %33 = vector.multi_reduction <add>, %32, %cst_19 [1] : vector<192x32xf32> to vector<192xf32>
    %34 = vector.shape_cast %33 : vector<192xf32> to vector<192x1xf32>
    %cst_20 = arith.constant 3.200000e+01 : f32
    %35 = vector.broadcast %cst_20 : f32 to vector<192x1xf32>
    %36 = arith.divf %34, %35 : vector<192x1xf32>
    %cst_21 = arith.constant 9.99999974E-6 : f32
    %37 = vector.broadcast %cst_21 : f32 to vector<192x1xf32>
    %38 = arith.addf %36, %37 : vector<192x1xf32>
    %39 = math.rsqrt %38 : vector<192x1xf32>
    %40 = vector.broadcast %39 : vector<192x1xf32> to vector<192x32xf32>
    %41 = arith.mulf %31, %40 : vector<192x32xf32>
    %42 = vector.broadcast %16 : vector<1x32xf32> to vector<192x32xf32>
    %43 = arith.mulf %41, %42 : vector<192x32xf32>
    %44 = vector.broadcast %17 : vector<1x32xf32> to vector<192x32xf32>
    %45 = arith.addf %43, %44 : vector<192x32xf32>
    %cst_22 = arith.constant dense<0.000000e+00> : vector<192x96xf32>
    %46 = tpu.matmul %45, %23, %cst_22 {dimension_numbers = #tpu.dot_dimension_numbers<[1], [0], [0], [1], [0, 0, 1, 1], [], []>} : vector<192x32xf32>, vector<32x96xf32>, vector<192x96xf32> -> vector<192x96xf32>
    %47 = vector.broadcast %20 : vector<1x96xf32> to vector<192x96xf32>
    %48 = arith.addf %46, %47 : vector<192x96xf32>
    %49 = vector.extract_strided_slice %48 {offsets = [0, 0], sizes = [192, 16], strides = [1, 1]} : vector<192x96xf32> to vector<192x16xf32>
    %50 = vector.shape_cast %49 : vector<192x16xf32> to vector<8x24x16xf32>
    %51 = vector.extract_strided_slice %48 {offsets = [0, 32], sizes = [192, 16], strides = [1, 1]} : vector<192x96xf32> to vector<192x16xf32>
    %52 = vector.shape_cast %51 : vector<192x16xf32> to vector<8x24x16xf32>
    %53 = vector.extract_strided_slice %48 {offsets = [0, 64], sizes = [192, 16], strides = [1, 1]} : vector<192x96xf32> to vector<192x16xf32>
    %54 = vector.shape_cast %53 : vector<192x16xf32> to vector<8x24x16xf32>
    "tpu.trace_start"() <{level = 10 : i32, message = "bqd,bkd->bqk"}> : () -> ()
    %cst_23 = arith.constant dense<0.000000e+00> : vector<8x24x24xf32>
    %55 = tpu.matmul %50, %52, %cst_23 {dimension_numbers = #tpu.dot_dimension_numbers<[2], [2], [1], [1], [0, 0, 0, 1, 1, 1], [0], [0]>} : vector<8x24x16xf32>, vector<8x24x16xf32>, vector<8x24x24xf32> -> vector<8x24x24xf32>
    "tpu.trace_stop"() : () -> ()
    %cst_24 = arith.constant 2.500000e-01 : f32
    %56 = vector.broadcast %cst_24 : f32 to vector<8x24x24xf32>
    %57 = arith.mulf %55, %56 : vector<8x24x24xf32>
    %58 = vector.shape_cast %15 : vector<1x24xf32> to vector<1x1x24xf32>
    %59 = vector.broadcast %58 : vector<1x1x24xf32> to vector<8x24x24xf32>
    %60 = arith.addf %57, %59 : vector<8x24x24xf32>
    %cst_25 = arith.constant dense<0xFF800000> : vector<8x24xf32>
    %61 = vector.multi_reduction <maximumf>, %60, %cst_25 [2] : vector<8x24x24xf32> to vector<8x24xf32>
    %62 = vector.shape_cast %61 : vector<8x24xf32> to vector<8x24x1xf32>
    %63 = vector.broadcast %62 : vector<8x24x1xf32> to vector<8x24x24xf32>
    %64 = arith.subf %60, %63 : vector<8x24x24xf32>
    %65 = math.exp %64 : vector<8x24x24xf32>
    %cst_26 = arith.constant dense<0.000000e+00> : vector<8x24xf32>
    %66 = vector.multi_reduction <add>, %65, %cst_26 [2] : vector<8x24x24xf32> to vector<8x24xf32>
    %67 = vector.shape_cast %66 : vector<8x24xf32> to vector<8x24x1xf32>
    %68 = tpu.reciprocal %67 {approx = true} : vector<8x24x1xf32> -> vector<8x24x1xf32>
    %69 = vector.broadcast %68 : vector<8x24x1xf32> to vector<8x24x24xf32>
    %70 = arith.mulf %65, %69 : vector<8x24x24xf32>
    "tpu.trace_start"() <{level = 10 : i32, message = "bqk,bkd->bqd"}> : () -> ()
    %cst_27 = arith.constant dense<0.000000e+00> : vector<8x24x16xf32>
    %71 = tpu.matmul %70, %54, %cst_27 {dimension_numbers = #tpu.dot_dimension_numbers<[2], [1], [1], [2], [0, 0, 0, 1, 1, 2], [0], [0]>} : vector<8x24x24xf32>, vector<8x24x16xf32>, vector<8x24x16xf32> -> vector<8x24x16xf32>
    "tpu.trace_stop"() : () -> ()
    %72 = vector.extract_strided_slice %48 {offsets = [0, 16], sizes = [192, 16], strides = [1, 1]} : vector<192x96xf32> to vector<192x16xf32>
    %73 = vector.shape_cast %72 : vector<192x16xf32> to vector<8x24x16xf32>
    %74 = vector.extract_strided_slice %48 {offsets = [0, 48], sizes = [192, 16], strides = [1, 1]} : vector<192x96xf32> to vector<192x16xf32>
    %75 = vector.shape_cast %74 : vector<192x16xf32> to vector<8x24x16xf32>
    %76 = vector.extract_strided_slice %48 {offsets = [0, 80], sizes = [192, 16], strides = [1, 1]} : vector<192x96xf32> to vector<192x16xf32>
    %77 = vector.shape_cast %76 : vector<192x16xf32> to vector<8x24x16xf32>
    "tpu.trace_start"() <{level = 10 : i32, message = "bqd,bkd->bqk"}> : () -> ()
    %cst_28 = arith.constant dense<0.000000e+00> : vector<8x24x24xf32>
    %78 = tpu.matmul %73, %75, %cst_28 {dimension_numbers = #tpu.dot_dimension_numbers<[2], [2], [1], [1], [0, 0, 0, 1, 1, 1], [0], [0]>} : vector<8x24x16xf32>, vector<8x24x16xf32>, vector<8x24x24xf32> -> vector<8x24x24xf32>
    "tpu.trace_stop"() : () -> ()
    %cst_29 = arith.constant 2.500000e-01 : f32
    %79 = vector.broadcast %cst_29 : f32 to vector<8x24x24xf32>
    %80 = arith.mulf %78, %79 : vector<8x24x24xf32>
    %81 = vector.shape_cast %15 : vector<1x24xf32> to vector<1x1x24xf32>
    %82 = vector.broadcast %81 : vector<1x1x24xf32> to vector<8x24x24xf32>
    %83 = arith.addf %80, %82 : vector<8x24x24xf32>
    %cst_30 = arith.constant dense<0xFF800000> : vector<8x24xf32>
    %84 = vector.multi_reduction <maximumf>, %83, %cst_30 [2] : vector<8x24x24xf32> to vector<8x24xf32>
    %85 = vector.shape_cast %84 : vector<8x24xf32> to vector<8x24x1xf32>
    %86 = vector.broadcast %85 : vector<8x24x1xf32> to vector<8x24x24xf32>
    %87 = arith.subf %83, %86 : vector<8x24x24xf32>
    %88 = math.exp %87 : vector<8x24x24xf32>
    %cst_31 = arith.constant dense<0.000000e+00> : vector<8x24xf32>
    %89 = vector.multi_reduction <add>, %88, %cst_31 [2] : vector<8x24x24xf32> to vector<8x24xf32>
    %90 = vector.shape_cast %89 : vector<8x24xf32> to vector<8x24x1xf32>
    %91 = tpu.reciprocal %90 {approx = true} : vector<8x24x1xf32> -> vector<8x24x1xf32>
    %92 = vector.broadcast %91 : vector<8x24x1xf32> to vector<8x24x24xf32>
    %93 = arith.mulf %88, %92 : vector<8x24x24xf32>
    "tpu.trace_start"() <{level = 10 : i32, message = "bqk,bkd->bqd"}> : () -> ()
    %cst_32 = arith.constant dense<0.000000e+00> : vector<8x24x16xf32>
    %94 = tpu.matmul %93, %77, %cst_32 {dimension_numbers = #tpu.dot_dimension_numbers<[2], [1], [1], [2], [0, 0, 0, 1, 1, 2], [0], [0]>} : vector<8x24x24xf32>, vector<8x24x16xf32>, vector<8x24x16xf32> -> vector<8x24x16xf32>
    "tpu.trace_stop"() : () -> ()
    %95 = tpu.concatenate %71, %94 in 2 : vector<8x24x16xf32>, vector<8x24x16xf32> -> vector<8x24x32xf32>
    %96 = vector.shape_cast %95 : vector<8x24x32xf32> to vector<192x32xf32>
    %97 = arith.addf %9, %96 : vector<192x32xf32>
    %cst_33 = arith.constant dense<0.000000e+00> : vector<192xf32>
    %98 = vector.multi_reduction <add>, %97, %cst_33 [1] : vector<192x32xf32> to vector<192xf32>
    %99 = vector.shape_cast %98 : vector<192xf32> to vector<192x1xf32>
    %cst_34 = arith.constant 3.200000e+01 : f32
    %100 = vector.broadcast %cst_34 : f32 to vector<192x1xf32>
    %101 = arith.divf %99, %100 : vector<192x1xf32>
    %102 = vector.broadcast %101 : vector<192x1xf32> to vector<192x32xf32>
    %103 = arith.subf %97, %102 : vector<192x32xf32>
    %104 = arith.mulf %103, %103 : vector<192x32xf32>
    %cst_35 = arith.constant dense<0.000000e+00> : vector<192xf32>
    %105 = vector.multi_reduction <add>, %104, %cst_35 [1] : vector<192x32xf32> to vector<192xf32>
    %106 = vector.shape_cast %105 : vector<192xf32> to vector<192x1xf32>
    %cst_36 = arith.constant 3.200000e+01 : f32
    %107 = vector.broadcast %cst_36 : f32 to vector<192x1xf32>
    %108 = arith.divf %106, %107 : vector<192x1xf32>
    %cst_37 = arith.constant 9.99999974E-6 : f32
    %109 = vector.broadcast %cst_37 : f32 to vector<192x1xf32>
    %110 = arith.addf %108, %109 : vector<192x1xf32>
    %111 = math.rsqrt %110 : vector<192x1xf32>
    %112 = vector.broadcast %111 : vector<192x1xf32> to vector<192x32xf32>
    %113 = arith.mulf %103, %112 : vector<192x32xf32>
    %114 = vector.broadcast %18 : vector<1x32xf32> to vector<192x32xf32>
    %115 = arith.mulf %113, %114 : vector<192x32xf32>
    %116 = vector.broadcast %19 : vector<1x32xf32> to vector<192x32xf32>
    %117 = arith.addf %115, %116 : vector<192x32xf32>
    %cst_38 = arith.constant dense<0.000000e+00> : vector<192x128xf32>
    %118 = tpu.matmul %117, %24, %cst_38 {dimension_numbers = #tpu.dot_dimension_numbers<[1], [0], [0], [1], [0, 0, 1, 1], [], []>} : vector<192x32xf32>, vector<32x128xf32>, vector<192x128xf32> -> vector<192x128xf32>
    %119 = vector.broadcast %21 : vector<1x128xf32> to vector<192x128xf32>
    %120 = arith.addf %118, %119 : vector<192x128xf32>
    %cst_39 = arith.constant 5.000000e-01 : f32
    %121 = vector.broadcast %cst_39 : f32 to vector<192x128xf32>
    %122 = arith.mulf %121, %120 : vector<192x128xf32>
    %cst_40 = arith.constant 4.471500e-02 : f32
    %123 = vector.broadcast %cst_40 : f32 to vector<192x128xf32>
    %124 = arith.mulf %123, %120 : vector<192x128xf32>
    %125 = arith.mulf %124, %120 : vector<192x128xf32>
    %126 = arith.mulf %125, %120 : vector<192x128xf32>
    %127 = arith.addf %120, %126 : vector<192x128xf32>
    %cst_41 = arith.constant 0.797884583 : f32
    %128 = vector.broadcast %cst_41 : f32 to vector<192x128xf32>
    %129 = arith.mulf %128, %127 : vector<192x128xf32>
    %130 = math.tanh %129 : vector<192x128xf32>
    %cst_42 = arith.constant 1.000000e+00 : f32
    %131 = vector.broadcast %cst_42 : f32 to vector<192x128xf32>
    %132 = arith.addf %131, %130 : vector<192x128xf32>
    %133 = arith.mulf %122, %132 : vector<192x128xf32>
    %cst_43 = arith.constant dense<0.000000e+00> : vector<192x32xf32>
    %134 = tpu.matmul %133, %25, %cst_43 {dimension_numbers = #tpu.dot_dimension_numbers<[1], [0], [0], [1], [0, 0, 1, 1], [], []>} : vector<192x128xf32>, vector<128x32xf32>, vector<192x32xf32> -> vector<192x32xf32>
    %135 = arith.addf %97, %134 : vector<192x32xf32>
    %136 = vector.broadcast %22 : vector<1x32xf32> to vector<192x32xf32>
    %137 = arith.addf %135, %136 : vector<192x32xf32>
    %c520 = arith.constant 520 : index
    %c0_44 = arith.constant 0 : index
    %138 = vector.load %arg2[%c520, %c0_44] : memref<528x128xf32, #tpu.memory_space<vmem>>, vector<1x32xf32>
    %c521 = arith.constant 521 : index
    %c0_45 = arith.constant 0 : index
    %139 = vector.load %arg2[%c521, %c0_45] : memref<528x128xf32, #tpu.memory_space<vmem>>, vector<1x32xf32>
    %c522 = arith.constant 522 : index
    %c0_46 = arith.constant 0 : index
    %140 = vector.load %arg2[%c522, %c0_46] : memref<528x128xf32, #tpu.memory_space<vmem>>, vector<1x32xf32>
    %c523 = arith.constant 523 : index
    %c0_47 = arith.constant 0 : index
    %141 = vector.load %arg2[%c523, %c0_47] : memref<528x128xf32, #tpu.memory_space<vmem>>, vector<1x32xf32>
    %c524 = arith.constant 524 : index
    %c0_48 = arith.constant 0 : index
    %142 = vector.load %arg2[%c524, %c0_48] : memref<528x128xf32, #tpu.memory_space<vmem>>, vector<1x96xf32>
    %c525 = arith.constant 525 : index
    %c0_49 = arith.constant 0 : index
    %143 = vector.load %arg2[%c525, %c0_49] : memref<528x128xf32, #tpu.memory_space<vmem>>, vector<1x128xf32>
    %c526 = arith.constant 526 : index
    %c0_50 = arith.constant 0 : index
    %144 = vector.load %arg2[%c526, %c0_50] : memref<528x128xf32, #tpu.memory_space<vmem>>, vector<1x32xf32>
    %c328 = arith.constant 328 : index
    %c0_51 = arith.constant 0 : index
    %145 = vector.load %arg2[%c328, %c0_51] : memref<528x128xf32, #tpu.memory_space<vmem>>, vector<32x96xf32>
    %c360 = arith.constant 360 : index
    %c0_52 = arith.constant 0 : index
    %146 = vector.load %arg2[%c360, %c0_52] : memref<528x128xf32, #tpu.memory_space<vmem>>, vector<32x128xf32>
    %c392 = arith.constant 392 : index
    %c0_53 = arith.constant 0 : index
    %147 = vector.load %arg2[%c392, %c0_53] : memref<528x128xf32, #tpu.memory_space<vmem>>, vector<128x32xf32>
    %cst_54 = arith.constant dense<0.000000e+00> : vector<192xf32>
    %148 = vector.multi_reduction <add>, %137, %cst_54 [1] : vector<192x32xf32> to vector<192xf32>
    %149 = vector.shape_cast %148 : vector<192xf32> to vector<192x1xf32>
    %cst_55 = arith.constant 3.200000e+01 : f32
    %150 = vector.broadcast %cst_55 : f32 to vector<192x1xf32>
    %151 = arith.divf %149, %150 : vector<192x1xf32>
    %152 = vector.broadcast %151 : vector<192x1xf32> to vector<192x32xf32>
    %153 = arith.subf %137, %152 : vector<192x32xf32>
    %154 = arith.mulf %153, %153 : vector<192x32xf32>
    %cst_56 = arith.constant dense<0.000000e+00> : vector<192xf32>
    %155 = vector.multi_reduction <add>, %154, %cst_56 [1] : vector<192x32xf32> to vector<192xf32>
    %156 = vector.shape_cast %155 : vector<192xf32> to vector<192x1xf32>
    %cst_57 = arith.constant 3.200000e+01 : f32
    %157 = vector.broadcast %cst_57 : f32 to vector<192x1xf32>
    %158 = arith.divf %156, %157 : vector<192x1xf32>
    %cst_58 = arith.constant 9.99999974E-6 : f32
    %159 = vector.broadcast %cst_58 : f32 to vector<192x1xf32>
    %160 = arith.addf %158, %159 : vector<192x1xf32>
    %161 = math.rsqrt %160 : vector<192x1xf32>
    %162 = vector.broadcast %161 : vector<192x1xf32> to vector<192x32xf32>
    %163 = arith.mulf %153, %162 : vector<192x32xf32>
    %164 = vector.broadcast %138 : vector<1x32xf32> to vector<192x32xf32>
    %165 = arith.mulf %163, %164 : vector<192x32xf32>
    %166 = vector.broadcast %139 : vector<1x32xf32> to vector<192x32xf32>
    %167 = arith.addf %165, %166 : vector<192x32xf32>
    %cst_59 = arith.constant dense<0.000000e+00> : vector<192x96xf32>
    %168 = tpu.matmul %167, %145, %cst_59 {dimension_numbers = #tpu.dot_dimension_numbers<[1], [0], [0], [1], [0, 0, 1, 1], [], []>} : vector<192x32xf32>, vector<32x96xf32>, vector<192x96xf32> -> vector<192x96xf32>
    %169 = vector.broadcast %142 : vector<1x96xf32> to vector<192x96xf32>
    %170 = arith.addf %168, %169 : vector<192x96xf32>
    %171 = vector.extract_strided_slice %170 {offsets = [0, 0], sizes = [192, 16], strides = [1, 1]} : vector<192x96xf32> to vector<192x16xf32>
    %172 = vector.shape_cast %171 : vector<192x16xf32> to vector<8x24x16xf32>
    %173 = vector.extract_strided_slice %170 {offsets = [0, 32], sizes = [192, 16], strides = [1, 1]} : vector<192x96xf32> to vector<192x16xf32>
    %174 = vector.shape_cast %173 : vector<192x16xf32> to vector<8x24x16xf32>
    %175 = vector.extract_strided_slice %170 {offsets = [0, 64], sizes = [192, 16], strides = [1, 1]} : vector<192x96xf32> to vector<192x16xf32>
    %176 = vector.shape_cast %175 : vector<192x16xf32> to vector<8x24x16xf32>
    "tpu.trace_start"() <{level = 10 : i32, message = "bqd,bkd->bqk"}> : () -> ()
    %cst_60 = arith.constant dense<0.000000e+00> : vector<8x24x24xf32>
    %177 = tpu.matmul %172, %174, %cst_60 {dimension_numbers = #tpu.dot_dimension_numbers<[2], [2], [1], [1], [0, 0, 0, 1, 1, 1], [0], [0]>} : vector<8x24x16xf32>, vector<8x24x16xf32>, vector<8x24x24xf32> -> vector<8x24x24xf32>
    "tpu.trace_stop"() : () -> ()
    %cst_61 = arith.constant 2.500000e-01 : f32
    %178 = vector.broadcast %cst_61 : f32 to vector<8x24x24xf32>
    %179 = arith.mulf %177, %178 : vector<8x24x24xf32>
    %180 = vector.shape_cast %15 : vector<1x24xf32> to vector<1x1x24xf32>
    %181 = vector.broadcast %180 : vector<1x1x24xf32> to vector<8x24x24xf32>
    %182 = arith.addf %179, %181 : vector<8x24x24xf32>
    %cst_62 = arith.constant dense<0xFF800000> : vector<8x24xf32>
    %183 = vector.multi_reduction <maximumf>, %182, %cst_62 [2] : vector<8x24x24xf32> to vector<8x24xf32>
    %184 = vector.shape_cast %183 : vector<8x24xf32> to vector<8x24x1xf32>
    %185 = vector.broadcast %184 : vector<8x24x1xf32> to vector<8x24x24xf32>
    %186 = arith.subf %182, %185 : vector<8x24x24xf32>
    %187 = math.exp %186 : vector<8x24x24xf32>
    %cst_63 = arith.constant dense<0.000000e+00> : vector<8x24xf32>
    %188 = vector.multi_reduction <add>, %187, %cst_63 [2] : vector<8x24x24xf32> to vector<8x24xf32>
    %189 = vector.shape_cast %188 : vector<8x24xf32> to vector<8x24x1xf32>
    %190 = tpu.reciprocal %189 {approx = true} : vector<8x24x1xf32> -> vector<8x24x1xf32>
    %191 = vector.broadcast %190 : vector<8x24x1xf32> to vector<8x24x24xf32>
    %192 = arith.mulf %187, %191 : vector<8x24x24xf32>
    "tpu.trace_start"() <{level = 10 : i32, message = "bqk,bkd->bqd"}> : () -> ()
    %cst_64 = arith.constant dense<0.000000e+00> : vector<8x24x16xf32>
    %193 = tpu.matmul %192, %176, %cst_64 {dimension_numbers = #tpu.dot_dimension_numbers<[2], [1], [1], [2], [0, 0, 0, 1, 1, 2], [0], [0]>} : vector<8x24x24xf32>, vector<8x24x16xf32>, vector<8x24x16xf32> -> vector<8x24x16xf32>
    "tpu.trace_stop"() : () -> ()
    %194 = vector.extract_strided_slice %170 {offsets = [0, 16], sizes = [192, 16], strides = [1, 1]} : vector<192x96xf32> to vector<192x16xf32>
    %195 = vector.shape_cast %194 : vector<192x16xf32> to vector<8x24x16xf32>
    %196 = vector.extract_strided_slice %170 {offsets = [0, 48], sizes = [192, 16], strides = [1, 1]} : vector<192x96xf32> to vector<192x16xf32>
    %197 = vector.shape_cast %196 : vector<192x16xf32> to vector<8x24x16xf32>
    %198 = vector.extract_strided_slice %170 {offsets = [0, 80], sizes = [192, 16], strides = [1, 1]} : vector<192x96xf32> to vector<192x16xf32>
    %199 = vector.shape_cast %198 : vector<192x16xf32> to vector<8x24x16xf32>
    "tpu.trace_start"() <{level = 10 : i32, message = "bqd,bkd->bqk"}> : () -> ()
    %cst_65 = arith.constant dense<0.000000e+00> : vector<8x24x24xf32>
    %200 = tpu.matmul %195, %197, %cst_65 {dimension_numbers = #tpu.dot_dimension_numbers<[2], [2], [1], [1], [0, 0, 0, 1, 1, 1], [0], [0]>} : vector<8x24x16xf32>, vector<8x24x16xf32>, vector<8x24x24xf32> -> vector<8x24x24xf32>
    "tpu.trace_stop"() : () -> ()
    %cst_66 = arith.constant 2.500000e-01 : f32
    %201 = vector.broadcast %cst_66 : f32 to vector<8x24x24xf32>
    %202 = arith.mulf %200, %201 : vector<8x24x24xf32>
    %203 = vector.shape_cast %15 : vector<1x24xf32> to vector<1x1x24xf32>
    %204 = vector.broadcast %203 : vector<1x1x24xf32> to vector<8x24x24xf32>
    %205 = arith.addf %202, %204 : vector<8x24x24xf32>
    %cst_67 = arith.constant dense<0xFF800000> : vector<8x24xf32>
    %206 = vector.multi_reduction <maximumf>, %205, %cst_67 [2] : vector<8x24x24xf32> to vector<8x24xf32>
    %207 = vector.shape_cast %206 : vector<8x24xf32> to vector<8x24x1xf32>
    %208 = vector.broadcast %207 : vector<8x24x1xf32> to vector<8x24x24xf32>
    %209 = arith.subf %205, %208 : vector<8x24x24xf32>
    %210 = math.exp %209 : vector<8x24x24xf32>
    %cst_68 = arith.constant dense<0.000000e+00> : vector<8x24xf32>
    %211 = vector.multi_reduction <add>, %210, %cst_68 [2] : vector<8x24x24xf32> to vector<8x24xf32>
    %212 = vector.shape_cast %211 : vector<8x24xf32> to vector<8x24x1xf32>
    %213 = tpu.reciprocal %212 {approx = true} : vector<8x24x1xf32> -> vector<8x24x1xf32>
    %214 = vector.broadcast %213 : vector<8x24x1xf32> to vector<8x24x24xf32>
    %215 = arith.mulf %210, %214 : vector<8x24x24xf32>
    "tpu.trace_start"() <{level = 10 : i32, message = "bqk,bkd->bqd"}> : () -> ()
    %cst_69 = arith.constant dense<0.000000e+00> : vector<8x24x16xf32>
    %216 = tpu.matmul %215, %199, %cst_69 {dimension_numbers = #tpu.dot_dimension_numbers<[2], [1], [1], [2], [0, 0, 0, 1, 1, 2], [0], [0]>} : vector<8x24x24xf32>, vector<8x24x16xf32>, vector<8x24x16xf32> -> vector<8x24x16xf32>
    "tpu.trace_stop"() : () -> ()
    %217 = tpu.concatenate %193, %216 in 2 : vector<8x24x16xf32>, vector<8x24x16xf32> -> vector<8x24x32xf32>
    %218 = vector.shape_cast %217 : vector<8x24x32xf32> to vector<192x32xf32>
    %219 = arith.addf %137, %218 : vector<192x32xf32>
    %cst_70 = arith.constant dense<0.000000e+00> : vector<192xf32>
    %220 = vector.multi_reduction <add>, %219, %cst_70 [1] : vector<192x32xf32> to vector<192xf32>
    %221 = vector.shape_cast %220 : vector<192xf32> to vector<192x1xf32>
    %cst_71 = arith.constant 3.200000e+01 : f32
    %222 = vector.broadcast %cst_71 : f32 to vector<192x1xf32>
    %223 = arith.divf %221, %222 : vector<192x1xf32>
    %224 = vector.broadcast %223 : vector<192x1xf32> to vector<192x32xf32>
    %225 = arith.subf %219, %224 : vector<192x32xf32>
    %226 = arith.mulf %225, %225 : vector<192x32xf32>
    %cst_72 = arith.constant dense<0.000000e+00> : vector<192xf32>
    %227 = vector.multi_reduction <add>, %226, %cst_72 [1] : vector<192x32xf32> to vector<192xf32>
    %228 = vector.shape_cast %227 : vector<192xf32> to vector<192x1xf32>
    %cst_73 = arith.constant 3.200000e+01 : f32
    %229 = vector.broadcast %cst_73 : f32 to vector<192x1xf32>
    %230 = arith.divf %228, %229 : vector<192x1xf32>
    %cst_74 = arith.constant 9.99999974E-6 : f32
    %231 = vector.broadcast %cst_74 : f32 to vector<192x1xf32>
    %232 = arith.addf %230, %231 : vector<192x1xf32>
    %233 = math.rsqrt %232 : vector<192x1xf32>
    %234 = vector.broadcast %233 : vector<192x1xf32> to vector<192x32xf32>
    %235 = arith.mulf %225, %234 : vector<192x32xf32>
    %236 = vector.broadcast %140 : vector<1x32xf32> to vector<192x32xf32>
    %237 = arith.mulf %235, %236 : vector<192x32xf32>
    %238 = vector.broadcast %141 : vector<1x32xf32> to vector<192x32xf32>
    %239 = arith.addf %237, %238 : vector<192x32xf32>
    %cst_75 = arith.constant dense<0.000000e+00> : vector<192x128xf32>
    %240 = tpu.matmul %239, %146, %cst_75 {dimension_numbers = #tpu.dot_dimension_numbers<[1], [0], [0], [1], [0, 0, 1, 1], [], []>} : vector<192x32xf32>, vector<32x128xf32>, vector<192x128xf32> -> vector<192x128xf32>
    %241 = vector.broadcast %143 : vector<1x128xf32> to vector<192x128xf32>
    %242 = arith.addf %240, %241 : vector<192x128xf32>
    %cst_76 = arith.constant 5.000000e-01 : f32
    %243 = vector.broadcast %cst_76 : f32 to vector<192x128xf32>
    %244 = arith.mulf %243, %242 : vector<192x128xf32>
    %cst_77 = arith.constant 4.471500e-02 : f32
    %245 = vector.broadcast %cst_77 : f32 to vector<192x128xf32>
    %246 = arith.mulf %245, %242 : vector<192x128xf32>
    %247 = arith.mulf %246, %242 : vector<192x128xf32>
    %248 = arith.mulf %247, %242 : vector<192x128xf32>
    %249 = arith.addf %242, %248 : vector<192x128xf32>
    %cst_78 = arith.constant 0.797884583 : f32
    %250 = vector.broadcast %cst_78 : f32 to vector<192x128xf32>
    %251 = arith.mulf %250, %249 : vector<192x128xf32>
    %252 = math.tanh %251 : vector<192x128xf32>
    %cst_79 = arith.constant 1.000000e+00 : f32
    %253 = vector.broadcast %cst_79 : f32 to vector<192x128xf32>
    %254 = arith.addf %253, %252 : vector<192x128xf32>
    %255 = arith.mulf %244, %254 : vector<192x128xf32>
    %cst_80 = arith.constant dense<0.000000e+00> : vector<192x32xf32>
    %256 = tpu.matmul %255, %147, %cst_80 {dimension_numbers = #tpu.dot_dimension_numbers<[1], [0], [0], [1], [0, 0, 1, 1], [], []>} : vector<192x128xf32>, vector<128x32xf32>, vector<192x32xf32> -> vector<192x32xf32>
    %257 = arith.addf %219, %256 : vector<192x32xf32>
    %258 = vector.broadcast %144 : vector<1x32xf32> to vector<192x32xf32>
    %259 = arith.addf %257, %258 : vector<192x32xf32>
    %260 = vector.shape_cast %259 : vector<192x32xf32> to vector<8x24x32xf32>
    %261 = vector.extract_strided_slice %260 {offsets = [0, 0, 0], sizes = [8, 1, 32], strides = [1, 1, 1]} : vector<8x24x32xf32> to vector<8x1x32xf32>
    %262 = vector.shape_cast %261 : vector<8x1x32xf32> to vector<8x32xf32>
    %c88 = arith.constant 88 : index
    %c0_81 = arith.constant 0 : index
    %263 = vector.load %arg2[%c88, %c0_81] : memref<528x128xf32, #tpu.memory_space<vmem>>, vector<32x128xf32>
    %c120 = arith.constant 120 : index
    %c0_82 = arith.constant 0 : index
    %264 = vector.load %arg2[%c120, %c0_82] : memref<528x128xf32, #tpu.memory_space<vmem>>, vector<1x128xf32>
    %cst_83 = arith.constant dense<0.000000e+00> : vector<8x128xf32>
    %265 = tpu.matmul %262, %263, %cst_83 {dimension_numbers = #tpu.dot_dimension_numbers<[1], [0], [0], [1], [0, 0, 1, 1], [], []>} : vector<8x32xf32>, vector<32x128xf32>, vector<8x128xf32> -> vector<8x128xf32>
    %266 = vector.broadcast %264 : vector<1x128xf32> to vector<8x128xf32>
    %267 = arith.addf %265, %266 : vector<8x128xf32>
    %cst_84 = arith.constant dense<0xFF800000> : vector<8xf32>
    %268 = vector.multi_reduction <maximumf>, %267, %cst_84 [1] : vector<8x128xf32> to vector<8xf32>
    %269 = vector.shape_cast %268 : vector<8xf32> to vector<8x1xf32>
    %270 = vector.broadcast %269 : vector<8x1xf32> to vector<8x128xf32>
    %271 = arith.subf %267, %270 : vector<8x128xf32>
    %272 = math.exp %271 : vector<8x128xf32>
    %cst_85 = arith.constant dense<0.000000e+00> : vector<8xf32>
    %273 = vector.multi_reduction <add>, %272, %cst_85 [1] : vector<8x128xf32> to vector<8xf32>
    %274 = vector.shape_cast %273 : vector<8xf32> to vector<8x1xf32>
    %275 = vector.broadcast %274 : vector<8x1xf32> to vector<8x128xf32>
    %276 = arith.divf %272, %275 : vector<8x128xf32>
    %c0_86 = arith.constant 0 : index
    %c0_87 = arith.constant 0 : index
    %277 = vector.load %arg3[%c0_86, %c0_87] : memref<8x128xf32, #tpu.memory_space<vmem>>, vector<8x128xf32>
    tpu.vector_store %arg3[%c0_86, %c0_87], %276 {strides = array<i32>} : memref<8x128xf32, #tpu.memory_space<vmem>>, vector<8x128xf32>,
    return
  }
  func.func @transform_0(%arg0: i32) -> (i32, i32, i32) {
    %c0_i32 = arith.constant 0 : i32
    %c0_i32_0 = arith.constant 0 : i32
    %c0_i32_1 = arith.constant 0 : i32
    return %arg0, %c0_i32, %c0_i32_0 : i32, i32, i32
  }
  func.func @transform_1(%arg0: i32) -> (i32, i32) {
    %c0_i32 = arith.constant 0 : i32
    %c0_i32_0 = arith.constant 0 : i32
    %c0_i32_1 = arith.constant 0 : i32
    return %c0_i32, %c0_i32_0 : i32, i32
  }
  func.func @transform_2(%arg0: i32) -> (i32, i32) {
    %c0_i32 = arith.constant 0 : i32
    %c0_i32_0 = arith.constant 0 : i32
    return %arg0, %c0_i32 : i32, i32
  }
}

</mosaic_0001>

<bundles_post_ra>
// kernel: _vit_pallas.1
= control target key start
LH: loop header
LB: loop body
LE: loop exit
PB: predicated region body
PF: predicated region fallthrough
CT: control target
= control target key end

     0   :  { %7 = vsyncpa [#allocation3], 0  ;;  %s14765_s0 = inlined_call_operand.hbm [shape: f32[8,24,64], index: 0, kind: input, shape index: {}]   ;;  %s14766_s1 = inlined_call_operand.hbm [shape: f32[528,128], index: 1, kind: input, shape index: {}]   ;;  %s14767_s2 = inlined_call_operand.hbm [shape: f32[8,128], index: 2, kind: output, shape index: {}]  }
   0x1   :  { %8 = vsyncpa [#allocation6], 0 }
   0x2   :  { %9 = vsyncpa [#allocation4], 0  ;;  %s14_s11 = sshll.u32 %s14765_s0, 4  ;;  %s10011_s12 = smov [#allocation2]   ;;  %s15_s11 = int_to_ptr.hbm [resolvable:$true] %s14_s11 }
   0x3   :  { %s16_s13 = sshll.u32 %s10011_s12, 4  ;;  %s27_s16 = sshll.u32 %s14766_s1, 4  ;;  %s17_s13 = int_to_ptr.vmem [resolvable:$true] %s16_s13  ;;  %s28_s16 = int_to_ptr.hbm [resolvable:$true] %s27_s16 }
   0x4   :  { %s10012_s17 = smov 128   ;;  %s10013_s18 = smov 8  }
   0x5   :  { %22 = dma.hbm_to_vmem [thread:$0]  %s15_s11, 3072, %s17_s13, [#allocation3], %s10012_s17, %s10012_s17, %s10013_s18  }
   0x6   :  { %s10014_s19 = smov [#allocation5]  }
   0x7   :  { %s29_s20 = sshll.u32 %s10014_s19, 4  ;;  %s30_s20 = int_to_ptr.vmem [resolvable:$true] %s29_s20 }
   0x8   :  { %35 = dma.hbm_to_vmem [thread:$0]  %s28_s16, 8448, %s30_s20, [#allocation6], %s10012_s17, %s10012_s17, %s10013_s18  }
   0x9   :  { %10005 = dma.done.wait [#allocation3], 3072  }
   0xa   :  { %10006 = vsyncadd [#allocation3], 4294964224 }
   0xb   :  { %10007 = dma.done.wait [#allocation6], 8448  }
   0xc   :  { %10008 = vsyncadd [#allocation6], 4294958848  ;;  %v75_v0 = vld [vmem:[#allocation5 + $0x38] sm:$0xff]  ;;  %v74_v1 = vld [vmem:[#allocation5 + $0x30] sm:$0xff]  ;;  %vm79_vm0 = vcmask 523264   ;;  %vm300_vm1 = vcmask 261120  }
   0xd   :  { %160 = vmatpush.msra.mxu0 %v75_v0  ;;  %v73_v2 = vld [vmem:[#allocation5 + $0x28] sm:$0xff]  ;;  %v72_v3 = vld [vmem:[#allocation5 + $0x20] sm:$0xff]  ;;  %v71_v4 = vld [vmem:[#allocation5 + $0x18] sm:$0xff]  ;;  %s10016_s0 = smov 80   ;;  %s10017_s1 = smov 112  }
   0xe   :  { %v70_v5 = vld [vmem:[#allocation5 + $0x10] sm:$0xff]  ;;  %v69_v6 = vld [vmem:[#allocation5 + $0x8] sm:$0xff]  ;;  %v68_v7 = vld [vmem:[#allocation5] sm:$0xff]  ;;  %s10018_s21 = smov 96   ;;  %s10019_s22 = smov 64  }
   0xf   :  { %161 = vmatpush.msra.mxu0 %v74_v1  ;;  %v44_v8 = vld [vmem:[#allocation2] sm:$0xff]  ;;  %v45_v9 = vld [vmem:[#allocation2 + $0x8] sm:$0xff]  ;;  %v46_v10 = vld [vmem:[#allocation2 + $0x10] sm:$0xff]  ;;  %s10020_s23 = smov 48   ;;  %s10022_s24 = smov 16  }
  0x10   :  { %v47_v11 = vld [vmem:[#allocation2 + $0x18] sm:$0xff]  ;;  %v48_v12 = vld [vmem:[#allocation2 + $0x20] sm:$0xff]  ;;  %v49_v13 = vld [vmem:[#allocation2 + $0x28] sm:$0xff]  ;;  %s10023_s25 = smov [#allocation7]   ;;  %s8544_s29 = sshll.u32 %s14767_s2, 4  ;;  %s8545_s29 = int_to_ptr.hbm [resolvable:$true] %s8544_s29 }
  0x11   :  { %162 = vmatpush.msra.mxu0 %v73_v2  ;;  %v50_v14 = vld [vmem:[#allocation2 + $0x30] sm:$0xff]  ;;  %v51_v15 = vld [vmem:[#allocation2 + $0x38] sm:$0xff]  ;;  %v52_v16 = vld [vmem:[#allocation2 + $0x40] sm:$0xff]  ;;  %s8542_s26 = sshll.u32 %s10023_s25, 4  ;;  %s8543_s26 = int_to_ptr.vmem [resolvable:$true] %s8542_s26 }
  0x12   :  { %v53_v17 = vld [vmem:[#allocation2 + $0x48] sm:$0xff]  ;;  %v54_v18 = vld [vmem:[#allocation2 + $0x50] sm:$0xff]  ;;  %v55_v19 = vld [vmem:[#allocation2 + $0x58] sm:$0xff] }
  0x13   :  { %163 = vmatpush.msra.mxu0 %v72_v3  ;;  %v56_v20 = vld [vmem:[#allocation2 + $0x60] sm:$0xff]  ;;  %v57_v21 = vld [vmem:[#allocation2 + $0x68] sm:$0xff]  ;;  %v58_v22 = vld [vmem:[#allocation2 + $0x70] sm:$0xff] }
  0x14   :  { %v59_v23 = vld [vmem:[#allocation2 + $0x78] sm:$0xff]  ;;  %v10061_v24 = vld [vmem:[#allocation5 + $0x40] sm:$0xff]  ;;  %v10069_v29 = vld [vmem:[#allocation5 + $0x48] sm:$0xff] }
  0x15   :  { %164 = vmatpush.msra.mxu0 %v71_v4  ;;  %v60_v26 = vld [vmem:[#allocation2 + $0x80] sm:$0xff]  ;;  %v61_v31 = vld [vmem:[#allocation2 + $0x88] sm:$0xff]  ;;  %v10077_v34 = vld [vmem:[#allocation5 + $0x50] sm:$0xff] }
  0x16   :  { %v62_v36 = vld [vmem:[#allocation2 + $0x90] sm:$0xff]  ;;  %v63_v40 = vld [vmem:[#allocation2 + $0x98] sm:$0xff]  ;;  %v64_v44 = vld [vmem:[#allocation2 + $0xa0] sm:$0xff] }
  0x17   :  { %165 = vmatpush.msra.mxu0 %v70_v5  ;;  %v65_v48 = vld [vmem:[#allocation2 + $0xa8] sm:$0xff]  ;;  %v279_v2 = vld [vmem:[#allocation5 + $0x98] sm:$0xff] }
  0x18   :  { %8964 = vmatpush.msra.mxu1 %v279_v2 }
  0x19   :  { %166 = vmatpush.msra.mxu0 %v69_v6  ;;  %v10015_v6 = vmov 32.0  }
  0x1a   :  { %9243 = vrcp.f32 %v10015_v6 }
  0x1b   :  { %167 = vmatpush.msra.mxu0 %v68_v7  ;;  %v66_v7 = vld [vmem:[#allocation2 + $0xb0] sm:$0xff] }
  0x1c   :  { %8555 = vmatmul.msk.f32.vlgmr.msra.gmra.mxu0 %vm79_vm0, %v44_v8 }
  0x1d   :  { %971 = vmatpush.msrb.mxu0 %v279_v2 }
  0x24   :  { %8556 = vmatmul.msk.f32.gmra.mxu0 %vm79_vm0, %v45_v9 }
  0x2c   :  { %8557 = vmatmul.msk.f32.gmra.mxu0 %vm79_vm0, %v46_v10  ;;  %v9244_v10 = vpop.eup %9243 }
  0x2d   :  { %vm378_vm2 = vweird.f32 %v9244_v10 }
  0x34   :  { %8558 = vmatmul.msk.f32.gmra.mxu0 %vm79_vm0, %v47_v11 }
  0x3c   :  { %8559 = vmatmul.msk.f32.gmra.mxu0 %vm79_vm0, %v48_v12  ;;  %v67_v12 = vld [vmem:[#allocation2 + $0xb8] sm:$0xff] }
  0x44   :  { %8560 = vmatmul.msk.f32.gmra.mxu0 %vm79_vm0, %v49_v13  ;;  %v374_v13 = vmul.f32 32.0, %v9244_v10 }
  0x4c   :  { %8561 = vmatmul.msk.f32.gmra.mxu0 %vm79_vm0, %v50_v14 }
  0x54   :  { %8562 = vmatmul.msk.f32.gmra.mxu0 %vm79_vm0, %v51_v15 }
  0x5c   :  { %8563 = vmatmul.msk.f32.gmra.mxu0 %vm79_vm0, %v52_v16  ;;  %v375_v16 = vsub.f32 1.0, %v374_v13 }
  0x64   :  { %8564 = vmatmul.msk.f32.gmra.mxu0 %vm79_vm0, %v53_v17 }
  0x6c   :  { %8565 = vmatmul.msk.f32.gmra.mxu0 %vm79_vm0, %v54_v18  ;;  %v376_v18 = vmul.f32 %v9244_v10, %v375_v16 }
  0x74   :  { %8566 = vmatmul.msk.f32.gmra.mxu0 %vm79_vm0, %v55_v19 }
  0x7c   :  { %8567 = vmatmul.msk.f32.gmra.mxu0 %vm79_vm0, %v56_v20 }
  0x84   :  { %8568 = vmatmul.msk.f32.gmra.mxu0 %vm79_vm0, %v57_v21  ;;  %v377_v21 = vadd.f32 %v9244_v10, %v376_v18 }
  0x8c   :  { %8569 = vmatmul.msk.f32.gmra.mxu0 %vm79_vm0, %v58_v22 }
  0x94   :  { %8570 = vmatmul.msk.f32.gmra.mxu0 %vm79_vm0, %v59_v23  ;;  %v10150_v23 = vsel %vm378_vm2, %v9244_v10, %v377_v21 }
  0x95   :  { %14860 = vst [vmem:[#allocation26_spill] sm:$0xff] %v10150_v23 }
  0x99   :  { %v169_v25 = vpop.f32.mrf.mxu0 }
  0x9a   :  { %v10064_v27 = vadd.f32 %v169_v25, %v10061_v24 }
  0x9c   :  { %14845 = vst [vmem:[#allocation11_spill] sm:$0xff] %v10064_v27  ;;  %8571 = vmatmul.msk.f32.gmra.mxu0 %vm79_vm0, %v60_v26  ;;  %v301_v28 = vsel %vm300_vm1, %v10064_v27, 0.0 }
  0x9d   :  { %302 = vadd.xlane.f32.xlu0 %v301_v28 }
  0xa1   :  { %v172_v30 = vpop.f32.mrf.mxu0 }
  0xa2   :  { %v10072_v32 = vadd.f32 %v172_v30, %v10069_v29 }
  0xa4   :  { %14846 = vst [vmem:[#allocation12_spill] sm:$0xff] %v10072_v32  ;;  %8572 = vmatmul.msk.f32.gmra.mxu0 %vm79_vm0, %v61_v31  ;;  %v304_v33 = vsel %vm300_vm1, %v10072_v32, 0.0 }
  0xa5   :  { %305 = vadd.xlane.f32.xlu0 %v304_v33 }
  0xa9   :  { %v175_v35 = vpop.f32.mrf.mxu0 }
  0xaa   :  { %v10080_v37 = vadd.f32 %v175_v35, %v10077_v34 }
  0xac   :  { %14847 = vst [vmem:[#allocation13_spill] sm:$0xff] %v10080_v37  ;;  %8573 = vmatmul.msk.f32.gmra.mxu0 %vm79_vm0, %v62_v36  ;;  %v307_v38 = vsel %vm300_vm1, %v10080_v37, 0.0 }
  0xad   :  { %308 = vadd.xlane.f32.xlu1 %v307_v38 }
  0xb1   :  { %v178_v39 = vpop.f32.mrf.mxu0 }
  0xb2   :  { %v10086_v41 = vadd.f32 %v178_v39, %v10061_v24 }
  0xb4   :  { %14848 = vst [vmem:[#allocation14_spill] sm:$0xff] %v10086_v41  ;;  %8574 = vmatmul.msk.f32.gmra.mxu0 %vm79_vm0, %v63_v40  ;;  %v310_v42 = vsel %vm300_vm1, %v10086_v41, 0.0 }
  0xb5   :  { %311 = vadd.xlane.f32.xlu1 %v310_v42 }
  0xb9   :  { %v181_v43 = vpop.f32.mrf.mxu0 }
  0xba   :  { %v10092_v45 = vadd.f32 %v181_v43, %v10069_v29 }
  0xbc   :  { %14849 = vst [vmem:[#allocation15_spill] sm:$0xff] %v10092_v45  ;;  %8575 = vmatmul.msk.f32.gmra.mxu0 %vm79_vm0, %v64_v44  ;;  %v313_v46 = vsel %vm300_vm1, %v10092_v45, 0.0  ;;  %v278_v44 = vld [vmem:[#allocation5 + $0x90] sm:$0xff] }
  0xbd   :  { %314 = vadd.xlane.f32.xlu2 %v313_v46  ;;  %972 = vmatpush.msrb.mxu0 %v278_v44 }
  0xbe   :  { %8965 = vmatpush.msra.mxu1 %v278_v44 }
  0xc1   :  { %v184_v47 = vpop.f32.mrf.mxu0 }
  0xc2   :  { %v10098_v49 = vadd.f32 %v184_v47, %v10077_v34 }
  0xc4   :  { %14850 = vst [vmem:[#allocation16_spill] sm:$0xff] %v10098_v49  ;;  %8576 = vmatmul.msk.f32.gmra.mxu0 %vm79_vm0, %v65_v48  ;;  %v316_v50 = vsel %vm300_vm1, %v10098_v49, 0.0 }
  0xc5   :  { %317 = vadd.xlane.f32.xlu0 %v316_v50 }
  0xc9   :  { %v187_v51 = vpop.f32.mrf.mxu0 }
  0xca   :  { %v10104_v52 = vadd.f32 %v187_v51, %v10061_v24 }
  0xcc   :  { %14851 = vst [vmem:[#allocation17_spill] sm:$0xff] %v10104_v52  ;;  %v319_v53 = vsel %vm300_vm1, %v10104_v52, 0.0  ;;  %8577 = vmatmul.msk.f32.gmra.mxu0 %vm79_vm0, %v66_v7 }
  0xcd   :  { %320 = vadd.xlane.f32.xlu0 %v319_v53 }
  0xd1   :  { %v190_v54 = vpop.f32.mrf.mxu0 }
  0xd2   :  { %v10109_v55 = vadd.f32 %v190_v54, %v10069_v29 }
  0xd4   :  { %14852 = vst [vmem:[#allocation18_spill] sm:$0xff] %v10109_v55  ;;  %v322_v56 = vsel %vm300_vm1, %v10109_v55, 0.0  ;;  %8578 = vmatmul.msk.f32.gmra.mxu0 %vm79_vm0, %v67_v12 }
  0xd5   :  { %323 = vadd.xlane.f32.xlu0 %v322_v56 }
  0xd9   :  { %v193_v57 = vpop.f32.mrf.mxu0 }
  0xda   :  { %v10114_v58 = vadd.f32 %v193_v57, %v10077_v34 }
  0xdc   :  { %14853 = vst [vmem:[#allocation19_spill] sm:$0xff] %v10114_v58  ;;  %v325_v59 = vsel %vm300_vm1, %v10114_v58, 0.0 }
  0xdd   :  { %326 = vadd.xlane.f32.xlu0 %v325_v59 }
  0xe1   :  { %v196_v60 = vpop.f32.mrf.mxu0 }
  0xe2   :  { %v10119_v61 = vadd.f32 %v196_v60, %v10061_v24 }
  0xe4   :  { %14854 = vst [vmem:[#allocation20_spill] sm:$0xff] %v10119_v61  ;;  %v328_v62 = vsel %vm300_vm1, %v10119_v61, 0.0 }
  0xe5   :  { %329 = vadd.xlane.f32.xlu0 %v328_v62 }
  0xe9   :  { %v199_v63 = vpop.f32.mrf.mxu0 }
  0xea   :  { %v10124_v0 = vadd.f32 %v199_v63, %v10069_v29 }
  0xec   :  { %14855 = vst [vmem:[#allocation21_spill] sm:$0xff] %v10124_v0  ;;  %v331_v1 = vsel %vm300_vm1, %v10124_v0, 0.0 }
  0xed   :  { %332 = vadd.xlane.f32.xlu2 %v331_v1 }
  0xf1   :  { %v202_v3 = vpop.f32.mrf.mxu0 }
  0xf2   :  { %v10129_v4 = vadd.f32 %v202_v3, %v10077_v34 }
  0xf4   :  { %14856 = vst [vmem:[#allocation22_spill] sm:$0xff] %v10129_v4  ;;  %v334_v5 = vsel %vm300_vm1, %v10129_v4, 0.0 }
  0xf5   :  { %335 = vadd.xlane.f32.xlu1 %v334_v5 }
  0xf9   :  { %v205_v8 = vpop.f32.mrf.mxu0 }
  0xfa   :  { %v10135_v9 = vadd.f32 %v205_v8, %v10061_v24 }
  0xfc   :  { %14857 = vst [vmem:[#allocation23_spill] sm:$0xff] %v10135_v9  ;;  %v337_v11 = vsel %vm300_vm1, %v10135_v9, 0.0 }
  0xfd   :  { %338 = vadd.xlane.f32.xlu1 %v337_v11 }
 0x101   :  { %v208_v14 = vpop.f32.mrf.mxu0 }
 0x102   :  { %v10141_v15 = vadd.f32 %v208_v14, %v10069_v29 }
 0x104   :  { %14858 = vst [vmem:[#allocation24_spill] sm:$0xff] %v10141_v15  ;;  %v340_v17 = vsel %vm300_vm1, %v10141_v15, 0.0 }
 0x105   :  { %341 = vadd.xlane.f32.xlu1 %v340_v17 }
 0x109   :  { %v211_v19 = vpop.f32.mrf.mxu0 }
 0x10a   :  { %v10146_v20 = vadd.f32 %v211_v19, %v10077_v34 }
 0x10c   :  { %14859 = vst [vmem:[#allocation25_spill] sm:$0xff] %v10146_v20  ;;  %v343_v22 = vsel %vm300_vm1, %v10146_v20, 0.0 }
 0x10d   :  { %344 = vadd.xlane.f32.xlu1 %v343_v22 }
 0x110   :  { %v303_v25 = vpop.xlane.xlu0 %302 }
 0x111   :  { %v380_v26 = vmul.f32 %v10150_v23, %v303_v25  ;;  %v214_v28 = vpop.f32.mrf.mxu0 }
 0x112   :  { %v10154_v30 = vadd.f32 %v214_v28, %v10061_v24 }
 0x113   :  { %v10157_v31 = vsub.f32 %v10064_v27, %v380_v26 }
 0x114   :  { %14861 = vst [vmem:[#allocation27_spill] sm:$0xff] %v10154_v30  ;;  %v346_v33 = vsel %vm300_vm1, %v10154_v30, 0.0 }
 0x115   :  { %347 = vadd.xlane.f32.xlu0 %v346_v33  ;;  %v428_v35 = vmul.f32 %v10157_v31, %v10157_v31 }
 0x117   :  { %v452_v36 = vsel %vm300_vm1, %v428_v35, 0.0 }
 0x118   :  { %v306_v38 = vpop.xlane.xlu0 %305  ;;  %453 = vadd.xlane.f32.xlu2 %v452_v36 }
 0x119   :  { %v381_v39 = vmul.f32 %v10150_v23, %v306_v38  ;;  %v217_v40 = vpop.f32.mrf.mxu0 }
 0x11a   :  { %v10166_v42 = vadd.f32 %v217_v40, %v10069_v29 }
 0x11b   :  { %v10169_v43 = vsub.f32 %v10072_v32, %v381_v39 }
 0x11c   :  { %14862 = vst [vmem:[#allocation28_spill] sm:$0xff] %v10166_v42  ;;  %v349_v46 = vsel %vm300_vm1, %v10166_v42, 0.0 }
 0x11d   :  { %350 = vadd.xlane.f32.xlu0 %v349_v46  ;;  %v429_v47 = vmul.f32 %v10169_v43, %v10169_v43  ;;  %v277_v46 = vld [vmem:[#allocation5 + $0x88] sm:$0xff] }
 0x11e   :  { %973 = vmatpush.msrb.mxu0 %v277_v46  ;;  %8966 = vmatpush.msra.mxu1 %v277_v46 }
 0x11f   :  { %v455_v48 = vsel %vm300_vm1, %v429_v47, 0.0 }
 0x120   :  { %v309_v50 = vpop.xlane.xlu1 %308  ;;  %456 = vadd.xlane.f32.xlu2 %v455_v48 }
 0x121   :  { %v382_v51 = vmul.f32 %v10150_v23, %v309_v50  ;;  %v220_v53 = vpop.f32.mrf.mxu0 }
 0x122   :  { %v10178_v54 = vadd.f32 %v220_v53, %v10077_v34 }
 0x123   :  { %v10181_v56 = vsub.f32 %v10080_v37, %v382_v51 }
 0x124   :  { %14863 = vst [vmem:[#allocation29_spill] sm:$0xff] %v10178_v54  ;;  %v352_v57 = vsel %vm300_vm1, %v10178_v54, 0.0 }
 0x125   :  { %353 = vadd.xlane.f32.xlu0 %v352_v57  ;;  %v430_v59 = vmul.f32 %v10181_v56, %v10181_v56 }
 0x127   :  { %v458_v60 = vsel %vm300_vm1, %v430_v59, 0.0 }
 0x128   :  { %v312_v62 = vpop.xlane.xlu1 %311  ;;  %459 = vadd.xlane.f32.xlu2 %v458_v60 }
 0x129   :  { %v383_v63 = vmul.f32 %v10150_v23, %v312_v62  ;;  %v223_v1 = vpop.f32.mrf.mxu0 }
 0x12a   :  { %v10222_v39 = vadd.f32 %v223_v1, %v10061_v24 }
 0x12b   :  { %v10190_v2 = vsub.f32 %v10086_v41, %v383_v63 }
 0x12c   :  { %14865 = vst [vmem:[#allocation31_spill] sm:$0xff] %v10222_v39  ;;  %v355_v48 = vsel %vm300_vm1, %v10222_v39, 0.0 }
 0x12d   :  { %v431_v3 = vmul.f32 %v10190_v2, %v10190_v2 }
 0x12f   :  { %v461_v5 = vsel %vm300_vm1, %v431_v3, 0.0 }
 0x130   :  { %v315_v6 = vpop.xlane.xlu2 %314  ;;  %462 = vadd.xlane.f32.xlu2 %v461_v5 }
 0x131   :  { %v384_v7 = vmul.f32 %v10150_v23, %v315_v6  ;;  %v226_v8 = vpop.f32.mrf.mxu0 }
 0x133   :  { %v10197_v10 = vsub.f32 %v10092_v45, %v384_v7 }
 0x135   :  { %v432_v11 = vmul.f32 %v10197_v10, %v10197_v10 }
 0x137   :  { %v464_v12 = vsel %vm300_vm1, %v432_v11, 0.0 }
 0x138   :  { %v318_v13 = vpop.xlane.xlu0 %317  ;;  %465 = vadd.xlane.f32.xlu1 %v464_v12 }
 0x139   :  { %v385_v14 = vmul.f32 %v10150_v23, %v318_v13  ;;  %v229_v16 = vpop.f32.mrf.mxu0 }
 0x13a   :  { %v10246_v63 = vadd.f32 %v229_v16, %v10077_v34 }
 0x13b   :  { %v10204_v17 = vsub.f32 %v10098_v49, %v385_v14 }
 0x13c   :  { %14867 = vst [vmem:[#allocation33_spill] sm:$0xff] %v10246_v63  ;;  %v361_v1 = vsel %vm300_vm1, %v10246_v63, 0.0 }
 0x13d   :  { %v433_v18 = vmul.f32 %v10204_v17, %v10204_v17 }
 0x13f   :  { %v467_v19 = vsel %vm300_vm1, %v433_v18, 0.0 }
 0x140   :  { %v321_v21 = vpop.xlane.xlu0 %320  ;;  %468 = vadd.xlane.f32.xlu1 %v467_v19 }
 0x141   :  { %v386_v22 = vmul.f32 %v10150_v23, %v321_v21  ;;  %v232_v25 = vpop.f32.mrf.mxu0 }
 0x142   :  { %v10211_v26 = vadd.f32 %v232_v25, %v10061_v24  ;;  %v10234_v24 = vadd.f32 %v226_v8, %v10069_v29 }
 0x143   :  { %v10214_v28 = vsub.f32 %v10104_v52, %v386_v22 }
 0x144   :  { %14864 = vst [vmem:[#allocation30_spill] sm:$0xff] %v10211_v26  ;;  %v364_v33 = vsel %vm300_vm1, %v10211_v26, 0.0  ;;  %v358_v60 = vsel %vm300_vm1, %v10234_v24, 0.0 }
 0x145   :  { %365 = vadd.xlane.f32.xlu0 %v364_v33  ;;  %v434_v35 = vmul.f32 %v10214_v28, %v10214_v28  ;;  %14866 = vst [vmem:[#allocation32_spill] sm:$0xff] %v10234_v24 }
 0x147   :  { %v470_v36 = vsel %vm300_vm1, %v434_v35, 0.0 }
 0x148   :  { %v324_v38 = vpop.xlane.xlu0 %323  ;;  %471 = vadd.xlane.f32.xlu1 %v470_v36 }
 0x149   :  { %v387_v40 = vmul.f32 %v10150_v23, %v324_v38 }
 0x14b   :  { %v10226_v44 = vsub.f32 %v10109_v55, %v387_v40 }
 0x14d   :  { %v435_v47 = vmul.f32 %v10226_v44, %v10226_v44 }
 0x14f   :  { %v473_v50 = vsel %vm300_vm1, %v435_v47, 0.0 }
 0x150   :  { %v327_v51 = vpop.xlane.xlu0 %326  ;;  %474 = vadd.xlane.f32.xlu2 %v473_v50  ;;  %356 = vadd.xlane.f32.xlu1 %v355_v48 }
 0x151   :  { %v388_v53 = vmul.f32 %v10150_v23, %v327_v51 }
 0x153   :  { %v10238_v57 = vsub.f32 %v10114_v58, %v388_v53  ;;  %v276_v53 = vld [vmem:[#allocation5 + $0x80] sm:$0xff] }
 0x154   :  { %974 = vmatpush.msrb.mxu0 %v276_v53  ;;  %8967 = vmatpush.msra.mxu1 %v276_v53 }
 0x155   :  { %v436_v59 = vmul.f32 %v10238_v57, %v10238_v57 }
 0x157   :  { %v476_v62 = vsel %vm300_vm1, %v436_v59, 0.0 }
 0x158   :  { %477 = vadd.xlane.f32.xlu2 %v476_v62  ;;  %359 = vadd.xlane.f32.xlu1 %v358_v60  ;;  %v330_v46 = vpop.xlane.xlu0 %329 }
 0x160   :  { %v333_v3 = vpop.xlane.xlu2 %332  ;;  %362 = vadd.xlane.f32.xlu1 %v361_v1 }
 0x161   :  { %v390_v5 = vmul.f32 %v10150_v23, %v333_v3 }
 0x163   :  { %v10252_v6 = vsub.f32 %v10124_v0, %v390_v5 }
 0x165   :  { %v438_v7 = vmul.f32 %v10252_v6, %v10252_v6 }
 0x167   :  { %v482_v8 = vsel %vm300_vm1, %v438_v7, 0.0 }
 0x168   :  { %483 = vadd.xlane.f32.xlu2 %v482_v8  ;;  %v336_v11 = vpop.xlane.xlu1 %335  ;;  %v235_v8 = vpop.f32.mrf.mxu0 }
 0x169   :  { %v391_v12 = vmul.f32 %v10150_v23, %v336_v11 }
 0x16b   :  { %v10259_v13 = vsub.f32 %v10129_v4, %v391_v12 }
 0x16d   :  { %v439_v14 = vmul.f32 %v10259_v13, %v10259_v13 }
 0x16f   :  { %v485_v16 = vsel %vm300_vm1, %v439_v14, 0.0 }
 0x170   :  { %486 = vadd.xlane.f32.xlu2 %v485_v16  ;;  %v339_v18 = vpop.xlane.xlu1 %338 }
 0x171   :  { %v392_v19 = vmul.f32 %v10150_v23, %v339_v18  ;;  %v10295_v18 = vadd.f32 %v235_v8, %v10069_v29 }
 0x173   :  { %v10266_v21 = vsub.f32 %v10135_v9, %v392_v19  ;;  %14868 = vst [vmem:[#allocation34_spill] sm:$0xff] %v10295_v18  ;;  %v389_v19 = vmul.f32 %v10150_v23, %v330_v46  ;;  %v10021_v9 = vmov -1e+30  }
 0x175   :  { %v440_v22 = vmul.f32 %v10266_v21, %v10266_v21 }
 0x177   :  { %v488_v25 = vsel %vm300_vm1, %v440_v22, 0.0 }
 0x178   :  { %489 = vadd.xlane.f32.xlu2 %v488_v25  ;;  %v342_v33 = vpop.xlane.xlu1 %341 }
 0x179   :  { %v393_v35 = vmul.f32 %v10150_v23, %v342_v33 }
 0x17b   :  { %v10273_v36 = vsub.f32 %v10141_v15, %v393_v35 }
 0x17d   :  { %v441_v38 = vmul.f32 %v10273_v36, %v10273_v36 }
 0x17f   :  { %v491_v40 = vsel %vm300_vm1, %v441_v38, 0.0  ;;  %v367_v38 = vsel %vm300_vm1, %v10295_v18, 0.0 }
 0x180   :  { %v345_v47 = vpop.xlane.xlu1 %344  ;;  %492 = vadd.xlane.f32.xlu0 %v491_v40 }
 0x181   :  { %v394_v48 = vmul.f32 %v10150_v23, %v345_v47  ;;  %v10307_v47 = vsub.f32 %v10119_v61, %v389_v19 }
 0x183   :  { %v10280_v50 = vsub.f32 %v10146_v20, %v394_v48 }
 0x185   :  { %v442_v51 = vmul.f32 %v10280_v50, %v10280_v50 }
 0x187   :  { %v494_v59 = vsel %vm300_vm1, %v442_v51, 0.0  ;;  %v238_v51 = vpop.f32.mrf.mxu0 }
 0x188   :  { %v348_v60 = vpop.xlane.xlu0 %347  ;;  %495 = vadd.xlane.f32.xlu0 %v494_v59 }
 0x189   :  { %v395_v62 = vmul.f32 %v10150_v23, %v348_v60 }
 0x18b   :  { %v10287_v1 = vsub.f32 %v10154_v30, %v395_v62  ;;  %v454_v3 = vpop.xlane.xlu2 %453  ;;  %v10312_v62 = vadd.f32 %v238_v51, %v10077_v34 }
 0x18c   :  { %v524_v5 = vmul.f32 %v454_v3, %v10150_v23  ;;  %v437_v3 = vmul.f32 %v10307_v47, %v10307_v47 }
 0x18d   :  { %v443_v7 = vmul.f32 %v10287_v1, %v10287_v1  ;;  %14869 = vst [vmem:[#allocation35_spill] sm:$0xff] %v10312_v62 }
 0x18e   :  { %v548_v11 = vadd.f32 1e-05, %v524_v5  ;;  %v479_v34 = vsel %vm300_vm1, %v437_v3, 0.0 }
 0x18f   :  { %v497_v12 = vsel %vm300_vm1, %v443_v7, 0.0 }
 0x190   :  { %9245 = vrsqrt.f32 %v548_v11  ;;  %498 = vadd.xlane.f32.xlu2 %v497_v12  ;;  %v351_v14 = vpop.xlane.xlu0 %350  ;;  %vm578_vm4 = vweird.f32 %v548_v11 }
 0x191   :  { %v396_v16 = vmul.f32 %v10150_v23, %v351_v14 }
 0x193   :  { %v10299_v22 = vsub.f32 %v10166_v42, %v396_v16  ;;  %v457_v25 = vpop.xlane.xlu2 %456 }
 0x194   :  { %v525_v33 = vmul.f32 %v457_v25, %v10150_v23 }
 0x195   :  { %v444_v35 = vmul.f32 %v10299_v22, %v10299_v22 }
 0x196   :  { %v9246_v40 = vpop.eup %9245  ;;  %v549_v29 = vadd.f32 1e-05, %v525_v33  ;;  %v370_v33 = vsel %vm300_vm1, %v10312_v62, 0.0 }
 0x197   :  { %v573_v48 = vmul.f32 %v9246_v40, %v548_v11  ;;  %v500_v46 = vsel %vm300_vm1, %v444_v35, 0.0  ;;  %vm579_vm3 = vweird.f32 %v9246_v40 }
 0x198   :  { %9247 = vrsqrt.f32 %v549_v29  ;;  %v354_v53 = vpop.xlane.xlu0 %353  ;;  %501 = vadd.xlane.f32.xlu1 %v500_v46  ;;  %368 = vadd.xlane.f32.xlu2 %v367_v38  ;;  %v10326_v46 = vld [vmem:[#allocation5 + $0x140] ss:$0 sm:$0xff]  ;;  %vm580_vm5 = vmor %vm578_vm4, %vm579_vm3  ;;  %vm588_vm7 = vweird.f32 %v549_v29 }
 0x199   :  { %v574_v59 = vmul.f32 %v9246_v40, %v573_v48  ;;  %v397_v60 = vmul.f32 %v10150_v23, %v354_v53 }
 0x19b   :  { %v575_v5 = vmul.f32 0.5, %v574_v59  ;;  %v10317_v7 = vsub.f32 %v10178_v54, %v397_v60  ;;  %v460_v8 = vpop.xlane.xlu2 %459  ;;  %v10329_v60 = vld [vmem:[#allocation5 + $0x141] ss:$0 sm:$0xff] }
 0x19c   :  { %v526_v12 = vmul.f32 %v460_v8, %v10150_v23 }
 0x19d   :  { %v576_v14 = vsub.f32 1.5, %v575_v5  ;;  %v445_v16 = vmul.f32 %v10317_v7, %v10317_v7 }
 0x19e   :  { %v9248_v19 = vpop.eup %9247  ;;  %v550_v25 = vadd.f32 1e-05, %v526_v12 }
 0x19f   :  { %v577_v35 = vmul.f32 %v9246_v40, %v576_v14  ;;  %v583_v38 = vmul.f32 %v9248_v19, %v549_v29  ;;  %v503_v48 = vsel %vm300_vm1, %v445_v16, 0.0  ;;  %vm589_vm6 = vweird.f32 %v9248_v19 }
 0x1a0   :  { %9249 = vrsqrt.f32 %v550_v25  ;;  %504 = vadd.xlane.f32.xlu0 %v503_v48  ;;  %480 = vadd.xlane.f32.xlu2 %v479_v34  ;;  %vm590_vm8 = vmor %vm588_vm7, %vm589_vm6  ;;  %vm598_vm10 = vweird.f32 %v550_v25 }
 0x1a1   :  { %v581_v51 = vsel %vm580_vm5, %v9246_v40, %v577_v35  ;;  %v584_v53 = vmul.f32 %v9248_v19, %v583_v38  ;;  %371 = vadd.xlane.f32.xlu1 %v370_v33 }
 0x1a2   :  { %v812_v59 = vmul.f32 %v581_v51, %v10157_v31 }
 0x1a3   :  { %v585_v3 = vmul.f32 0.5, %v584_v53  ;;  %v463_v5 = vpop.xlane.xlu2 %462 }
 0x1a4   :  { %v837_v11 = vmul.f32 %v10326_v46, %v812_v59  ;;  %v527_v8 = vmul.f32 %v463_v5, %v10150_v23 }
 0x1a5   :  { %v586_v12 = vsub.f32 1.5, %v585_v3 }
 0x1a6   :  { %v9250_v14 = vpop.eup %9249  ;;  %v551_v16 = vadd.f32 1e-05, %v527_v8  ;;  %v862_v48 = vadd.f32 %v10329_v60, %v837_v11 }
 0x1a7   :  { %v587_v34 = vmul.f32 %v9248_v19, %v586_v12  ;;  %v593_v40 = vmul.f32 %v9250_v14, %v550_v25  ;;  %vm599_vm9 = vweird.f32 %v9250_v14 }
 0x1a8   :  { %9251 = vrsqrt.f32 %v551_v16  ;;  %8579 = vmatmul.msk.f32.vlgmr.msrb.gmra.mxu0 %vm300_vm1, %v862_v48  ;;  %vm600_vm11 = vmor %vm598_vm10, %vm599_vm9  ;;  %vm608_vm13 = vweird.f32 %v551_v16 }
 0x1a9   :  { %v591_v31 = vsel %vm590_vm8, %v9248_v19, %v587_v34  ;;  %v594_v33 = vmul.f32 %v9250_v14, %v593_v40 }
 0x1aa   :  { %v813_v35 = vmul.f32 %v591_v31, %v10169_v43 }
 0x1ab   :  { %v595_v38 = vmul.f32 0.5, %v594_v33  ;;  %v466_v51 = vpop.xlane.xlu1 %465 }
 0x1ac   :  { %v528_v53 = vmul.f32 %v466_v51, %v10150_v23  ;;  %v838_v59 = vmul.f32 %v10326_v46, %v813_v35 }
 0x1ad   :  { %v596_v3 = vsub.f32 1.5, %v595_v38 }
 0x1ae   :  { %v9252_v5 = vpop.eup %9251  ;;  %v552_v11 = vadd.f32 1e-05, %v528_v53  ;;  %v863_v29 = vadd.f32 %v10329_v60, %v838_v59 }
 0x1af   :  { %v597_v8 = vmul.f32 %v9250_v14, %v596_v3  ;;  %v603_v12 = vmul.f32 %v9252_v5, %v551_v16  ;;  %vm609_vm12 = vweird.f32 %v9252_v5 }
 0x1b0   :  { %9253 = vrsqrt.f32 %v552_v11  ;;  %8580 = vmatmul.msk.f32.gmra.mxu0 %vm300_vm1, %v863_v29  ;;  %vm610_vm14 = vmor %vm608_vm13, %vm609_vm12  ;;  %vm618_vm0 = vweird.f32 %v552_v11 }
 0x1b1   :  { %v601_v43 = vsel %vm600_vm11, %v9250_v14, %v597_v8  ;;  %v604_v19 = vmul.f32 %v9252_v5, %v603_v12 }
 0x1b2   :  { %v814_v48 = vmul.f32 %v601_v43, %v10181_v56 }
 0x1b3   :  { %v605_v34 = vmul.f32 0.5, %v604_v19  ;;  %v469_v40 = vpop.xlane.xlu1 %468 }
 0x1b4   :  { %v529_v31 = vmul.f32 %v469_v40, %v10150_v23  ;;  %v839_v33 = vmul.f32 %v10326_v46, %v814_v48 }
 0x1b5   :  { %v606_v35 = vsub.f32 1.5, %v605_v34 }
 0x1b6   :  { %v9254_v38 = vpop.eup %9253  ;;  %v553_v51 = vadd.f32 1e-05, %v529_v31  ;;  %v864_v25 = vadd.f32 %v10329_v60, %v839_v33 }
 0x1b7   :  { %v607_v53 = vmul.f32 %v9252_v5, %v606_v35  ;;  %v613_v59 = vmul.f32 %v9254_v38, %v552_v11  ;;  %vm619_vm15 = vweird.f32 %v9254_v38 }
 0x1b8   :  { %9255 = vrsqrt.f32 %v553_v51  ;;  %8581 = vmatmul.msk.f32.gmra.mxu0 %vm300_vm1, %v864_v25  ;;  %vm620_vm2 = vmor %vm618_vm0, %vm619_vm15  ;;  %v366_v35 = vpop.xlane.xlu0 %365  ;;  %vm628_vm4 = vweird.f32 %v553_v51 }
 0x1b9   :  { %v611_v56 = vsel %vm610_vm14, %v9252_v5, %v607_v53  ;;  %v614_v14 = vmul.f32 %v9254_v38, %v613_v59 }
 0x1ba   :  { %v815_v3 = vmul.f32 %v611_v56, %v10190_v2 }
 0x1bb   :  { %v615_v29 = vmul.f32 0.5, %v614_v14  ;;  %v472_v8 = vpop.xlane.xlu1 %471 }
 0x1bc   :  { %v530_v12 = vmul.f32 %v472_v8, %v10150_v23  ;;  %v840_v43 = vmul.f32 %v10326_v46, %v815_v3  ;;  %v401_v8 = vmul.f32 %v10150_v23, %v366_v35 }
 0x1bd   :  { %v616_v19 = vsub.f32 1.5, %v615_v29 }
 0x1be   :  { %v9256_v48 = vpop.eup %9255  ;;  %v554_v34 = vadd.f32 1e-05, %v530_v12  ;;  %v865_v16 = vadd.f32 %v10329_v60, %v840_v43 }
 0x1bf   :  { %v617_v40 = vmul.f32 %v9254_v38, %v616_v19  ;;  %v623_v31 = vmul.f32 %v9256_v48, %v553_v51  ;;  %vm629_vm3 = vweird.f32 %v9256_v48 }
 0x1c0   :  { %9257 = vrsqrt.f32 %v554_v34  ;;  %8582 = vmatmul.msk.f32.gmra.mxu0 %vm300_vm1, %v865_v16  ;;  %vm630_vm5 = vmor %vm628_vm4, %vm629_vm3  ;;  %vm638_vm7 = vweird.f32 %v554_v34 }
 0x1c1   :  { %v621_v2 = vsel %vm620_vm2, %v9254_v38, %v617_v40  ;;  %v624_v5 = vmul.f32 %v9256_v48, %v623_v31 }
 0x1c2   :  { %v816_v33 = vmul.f32 %v621_v2, %v10197_v10 }
 0x1c3   :  { %v625_v25 = vmul.f32 0.5, %v624_v5  ;;  %v475_v53 = vpop.xlane.xlu2 %474  ;;  %v357_v59 = vpop.xlane.xlu1 %356  ;;  %v10364_v5 = vsub.f32 %v10211_v26, %v401_v8 }
 0x1c4   :  { %v531_v56 = vmul.f32 %v475_v53, %v10150_v23  ;;  %v398_v14 = vmul.f32 %v10150_v23, %v357_v59  ;;  %v841_v3 = vmul.f32 %v10326_v46, %v816_v33 }
 0x1c5   :  { %v626_v11 = vsub.f32 1.5, %v625_v25  ;;  %v449_v8 = vmul.f32 %v10364_v5, %v10364_v5 }
 0x1c6   :  { %v9258_v29 = vpop.eup %9257  ;;  %v555_v12 = vadd.f32 1e-05, %v531_v56  ;;  %v10356_v38 = vsub.f32 %v10222_v39, %v398_v14  ;;  %v866_v10 = vadd.f32 %v10329_v60, %v841_v3 }
 0x1c7   :  { %v627_v43 = vmul.f32 %v9256_v48, %v626_v11  ;;  %v633_v19 = vmul.f32 %v9258_v29, %v554_v34  ;;  %vm639_vm6 = vweird.f32 %v9258_v29 }
 0x1c8   :  { %9259 = vrsqrt.f32 %v555_v12  ;;  %8583 = vmatmul.msk.f32.gmra.mxu0 %vm300_vm1, %v866_v10  ;;  %v446_v16 = vmul.f32 %v10356_v38, %v10356_v38  ;;  %vm640_vm8 = vmor %vm638_vm7, %vm639_vm6  ;;  %vm648_vm10 = vweird.f32 %v555_v12 }
 0x1c9   :  { %v631_v40 = vsel %vm630_vm5, %v9256_v48, %v627_v43  ;;  %v634_v31 = vmul.f32 %v9258_v29, %v633_v19 }
 0x1ca   :  { %v817_v2 = vmul.f32 %v631_v40, %v10204_v17  ;;  %v506_v33 = vsel %vm300_vm1, %v446_v16, 0.0 }
 0x1cb   :  { %v635_v35 = vmul.f32 0.5, %v634_v31  ;;  %v478_v25 = vpop.xlane.xlu2 %477  ;;  %v360_v51 = vpop.xlane.xlu1 %359  ;;  %507 = vadd.xlane.f32.xlu0 %v506_v33 }
 0x1cc   :  { %v532_v53 = vmul.f32 %v478_v25, %v10150_v23  ;;  %v399_v59 = vmul.f32 %v10150_v23, %v360_v51  ;;  %v842_v56 = vmul.f32 %v10326_v46, %v817_v2  ;;  %v515_v2 = vsel %vm300_vm1, %v449_v8, 0.0 }
 0x1cd   :  { %v636_v14 = vsub.f32 1.5, %v635_v35 }
 0x1ce   :  { %v9260_v48 = vpop.eup %9259  ;;  %v556_v3 = vadd.f32 1e-05, %v532_v53  ;;  %v10371_v17 = vsub.f32 %v10234_v24, %v399_v59  ;;  %v867_v11 = vadd.f32 %v10329_v60, %v842_v56 }
 0x1cf   :  { %v637_v10 = vmul.f32 %v9258_v29, %v636_v14  ;;  %v643_v43 = vmul.f32 %v9260_v48, %v555_v12  ;;  %vm649_vm9 = vweird.f32 %v9260_v48 }
 0x1d0   :  { %9261 = vrsqrt.f32 %v556_v3  ;;  %8584 = vmatmul.msk.f32.gmra.mxu0 %vm300_vm1, %v867_v11  ;;  %v447_v19 = vmul.f32 %v10371_v17, %v10371_v17  ;;  %vm650_vm11 = vmor %vm648_vm10, %vm649_vm9  ;;  %vm658_vm13 = vweird.f32 %v556_v3 }
 0x1d1   :  { %v641_v16 = vsel %vm640_vm8, %v9258_v29, %v637_v10  ;;  %v644_v40 = vmul.f32 %v9260_v48, %v643_v43 }
 0x1d2   :  { %v818_v31 = vmul.f32 %v641_v16, %v10214_v28  ;;  %v509_v33 = vsel %vm300_vm1, %v447_v19, 0.0 }
 0x1d3   :  { %v645_v35 = vmul.f32 0.5, %v644_v40  ;;  %v363_v25 = vpop.xlane.xlu1 %362  ;;  %516 = vadd.xlane.f32.xlu0 %v515_v2  ;;  %510 = vadd.xlane.f32.xlu1 %v509_v33 }
 0x1d4   :  { %v400_v34 = vmul.f32 %v10150_v23, %v363_v25  ;;  %v843_v51 = vmul.f32 %v10326_v46, %v818_v31 }
 0x1d5   :  { %v646_v53 = vsub.f32 1.5, %v645_v35 }
 0x1d6   :  { %v9262_v59 = vpop.eup %9261  ;;  %v10385_v29 = vsub.f32 %v10246_v63, %v400_v34  ;;  %v868_v28 = vadd.f32 %v10329_v60, %v843_v51 }
 0x1d7   :  { %v647_v56 = vmul.f32 %v9260_v48, %v646_v53  ;;  %v653_v14 = vmul.f32 %v9262_v59, %v556_v3  ;;  %vm659_vm12 = vweird.f32 %v9262_v59 }
 0x1d8   :  { %8585 = vmatmul.msk.f32.gmra.mxu0 %vm300_vm1, %v868_v28  ;;  %v448_v11 = vmul.f32 %v10385_v29, %v10385_v29  ;;  %vm660_vm14 = vmor %vm658_vm13, %vm659_vm12 }
 0x1d9   :  { %v651_v8 = vsel %vm650_vm11, %v9260_v48, %v647_v56  ;;  %v654_v10 = vmul.f32 %v9262_v59, %v653_v14 }
 0x1da   :  { %v819_v43 = vmul.f32 %v651_v8, %v10226_v44  ;;  %v512_v19 = vsel %vm300_vm1, %v448_v11, 0.0 }
 0x1db   :  { %v655_v16 = vmul.f32 0.5, %v654_v10  ;;  %v484_v40 = vpop.xlane.xlu2 %483  ;;  %513 = vadd.xlane.f32.xlu2 %v512_v19 }
 0x1dc   :  { %v534_v31 = vmul.f32 %v484_v40, %v10150_v23  ;;  %v844_v12 = vmul.f32 %v10326_v46, %v819_v43 }
 0x1dd   :  { %v656_v2 = vsub.f32 1.5, %v655_v16 }
 0x1de   :  { %v558_v33 = vadd.f32 1e-05, %v534_v31  ;;  %v869_v35 = vadd.f32 %v10329_v60, %v844_v12 }
 0x1df   :  { %v657_v25 = vmul.f32 %v9262_v59, %v656_v2 }
 0x1e0   :  { %9263 = vrsqrt.f32 %v558_v33  ;;  %8586 = vmatmul.msk.f32.gmra.mxu0 %vm300_vm1, %v869_v35  ;;  %vm678_vm0 = vweird.f32 %v558_v33 }
 0x1e1   :  { %v661_v44 = vsel %vm660_vm14, %v9262_v59, %v657_v25 }
 0x1e2   :  { %v820_v48 = vmul.f32 %v661_v44, %v10238_v57 }
 0x1e3   :  { %v487_v34 = vpop.xlane.xlu2 %486 }
 0x1e4   :  { %v535_v51 = vmul.f32 %v487_v34, %v10150_v23  ;;  %v845_v53 = vmul.f32 %v10326_v46, %v820_v48 }
 0x1e6   :  { %v9264_v28 = vpop.eup %9263  ;;  %v559_v56 = vadd.f32 1e-05, %v535_v51  ;;  %v870_v14 = vadd.f32 %v10329_v60, %v845_v53 }
 0x1e7   :  { %v673_v11 = vmul.f32 %v9264_v28, %v558_v33  ;;  %vm679_vm15 = vweird.f32 %v9264_v28 }
 0x1e8   :  { %9265 = vrsqrt.f32 %v559_v56  ;;  %8587 = vmatmul.msk.f32.gmra.mxu0 %vm300_vm1, %v870_v14  ;;  %vm680_vm2 = vmor %vm678_vm0, %vm679_vm15  ;;  %vm688_vm4 = vweird.f32 %v559_v56 }
 0x1e9   :  { %v674_v3 = vmul.f32 %v9264_v28, %v673_v11 }
 0x1eb   :  { %v675_v8 = vmul.f32 0.5, %v674_v3  ;;  %v490_v10 = vpop.xlane.xlu2 %489 }
 0x1ec   :  { %v536_v59 = vmul.f32 %v490_v10, %v10150_v23 }
 0x1ed   :  { %v676_v43 = vsub.f32 1.5, %v675_v8 }
 0x1ee   :  { %v9266_v57 = vpop.eup %9265  ;;  %v560_v19 = vadd.f32 1e-05, %v536_v59 }
 0x1ef   :  { %v677_v16 = vmul.f32 %v9264_v28, %v676_v43  ;;  %v683_v40 = vmul.f32 %v9266_v57, %v559_v56  ;;  %vm689_vm3 = vweird.f32 %v9266_v57 }
 0x1f0   :  { %9267 = vrsqrt.f32 %v560_v19  ;;  %vm690_vm5 = vmor %vm688_vm4, %vm689_vm3  ;;  %vm698_vm7 = vweird.f32 %v560_v19 }
 0x1f1   :  { %v684_v31 = vmul.f32 %v9266_v57, %v683_v40  ;;  %v681_v12 = vsel %vm680_vm2, %v9264_v28, %v677_v16 }
 0x1f2   :  { %v822_v2 = vmul.f32 %v681_v12, %v10252_v6 }
 0x1f3   :  { %v685_v35 = vmul.f32 0.5, %v684_v31  ;;  %v493_v25 = vpop.xlane.xlu0 %492 }
 0x1f4   :  { %v537_v44 = vmul.f32 %v493_v25, %v10150_v23  ;;  %v847_v48 = vmul.f32 %v10326_v46, %v822_v2 }
 0x1f5   :  { %v686_v34 = vsub.f32 1.5, %v685_v35 }
 0x1f6   :  { %v9268_v51 = vpop.eup %9267  ;;  %v561_v53 = vadd.f32 1e-05, %v537_v44  ;;  %v872_v14 = vadd.f32 %v10329_v60, %v847_v48 }
 0x1f7   :  { %v687_v33 = vmul.f32 %v9266_v57, %v686_v34  ;;  %v693_v11 = vmul.f32 %v9268_v51, %v560_v19  ;;  %vm699_vm6 = vweird.f32 %v9268_v51 }
 0x1f8   :  { %9269 = vrsqrt.f32 %v561_v53  ;;  %8589 = vmatmul.msk.f32.vlgmr.msra.gmra.mxu1 %vm300_vm1, %v872_v14  ;;  %vm700_vm8 = vmor %vm698_vm7, %vm699_vm6  ;;  %vm708_vm10 = vweird.f32 %v561_v53 }
 0x1f9   :  { %v694_v6 = vmul.f32 %v9268_v51, %v693_v11  ;;  %v691_v28 = vsel %vm690_vm5, %v9266_v57, %v687_v33 }
 0x1fa   :  { %v823_v3 = vmul.f32 %v691_v28, %v10259_v13 }
 0x1fb   :  { %v695_v8 = vmul.f32 0.5, %v694_v6  ;;  %v496_v10 = vpop.xlane.xlu0 %495 }
 0x1fc   :  { %v538_v59 = vmul.f32 %v496_v10, %v10150_v23  ;;  %v848_v43 = vmul.f32 %v10326_v46, %v823_v3 }
 0x1fd   :  { %v696_v16 = vsub.f32 1.5, %v695_v8 }
 0x1fe   :  { %v9270_v40 = vpop.eup %9269  ;;  %v562_v31 = vadd.f32 1e-05, %v538_v59  ;;  %v873_v56 = vadd.f32 %v10329_v60, %v848_v43 }
 0x1ff   :  { %v697_v12 = vmul.f32 %v9268_v51, %v696_v16  ;;  %v703_v2 = vmul.f32 %v9270_v40, %v561_v53  ;;  %vm709_vm9 = vweird.f32 %v9270_v40 }
 0x200   :  { %9271 = vrsqrt.f32 %v562_v31  ;;  %8590 = vmatmul.msk.f32.gmra.mxu1 %vm300_vm1, %v873_v56  ;;  %vm710_vm11 = vmor %vm708_vm10, %vm709_vm9  ;;  %vm718_vm13 = vweird.f32 %v562_v31 }
 0x201   :  { %v704_v13 = vmul.f32 %v9270_v40, %v703_v2  ;;  %v701_v57 = vsel %vm700_vm8, %v9268_v51, %v697_v12 }
 0x202   :  { %v824_v35 = vmul.f32 %v701_v57, %v10266_v21 }
 0x203   :  { %v705_v25 = vmul.f32 0.5, %v704_v13  ;;  %v499_v44 = vpop.xlane.xlu2 %498 }
 0x204   :  { %v539_v48 = vmul.f32 %v499_v44, %v10150_v23  ;;  %v849_v34 = vmul.f32 %v10326_v46, %v824_v35 }
 0x205   :  { %v706_v14 = vsub.f32 1.5, %v705_v25 }
 0x206   :  { %v9272_v33 = vpop.eup %9271  ;;  %v563_v11 = vadd.f32 1e-05, %v539_v48  ;;  %v874_v19 = vadd.f32 %v10329_v60, %v849_v34 }
 0x207   :  { %v707_v6 = vmul.f32 %v9270_v40, %v706_v14  ;;  %v713_v28 = vmul.f32 %v9272_v33, %v562_v31  ;;  %vm719_vm12 = vweird.f32 %v9272_v33 }
 0x208   :  { %9273 = vrsqrt.f32 %v563_v11  ;;  %8591 = vmatmul.msk.f32.gmra.mxu1 %vm300_vm1, %v874_v19  ;;  %vm720_vm14 = vmor %vm718_vm13, %vm719_vm12  ;;  %vm728_vm0 = vweird.f32 %v563_v11 }
 0x209   :  { %v714_v21 = vmul.f32 %v9272_v33, %v713_v28  ;;  %v711_v51 = vsel %vm710_vm11, %v9270_v40, %v707_v6 }
 0x20a   :  { %v825_v3 = vmul.f32 %v711_v51, %v10273_v36 }
 0x20b   :  { %v715_v8 = vmul.f32 0.5, %v714_v21  ;;  %v502_v10 = vpop.xlane.xlu1 %501  ;;  %v369_v59 = vpop.xlane.xlu2 %368 }
 0x20c   :  { %v540_v43 = vmul.f32 %v502_v10, %v10150_v23  ;;  %v402_v16 = vmul.f32 %v10150_v23, %v369_v59  ;;  %v850_v56 = vmul.f32 %v10326_v46, %v825_v3 }
 0x20d   :  { %v716_v12 = vsub.f32 1.5, %v715_v8 }
 0x20e   :  { %v9274_v53 = vpop.eup %9273  ;;  %v564_v2 = vadd.f32 1e-05, %v540_v43  ;;  %v10423_v13 = vsub.f32 %v10295_v18, %v402_v16  ;;  %v875_v40 = vadd.f32 %v10329_v60, %v850_v56 }
 0x20f   :  { %v717_v57 = vmul.f32 %v9272_v33, %v716_v12  ;;  %v723_v36 = vmul.f32 %v9274_v53, %v563_v11  ;;  %vm729_vm15 = vweird.f32 %v9274_v53 }
 0x210   :  { %9275 = vrsqrt.f32 %v564_v2  ;;  %8592 = vmatmul.msk.f32.gmra.mxu1 %vm300_vm1, %v875_v40  ;;  %v450_v35 = vmul.f32 %v10423_v13, %v10423_v13  ;;  %vm730_vm2 = vmor %vm728_vm0, %vm729_vm15  ;;  %vm738_vm4 = vweird.f32 %v564_v2 }
 0x211   :  { %v724_v25 = vmul.f32 %v9274_v53, %v723_v36  ;;  %v721_v44 = vsel %vm720_vm14, %v9272_v33, %v717_v57 }
 0x212   :  { %v518_v48 = vsel %vm300_vm1, %v450_v35, 0.0  ;;  %v826_v34 = vmul.f32 %v721_v44, %v10280_v50 }
 0x213   :  { %v725_v14 = vmul.f32 0.5, %v724_v25  ;;  %v505_v19 = vpop.xlane.xlu0 %504  ;;  %v481_v6 = vpop.xlane.xlu2 %480  ;;  %519 = vadd.xlane.f32.xlu1 %v518_v48 }
 0x214   :  { %v541_v31 = vmul.f32 %v505_v19, %v10150_v23  ;;  %v533_v28 = vmul.f32 %v481_v6, %v10150_v23  ;;  %v372_v21 = vpop.xlane.xlu1 %371  ;;  %v851_v51 = vmul.f32 %v10326_v46, %v826_v34 }
 0x215   :  { %v726_v3 = vsub.f32 1.5, %v725_v14  ;;  %v403_v8 = vmul.f32 %v10150_v23, %v372_v21  ;;  %v10447_v21 = vld [vmem:[#allocation5 + $0x144] ss:$0 sm:$0xff] }
 0x216   :  { %v9276_v33 = vpop.eup %9275  ;;  %v565_v10 = vadd.f32 1e-05, %v541_v31  ;;  %v557_v59 = vadd.f32 1e-05, %v533_v28  ;;  %v876_v50 = vadd.f32 %v10329_v60, %v851_v51 }
 0x217   :  { %v727_v43 = vmul.f32 %v9274_v53, %v726_v3  ;;  %v733_v16 = vmul.f32 %v9276_v33, %v564_v2  ;;  %v10437_v56 = vsub.f32 %v10312_v62, %v403_v8  ;;  %vm739_vm3 = vweird.f32 %v9276_v33 }
 0x218   :  { %9277 = vrsqrt.f32 %v565_v10  ;;  %8593 = vmatmul.msk.f32.gmra.mxu1 %vm300_vm1, %v876_v50  ;;  %vm740_vm5 = vmor %vm738_vm4, %vm739_vm3  ;;  %vm748_vm8 = vweird.f32 %v565_v10  ;;  %vm668_vm10 = vweird.f32 %v557_v59 }
 0x219   :  { %v734_v12 = vmul.f32 %v9276_v33, %v733_v16  ;;  %9279 = vrsqrt.f32 %v557_v59  ;;  %v451_v40 = vmul.f32 %v10437_v56, %v10437_v56  ;;  %v731_v57 = vsel %vm730_vm2, %v9274_v53, %v727_v43 }
 0x21a   :  { %v827_v36 = vmul.f32 %v731_v57, %v10287_v1 }
 0x21b   :  { %v735_v35 = vmul.f32 0.5, %v734_v12  ;;  %v521_v25 = vsel %vm300_vm1, %v451_v40, 0.0 }
 0x21c   :  { %522 = vadd.xlane.f32.xlu2 %v521_v25  ;;  %v852_v11 = vmul.f32 %v10326_v46, %v827_v36 }
 0x21d   :  { %v736_v44 = vsub.f32 1.5, %v735_v35 }
 0x21e   :  { %v9278_v48 = vpop.eup %9277  ;;  %v877_v34 = vadd.f32 %v10329_v60, %v852_v11 }
 0x21f   :  { %v9280_v14 = vpop.eup %9279  ;;  %v737_v19 = vmul.f32 %v9276_v33, %v736_v44  ;;  %v743_v6 = vmul.f32 %v9278_v48, %v565_v10  ;;  %vm749_vm6 = vweird.f32 %v9278_v48 }
 0x220   :  { %v663_v31 = vmul.f32 %v9280_v14, %v557_v59  ;;  %8594 = vmatmul.msk.f32.gmra.mxu1 %vm300_vm1, %v877_v34  ;;  %vm669_vm7 = vweird.f32 %v9280_v14  ;;  %vm750_vm9 = vmor %vm748_vm8, %vm749_vm6 }
 0x221   :  { %v744_v1 = vmul.f32 %v9278_v48, %v743_v6  ;;  %v741_v53 = vsel %vm740_vm5, %v9276_v33, %v737_v19  ;;  %vm670_vm11 = vmor %vm668_vm10, %vm669_vm7 }
 0x222   :  { %v664_v28 = vmul.f32 %v9280_v14, %v663_v31  ;;  %v828_v51 = vmul.f32 %v741_v53, %v10299_v22 }
 0x223   :  { %v745_v3 = vmul.f32 0.5, %v744_v1 }
 0x224   :  { %v665_v8 = vmul.f32 0.5, %v664_v28  ;;  %v853_v50 = vmul.f32 %v10326_v46, %v828_v51 }
 0x225   :  { %v746_v43 = vsub.f32 1.5, %v745_v3  ;;  %v976_v16 = vpop.f32.mrf.mxu0 }
 0x226   :  { %v666_v2 = vsub.f32 1.5, %v665_v8  ;;  %v10452_v12 = vadd.f32 %v10447_v21, %v976_v16  ;;  %v878_v40 = vadd.f32 %v10329_v60, %v853_v50 }
 0x227   :  { %v747_v33 = vmul.f32 %v9278_v48, %v746_v43 }
 0x228   :  { %v667_v57 = vmul.f32 %v9280_v14, %v666_v2  ;;  %8595 = vmatmul.msk.f32.gmra.mxu1 %vm300_vm1, %v878_v40  ;;  %2096 = vrot.lane.b32.xlu0 %v10452_v12, %s10016_s0 }
 0x229   :  { %v751_v22 = vsel %vm750_vm9, %v9278_v48, %v747_v33 }
 0x22a   :  { %v671_v36 = vsel %vm670_vm11, %v9280_v14, %v667_v57  ;;  %v829_v35 = vmul.f32 %v751_v22, %v10317_v7 }
 0x22b   :  { %v821_v25 = vmul.f32 %v671_v36, %v10307_v47 }
 0x22c   :  { %v854_v11 = vmul.f32 %v10326_v46, %v829_v35 }
 0x22d   :  { %v979_v44 = vpop.f32.mrf.mxu0  ;;  %v846_v10 = vmul.f32 %v10326_v46, %v821_v25 }
 0x22e   :  { %v10463_v59 = vadd.f32 %v10447_v21, %v979_v44  ;;  %v879_v34 = vadd.f32 %v10329_v60, %v854_v11 }
 0x22f   :  { %v871_v19 = vadd.f32 %v10329_v60, %v846_v10 }
 0x230   :  { %8596 = vmatmul.msk.f32.gmra.mxu1 %vm300_vm1, %v879_v34  ;;  %2090 = vrot.lane.b32.xlu0 %v10452_v12, %s10017_s1 }
 0x231   :  { %8588 = vmatmul.msk.f32.gmra.mxu0 %vm300_vm1, %v871_v19  ;;  %1053 = vrot.lane.b32.xlu1 %v10463_v59, %s10018_s21 }
 0x234   :  { %1051 = vrot.lane.b32.xlu2 %v10452_v12, %s10018_s21 }
 0x235   :  { %v982_v47 = vpop.f32.mrf.mxu0 }
 0x236   :  { %v10476_v7 = vadd.f32 %v10447_v21, %v982_v47 }
 0x238   :  { %1055 = vrot.lane.b32.xlu0 %v10476_v7, %s10018_s21  ;;  %v10501_v43 = vpack.i.bf16 %v10463_v59, %v10476_v7 }
 0x239   :  { %2098 = vrot.lane.b32.xlu1 %v10463_v59, %s10016_s0 }
 0x23c   :  { %2100 = vrot.lane.b32.xlu2 %v10476_v7, %s10016_s0 }
 0x23d   :  { %v985_v48 = vpop.f32.mrf.mxu0 }
 0x23e   :  { %v10485_v14 = vadd.f32 %v10447_v21, %v985_v48  ;;  %v508_v6 = vpop.xlane.xlu0 %507 }
 0x23f   :  { %v542_v31 = vmul.f32 %v508_v6, %v10150_v23 }
 0x240   :  { %2140 = vrot.lane.b32.xlu0 %v10485_v14, %s10017_s1 }
 0x241   :  { %v566_v1 = vadd.f32 1e-05, %v542_v31  ;;  %2092 = vrot.lane.b32.xlu1 %v10463_v59, %s10017_s1 }
 0x243   :  { %9281 = vrsqrt.f32 %v566_v1  ;;  %vm758_vm13 = vweird.f32 %v566_v1 }
 0x244   :  { %1099 = vrot.lane.b32.xlu2 %v10485_v14, %s10018_s21 }
 0x245   :  { %v988_v53 = vpop.f32.mrf.mxu0 }
 0x246   :  { %v10495_v28 = vadd.f32 %v10447_v21, %v988_v53  ;;  %v517_v51 = vpop.xlane.xlu0 %516  ;;  %v511_v3 = vpop.xlane.xlu1 %510 }
 0x247   :  { %v545_v8 = vmul.f32 %v517_v51, %v10150_v23  ;;  %v543_v50 = vmul.f32 %v511_v3, %v10150_v23 }
 0x248   :  { %2142 = vrot.lane.b32.xlu0 %v10495_v28, %s10017_s1 }
 0x249   :  { %v9282_v16 = vpop.eup %9281  ;;  %v10505_v2 = vadd.f32 1e-05, %v545_v8  ;;  %v567_v40 = vadd.f32 1e-05, %v543_v50  ;;  %8989 = vrot.lane.b32.xlu1 %v10501_v43, %s10019_s22 }
 0x24a   :  { %v753_v33 = vmul.f32 %v9282_v16, %v566_v1  ;;  %vm759_vm12 = vweird.f32 %v9282_v16 }
 0x24b   :  { %9283 = vrsqrt.f32 %v10505_v2  ;;  %vm760_vm14 = vmor %vm758_vm13, %vm759_vm12  ;;  %vm768_vm0 = vweird.f32 %v567_v40  ;;  %vm788_vm7 = vweird.f32 %v10505_v2  ;;  %vm1057_vm12 = vcmask 130048  }
 0x24c   :  { %v754_v57 = vmul.f32 %v9282_v16, %v753_v33  ;;  %9285 = vrsqrt.f32 %v567_v40  ;;  %2148 = vrot.lane.b32.xlu2 %v10495_v28, %s10016_s0 }
 0x24d   :  { %v991_v22 = vpop.f32.mrf.mxu0 }
 0x24e   :  { %v755_v36 = vmul.f32 0.5, %v754_v57  ;;  %v10513_v35 = vadd.f32 %v10447_v21, %v991_v22  ;;  %v514_v25 = vpop.xlane.xlu2 %513 }
 0x24f   :  { %v544_v11 = vmul.f32 %v514_v25, %v10150_v23 }
 0x250   :  { %v756_v44 = vsub.f32 1.5, %v755_v36  ;;  %1103 = vrot.lane.b32.xlu0 %v10513_v35, %s10018_s21  ;;  %v10520_v10 = vpack.i.bf16 %v10513_v35, %v10452_v12 }
 0x251   :  { %v10522_v34 = vpop.eup %9283  ;;  %v568_v19 = vadd.f32 1e-05, %v544_v11  ;;  %2094 = vrot.lane.b32.xlu1 %v10476_v7, %s10017_s1 }
 0x252   :  { %v9286_v47 = vpop.eup %9285  ;;  %v757_v48 = vmul.f32 %v9282_v16, %v756_v44  ;;  %v783_v6 = vmul.f32 %v10522_v34, %v10505_v2  ;;  %vm789_vm5 = vweird.f32 %v10522_v34 }
 0x253   :  { %v763_v31 = vmul.f32 %v9286_v47, %v567_v40  ;;  %9287 = vrsqrt.f32 %v568_v19  ;;  %vm769_vm15 = vweird.f32 %v9286_v47  ;;  %vm778_vm4 = vweird.f32 %v568_v19  ;;  %vm790_vm8 = vmor %vm788_vm7, %vm789_vm5 }
 0x254   :  { %8994 = vrot.lane.b32.xlu2 %v10520_v10, %s10019_s22  ;;  %v761_v53 = vsel %vm760_vm14, %v9282_v16, %v757_v48  ;;  %v784_v50 = vmul.f32 %v10522_v34, %v783_v6  ;;  %vm770_vm2 = vmor %vm768_vm0, %vm769_vm15 }
 0x255   :  { %v764_v51 = vmul.f32 %v9286_v47, %v763_v31  ;;  %v994_v3 = vpop.f32.mrf.mxu0  ;;  %v830_v8 = vmul.f32 %v761_v53, %v10356_v38 }
 0x256   :  { %v785_v25 = vmul.f32 0.5, %v784_v50 }
 0x257   :  { %v765_v33 = vmul.f32 0.5, %v764_v51  ;;  %v855_v57 = vmul.f32 %v10326_v46, %v830_v8 }
 0x258   :  { %2150 = vrot.lane.b32.xlu0 %v10513_v35, %s10016_s0  ;;  %v786_v51 = vsub.f32 1.5, %v785_v25 }
 0x259   :  { %v9288_v1 = vpop.eup %9287  ;;  %v766_v22 = vsub.f32 1.5, %v765_v33  ;;  %2146 = vrot.lane.b32.xlu1 %v10485_v14, %s10016_s0  ;;  %v880_v16 = vadd.f32 %v10329_v60, %v855_v57 }
 0x25a   :  { %v773_v36 = vmul.f32 %v9288_v1, %v568_v19  ;;  %vm779_vm3 = vweird.f32 %v9288_v1 }
 0x25b   :  { %v767_v11 = vmul.f32 %v9286_v47, %v766_v22  ;;  %8597 = vmatmul.msk.f32.gmra.mxu1 %vm300_vm1, %v880_v16  ;;  %vm780_vm6 = vmor %vm778_vm4, %vm779_vm3  ;;  %v10557_v16 = vadd.f32 %v10447_v21, %v994_v3 }
 0x25c   :  { %v774_v38 = vmul.f32 %v9288_v1, %v773_v36 }
 0x25d   :  { %v997_v44 = vpop.f32.mrf.mxu0  ;;  %v771_v48 = vsel %vm770_vm2, %v9286_v47, %v767_v11  ;;  %vm1473_vm2 = vcmask 195584  }
 0x25e   :  { %v775_v6 = vmul.f32 0.5, %v774_v38  ;;  %v10540_v31 = vadd.f32 %v10447_v21, %v997_v44  ;;  %v831_v53 = vmul.f32 %v771_v48, %v10371_v17  ;;  %v787_v17 = vmul.f32 %v10522_v34, %v786_v51 }
 0x260   :  { %v776_v8 = vsub.f32 1.5, %v775_v6  ;;  %2144 = vrot.lane.b32.xlu0 %v10513_v35, %s10017_s1  ;;  %2198 = vrot.lane.b32.xlu2 %v10540_v31, %s10016_s0  ;;  %v856_v40 = vmul.f32 %v10326_v46, %v831_v53  ;;  %v791_v25 = vsel %vm790_vm8, %v10522_v34, %v787_v17 }
 0x261   :  { %1101 = vrot.lane.b32.xlu1 %v10495_v28, %s10018_s21  ;;  %v833_v2 = vmul.f32 %v791_v25, %v10364_v5 }
 0x262   :  { %v777_v47 = vmul.f32 %v9288_v1, %v776_v8  ;;  %v881_v50 = vadd.f32 %v10329_v60, %v856_v40 }
 0x263   :  { %v858_v3 = vmul.f32 %v10326_v46, %v833_v2 }
 0x264   :  { %8598 = vmatmul.msk.f32.gmra.mxu1 %vm300_vm1, %v881_v50  ;;  %v781_v33 = vsel %vm780_vm6, %v9288_v1, %v777_v47  ;;  %v8998_v1 = vpack.i.bf16 %v10485_v14, %v10540_v31 }
 0x265   :  { %v1000_v57 = vpop.f32.mrf.mxu0  ;;  %v832_v22 = vmul.f32 %v781_v33, %v10385_v29  ;;  %v883_v34 = vadd.f32 %v10329_v60, %v858_v3 }
 0x266   :  { %v10560_v19 = vadd.f32 %v10447_v21, %v1000_v57 }
 0x267   :  { %v857_v36 = vmul.f32 %v10326_v46, %v832_v22 }
 0x268   :  { %2196 = vrot.lane.b32.xlu0 %v10557_v16, %s10016_s0  ;;  %1150 = vrot.lane.b32.xlu2 %v10560_v19, %s10018_s21  ;;  %v9003_v5 = vpack.i.bf16 %v10495_v28, %v10560_v19 }
 0x269   :  { %1146 = vrot.lane.b32.xlu1 %v10557_v16, %s10018_s21  ;;  %v882_v29 = vadd.f32 %v10329_v60, %v857_v36 }
 0x26c   :  { %8599 = vmatmul.msk.f32.gmra.mxu1 %vm300_vm1, %v882_v29 }
 0x270   :  { %1148 = vrot.lane.b32.xlu0 %v10540_v31, %s10018_s21 }
 0x271   :  { %2190 = vrot.lane.b32.xlu1 %v10557_v16, %s10017_s1 }
 0x274   :  { %8600 = vmatmul.msk.f32.gmra.mxu1 %vm300_vm1, %v883_v34 }
 0x275   :  { %v1006_v11 = vpop.f32.mrf.mxu1 }
 0x276   :  { %v10595_v17 = vadd.f32 %v10447_v21, %v1006_v11 }
 0x278   :  { %2192 = vrot.lane.b32.xlu0 %v10540_v31, %s10017_s1 }
 0x279   :  { %8999 = vrot.lane.b32.xlu1 %v8998_v1, %s10019_s22 }
 0x27d   :  { %v1009_v6 = vpop.f32.mrf.mxu1 }
 0x280   :  { %9004 = vrot.lane.b32.xlu0 %v9003_v5, %s10019_s22 }
 0x285   :  { %v10599_v36 = vpop.f32.mrf.mxu1 }
 0x286   :  { %v520_v38 = vpop.xlane.xlu1 %519 }
 0x287   :  { %v546_v44 = vmul.f32 %v520_v38, %v10150_v23 }
 0x288   :  { %2200 = vrot.lane.b32.xlu0 %v10560_v19, %s10016_s0 }
 0x289   :  { %v570_v48 = vadd.f32 1e-05, %v546_v44 }
 0x28b   :  { %9289 = vrsqrt.f32 %v570_v48  ;;  %vm798_vm10 = vweird.f32 %v570_v48 }
 0x28f   :  { %v523_v53 = vpop.xlane.xlu2 %522 }
 0x290   :  { %v547_v51 = vmul.f32 %v523_v53, %v10150_v23  ;;  %2194 = vrot.lane.b32.xlu0 %v10560_v19, %s10017_s1 }
 0x291   :  { %v9290_v8 = vpop.eup %9289 }
 0x292   :  { %v793_v40 = vmul.f32 %v9290_v8, %v570_v48  ;;  %v571_v47 = vadd.f32 1e-05, %v547_v51  ;;  %vm799_vm9 = vweird.f32 %v9290_v8 }
 0x293   :  { %vm800_vm11 = vmor %vm798_vm10, %vm799_vm9 }
 0x294   :  { %v794_v50 = vmul.f32 %v9290_v8, %v793_v40  ;;  %9291 = vrsqrt.f32 %v571_v47  ;;  %v1015_v40 = vpop.f32.mrf.mxu1  ;;  %vm808_vm14 = vweird.f32 %v571_v47 }
 0x296   :  { %v795_v33 = vmul.f32 0.5, %v794_v50 }
 0x297   :  { %v1052_v57 = vpop.permute.xlu2 %1051 }
 0x298   :  { %v796_v22 = vsub.f32 1.5, %v795_v33  ;;  %2248 = vrot.lane.b32.xlu0 %v10595_v17, %s10016_s0 }
 0x29a   :  { %v9292_v25 = vpop.eup %9291  ;;  %v797_v29 = vmul.f32 %v9290_v8, %v796_v22  ;;  %v2097_v2 = vpop.permute.xlu0 %2096 }
 0x29b   :  { %v803_v3 = vmul.f32 %v9292_v25, %v571_v47  ;;  %vm809_vm13 = vweird.f32 %v9292_v25 }
 0x29c   :  { %v801_v34 = vsel %vm800_vm11, %v9290_v8, %v797_v29  ;;  %vm810_vm15 = vmor %vm808_vm14, %vm809_vm13 }
 0x29d   :  { %v804_v1 = vmul.f32 %v9292_v25, %v803_v3  ;;  %v834_v5 = vmul.f32 %v801_v34, %v10423_v13  ;;  %v9922_v34 = vld [vmem:[#allocation5 + $0x141] ss:$0 sm:$0xff] }
 0x29f   :  { %v805_v11 = vmul.f32 0.5, %v804_v1  ;;  %v2101_v38 = vpop.permute.xlu2 %2100  ;;  %v859_v44 = vmul.f32 %v10326_v46, %v834_v5  ;;  %v10609_v46 = vadd.f32 %v10447_v21, %v1009_v6 }
 0x2a0   :  { %8675 = vmatpush.xpose.msk.msrb.mxu1 %vm1057_vm12, %v2101_v38  ;;  %2242 = vrot.lane.b32.xlu0 %v10595_v17, %s10017_s1 }
 0x2a1   :  { %v806_v53 = vsub.f32 1.5, %v805_v11  ;;  %v884_v48 = vadd.f32 %v10329_v60, %v859_v44  ;;  %v9921_v60 = vld [vmem:[#allocation5 + $0x140] ss:$0 sm:$0xff] }
 0x2a2   :  { %v2091_v51 = vpop.permute.xlu0 %2090 }
 0x2a3   :  { %v807_v8 = vmul.f32 %v9292_v25, %v806_v53  ;;  %v1054_v50 = vpop.permute.xlu1 %1053  ;;  %8601 = vmatmul.msk.f32.gmra.mxu1 %vm300_vm1, %v884_v48  ;;  %v10641_v53 = vadd.f32 %v10447_v21, %v1015_v40 }
 0x2a5   :  { %v811_v13 = vsel %vm810_vm15, %v9292_v25, %v807_v8  ;;  %v1018_v25 = vpop.f32.mrf.mxu1 }
 0x2a6   :  { %v835_v33 = vmul.f32 %v811_v13, %v10437_v56  ;;  %v10621_v56 = vpack.i.bf16 %v10609_v46, %v10557_v16  ;;  %v10677_v13 = vadd.f32 %v10447_v21, %v10599_v36 }
 0x2a7   :  { %v10612_v22 = vpop.permute.xlu2 %1099 }
 0x2a8   :  { %1197 = vrot.lane.b32.xlu0 %v10609_v46, %s10018_s21  ;;  %v860_v29 = vmul.f32 %v9921_v60, %v835_v33 }
 0x2aa   :  { %v1056_v3 = vpop.permute.xlu0 %1055  ;;  %v885_v47 = vadd.f32 %v9922_v34, %v860_v29 }
 0x2ab   :  { %v2099_v1 = vpop.permute.xlu1 %2098  ;;  %8603 = vmatpush.xpose.msk.msra.mxu2 %vm1057_vm12, %v1056_v3 }
 0x2ac   :  { %8602 = vmatmul.msk.f32.gmra.mxu1 %vm300_vm1, %v885_v47 }
 0x2ad   :  { %8676 = vmatpush.xpose.msk.msrb.mxu1 %vm1057_vm12, %v2099_v1 }
 0x2ae   :  { %v1003_v6 = vpop.f32.mrf.mxu0 }
 0x2af   :  { %v10624_v5 = vadd.f32 %v10447_v21, %v1003_v6  ;;  %v10626_v11 = vpop.permute.xlu2 %2148  ;;  %8604 = vmatpush.xpose.msk.msra.mxu2 %vm1057_vm12, %v1054_v50  ;;  %v10708_v6 = vadd.f32 %v10447_v21, %v1018_v25 }
 0x2b0   :  { %9009 = vrot.lane.b32.xlu0 %v10621_v56, %s10019_s22 }
 0x2b1   :  { %8677 = vmatpush.xpose.msk.msrb.mxu1 %vm1057_vm12, %v2097_v2  ;;  %2240 = vrot.lane.b32.xlu1 %v10624_v5, %s10017_s1  ;;  %v1021_v2 = vpop.f32.mrf.mxu1  ;;  %v9013_v3 = vpack.i.bf16 %v10624_v5, %v10641_v53  ;;  %v9018_v25 = vpack.i.bf16 %v10595_v17, %v10708_v6 }
 0x2b2   :  { %1193 = vrot.lane.b32.xlu2 %v10624_v5, %s10018_s21  ;;  %v10636_v38 = vpop.permute.xlu0 %2140 }
 0x2b3   :  { %14870 = vst [vmem:[#allocation36_spill] sm:$0xff] %v10636_v38  ;;  %v2093_v44 = vpop.permute.xlu1 %2092  ;;  %8605 = vmatpush.xpose.msk.msra.mxu2 %vm1057_vm12, %v1052_v57 }
 0x2b4   :  { %8678 = vmatmul.msk.f32.vlgmr.msrb.gmra.mxu1 %vm1057_vm12, %v2091_v51 }
 0x2b6   :  { %8606 = vmatmul.msk.f32.vlgmr.msra.gmra.mxu2 %vm1057_vm12, %v10452_v12 }
 0x2b7   :  { %v10645_v48 = vpop.permute.xlu2 %8994 }
 0x2b8   :  { %1242 = vrot.lane.b32.xlu0 %v10641_v53, %s10018_s21 }
 0x2b9   :  { %1195 = vrot.lane.b32.xlu1 %v10595_v17, %s10018_s21  ;;  %v1024_v40 = vpop.f32.mrf.mxu1 }
 0x2ba   :  { %2246 = vrot.lane.b32.xlu2 %v10624_v5, %s10016_s0  ;;  %v10653_v57 = vpop.permute.xlu0 %2142 }
 0x2bb   :  { %14871 = vst [vmem:[#allocation37_spill] sm:$0xff] %v10653_v57  ;;  %v10655_v51 = vpop.permute.xlu1 %8989 }
 0x2bc   :  { %8679 = vmatmul.msk.f32.gmra.mxu1 %vm1057_vm12, %v2093_v44 }
 0x2be   :  { %8607 = vmatmul.msk.f32.gmra.mxu2 %vm1057_vm12, %v10463_v59  ;;  %v10671_v59 = vadd.f32 %v10447_v21, %v1021_v2 }
 0x2bf   :  { %v10660_v12 = vpop.permute.xlu2 %2198 }
 0x2c0   :  { %14872 = vst [vmem:[#allocation38_spill] sm:$0xff] %v10660_v12  ;;  %2298 = vrot.lane.b32.xlu0 %v10641_v53, %s10016_s0 }
 0x2c1   :  { %2244 = vrot.lane.b32.xlu1 %v10609_v46, %s10017_s1  ;;  %14873 = vst [vmem:[#allocation39_spill] sm:$0xff] %v10671_v59  ;;  %v1027_v29 = vpop.f32.mrf.mxu1 }
 0x2c2   :  { %2250 = vrot.lane.b32.xlu2 %v10609_v46, %s10016_s0  ;;  %v1104_v8 = vpop.permute.xlu0 %1103  ;;  %v10691_v36 = vadd.f32 %v10447_v21, %v1027_v29 }
 0x2c3   :  { %v2095_v50 = vpop.permute.xlu1 %2094  ;;  %8609 = vmatpush.xpose.msk.msra.mxu3 %vm1057_vm12, %v1104_v8  ;;  %v10733_v8 = vadd.f32 %v10447_v21, %v1024_v40 }
 0x2c4   :  { %8680 = vmatmul.msk.f32.gmra.mxu1 %vm1057_vm12, %v2095_v50  ;;  %v10705_v1 = vpack.i.bf16 %v10691_v36, %v10677_v13 }
 0x2c5   :  { %14878 = vst [vmem:[#allocation44_spill] sm:$0xff] %v10733_v8 }
 0x2c6   :  { %8608 = vmatmul.msk.f32.gmra.mxu2 %vm1057_vm12, %v10476_v7  ;;  %14876 = vst [vmem:[#allocation42_spill] sm:$0xff] %v10705_v1 }
 0x2c7   :  { %v1151_v33 = vpop.permute.xlu2 %1150 }
 0x2c8   :  { %8615 = vmatpush.xpose.msk.msrb.mxu2 %vm1057_vm12, %v1151_v33  ;;  %2346 = vrot.lane.b32.xlu0 %v10671_v59, %s10016_s0 }
 0x2c9   :  { %1240 = vrot.lane.b32.xlu1 %v10677_v13, %s10018_s21 }
 0x2ca   :  { %2296 = vrot.lane.b32.xlu2 %v10677_v13, %s10016_s0  ;;  %v10686_v60 = vpop.permute.xlu0 %2150 }
 0x2cb   :  { %v10688_v7 = vpop.permute.xlu1 %2146 }
 0x2cc   :  { %14874 = vst [vmem:[#allocation40_spill] sm:$0xff] %v10688_v7 }
 0x2d0   :  { %1291 = vrot.lane.b32.xlu0 %v10691_v36, %s10018_s21 }
 0x2d1   :  { %2290 = vrot.lane.b32.xlu1 %v10677_v13, %s10017_s1 }
 0x2d2   :  { %9014 = vrot.lane.b32.xlu2 %v9013_v3, %s10019_s22  ;;  %v10700_v34 = vpop.permute.xlu0 %2144 }
 0x2d3   :  { %14875 = vst [vmem:[#allocation41_spill] sm:$0xff] %v10700_v34  ;;  %v1102_v47 = vpop.permute.xlu1 %1101 }
 0x2d4   :  { %8610 = vmatpush.xpose.msk.msra.mxu3 %vm1057_vm12, %v1102_v47 }
 0x2d8   :  { %8611 = vmatpush.xpose.msk.msra.mxu3 %vm1057_vm12, %v10612_v22  ;;  %9024 = vrot.lane.b32.xlu0 %v10705_v1, %s10019_s22  ;;  %v1030_v22 = vpop.f32.mrf.mxu1 }
 0x2d9   :  { %2292 = vrot.lane.b32.xlu1 %v10641_v53, %s10017_s1  ;;  %v10752_v3 = vadd.f32 %v10447_v21, %v1030_v22 }
 0x2da   :  { %1244 = vrot.lane.b32.xlu2 %v10708_v6, %s10018_s21  ;;  %v10718_v44 = vpop.permute.xlu0 %2196 }
 0x2db   :  { %14877 = vst [vmem:[#allocation43_spill] sm:$0xff] %v10718_v44  ;;  %8612 = vmatmul.msk.f32.vlgmr.msra.gmra.mxu3 %vm1057_vm12, %v10485_v14  ;;  %v1147_v50 = vpop.permute.xlu1 %1146 }
 0x2e0   :  { %2350 = vrot.lane.b32.xlu0 %v10691_v36, %s10016_s0 }
 0x2e1   :  { %9019 = vrot.lane.b32.xlu1 %v9018_v25, %s10019_s22  ;;  %v1033_v29 = vpop.f32.mrf.mxu1 }
 0x2e2   :  { %2300 = vrot.lane.b32.xlu2 %v10708_v6, %s10016_s0  ;;  %v1149_v2 = vpop.permute.xlu0 %1148  ;;  %v10749_v40 = vadd.f32 %v10447_v21, %v1033_v29 }
 0x2e3   :  { %8613 = vmatmul.msk.f32.gmra.mxu3 %vm1057_vm12, %v10495_v28  ;;  %8616 = vmatpush.xpose.msk.msrb.mxu2 %vm1057_vm12, %v1149_v2 }
 0x2e4   :  { %v9028_v25 = vpack.i.bf16 %v10671_v59, %v10749_v40 }
 0x2e7   :  { %8617 = vmatpush.xpose.msk.msrb.mxu2 %vm1057_vm12, %v1147_v50 }
 0x2e8   :  { %2342 = vrot.lane.b32.xlu0 %v10733_v8, %s10017_s1 }
 0x2e9   :  { %1289 = vrot.lane.b32.xlu1 %v10733_v8, %s10018_s21 }
 0x2ea   :  { %1287 = vrot.lane.b32.xlu2 %v10671_v59, %s10018_s21  ;;  %v10742_v33 = vpop.permute.xlu0 %2192  ;;  %8618 = vmatmul.msk.f32.vlgmr.msrb.gmra.mxu2 %vm1057_vm12, %v10557_v16 }
 0x2eb   :  { %14879 = vst [vmem:[#allocation45_spill] sm:$0xff] %v10742_v33  ;;  %8614 = vmatmul.msk.f32.gmra.mxu3 %vm1057_vm12, %v10513_v35  ;;  %v1036_v35 = vpop.f32.mrf.mxu1 }
 0x2ec   :  { %v10777_v22 = vadd.f32 %v10447_v21, %v1036_v35 }
 0x2ee   :  { %v9033_v62 = vpack.i.bf16 %v10733_v8, %v10777_v22 }
 0x2f0   :  { %1336 = vrot.lane.b32.xlu0 %v10749_v40, %s10018_s21 }
 0x2f1   :  { %1334 = vrot.lane.b32.xlu1 %v10752_v3, %s10018_s21 }
 0x2f2   :  { %2340 = vrot.lane.b32.xlu2 %v10671_v59, %s10017_s1  ;;  %v10760_v16 = vpop.permute.xlu0 %9004  ;;  %8619 = vmatmul.msk.f32.gmra.mxu2 %vm1057_vm12, %v10540_v31 }
 0x2f3   :  { %v1039_v50 = vpop.f32.mrf.mxu1 }
 0x2f4   :  { %v10787_v29 = vadd.f32 %v10447_v21, %v1039_v50 }
 0x2f8   :  { %2398 = vrot.lane.b32.xlu0 %v10749_v40, %s10016_s0 }
 0x2f9   :  { %2294 = vrot.lane.b32.xlu1 %v10708_v6, %s10017_s1 }
 0x2fa   :  { %2348 = vrot.lane.b32.xlu2 %v10733_v8, %s10016_s0  ;;  %v10770_v47 = vpop.permute.xlu0 %2200  ;;  %8620 = vmatmul.msk.f32.gmra.mxu2 %vm1057_vm12, %v10560_v19 }
 0x2fb   :  { %14880 = vst [vmem:[#allocation46_spill] sm:$0xff] %v10770_v47 }
 0x300   :  { %2392 = vrot.lane.b32.xlu0 %v10749_v40, %s10017_s1 }
 0x301   :  { %9029 = vrot.lane.b32.xlu1 %v9028_v25, %s10019_s22  ;;  %v10794_v25 = vpop.permute.xlu1 %2190 }
 0x302   :  { %1338 = vrot.lane.b32.xlu2 %v10777_v22, %s10018_s21  ;;  %v10784_v2 = vpop.permute.xlu0 %2194  ;;  %14882 = vst [vmem:[#allocation48_spill] sm:$0xff] %v10794_v25 }
 0x303   :  { %14881 = vst [vmem:[#allocation47_spill] sm:$0xff] %v10784_v2 }
 0x309   :  { %1381 = vrot.lane.b32.xlu1 %v10787_v29, %s10018_s21 }
 0x30a   :  { %9034 = vrot.lane.b32.xlu2 %v9033_v62, %s10019_s22  ;;  %v2249_v35 = vpop.permute.xlu0 %2248  ;;  %v10804_v62 = vpop.permute.xlu1 %8999 }
 0x30c   :  { %v1194_v18 = vpop.permute.xlu2 %1193 }
 0x311   :  { %2344 = vrot.lane.b32.xlu1 %v10691_v36, %s10017_s1 }
 0x312   :  { %2400 = vrot.lane.b32.xlu2 %v10777_v22, %s10016_s0  ;;  %v2243_v50 = vpop.permute.xlu0 %2242 }
 0x314   :  { %v2247_v26 = vpop.permute.xlu2 %2246 }
 0x319   :  { %2390 = vrot.lane.b32.xlu1 %v10752_v3, %s10017_s1 }
 0x31a   :  { %2396 = vrot.lane.b32.xlu2 %v10752_v3, %s10016_s0  ;;  %v1198_v63 = vpop.permute.xlu0 %1197 }
 0x31b   :  { %8621 = vmatpush.xpose.msk.msrb.mxu3 %vm1057_vm12, %v1198_v63 }
 0x31c   :  { %v2251_v24 = vpop.permute.xlu2 %2250 }
 0x31d   :  { %8693 = vmatpush.xpose.msk.msra.mxu0 %vm1057_vm12, %v2251_v24 }
 0x320   :  { %v1042_v39 = vpop.f32.mrf.mxu1 }
 0x321   :  { %8694 = vmatpush.xpose.msk.msra.mxu0 %vm1057_vm12, %v2249_v35  ;;  %9039 = vrot.lane.b32.xlu1 %v10501_v43, %s10020_s23  ;;  %v10812_v42 = vadd.f32 %v10447_v21, %v1042_v39 }
 0x322   :  { %2394 = vrot.lane.b32.xlu2 %v10777_v22, %s10017_s1  ;;  %v10816_v54 = vpop.permute.xlu0 %9009 }
 0x323   :  { %v2241_v30 = vpop.permute.xlu1 %2240  ;;  %2448 = vrot.lane.b32.xlu0 %v10812_v42, %s10016_s0 }
 0x324   :  { %v2297_v24 = vpop.permute.xlu2 %2296 }
 0x325   :  { %8695 = vmatpush.xpose.msk.msra.mxu0 %vm1057_vm12, %v2247_v26 }
 0x328   :  { %8696 = vmatmul.msk.f32.vlgmr.msra.gmra.mxu0 %vm1057_vm12, %v2241_v30 }
 0x329   :  { %2440 = vrot.lane.b32.xlu1 %v10787_v29, %s10017_s1  ;;  %v1045_v63 = vpop.f32.mrf.mxu1 }
 0x32a   :  { %2446 = vrot.lane.b32.xlu2 %v10787_v29, %s10016_s0  ;;  %v10827_v39 = vadd.f32 %v10447_v21, %v1045_v63  ;;  %v1243_v43 = vpop.permute.xlu0 %1242 }
 0x32b   :  { %v1196_v35 = vpop.permute.xlu1 %1195 }
 0x32c   :  { %v10829_v58 = vpop.permute.xlu2 %9014  ;;  %1385 = vrot.lane.b32.xlu0 %v10827_v39, %s10018_s21  ;;  %8622 = vmatpush.xpose.msk.msrb.mxu3 %vm1057_vm12, %v1196_v35  ;;  %v10842_v26 = vpack.i.bf16 %v10827_v39, %v10752_v3 }
 0x32e   :  { %14883 = vst [vmem:[#allocation49_spill] sm:$0xff] %v10842_v26 }
 0x330   :  { %8697 = vmatmul.msk.f32.gmra.mxu0 %vm1057_vm12, %v2243_v50  ;;  %8623 = vmatpush.xpose.msk.msrb.mxu3 %vm1057_vm12, %v1194_v18  ;;  %v10852_v18 = vpack.i.bf16 %v10787_v29, %v10812_v42 }
 0x331   :  { %2450 = vrot.lane.b32.xlu1 %v10827_v39, %s10016_s0 }
 0x332   :  { %1383 = vrot.lane.b32.xlu2 %v10812_v42, %s10018_s21  ;;  %v2299_v30 = vpop.permute.xlu0 %2298  ;;  %14884 = vst [vmem:[#allocation50_spill] sm:$0xff] %v10852_v18 }
 0x333   :  { %8624 = vmatmul.msk.f32.vlgmr.msrb.gmra.mxu3 %vm1057_vm12, %v10624_v5  ;;  %v2245_v21 = vpop.permute.xlu1 %2244 }
 0x334   :  { %v1245_v63 = vpop.permute.xlu2 %1244  ;;  %9049 = vrot.lane.b32.xlu0 %v10842_v26, %s10019_s22 }
 0x335   :  { %8627 = vmatpush.xpose.msk.msra.mxu2 %vm1057_vm12, %v1245_v63 }
 0x338   :  { %8698 = vmatmul.msk.f32.gmra.mxu0 %vm1057_vm12, %v2245_v21 }
 0x339   :  { %8628 = vmatpush.xpose.msk.msra.mxu2 %vm1057_vm12, %v1243_v43  ;;  %v1087_v21 = vpop.f32.mrf.mxu2 }
 0x33a   :  { %9044 = vrot.lane.b32.xlu2 %v10852_v18, %s10019_s22  ;;  %v10857_v50 = vpop.permute.xlu0 %2346 }
 0x33b   :  { %14885 = vst [vmem:[#allocation51_spill] sm:$0xff] %v10857_v50  ;;  %8625 = vmatmul.msk.f32.gmra.mxu3 %vm1057_vm12, %v10595_v17  ;;  %v1241_v35 = vpop.permute.xlu1 %1240 }
 0x33c   :  { %v2301_v15 = vpop.permute.xlu2 %2300 }
 0x33d   :  { %8629 = vmatpush.xpose.msk.msra.mxu2 %vm1057_vm12, %v1241_v35  ;;  %8699 = vmatpush.xpose.msk.msra.mxu1 %vm1057_vm12, %v2301_v15  ;;  %v2131_v35 = vpop.f32.mrf.mxu1 }
 0x33e   :  { %v2490_v49 = vmul.f32 0.25, %v2131_v35 }
 0x340   :  { %8630 = vmatmul.msk.f32.vlgmr.msra.gmra.mxu2 %vm1057_vm12, %v10677_v13  ;;  %v265_v13 = vlaneseq }
 0x341   :  { %8700 = vmatpush.xpose.msk.msra.mxu1 %vm1057_vm12, %v2299_v30  ;;  %v1090_v55 = vpop.f32.mrf.mxu2 }
 0x342   :  { %2442 = vrot.lane.b32.xlu2 %v10812_v42, %s10017_s1  ;;  %v1292_v43 = vpop.permute.xlu0 %1291  ;;  %v266_v20 = vand.u32 127, %v265_v13 }
 0x343   :  { %8626 = vmatmul.msk.f32.gmra.mxu3 %vm1057_vm12, %v10609_v46  ;;  %v2291_v63 = vpop.permute.xlu1 %2290 }
 0x344   :  { %v1288_v41 = vpop.permute.xlu2 %1287  ;;  %8633 = vmatpush.xpose.msk.msra.mxu3 %vm1057_vm12, %v1292_v43  ;;  %vm267_vm0 = vcmp.lt.s32.totalorder %v266_v20, 17 }
 0x345   :  { %8701 = vmatpush.xpose.msk.msra.mxu1 %vm1057_vm12, %v2297_v24  ;;  %v2134_v43 = vpop.f32.mrf.mxu1  ;;  %v10890_v4 = vsel %vm267_vm0, 0.0, %v10021_v9  ;;  %v1425_v9 = vmul.f32 0.25, %v1087_v21 }
 0x346   :  { %v2491_v24 = vmul.f32 0.25, %v2134_v43  ;;  %14889 = vst [vmem:[#allocation55_spill] sm:$0xff] %v10890_v4  ;;  %v10896_v0 = vadd.f32 %v2490_v49, %v10890_v4 }
 0x347   :  { %v10911_v27 = vadd.f32 %v1425_v9, %v10890_v4  ;;  %v8991_v9 = vunpack.i.l.bf16 %v10655_v51 }
 0x348   :  { %8631 = vmatmul.msk.f32.gmra.mxu2 %vm1057_vm12, %v10641_v53  ;;  %8702 = vmatmul.msk.f32.vlgmr.msra.gmra.mxu1 %vm1057_vm12, %v2291_v63  ;;  %v10893_v13 = vadd.f32 %v2491_v24, %v10890_v4  ;;  %v2538_v24 = vsel %vm1473_vm2, %v10896_v0, -inf }
 0x349   :  { %v1093_v61 = vpop.f32.mrf.mxu2 }
 0x34a   :  { %2444 = vrot.lane.b32.xlu2 %v10827_v39, %s10017_s1  ;;  %v10877_v15 = vpop.permute.xlu0 %9024  ;;  %v2541_v20 = vsel %vm1473_vm2, %v10893_v13, -inf }
 0x34b   :  { %v2293_v30 = vpop.permute.xlu1 %2292 }
 0x34c   :  { %v10879_v46 = vpop.permute.xlu2 %2340 }
 0x34d   :  { %14886 = vst [vmem:[#allocation52_spill] sm:$0xff] %v10879_v46  ;;  %v2137_v32 = vpop.f32.mrf.mxu1 }
 0x350   :  { %8632 = vmatmul.msk.f32.gmra.mxu2 %vm1057_vm12, %v10708_v6  ;;  %8703 = vmatmul.msk.f32.gmra.mxu1 %vm1057_vm12, %v2293_v30  ;;  %v1427_v30 = vmul.f32 0.25, %v1093_v61 }
 0x352   :  { %v10884_v52 = vpop.permute.xlu0 %2350  ;;  %v10907_v61 = vadd.f32 %v1427_v30, %v10890_v4  ;;  %v1474_v30 = vsel %vm1473_vm2, %v10911_v27, -inf }
 0x353   :  { %14887 = vst [vmem:[#allocation53_spill] sm:$0xff] %v10884_v52  ;;  %v10886_v63 = vpop.permute.xlu1 %9019 }
 0x354   :  { %v10888_v45 = vpop.permute.xlu2 %2348 }
 0x355   :  { %14888 = vst [vmem:[#allocation54_spill] sm:$0xff] %v10888_v45 }
 0x35a   :  { %v10898_v43 = vpop.permute.xlu0 %2342 }
 0x35b   :  { %14890 = vst [vmem:[#allocation56_spill] sm:$0xff] %v10898_v43  ;;  %2542 = vmax.xlane.f32.xlu1 %v2541_v20  ;;  %v1290_v23 = vpop.permute.xlu1 %1289 }
 0x35c   :  { %v1339_v35 = vpop.permute.xlu2 %1338  ;;  %8634 = vmatpush.xpose.msk.msra.mxu3 %vm1057_vm12, %v1290_v23  ;;  %v1480_v23 = vsel %vm1473_vm2, %v10907_v61, -inf }
 0x35d   :  { %8639 = vmatpush.xpose.msk.msrb.mxu2 %vm1057_vm12, %v1339_v35 }
 0x35e   :  { %2539 = vmax.xlane.f32.xlu0 %v2538_v24  ;;  %v1134_v49 = vpop.f32.mrf.mxu3 }
 0x35f   :  { %v1428_v35 = vmul.f32 0.25, %v1134_v49  ;;  %v1426_v49 = vmul.f32 0.25, %v1090_v55 }
 0x360   :  { %8635 = vmatpush.xpose.msk.msra.mxu3 %vm1057_vm12, %v1288_v41 }
 0x361   :  { %v10926_v37 = vadd.f32 %v1428_v35, %v10890_v4  ;;  %v9006_v35 = vunpack.i.l.bf16 %v10760_v16 }
 0x362   :  { %v1337_v20 = vpop.permute.xlu0 %1336 }
 0x363   :  { %1481 = vmax.xlane.f32.xlu1 %v1480_v23  ;;  %8636 = vmatmul.msk.f32.vlgmr.msra.gmra.mxu3 %vm1057_vm12, %v10671_v59  ;;  %v1335_v21 = vpop.permute.xlu1 %1334  ;;  %v1483_v55 = vsel %vm1473_vm2, %v10926_v37, -inf }
 0x364   :  { %8640 = vmatpush.xpose.msk.msrb.mxu2 %vm1057_vm12, %v1337_v20  ;;  %v8992_v20 = vunpack.i.h.bf16 %v10655_v51 }
 0x366   :  { %1475 = vmax.xlane.f32.xlu0 %v1474_v30  ;;  %v1137_v41 = vpop.f32.mrf.mxu3 }
 0x367   :  { %v1429_v24 = vmul.f32 0.25, %v1137_v41  ;;  %v8996_v41 = vunpack.i.l.bf16 %v10645_v48 }
 0x368   :  { %8641 = vmatpush.xpose.msk.msrb.mxu2 %vm1057_vm12, %v1335_v21 }
 0x369   :  { %v10923_v23 = vadd.f32 %v1429_v24, %v10890_v4  ;;  %v9001_v24 = vunpack.i.l.bf16 %v10804_v62 }
 0x36b   :  { %8637 = vmatmul.msk.f32.gmra.mxu3 %vm1057_vm12, %v10733_v8  ;;  %8642 = vmatmul.msk.f32.vlgmr.msrb.gmra.mxu2 %vm1057_vm12, %v10752_v3  ;;  %v2295_v30 = vpop.permute.xlu1 %2294  ;;  %v1486_v21 = vsel %vm1473_vm2, %v10923_v23, -inf  ;;  %v10943_v3 = vadd.f32 %v1426_v49, %v10890_v4 }
 0x36c   :  { %1769 = vmatpush.msra.mxu2 %v8991_v9  ;;  %1487 = vmax.xlane.f32.xlu1 %v1486_v21  ;;  %v10940_v9 = vpop.permute.xlu2 %9034  ;;  %v2492_v21 = vmul.f32 0.25, %v2137_v32 }
 0x36d   :  { %8704 = vmatmul.msk.f32.gmra.mxu1 %vm1057_vm12, %v2295_v30  ;;  %v1181_v51 = vpop.f32.mrf.mxu2  ;;  %v1477_v30 = vsel %vm1473_vm2, %v10943_v3, -inf }
 0x36e   :  { %1770 = vmatpush.msra.mxu2 %v8992_v20  ;;  %1484 = vmax.xlane.f32.xlu0 %v1483_v55  ;;  %v9011_v20 = vunpack.i.l.bf16 %v10816_v54  ;;  %v1140_v55 = vpop.f32.mrf.mxu3 }
 0x370   :  { %1771 = vmatpush.msra.mxu2 %v8996_v41 }
 0x372   :  { %1857 = vmatpush.msrb.mxu2 %v9006_v35  ;;  %v10956_v35 = vadd.f32 %v2492_v21, %v10890_v4 }
 0x373   :  { %1478 = vmax.xlane.f32.xlu2 %v1477_v30  ;;  %v10949_v18 = vpop.permute.xlu1 %9029  ;;  %8638 = vmatmul.msk.f32.gmra.mxu3 %vm1057_vm12, %v10691_v36 }
 0x374   :  { %1858 = vmatpush.msrb.mxu2 %v9001_v24  ;;  %v10958_v32 = vpop.permute.xlu2 %2400  ;;  %v2544_v30 = vsel %vm1473_vm2, %v10956_v35, -inf }
 0x375   :  { %8643 = vmatmul.msk.f32.gmra.mxu2 %vm1057_vm12, %v10749_v40  ;;  %v1184_v49 = vpop.f32.mrf.mxu2  ;;  %14891 = vst [vmem:[#allocation57_spill] sm:$0xff] %v10958_v32 }
 0x376   :  { %1859 = vmatpush.msrb.mxu2 %v9011_v20  ;;  %v1432_v41 = vmul.f32 0.25, %v1184_v49  ;;  %v1430_v20 = vmul.f32 0.25, %v1140_v55  ;;  %v1431_v55 = vmul.f32 0.25, %v1181_v51 }
 0x378   :  { %v10961_v24 = vadd.f32 %v1432_v41, %v10890_v4  ;;  %v10970_v33 = vadd.f32 %v1430_v20, %v10890_v4  ;;  %v10986_v20 = vadd.f32 %v1431_v55, %v10890_v4 }
 0x37a   :  { %v1495_v36 = vsel %vm1473_vm2, %v10961_v24, -inf  ;;  %v1489_v43 = vsel %vm1473_vm2, %v10970_v33, -inf  ;;  %v1492_v51 = vsel %vm1473_vm2, %v10986_v20, -inf }
 0x37b   :  { %2545 = vmax.xlane.f32.xlu2 %v2544_v30  ;;  %v1382_v2 = vpop.permute.xlu1 %1381  ;;  %1496 = vmax.xlane.f32.xlu0 %v1495_v36  ;;  %v10981_v36 = vpop.permute.xlu0 %2398 }
 0x37c   :  { %v10975_v25 = vpop.permute.xlu2 %2396  ;;  %14893 = vst [vmem:[#allocation59_spill] sm:$0xff] %v10981_v36 }
 0x37d   :  { %8644 = vmatmul.msk.f32.gmra.mxu2 %vm1057_vm12, %v10777_v22  ;;  %v1187_v21 = vpop.f32.mrf.mxu2  ;;  %14892 = vst [vmem:[#allocation58_spill] sm:$0xff] %v10975_v25 }
 0x37e   :  { %v1433_v49 = vmul.f32 0.25, %v1187_v21 }
 0x380   :  { %v10973_v41 = vadd.f32 %v1433_v49, %v10890_v4 }
 0x382   :  { %v1498_v30 = vsel %vm1473_vm2, %v10973_v41, -inf }
 0x383   :  { %1490 = vmax.xlane.f32.xlu2 %v1489_v43  ;;  %v10983_v59 = vpop.permute.xlu1 %2344  ;;  %1499 = vmax.xlane.f32.xlu1 %v1498_v30  ;;  %v10994_v8 = vpop.permute.xlu0 %2392 }
 0x384   :  { %14894 = vst [vmem:[#allocation60_spill] sm:$0xff] %v10983_v59  ;;  %v10992_v49 = vpop.permute.xlu2 %2394 }
 0x385   :  { %14896 = vst [vmem:[#allocation62_spill] sm:$0xff] %v10992_v49  ;;  %v8997_v49 = vunpack.i.h.bf16 %v10645_v48  ;;  %v9022_v48 = vunpack.i.h.bf16 %v10886_v63 }
 0x386   :  { %14897 = vst [vmem:[#allocation63_spill] sm:$0xff] %v10994_v8 }
 0x38b   :  { %1493 = vmax.xlane.f32.xlu2 %v1492_v51  ;;  %v10990_v21 = vpop.permute.xlu1 %2390 }
 0x38c   :  { %14895 = vst [vmem:[#allocation61_spill] sm:$0xff] %v10990_v21  ;;  %v2447_v43 = vpop.permute.xlu2 %2446 }
 0x393   :  { %v9040_v46 = vpop.permute.xlu1 %9039 }
 0x394   :  { %v9041_v1 = vunpack.i.l.bf16 %v9040_v46  ;;  %v9042_v26 = vunpack.i.h.bf16 %v9040_v46  ;;  %v1384_v59 = vpop.permute.xlu2 %1383  ;;  %v9002_v46 = vunpack.i.h.bf16 %v10804_v62 }
 0x395   :  { %v2449_v34 = vpop.permute.xlu0 %2448 }
 0x396   :  { %2833 = vmatpush.msrb.mxu1 %v9041_v1  ;;  %v9007_v1 = vunpack.i.h.bf16 %v10760_v16 }
 0x398   :  { %2834 = vmatpush.msrb.mxu1 %v9042_v26 }
 0x39b   :  { %v2441_v30 = vpop.permute.xlu1 %2440 }
 0x39c   :  { %v11003_v26 = vpop.permute.xlu2 %9044 }
 0x39e   :  { %v1386_v55 = vpop.permute.xlu0 %1385 }
 0x39f   :  { %8645 = vmatpush.xpose.msk.msrb.mxu3 %vm1057_vm12, %v1386_v55 }
 0x3a3   :  { %8646 = vmatpush.xpose.msk.msrb.mxu3 %vm1057_vm12, %v1384_v59  ;;  %v2451_v51 = vpop.permute.xlu1 %2450  ;;  %v9012_v59 = vunpack.i.h.bf16 %v10816_v54 }
 0x3a4   :  { %8717 = vmatpush.xpose.msk.msrb.mxu0 %vm1057_vm12, %v2451_v51  ;;  %v2443_v16 = vpop.permute.xlu2 %2442 }
 0x3a7   :  { %8647 = vmatpush.xpose.msk.msrb.mxu3 %vm1057_vm12, %v1382_v2 }
 0x3a8   :  { %8718 = vmatpush.xpose.msk.msrb.mxu0 %vm1057_vm12, %v2449_v34  ;;  %v9017_v34 = vunpack.i.h.bf16 %v10829_v58 }
 0x3aa   :  { %8648 = vmatmul.msk.f32.vlgmr.msrb.gmra.mxu3 %vm1057_vm12, %v10787_v29 }
 0x3ab   :  { %1813 = vmatpush.msra.mxu3 %v8997_v49 }
 0x3ac   :  { %8719 = vmatpush.xpose.msk.msrb.mxu0 %vm1057_vm12, %v2447_v43  ;;  %v2445_v49 = vpop.permute.xlu2 %2444 }
 0x3ad   :  { %1814 = vmatpush.msra.mxu3 %v9007_v1 }
 0x3af   :  { %1815 = vmatpush.msra.mxu3 %v9002_v46  ;;  %8720 = vmatmul.msk.f32.vlgmr.msrb.gmra.mxu0 %vm1057_vm12, %v2441_v30 }
 0x3b1   :  { %1901 = vmatpush.msrb.mxu3 %v9012_v59 }
 0x3b2   :  { %8649 = vmatmul.msk.f32.gmra.mxu3 %vm1057_vm12, %v10812_v42 }
 0x3b3   :  { %1902 = vmatpush.msrb.mxu3 %v9022_v48 }
 0x3b5   :  { %1903 = vmatpush.msrb.mxu3 %v9017_v34  ;;  %v11034_v34 = vpop.permute.xlu0 %9049 }
 0x3b6   :  { %v1228_v2 = vpop.f32.mrf.mxu3 }
 0x3b7   :  { %v1434_v29 = vmul.f32 0.25, %v1228_v2  ;;  %8721 = vmatmul.msk.f32.gmra.mxu0 %vm1057_vm12, %v2443_v16 }
 0x3b9   :  { %v11017_v54 = vadd.f32 %v1434_v29, %v10890_v4 }
 0x3ba   :  { %8650 = vmatmul.msk.f32.gmra.mxu3 %vm1057_vm12, %v10827_v39 }
 0x3bb   :  { %v1501_v62 = vsel %vm1473_vm2, %v11017_v54, -inf }
 0x3bc   :  { %1502 = vmax.xlane.f32.xlu0 %v1501_v62 }
 0x3be   :  { %v1231_v43 = vpop.f32.mrf.mxu3 }
 0x3bf   :  { %v1435_v30 = vmul.f32 0.25, %v1231_v43  ;;  %8722 = vmatmul.msk.f32.gmra.mxu0 %vm1057_vm12, %v2445_v49 }
 0x3c1   :  { %v11025_v42 = vadd.f32 %v1435_v30, %v10890_v4 }
 0x3c3   :  { %v1275_v55 = vpop.f32.mrf.mxu2  ;;  %v1504_v51 = vsel %vm1473_vm2, %v11025_v42, -inf }
 0x3c4   :  { %v1437_v1 = vmul.f32 0.25, %v1275_v55  ;;  %1505 = vmax.xlane.f32.xlu0 %v1504_v51 }
 0x3c6   :  { %v1234_v46 = vpop.f32.mrf.mxu3  ;;  %v11030_v39 = vadd.f32 %v1437_v1, %v10890_v4 }
 0x3c7   :  { %v1436_v59 = vmul.f32 0.25, %v1234_v46 }
 0x3c8   :  { %v1510_v48 = vsel %vm1473_vm2, %v11030_v39, -inf }
 0x3c9   :  { %1511 = vmax.xlane.f32.xlu2 %v1510_v48  ;;  %v11037_v16 = vadd.f32 %v1436_v59, %v10890_v4 }
 0x3cb   :  { %v1278_v2 = vpop.f32.mrf.mxu2  ;;  %v1507_v29 = vsel %vm1473_vm2, %v11037_v16, -inf }
 0x3cc   :  { %v1438_v62 = vmul.f32 0.25, %v1278_v2  ;;  %1508 = vmax.xlane.f32.xlu0 %v1507_v29 }
 0x3ce   :  { %v11042_v49 = vadd.f32 %v1438_v62, %v10890_v4  ;;  %v2543_v43 = vpop.xlane.xlu1 %2542 }
 0x3cf   :  { %v2611_v46 = vsub.f32 %v10893_v13, %v2543_v43 }
 0x3d0   :  { %v1513_v30 = vsel %vm1473_vm2, %v11042_v49, -inf }
 0x3d1   :  { %1514 = vmax.xlane.f32.xlu2 %v1513_v30  ;;  %v2540_v55 = vpop.xlane.xlu0 %2539  ;;  %v2636_v29 = vmul.f32 1.442695, %v2611_v46 }
 0x3d2   :  { %v2610_v51 = vsub.f32 %v10896_v0, %v2540_v55 }
 0x3d3   :  { %v1281_v1 = vpop.f32.mrf.mxu2 }
 0x3d4   :  { %v2634_v59 = vmul.f32 1.442695, %v2610_v51  ;;  %v1439_v48 = vmul.f32 0.25, %v1281_v1 }
 0x3d6   :  { %9293 = vpow2.f32 %v2634_v59  ;;  %v11049_v2 = vadd.f32 %v1439_v48, %v10890_v4  ;;  %v1482_v8 = vpop.xlane.xlu1 %1481 }
 0x3d7   :  { %9295 = vpow2.f32 %v2636_v29  ;;  %v1548_v0 = vsub.f32 %v10907_v61, %v1482_v8 }
 0x3d8   :  { %v1516_v62 = vsel %vm1473_vm2, %v11049_v2, -inf }
 0x3d9   :  { %1517 = vmax.xlane.f32.xlu0 %v1516_v62  ;;  %v1476_v21 = vpop.xlane.xlu0 %1475  ;;  %v1574_v55 = vmul.f32 1.442695, %v1548_v0 }
 0x3da   :  { %v1546_v30 = vsub.f32 %v10911_v27, %v1476_v21 }
 0x3dc   :  { %v11054_v57 = vpop.eup %9293  ;;  %v1570_v13 = vmul.f32 1.442695, %v1546_v30 }
 0x3dd   :  { %v2682_v43 = vsel %vm1473_vm2, %v11054_v57, 0.0  ;;  %v11059_v51 = vpop.eup %9295 }
 0x3de   :  { %9297 = vpow2.f32 %v1570_v13  ;;  %2683 = vadd.xlane.f32.xlu2 %v2682_v43  ;;  %v2685_v21 = vsel %vm1473_vm2, %v11059_v51, 0.0 }
 0x3df   :  { %9299 = vpow2.f32 %v1574_v55 }
 0x3e1   :  { %v1485_v43 = vpop.xlane.xlu0 %1484 }
 0x3e4   :  { %v11061_v1 = vpop.eup %9297 }
 0x3e5   :  { %v1618_v27 = vsel %vm1473_vm2, %v11061_v1, 0.0  ;;  %v11070_v48 = vpop.eup %9299 }
 0x3e6   :  { %1619 = vadd.xlane.f32.xlu1 %v1618_v27  ;;  %v1322_v8 = vpop.f32.mrf.mxu3  ;;  %2686 = vadd.xlane.f32.xlu2 %v2685_v21  ;;  %v1479_v61 = vpop.xlane.xlu2 %1478  ;;  %v1624_v30 = vsel %vm1473_vm2, %v11070_v48, 0.0 }
 0x3e7   :  { %v1440_v46 = vmul.f32 0.25, %v1322_v8  ;;  %v1547_v29 = vsub.f32 %v10943_v3, %v1479_v61  ;;  %v1549_v8 = vsub.f32 %v10926_v37, %v1485_v43 }
 0x3e9   :  { %v11068_v59 = vadd.f32 %v1440_v46, %v10890_v4  ;;  %v1572_v0 = vmul.f32 1.442695, %v1547_v29  ;;  %v1576_v46 = vmul.f32 1.442695, %v1549_v8 }
 0x3eb   :  { %v1519_v62 = vsel %vm1473_vm2, %v11068_v59, -inf  ;;  %9301 = vpow2.f32 %v1572_v0 }
 0x3ec   :  { %1520 = vmax.xlane.f32.xlu0 %v1519_v62  ;;  %9303 = vpow2.f32 %v1576_v46 }
 0x3ee   :  { %v1325_v13 = vpop.f32.mrf.mxu3  ;;  %1625 = vadd.xlane.f32.xlu1 %v1624_v30  ;;  %v1369_v27 = vpop.f32.mrf.mxu2 }
 0x3ef   :  { %v1441_v55 = vmul.f32 0.25, %v1325_v13  ;;  %v2546_v3 = vpop.xlane.xlu2 %2545  ;;  %v1488_v30 = vpop.xlane.xlu1 %1487  ;;  %v1443_v0 = vmul.f32 0.25, %v1369_v27 }
 0x3f1   :  { %v11078_v21 = vadd.f32 %v1441_v55, %v10890_v4  ;;  %v11083_v29 = vpop.eup %9301  ;;  %v1550_v55 = vsub.f32 %v10923_v23, %v1488_v30 }
 0x3f2   :  { %v1621_v37 = vsel %vm1473_vm2, %v11083_v29, 0.0  ;;  %v11093_v32 = vpop.eup %9303 }
 0x3f3   :  { %v1522_v61 = vsel %vm1473_vm2, %v11078_v21, -inf }
 0x3f4   :  { %1523 = vmax.xlane.f32.xlu0 %v1522_v61  ;;  %v1578_v61 = vmul.f32 1.442695, %v1550_v55 }
 0x3f6   :  { %v1328_v62 = vpop.f32.mrf.mxu3  ;;  %9305 = vpow2.f32 %v1578_v61 }
 0x3f7   :  { %v1442_v25 = vmul.f32 0.25, %v1328_v62  ;;  %v1491_v8 = vpop.xlane.xlu2 %1490  ;;  %v2281_v62 = vpop.f32.mrf.mxu0 }
 0x3f8   :  { %v1372_v38 = vpop.f32.mrf.mxu2  ;;  %v1551_v23 = vsub.f32 %v10970_v33, %v1491_v8 }
 0x3f9   :  { %v11086_v13 = vadd.f32 %v1442_v25, %v10890_v4  ;;  %v11096_v25 = vadd.f32 %v1443_v0, %v10890_v4  ;;  %v1444_v27 = vmul.f32 0.25, %v1372_v38 }
 0x3fa   :  { %v1580_v0 = vmul.f32 1.442695, %v1551_v23 }
 0x3fb   :  { %v1525_v43 = vsel %vm1473_vm2, %v11086_v13, -inf  ;;  %v1528_v55 = vsel %vm1473_vm2, %v11096_v25, -inf  ;;  %v11109_v8 = vadd.f32 %v1444_v27, %v10890_v4 }
 0x3fc   :  { %1622 = vadd.xlane.f32.xlu0 %v1621_v37  ;;  %1526 = vmax.xlane.f32.xlu2 %v1525_v43  ;;  %v1627_v37 = vsel %vm1473_vm2, %v11093_v32, 0.0  ;;  %v2499_v43 = vmul.f32 0.25, %v2281_v62  ;;  %v11114_v61 = vpop.eup %9305  ;;  %9307 = vpow2.f32 %v1580_v0  ;;  %v2612_v0 = vsub.f32 %v10956_v35, %v2546_v3 }
 0x3fd   :  { %v1531_v62 = vsel %vm1473_vm2, %v11109_v8, -inf  ;;  %v1630_v23 = vsel %vm1473_vm2, %v11114_v61, 0.0 }
 0x3fe   :  { %v11112_v38 = vadd.f32 %v2499_v43, %v10890_v4 }
 0x3ff   :  { %v1494_v33 = vpop.xlane.xlu2 %1493 }
 0x400   :  { %v1375_v36 = vpop.f32.mrf.mxu2 }
 0x401   :  { %v1445_v46 = vmul.f32 0.25, %v1375_v36 }
 0x402   :  { %v11123_v43 = vpop.eup %9307 }
 0x403   :  { %v11100_v30 = vadd.f32 %v1445_v46, %v10890_v4  ;;  %v1552_v46 = vsub.f32 %v10986_v20, %v1494_v33  ;;  %v2638_v33 = vmul.f32 1.442695, %v2612_v0 }
 0x404   :  { %1628 = vadd.xlane.f32.xlu0 %v1627_v37  ;;  %1529 = vmax.xlane.f32.xlu2 %v1528_v55  ;;  %v2565_v37 = vsel %vm1473_vm2, %v11112_v38, -inf  ;;  %v1633_v55 = vsel %vm1473_vm2, %v11123_v43, 0.0 }
 0x405   :  { %v1534_v36 = vsel %vm1473_vm2, %v11100_v30, -inf  ;;  %v1582_v27 = vmul.f32 1.442695, %v1552_v46 }
 0x406   :  { %1535 = vmax.xlane.f32.xlu1 %v1534_v36 }
 0x407   :  { %9309 = vpow2.f32 %v1582_v27 }
 0x408   :  { %9311 = vpow2.f32 %v2638_v33 }
 0x40c   :  { %1532 = vmax.xlane.f32.xlu0 %v1531_v62  ;;  %1631 = vadd.xlane.f32.xlu2 %v1630_v23  ;;  %v11137_v23 = vpop.xlane.xlu0 %1496 }
 0x40d   :  { %v11127_v20 = vpop.eup %9309 }
 0x40e   :  { %2566 = vmax.xlane.f32.xlu1 %v2565_v37  ;;  %v1636_v36 = vsel %vm1473_vm2, %v11127_v20, 0.0 }
 0x414   :  { %1634 = vadd.xlane.f32.xlu0 %v1633_v55 }
 0x41c   :  { %1637 = vadd.xlane.f32.xlu0 %v1636_v36  ;;  %v11143_v36 = vpop.eup %9311 }
 0x41d   :  { %v2688_v3 = vsel %vm1473_vm2, %v11143_v36, 0.0 }
 0x42d   :  { %v1416_v62 = vpop.f32.mrf.mxu3 }
 0x42e   :  { %v1446_v37 = vmul.f32 0.25, %v1416_v62 }
 0x42f   :  { %v11145_v35 = vpop.xlane.xlu0 %1502 }
 0x430   :  { %9054 = vrot.lane.b32.xlu0 %v10520_v10, %s10020_s23  ;;  %v11135_v46 = vadd.f32 %v1446_v37, %v10890_v4 }
 0x432   :  { %v1537_v27 = vsel %vm1473_vm2, %v11135_v46, -inf }
 0x433   :  { %1538 = vmax.xlane.f32.xlu2 %v1537_v27 }
 0x435   :  { %v11141_v55 = vpop.f32.mrf.mxu3 }
 0x437   :  { %v1506_v62 = vpop.xlane.xlu0 %1505 }
 0x438   :  { %v1556_v50 = vsub.f32 %v11025_v42, %v1506_v62 }
 0x43a   :  { %v1590_v45 = vmul.f32 1.442695, %v1556_v50 }
 0x43b   :  { %2689 = vadd.xlane.f32.xlu2 %v2688_v3 }
 0x43c   :  { %v11152_v37 = vpop.xlane.xlu2 %1511  ;;  %9313 = vpow2.f32 %v1590_v45 }
 0x43d   :  { %v1422_v10 = vpop.f32.mrf.mxu3 }
 0x43e   :  { %v1448_v0 = vmul.f32 0.25, %v1422_v10  ;;  %v11160_v10 = vpop.xlane.xlu1 %1499 }
 0x43f   :  { %v11157_v52 = vpop.xlane.xlu0 %1508 }
 0x440   :  { %v11150_v33 = vadd.f32 %v1448_v0, %v10890_v4  ;;  %v9058_v0 = vpack.i.bf16 %v10485_v14, %v10495_v28 }
 0x442   :  { %v1543_v27 = vsel %vm1473_vm2, %v11150_v33, -inf  ;;  %v11165_v7 = vpop.eup %9313 }
 0x443   :  { %1544 = vmax.xlane.f32.xlu1 %v1543_v27  ;;  %v1648_v45 = vsel %vm1473_vm2, %v11165_v7, 0.0  ;;  %v9016_v27 = vunpack.i.l.bf16 %v10829_v58 }
 0x444   :  { %v1515_v44 = vpop.xlane.xlu2 %1514 }
 0x445   :  { %v1559_v3 = vsub.f32 %v11042_v49, %v1515_v44 }
 0x447   :  { %v1596_v12 = vmul.f32 1.442695, %v1559_v3 }
 0x449   :  { %9315 = vpow2.f32 %v1596_v12 }
 0x44c   :  { %v1518_v47 = vpop.xlane.xlu0 %1517 }
 0x44d   :  { %v1560_v50 = vsub.f32 %v11049_v2, %v1518_v47  ;;  %v9021_v2 = vunpack.i.l.bf16 %v10886_v63 }
 0x44f   :  { %v1598_v44 = vmul.f32 1.442695, %v1560_v50  ;;  %v11170_v49 = vpop.eup %9315 }
 0x450   :  { %v1657_v12 = vsel %vm1473_vm2, %v11170_v49, 0.0 }
 0x451   :  { %v11172_v62 = vpop.xlane.xlu2 %2683 }
 0x453   :  { %9059 = vrot.lane.b32.xlu2 %v9058_v0, %s10020_s23  ;;  %v9026_v0 = vunpack.i.l.bf16 %v10877_v15 }
 0x459   :  { %v1620_v42 = vpop.xlane.xlu1 %1619 }
 0x45a   :  { %1649 = vadd.xlane.f32.xlu0 %v1648_v45  ;;  %9317 = vrcp.f32 %v1620_v42  ;;  %v11185_v42 = vpop.xlane.xlu2 %2686 }
 0x45b   :  { %9319 = vpow2.f32 %v1598_v44  ;;  %v2284_v44 = vpop.f32.mrf.mxu0 }
 0x45f   :  { %v11174_v14 = vpop.xlane.xlu0 %1520 }
 0x460   :  { %v9318_v28 = vpop.eup %9317 }
 0x461   :  { %v1714_v47 = vmul.f32 %v9318_v28, %v11061_v1  ;;  %v11182_v3 = vpop.eup %9319  ;;  %v1626_v28 = vpop.xlane.xlu1 %1625 }
 0x462   :  { %1658 = vadd.xlane.f32.xlu0 %v1657_v12  ;;  %14898 = vst [vmem:[#allocation64_spill] sm:$0xff] %v11182_v3  ;;  %v1660_v1 = vsel %vm1473_vm2, %v11182_v3, 0.0 }
 0x463   :  { %8651 = vmatmul.msk.f32.vlgmr.msra.gmra.mxu2 %vm1473_vm2, %v1714_v47 }
 0x464   :  { %1945 = vmatpush.msra.mxu2 %v9021_v2  ;;  %v2500_v2 = vmul.f32 0.25, %v2284_v44  ;;  %v1553_v44 = vsub.f32 %v10961_v24, %v11137_v23  ;;  %v9027_v23 = vunpack.i.h.bf16 %v10877_v15 }
 0x466   :  { %1946 = vmatpush.msra.mxu2 %v9016_v27 }
 0x467   :  { %v1524_v50 = vpop.xlane.xlu0 %1523 }
 0x468   :  { %v1562_v45 = vsub.f32 %v11078_v21, %v1524_v50  ;;  %1947 = vmatpush.msra.mxu2 %v9026_v0 }
 0x46a   :  { %v1602_v63 = vmul.f32 1.442695, %v1562_v45  ;;  %1661 = vadd.xlane.f32.xlu0 %v1660_v1  ;;  %v11198_v45 = vadd.f32 %v2500_v2, %v10890_v4 }
 0x46c   :  { %9321 = vpow2.f32 %v1602_v63 }
 0x46f   :  { %v1623_v58 = vpop.xlane.xlu0 %1622  ;;  %v11190_v12 = vpop.xlane.xlu2 %1526 }
 0x470   :  { %9323 = vrcp.f32 %v1623_v58 }
 0x471   :  { %9325 = vrcp.f32 %v1626_v28 }
 0x472   :  { %v11192_v47 = vpop.eup %9321 }
 0x473   :  { %14899 = vst [vmem:[#allocation65_spill] sm:$0xff] %v11192_v47  ;;  %v1666_v27 = vsel %vm1473_vm2, %v11192_v47, 0.0 }
 0x474   :  { %1667 = vadd.xlane.f32.xlu0 %v1666_v27  ;;  %v1447_v27 = vmul.f32 0.25, %v11141_v55 }
 0x476   :  { %v9324_v21 = vpop.eup %9323  ;;  %v11211_v24 = vadd.f32 %v1447_v27, %v10890_v4  ;;  %v2287_v27 = vpop.f32.mrf.mxu0 }
 0x477   :  { %v1629_v0 = vpop.xlane.xlu0 %1628  ;;  %v1715_v50 = vmul.f32 %v9324_v21, %v11083_v29  ;;  %v1530_v1 = vpop.xlane.xlu2 %1529  ;;  %v2568_v29 = vsel %vm1473_vm2, %v11198_v45, -inf }
 0x478   :  { %9327 = vrcp.f32 %v1629_v0  ;;  %v1564_v58 = vsub.f32 %v11096_v25, %v1530_v1  ;;  %v9326_v2 = vpop.eup %9325  ;;  %v1584_v0 = vmul.f32 1.442695, %v1553_v44  ;;  %v1540_v15 = vsel %vm1473_vm2, %v11211_v24, -inf }
 0x479   :  { %v1536_v63 = vpop.xlane.xlu1 %1535  ;;  %8652 = vmatmul.msk.f32.gmra.mxu2 %vm1473_vm2, %v1715_v50  ;;  %v1716_v3 = vmul.f32 %v9326_v2, %v11070_v48 }
 0x47a   :  { %v1606_v47 = vmul.f32 1.442695, %v1564_v58  ;;  %v1566_v28 = vsub.f32 %v11100_v30, %v1536_v63 }
 0x47c   :  { %2569 = vmax.xlane.f32.xlu2 %v2568_v29  ;;  %9329 = vpow2.f32 %v1606_v47  ;;  %v1610_v1 = vmul.f32 1.442695, %v1566_v28  ;;  %v9037_v47 = vunpack.i.h.bf16 %v10940_v9 }
 0x47e   :  { %v9328_v21 = vpop.eup %9327 }
 0x47f   :  { %v1717_v25 = vmul.f32 %v9328_v21, %v11093_v32  ;;  %v1533_v50 = vpop.xlane.xlu0 %1532  ;;  %v1632_v55 = vpop.xlane.xlu2 %1631  ;;  %v1554_v32 = vsub.f32 %v10973_v41, %v11160_v10  ;;  %v1555_v21 = vsub.f32 %v11017_v54, %v11145_v35 }
 0x480   :  { %v1565_v30 = vsub.f32 %v11109_v8, %v1533_v50  ;;  %9331 = vrcp.f32 %v1632_v55  ;;  %v9032_v8 = vunpack.i.h.bf16 %v10949_v18 }
 0x481   :  { %8653 = vmatmul.msk.f32.gmra.mxu2 %vm1473_vm2, %v1716_v3  ;;  %8654 = vmatmul.msk.f32.vlgmr.msra.gmra.mxu3 %vm1473_vm2, %v1717_v25  ;;  %9333 = vpow2.f32 %v1584_v0  ;;  %v1586_v58 = vmul.f32 1.442695, %v1554_v32  ;;  %v2501_v0 = vmul.f32 0.25, %v2287_v27 }
 0x482   :  { %v1608_v48 = vmul.f32 1.442695, %v1565_v30  ;;  %1989 = vmatpush.msra.mxu3 %v9027_v23  ;;  %v11220_v63 = vpop.eup %9329  ;;  %9335 = vpow2.f32 %v1610_v1  ;;  %v1588_v23 = vmul.f32 1.442695, %v1555_v21  ;;  %v9063_v21 = vpack.i.bf16 %v10540_v31, %v10560_v19 }
 0x483   :  { %v1672_v3 = vsel %vm1473_vm2, %v11220_v63, 0.0  ;;  %v11245_v35 = vadd.f32 %v2501_v0, %v10890_v4 }
 0x484   :  { %9337 = vpow2.f32 %v1608_v48  ;;  %1990 = vmatpush.msra.mxu3 %v9037_v47  ;;  %1541 = vmax.xlane.f32.xlu2 %v1540_v15  ;;  %v1557_v47 = vsub.f32 %v11037_v16, %v11157_v52  ;;  %v9031_v52 = vunpack.i.l.bf16 %v10949_v18  ;;  %v1558_v16 = vsub.f32 %v11030_v39, %v11152_v37 }
 0x485   :  { %1673 = vadd.xlane.f32.xlu1 %v1672_v3  ;;  %v2571_v32 = vsel %vm1473_vm2, %v11245_v35, -inf  ;;  %v1561_v18 = vsub.f32 %v11068_v59, %v11174_v14 }
 0x486   :  { %1991 = vmatpush.msra.mxu3 %v9032_v8  ;;  %v9332_v41 = vpop.eup %9331  ;;  %v1592_v15 = vmul.f32 1.442695, %v1557_v47  ;;  %v2567_v47 = vpop.xlane.xlu1 %2566 }
 0x487   :  { %v1635_v10 = vpop.xlane.xlu0 %1634  ;;  %v11227_v44 = vpop.eup %9333  ;;  %v1718_v28 = vmul.f32 %v9332_v41, %v11114_v61  ;;  %v1600_v0 = vmul.f32 1.442695, %v1561_v18 }
 0x488   :  { %9339 = vrcp.f32 %v1635_v10  ;;  %v11230_v29 = vpop.eup %9335  ;;  %v1639_v1 = vsel %vm1473_vm2, %v11227_v44, 0.0  ;;  %v1594_v10 = vmul.f32 1.442695, %v1558_v16 }
 0x489   :  { %9341 = vpow2.f32 %v1586_v58  ;;  %8655 = vmatmul.msk.f32.gmra.mxu3 %vm1473_vm2, %v1718_v28  ;;  %v1678_v61 = vsel %vm1473_vm2, %v11230_v29, 0.0  ;;  %v9036_v58 = vunpack.i.l.bf16 %v10940_v9 }
 0x48a   :  { %v11232_v2 = vpop.eup %9337 }
 0x48b   :  { %v1675_v25 = vsel %vm1473_vm2, %v11232_v2, 0.0 }
 0x48c   :  { %1676 = vadd.xlane.f32.xlu0 %v1675_v25  ;;  %1640 = vadd.xlane.f32.xlu2 %v1639_v1 }
 0x48d   :  { %1679 = vadd.xlane.f32.xlu1 %v1678_v61  ;;  %v2331_v61 = vpop.f32.mrf.mxu1 }
 0x48e   :  { %v9340_v50 = vpop.eup %9339 }
 0x48f   :  { %v1638_v30 = vpop.xlane.xlu0 %1637  ;;  %v1719_v54 = vmul.f32 %v9340_v50, %v11123_v43  ;;  %v11247_v55 = vpop.eup %9341 }
 0x490   :  { %9343 = vrcp.f32 %v1638_v30  ;;  %v1642_v48 = vsel %vm1473_vm2, %v11247_v55, 0.0 }
 0x491   :  { %9345 = vpow2.f32 %v1588_v23  ;;  %8656 = vmatmul.msk.f32.gmra.mxu3 %vm1473_vm2, %v1719_v54  ;;  %v2502_v54 = vmul.f32 0.25, %v2331_v61 }
 0x492   :  { %9347 = vpow2.f32 %v1592_v15 }
 0x493   :  { %9349 = vrcp.f32 %v11172_v62 }
 0x494   :  { %2572 = vmax.xlane.f32.xlu0 %v2571_v32  ;;  %1643 = vadd.xlane.f32.xlu2 %v1642_v48  ;;  %9351 = vpow2.f32 %v1594_v10  ;;  %v11302_v48 = vadd.f32 %v2502_v54, %v10890_v4 }
 0x495   :  { %9353 = vrcp.f32 %v11185_v42 }
 0x496   :  { %v9344_v43 = vpop.eup %9343  ;;  %9355 = vpow2.f32 %v1600_v0 }
 0x497   :  { %v1720_v8 = vmul.f32 %v9344_v43, %v11127_v20  ;;  %v11257_v3 = vpop.eup %9345  ;;  %v9051_v20 = vunpack.i.l.bf16 %v11034_v34  ;;  %v2334_v43 = vpop.f32.mrf.mxu1 }
 0x498   :  { %v1645_v41 = vsel %vm1473_vm2, %v11257_v3, 0.0  ;;  %v11268_v9 = vpop.eup %9347 }
 0x499   :  { %8657 = vmatmul.msk.f32.vlgmr.msrb.gmra.mxu2 %vm1473_vm2, %v1720_v8  ;;  %v9350_v27 = vpop.eup %9349  ;;  %v1651_v62 = vsel %vm1473_vm2, %v11268_v9, 0.0  ;;  %v2619_v8 = vsub.f32 %v11112_v38, %v2567_v47 }
 0x49a   :  { %2033 = vmatpush.msrb.mxu2 %v9036_v58  ;;  %v2778_v28 = vmul.f32 %v9350_v27, %v11054_v57  ;;  %v11284_v42 = vpop.eup %9351  ;;  %v1563_v57 = vsub.f32 %v11086_v13, %v11190_v12  ;;  %v2503_v58 = vmul.f32 0.25, %v2334_v43 }
 0x49b   :  { %v9354_v25 = vpop.eup %9353  ;;  %v1654_v31 = vsel %vm1473_vm2, %v11284_v42, 0.0 }
 0x49c   :  { %2034 = vmatpush.msrb.mxu2 %v9031_v52  ;;  %1646 = vadd.xlane.f32.xlu2 %v1645_v41  ;;  %v2779_v19 = vmul.f32 %v9354_v25, %v11059_v51  ;;  %v1604_v50 = vmul.f32 1.442695, %v1563_v57  ;;  %v2574_v52 = vsel %vm1473_vm2, %v11302_v48, -inf  ;;  %v11313_v41 = vadd.f32 %v2503_v58, %v10890_v4  ;;  %v2481_v25 = vpop.f32.mrf.mxu0 }
 0x49e   :  { %2035 = vmatpush.msrb.mxu2 %v9051_v20  ;;  %v2577_v20 = vsel %vm1473_vm2, %v11313_v41, -inf }
 0x49f   :  { %v2337_v10 = vpop.f32.mrf.mxu1 }
 0x4a0   :  { %v2504_v27 = vmul.f32 0.25, %v2337_v10 }
 0x4a2   :  { %v11272_v39 = vpop.permute.xlu0 %9054 }
 0x4a3   :  { %v9056_v37 = vunpack.i.l.bf16 %v11272_v39 }
 0x4a4   :  { %1652 = vadd.xlane.f32.xlu2 %v1651_v62 }
 0x4a5   :  { %2835 = vmatpush.msrb.mxu1 %v9056_v37  ;;  %v11322_v37 = vadd.f32 %v2504_v27, %v10890_v4 }
 0x4a6   :  { %9064 = vrot.lane.b32.xlu1 %v9063_v21, %s10020_s23  ;;  %v1539_v59 = vpop.xlane.xlu2 %1538  ;;  %8723 = vmatmul.msk.f32.vlgmr.msrb.gmra.mxu1 %vm1473_vm2, %v2778_v28  ;;  %v9073_v28 = vpack.i.bf16 %v10624_v5, %v10595_v17  ;;  %v11336_v5 = vpop.f32.mrf.mxu0 }
 0x4a7   :  { %v1567_v14 = vsub.f32 %v11135_v46, %v1539_v59  ;;  %v11292_v46 = vpop.eup %9355  ;;  %v2580_v62 = vsel %vm1473_vm2, %v11322_v37, -inf }
 0x4a8   :  { %v1663_v12 = vsel %vm1473_vm2, %v11292_v46, 0.0 }
 0x4a9   :  { %v1612_v1 = vmul.f32 1.442695, %v1567_v14 }
 0x4ab   :  { %9357 = vpow2.f32 %v1612_v1 }
 0x4ac   :  { %1655 = vadd.xlane.f32.xlu2 %v1654_v31 }
 0x4ae   :  { %v2690_v23 = vpop.xlane.xlu2 %2689  ;;  %8724 = vmatmul.msk.f32.gmra.mxu1 %vm1473_vm2, %v2779_v19  ;;  %v2487_v43 = vpop.f32.mrf.mxu0 }
 0x4af   :  { %9359 = vrcp.f32 %v2690_v23 }
 0x4b0   :  { %9361 = vpow2.f32 %v1604_v50 }
 0x4b1   :  { %v11294_v30 = vpop.eup %9357 }
 0x4b2   :  { %v1681_v13 = vsel %vm1473_vm2, %v11294_v30, 0.0 }
 0x4b3   :  { %1682 = vadd.xlane.f32.xlu0 %v1681_v13  ;;  %v2511_v13 = vmul.f32 0.25, %v2481_v25  ;;  %v9052_v25 = vunpack.i.h.bf16 %v11034_v34 }
 0x4b4   :  { %1664 = vadd.xlane.f32.xlu2 %v1663_v12 }
 0x4b5   :  { %v9360_v51 = vpop.eup %9359 }
 0x4b6   :  { %v2780_v32 = vmul.f32 %v9360_v51, %v11143_v36  ;;  %v11304_v15 = vpop.eup %9361  ;;  %v2652_v36 = vmul.f32 1.442695, %v2619_v8  ;;  %v11329_v21 = vpop.permute.xlu2 %9059 }
 0x4b7   :  { %v1669_v16 = vsel %vm1473_vm2, %v11304_v15, 0.0  ;;  %v1545_v0 = vpop.xlane.xlu1 %1544 }
 0x4b8   :  { %8725 = vmatmul.msk.f32.gmra.mxu1 %vm1473_vm2, %v2780_v32  ;;  %9363 = vpow2.f32 %v2652_v36  ;;  %v1569_v1 = vsub.f32 %v11150_v33, %v1545_v0  ;;  %v11349_v32 = vadd.f32 %v2511_v13, %v10890_v4 }
 0x4ba   :  { %v1616_v31 = vmul.f32 1.442695, %v1569_v1  ;;  %v9046_v1 = vunpack.i.l.bf16 %v11003_v26 }
 0x4bb   :  { %2575 = vmax.xlane.f32.xlu0 %v2574_v52  ;;  %v2513_v52 = vmul.f32 0.25, %v2487_v43 }
 0x4bc   :  { %1670 = vadd.xlane.f32.xlu2 %v1669_v16  ;;  %v2601_v16 = vsel %vm1473_vm2, %v11349_v32, -inf }
 0x4bd   :  { %v11356_v10 = vadd.f32 %v2513_v52, %v10890_v4  ;;  %v14904_v52 = vld [vmem:[#allocation65_spill] sm:$0xff] }
 0x4be   :  { %v11317_v38 = vpop.eup %9363 }
 0x4bf   :  { %v2709_v18 = vsel %vm1473_vm2, %v11317_v38, 0.0 }
 0x4c3   :  { %2578 = vmax.xlane.f32.xlu0 %v2577_v20 }
 0x4cb   :  { %2710 = vadd.xlane.f32.xlu0 %v2709_v18 }
 0x4cd   :  { %v1650_v19 = vpop.xlane.xlu0 %1649 }
 0x4d0   :  { %2581 = vmax.xlane.f32.xlu1 %v2580_v62 }
 0x4d5   :  { %v1659_v12 = vpop.xlane.xlu0 %1658 }
 0x4dd   :  { %v1662_v20 = vpop.xlane.xlu0 %1661 }
 0x4df   :  { %9074 = vrot.lane.b32.xlu0 %v9073_v28, %s10020_s23  ;;  %v2607_v28 = vsel %vm1473_vm2, %v11356_v10, -inf }
 0x4e7   :  { %v1668_v0 = vpop.xlane.xlu0 %1667 }
 0x4ef   :  { %v2570_v59 = vpop.xlane.xlu2 %2569 }
 0x4f0   :  { %v2620_v14 = vsub.f32 %v11198_v45, %v2570_v59 }
 0x4f2   :  { %v2654_v57 = vmul.f32 1.442695, %v2620_v14 }
 0x4f4   :  { %9365 = vpow2.f32 %v2654_v57  ;;  %v9078_v57 = vpack.i.bf16 %v10641_v53, %v10708_v6  ;;  %v9093_v53 = vpack.i.bf16 %v10749_v40, %v10777_v22 }
 0x4f5   :  { %9367 = vpow2.f32 %v1616_v31 }
 0x4f7   :  { %v1542_v61 = vpop.xlane.xlu2 %1541 }
 0x4f8   :  { %v1568_v50 = vsub.f32 %v11211_v24, %v1542_v61  ;;  %v9047_v61 = vunpack.i.h.bf16 %v11003_v26 }
 0x4fa   :  { %v11334_v23 = vpop.eup %9365  ;;  %v1614_v17 = vmul.f32 1.442695, %v1568_v50 }
 0x4fb   :  { %v2712_v54 = vsel %vm1473_vm2, %v11334_v23, 0.0  ;;  %v11340_v33 = vpop.eup %9367 }
 0x4fc   :  { %9369 = vpow2.f32 %v1614_v17  ;;  %2713 = vadd.xlane.f32.xlu1 %v2712_v54  ;;  %v1687_v47 = vsel %vm1473_vm2, %v11340_v33, 0.0  ;;  %v1674_v54 = vpop.xlane.xlu1 %1673 }
 0x4ff   :  { %v1641_v45 = vpop.xlane.xlu2 %1640 }
 0x500   :  { %9371 = vrcp.f32 %v1641_v45  ;;  %v14900_v45 = vld [vmem:[#allocation40_spill] sm:$0xff] }
 0x502   :  { %v11342_v51 = vpop.eup %9369 }
 0x503   :  { %v1684_v24 = vsel %vm1473_vm2, %v11342_v51, 0.0 }
 0x504   :  { %1685 = vadd.xlane.f32.xlu2 %v1684_v24  ;;  %1688 = vadd.xlane.f32.xlu1 %v1687_v47 }
 0x506   :  { %v9372_v8 = vpop.eup %9371 }
 0x507   :  { %v1644_v58 = vpop.xlane.xlu2 %1643  ;;  %v1721_v36 = vmul.f32 %v9372_v8, %v11227_v44  ;;  %v14903_v8 = vld [vmem:[#allocation64_spill] sm:$0xff] }
 0x508   :  { %9373 = vrcp.f32 %v1644_v58 }
 0x509   :  { %2602 = vmax.xlane.f32.xlu0 %v2601_v16  ;;  %8658 = vmatmul.msk.f32.gmra.mxu2 %vm1473_vm2, %v1721_v36  ;;  %v14905_v36 = vld [vmem:[#allocation43_spill] sm:$0xff] }
 0x50e   :  { %v9374_v27 = vpop.eup %9373 }
 0x50f   :  { %v1647_v18 = vpop.xlane.xlu2 %1646  ;;  %v1722_v62 = vmul.f32 %v9374_v27, %v11247_v55  ;;  %v1677_v55 = vpop.xlane.xlu0 %1676 }
 0x510   :  { %9375 = vrcp.f32 %v1647_v18 }
 0x511   :  { %2608 = vmax.xlane.f32.xlu0 %v2607_v28  ;;  %8659 = vmatmul.msk.f32.gmra.mxu2 %vm1473_vm2, %v1722_v62  ;;  %9377 = vrcp.f32 %v1650_v19 }
 0x516   :  { %v9376_v44 = vpop.eup %9375 }
 0x517   :  { %v1723_v59 = vmul.f32 %v9376_v44, %v11257_v3  ;;  %v1653_v14 = vpop.xlane.xlu2 %1652  ;;  %v9378_v31 = vpop.eup %9377 }
 0x518   :  { %9379 = vrcp.f32 %v1653_v14  ;;  %v1724_v3 = vmul.f32 %v9378_v31, %v11165_v7  ;;  %v2573_v19 = vpop.xlane.xlu0 %2572  ;;  %v14906_v14 = vld [vmem:[#allocation53_spill] sm:$0xff]  ;;  %v14907_v31 = vld [vmem:[#allocation54_spill] sm:$0xff] }
 0x519   :  { %8660 = vmatmul.msk.f32.vlgmr.msrb.gmra.mxu3 %vm1473_vm2, %v1723_v59  ;;  %v2621_v24 = vsub.f32 %v11245_v35, %v2573_v19  ;;  %v14910_v19 = vld [vmem:[#allocation59_spill] sm:$0xff] }
 0x51a   :  { %2077 = vmatpush.msrb.mxu3 %v9052_v25 }
 0x51b   :  { %v2656_v43 = vmul.f32 1.442695, %v2621_v24  ;;  %v14919_v24 = vld [vmem:[#allocation39_spill] sm:$0xff] }
 0x51c   :  { %2078 = vmatpush.msrb.mxu3 %v9046_v1  ;;  %9069 = vrot.lane.b32.xlu2 %v10621_v56, %s10020_s23 }
 0x51d   :  { %9079 = vrot.lane.b32.xlu1 %v9078_v57, %s10020_s23 }
 0x51e   :  { %2079 = vmatpush.msrb.mxu3 %v9047_v61  ;;  %v9380_v6 = vpop.eup %9379 }
 0x51f   :  { %v1656_v34 = vpop.xlane.xlu2 %1655  ;;  %v1725_v17 = vmul.f32 %v9380_v6, %v11268_v9 }
 0x520   :  { %9381 = vrcp.f32 %v1656_v34 }
 0x521   :  { %8661 = vmatmul.msk.f32.gmra.mxu3 %vm1473_vm2, %v1724_v3  ;;  %9383 = vrcp.f32 %v1659_v12  ;;  %v1680_v12 = vpop.xlane.xlu1 %1679 }
 0x525   :  { %9094 = vrot.lane.b32.xlu0 %v9093_v53, %s10020_s23  ;;  %v14909_v53 = vld [vmem:[#allocation57_spill] sm:$0xff] }
 0x526   :  { %v9382_v26 = vpop.eup %9381  ;;  %v1683_v40 = vpop.xlane.xlu0 %1682 }
 0x527   :  { %v1726_v56 = vmul.f32 %v9382_v26, %v11284_v42  ;;  %v1665_v50 = vpop.xlane.xlu2 %1664  ;;  %v9384_v7 = vpop.eup %9383 }
 0x528   :  { %9385 = vrcp.f32 %v1665_v50  ;;  %v1727_v9 = vmul.f32 %v9384_v7, %v11170_v49  ;;  %v14902_v49 = vld [vmem:[#allocation38_spill] sm:$0xff]  ;;  %v9057_v7 = vunpack.i.h.bf16 %v11272_v39 }
 0x529   :  { %8662 = vmatmul.msk.f32.gmra.mxu3 %vm1473_vm2, %v1725_v17  ;;  %8663 = vmatmul.msk.f32.vlgmr.msra.gmra.mxu2 %vm1473_vm2, %v1726_v56  ;;  %9387 = vrcp.f32 %v1662_v20  ;;  %v11402_v20 = vpop.permute.xlu1 %9064  ;;  %v14911_v17 = vld [vmem:[#allocation58_spill] sm:$0xff] }
 0x52a   :  { %8681 = vmatpush.xpose.msk.msra.mxu2 %vm1057_vm12, %v10686_v60  ;;  %9389 = vrcp.f32 %v1668_v0  ;;  %v14901_v60 = vld [vmem:[#allocation46_spill] sm:$0xff] }
 0x52b   :  { %9391 = vrcp.f32 %v1674_v54 }
 0x52e   :  { %v9386_v22 = vpop.eup %9385  ;;  %8682 = vmatpush.xpose.msk.msra.mxu2 %vm1057_vm12, %v10626_v11 }
 0x52f   :  { %v1729_v42 = vmul.f32 %v9386_v22, %v11292_v46  ;;  %v9388_v13 = vpop.eup %9387  ;;  %v1671_v47 = vpop.xlane.xlu2 %1670  ;;  %v9061_v22 = vunpack.i.l.bf16 %v11329_v21 }
 0x530   :  { %v9390_v11 = vpop.eup %9389  ;;  %v2576_v46 = vpop.xlane.xlu0 %2575  ;;  %9393 = vrcp.f32 %v1671_v47  ;;  %v1728_v58 = vmul.f32 %v9388_v13, %v14903_v8 }
 0x531   :  { %8664 = vmatmul.msk.f32.gmra.mxu2 %vm1473_vm2, %v1727_v9  ;;  %8666 = vmatmul.msk.f32.vlgmr.msra.gmra.mxu3 %vm1473_vm2, %v1729_v42  ;;  %v1730_v16 = vmul.f32 %v9390_v11, %v14904_v52  ;;  %v9392_v35 = vpop.eup %9391  ;;  %9395 = vpow2.f32 %v2656_v43  ;;  %v2622_v27 = vsub.f32 %v11302_v48, %v2576_v46  ;;  %v14913_v42 = vld [vmem:[#allocation37_spill] sm:$0xff]  ;;  %v14920_v43 = vld [vmem:[#allocation56_spill] sm:$0xff] }
 0x532   :  { %8683 = vmatpush.xpose.msk.msra.mxu2 %vm1057_vm12, %v14900_v45  ;;  %8687 = vmatpush.xpose.msk.msra.mxu3 %vm1057_vm12, %v14901_v60  ;;  %9397 = vrcp.f32 %v1677_v55  ;;  %v1732_v62 = vmul.f32 %v9392_v35, %v11220_v63  ;;  %v14914_v9 = vld [vmem:[#allocation49_spill] sm:$0xff]  ;;  %v14916_v60 = vld [vmem:[#allocation42_spill] sm:$0xff] }
 0x533   :  { %9399 = vrcp.f32 %v1683_v40  ;;  %v2658_v28 = vmul.f32 1.442695, %v2622_v27  ;;  %v14912_v40 = vld [vmem:[#allocation36_spill] sm:$0xff]  ;;  %v14915_v45 = vld [vmem:[#allocation41_spill] sm:$0xff] }
 0x535   :  { %9401 = vpow2.f32 %v2658_v28 }
 0x536   :  { %8688 = vmatpush.xpose.msk.msra.mxu3 %vm1057_vm12, %v14902_v49  ;;  %v9394_v18 = vpop.eup %9393  ;;  %9403 = vrcp.f32 %v1680_v12  ;;  %v14917_v12 = vld [vmem:[#allocation52_spill] sm:$0xff]  ;;  %v11463_v49 = vpop.f32.mrf.mxu2 }
 0x537   :  { %v1731_v0 = vmul.f32 %v9394_v18, %v11304_v15  ;;  %v11407_v59 = vpop.eup %9395  ;;  %v14921_v18 = vld [vmem:[#allocation60_spill] sm:$0xff] }
 0x538   :  { %v2579_v44 = vpop.xlane.xlu0 %2578  ;;  %v9398_v25 = vpop.eup %9397  ;;  %v2715_v15 = vsel %vm1473_vm2, %v11407_v59, 0.0 }
 0x539   :  { %8665 = vmatmul.msk.f32.gmra.mxu2 %vm1473_vm2, %v1728_v58  ;;  %8667 = vmatmul.msk.f32.gmra.mxu3 %vm1473_vm2, %v1730_v16  ;;  %v2623_v48 = vsub.f32 %v11313_v41, %v2579_v44  ;;  %v9400_v55 = vpop.eup %9399  ;;  %v1733_v3 = vmul.f32 %v9398_v25, %v11232_v2 }
 0x53a   :  { %8689 = vmatpush.xpose.msk.msra.mxu3 %vm1057_vm12, %v14905_v36  ;;  %v1735_v61 = vmul.f32 %v9400_v55, %v11294_v30 }
 0x53b   :  { %v2660_v34 = vmul.f32 1.442695, %v2623_v48  ;;  %v11421_v41 = vpop.eup %9401 }
 0x53c   :  { %v9404_v6 = vpop.eup %9403  ;;  %v2718_v30 = vsel %vm1473_vm2, %v11421_v41, 0.0 }
 0x53d   :  { %v1734_v56 = vmul.f32 %v9404_v6, %v11230_v29  ;;  %v9062_v29 = vunpack.i.h.bf16 %v11329_v21  ;;  %v14918_v21 = vld [vmem:[#allocation44_spill] sm:$0xff]  ;;  %v2512_v6 = vmul.f32 0.25, %v11336_v5  ;;  %v11507_v5 = vpop.f32.mrf.mxu3 }
 0x53e   :  { %v9088_v47 = vpack.i.bf16 %v14919_v24, %v14918_v21  ;;  %v11468_v35 = vpop.f32.mrf.mxu2  ;;  %v14927_v21 = vld [vmem:[#allocation62_spill] sm:$0xff]  ;;  %v11527_v24 = vpop.f32.mrf.mxu1 }
 0x540   :  { %v2711_v39 = vpop.xlane.xlu0 %2710 }
 0x541   :  { %8668 = vmatmul.msk.f32.gmra.mxu3 %vm1473_vm2, %v1731_v0  ;;  %8669 = vmatmul.msk.f32.vlgmr.msrb.gmra.mxu2 %vm1473_vm2, %v1732_v62 }
 0x542   :  { %8705 = vmatpush.xpose.msk.msrb.mxu2 %vm1057_vm12, %v14906_v14 }
 0x543   :  { %v2582_v1 = vpop.xlane.xlu1 %2581 }
 0x544   :  { %v2624_v63 = vsub.f32 %v11322_v37, %v2582_v1  ;;  %v14908_v37 = vld [vmem:[#allocation51_spill] sm:$0xff] }
 0x545   :  { %2716 = vadd.xlane.f32.xlu2 %v2715_v15 }
 0x546   :  { %v2662_v57 = vmul.f32 1.442695, %v2624_v63  ;;  %8706 = vmatpush.xpose.msk.msrb.mxu2 %vm1057_vm12, %v14907_v31  ;;  %v11478_v63 = vpop.f32.mrf.mxu2 }
 0x548   :  { %9405 = vpow2.f32 %v2662_v57 }
 0x549   :  { %8670 = vmatmul.msk.f32.gmra.mxu2 %vm1473_vm2, %v1733_v3  ;;  %8672 = vmatmul.msk.f32.vlgmr.msrb.gmra.mxu3 %vm1473_vm2, %v1735_v61  ;;  %9407 = vpow2.f32 %v2660_v34  ;;  %v9067_v34 = vunpack.i.h.bf16 %v11402_v20 }
 0x54a   :  { %8707 = vmatpush.xpose.msk.msrb.mxu2 %vm1057_vm12, %v14908_v37  ;;  %8711 = vmatpush.xpose.msk.msrb.mxu3 %vm1057_vm12, %v14909_v53 }
 0x54d   :  { %2719 = vadd.xlane.f32.xlu2 %v2718_v30 }
 0x54e   :  { %v11431_v2 = vpop.eup %9405  ;;  %8712 = vmatpush.xpose.msk.msrb.mxu3 %vm1057_vm12, %v14910_v19  ;;  %v11490_v3 = vpop.f32.mrf.mxu2  ;;  %v14923_v19 = vld [vmem:[#allocation45_spill] sm:$0xff] }
 0x54f   :  { %v2724_v26 = vsel %vm1473_vm2, %v11431_v2, 0.0  ;;  %v11438_v50 = vpop.eup %9407 }
 0x550   :  { %2725 = vadd.xlane.f32.xlu1 %v2724_v26  ;;  %v2721_v54 = vsel %vm1473_vm2, %v11438_v50, 0.0  ;;  %v11497_v26 = vadd.f32 %v2512_v6, %v10890_v4 }
 0x551   :  { %8671 = vmatmul.msk.f32.gmra.mxu2 %vm1473_vm2, %v1734_v56  ;;  %v9075_v11 = vpop.permute.xlu0 %9074 }
 0x552   :  { %8713 = vmatpush.xpose.msk.msrb.mxu3 %vm1057_vm12, %v14911_v17  ;;  %v9076_v28 = vunpack.i.l.bf16 %v9075_v11  ;;  %v9077_v44 = vunpack.i.h.bf16 %v9075_v11  ;;  %v2604_v56 = vsel %vm1473_vm2, %v11497_v26, -inf  ;;  %v14928_v11 = vld [vmem:[#allocation50_spill] sm:$0xff] }
 0x555   :  { %2722 = vadd.xlane.f32.xlu2 %v2721_v54 }
 0x559   :  { %8684 = vmatmul.msk.f32.vlgmr.msra.gmra.mxu2 %vm1057_vm12, %v14912_v40 }
 0x55a   :  { %2877 = vmatpush.msra.mxu2 %v9057_v7 }
 0x55c   :  { %2878 = vmatpush.msra.mxu2 %v9061_v22 }
 0x55e   :  { %2879 = vmatpush.msra.mxu2 %v9062_v29  ;;  %v14925_v29 = vld [vmem:[#allocation61_spill] sm:$0xff] }
 0x561   :  { %8685 = vmatmul.msk.f32.gmra.mxu2 %vm1057_vm12, %v14913_v42 }
 0x569   :  { %9099 = vrot.lane.b32.xlu1 %v14914_v9, %s10020_s23  ;;  %8686 = vmatmul.msk.f32.gmra.mxu2 %vm1057_vm12, %v14915_v45  ;;  %v11517_v45 = vpop.f32.mrf.mxu3 }
 0x56d   :  { %9084 = vrot.lane.b32.xlu2 %v14916_v60, %s10020_s23 }
 0x56f   :  { %v2714_v13 = vpop.xlane.xlu1 %2713 }
 0x571   :  { %8708 = vmatmul.msk.f32.vlgmr.msrb.gmra.mxu2 %vm1057_vm12, %v14917_v12 }
 0x575   :  { %9089 = vrot.lane.b32.xlu2 %v9088_v47, %s10020_s23 }
 0x577   :  { %v1686_v46 = vpop.xlane.xlu2 %1685  ;;  %v1689_v8 = vpop.xlane.xlu1 %1688 }
 0x578   :  { %9409 = vrcp.f32 %v1686_v46 }
 0x579   :  { %8709 = vmatmul.msk.f32.gmra.mxu2 %vm1057_vm12, %v14920_v43  ;;  %9411 = vrcp.f32 %v2711_v39  ;;  %v14926_v39 = vld [vmem:[#allocation63_spill] sm:$0xff] }
 0x57a   :  { %9413 = vrcp.f32 %v1689_v8 }
 0x57b   :  { %9415 = vrcp.f32 %v2714_v13  ;;  %v11523_v13 = vpop.f32.mrf.mxu3 }
 0x57c   :  { %v2603_v58 = vpop.xlane.xlu0 %2602 }
 0x57d   :  { %v2631_v37 = vsub.f32 %v11349_v32, %v2603_v58  ;;  %v14924_v32 = vld [vmem:[#allocation47_spill] sm:$0xff] }
 0x57e   :  { %v9410_v52 = vpop.eup %9409 }
 0x57f   :  { %v9070_v16 = vpop.permute.xlu2 %9069  ;;  %v1736_v36 = vmul.f32 %v9410_v52, %v11342_v51  ;;  %v9412_v62 = vpop.eup %9411  ;;  %v2676_v30 = vmul.f32 1.442695, %v2631_v37 }
 0x580   :  { %v9072_v27 = vunpack.i.h.bf16 %v9070_v16  ;;  %v9414_v0 = vpop.eup %9413  ;;  %v2787_v25 = vmul.f32 %v9412_v62, %v11317_v38  ;;  %v9071_v53 = vunpack.i.l.bf16 %v9070_v16  ;;  %v2840_v16 = vpop.f32.mrf.mxu1 }
 0x581   :  { %8673 = vmatmul.msk.f32.gmra.mxu3 %vm1473_vm2, %v1736_v36  ;;  %8710 = vmatmul.msk.f32.gmra.mxu2 %vm1057_vm12, %v14921_v18  ;;  %v1737_v1 = vmul.f32 %v9414_v0, %v11340_v33  ;;  %v9416_v55 = vpop.eup %9415  ;;  %v14922_v33 = vld [vmem:[#allocation48_spill] sm:$0xff] }
 0x582   :  { %2965 = vmatpush.msra.mxu0 %v9072_v27  ;;  %v2788_v15 = vmul.f32 %v9416_v55, %v11334_v23 }
 0x584   :  { %v2609_v14 = vpop.xlane.xlu0 %2608  ;;  %2966 = vmatpush.msra.mxu0 %v9076_v28 }
 0x585   :  { %v2633_v51 = vsub.f32 %v11356_v10, %v2609_v14  ;;  %v9066_v10 = vunpack.i.l.bf16 %v11402_v20 }
 0x586   :  { %2967 = vmatpush.msra.mxu0 %v9077_v44 }
 0x587   :  { %v2680_v48 = vmul.f32 1.442695, %v2633_v51  ;;  %8732 = vmatmul.msk.f32.vlgmr.msra.gmra.mxu0 %vm1473_vm2, %v2787_v25 }
 0x588   :  { %v2843_v62 = vpop.f32.mrf.mxu1 }
 0x589   :  { %9417 = vpow2.f32 %v2680_v48  ;;  %8674 = vmatmul.msk.f32.gmra.mxu3 %vm1473_vm2, %v1737_v1 }
 0x58a   :  { %9419 = vpow2.f32 %v2676_v30 }
 0x58c   :  { %v11499_v20 = vpop.f32.mrf.mxu2 }
 0x58f   :  { %v11481_v57 = vpop.eup %9417  ;;  %8733 = vmatmul.msk.f32.gmra.mxu0 %vm1473_vm2, %v2788_v15  ;;  %v9080_v38 = vpop.permute.xlu1 %9079 }
 0x590   :  { %v9081_v31 = vunpack.i.l.bf16 %v9080_v38  ;;  %v2751_v61 = vsel %vm1473_vm2, %v11481_v57, 0.0  ;;  %v9082_v23 = vunpack.i.h.bf16 %v9080_v38  ;;  %v11505_v17 = vpop.eup %9419 }
 0x591   :  { %2752 = vadd.xlane.f32.xlu0 %v2751_v61  ;;  %8690 = vmatmul.msk.f32.vlgmr.msra.gmra.mxu3 %vm1057_vm12, %v14922_v33  ;;  %v2745_v40 = vsel %vm1473_vm2, %v11505_v17, 0.0 }
 0x592   :  { %2921 = vmatpush.msra.mxu3 %v9066_v10  ;;  %3009 = vmatpush.msra.mxu1 %v9081_v31 }
 0x594   :  { %2922 = vmatpush.msra.mxu3 %v9067_v34  ;;  %3010 = vmatpush.msra.mxu1 %v9082_v23  ;;  %v11509_v54 = vpop.f32.mrf.mxu2 }
 0x596   :  { %2923 = vmatpush.msra.mxu3 %v9071_v53 }
 0x597   :  { %v9095_v7 = vpop.permute.xlu0 %9094 }
 0x598   :  { %v9096_v22 = vunpack.i.l.bf16 %v9095_v7  ;;  %v9097_v42 = vunpack.i.h.bf16 %v9095_v7 }
 0x599   :  { %8691 = vmatmul.msk.f32.gmra.mxu3 %vm1057_vm12, %v14923_v19 }
 0x59c   :  { %v11533_v43 = vpop.f32.mrf.mxu3 }
 0x59e   :  { %2605 = vmax.xlane.f32.xlu2 %v2604_v56 }
 0x5a1   :  { %8692 = vmatmul.msk.f32.gmra.mxu3 %vm1057_vm12, %v14924_v32 }
 0x5a4   :  { %v11540_v27 = vpop.f32.mrf.mxu3 }
 0x5a6   :  { %2746 = vadd.xlane.f32.xlu2 %v2745_v40 }
 0x5a9   :  { %8714 = vmatmul.msk.f32.vlgmr.msrb.gmra.mxu3 %vm1057_vm12, %v14925_v29 }
 0x5aa   :  { %3097 = vmatpush.msrb.mxu3 %v9096_v22 }
 0x5ac   :  { %3098 = vmatpush.msrb.mxu3 %v9097_v42  ;;  %v11515_v9 = vpop.f32.mrf.mxu2  ;;  %v11546_v51 = vpop.f32.mrf.mxu3 }
 0x5b1   :  { %8715 = vmatmul.msk.f32.gmra.mxu3 %vm1057_vm12, %v14926_v39 }
 0x5b4   :  { %v11521_v60 = vpop.f32.mrf.mxu2  ;;  %v11553_v23 = vpop.f32.mrf.mxu3 }
 0x5b8   :  { %v2717_v12 = vpop.xlane.xlu2 %2716 }
 0x5b9   :  { %9421 = vrcp.f32 %v2717_v12  ;;  %8716 = vmatmul.msk.f32.gmra.mxu3 %vm1057_vm12, %v14927_v21 }
 0x5bc   :  { %v11529_v47 = vpop.f32.mrf.mxu2  ;;  %v11562_v30 = vpop.f32.mrf.mxu3 }
 0x5be   :  { %9104 = vrot.lane.b32.xlu2 %v14928_v11, %s10020_s23 }
 0x5bf   :  { %v9422_v46 = vpop.eup %9421 }
 0x5c0   :  { %v2720_v8 = vpop.xlane.xlu2 %2719  ;;  %v2789_v58 = vmul.f32 %v9422_v46, %v11407_v59 }
 0x5c1   :  { %9423 = vrcp.f32 %v2720_v8 }
 0x5c2   :  { %8734 = vmatmul.msk.f32.gmra.mxu0 %vm1473_vm2, %v2789_v58 }
 0x5c3   :  { %v2726_v25 = vpop.xlane.xlu1 %2725 }
 0x5c4   :  { %v11537_v52 = vpop.f32.mrf.mxu2  ;;  %v11564_v19 = vpop.f32.mrf.mxu3 }
 0x5c6   :  { %3180 = vrot.lane.b32.xlu2 %v2840_v16, %s10022_s24 }
 0x5c7   :  { %v9424_v28 = vpop.eup %9423 }
 0x5c8   :  { %v2723_v36 = vpop.xlane.xlu2 %2722  ;;  %v2790_v14 = vmul.f32 %v9424_v28, %v11421_v41 }
 0x5c9   :  { %9425 = vrcp.f32 %v2723_v36 }
 0x5ca   :  { %9427 = vrcp.f32 %v2726_v25 }
 0x5cc   :  { %v11542_v18 = vpop.f32.mrf.mxu2  ;;  %v11566_v56 = vpop.f32.mrf.mxu3 }
 0x5ce   :  { %3182 = vrot.lane.b32.xlu2 %v2843_v62, %s10022_s24 }
 0x5cf   :  { %v9426_v1 = vpop.eup %9425 }
 0x5d0   :  { %v9085_v0 = vpop.permute.xlu2 %9084  ;;  %v2791_v38 = vmul.f32 %v9426_v1, %v11438_v50  ;;  %v9428_v37 = vpop.eup %9427 }
 0x5d1   :  { %v9087_v59 = vunpack.i.h.bf16 %v9085_v0  ;;  %v9086_v44 = vunpack.i.l.bf16 %v9085_v0  ;;  %v2792_v6 = vmul.f32 %v9428_v37, %v11431_v2 }
 0x5d3   :  { %3011 = vmatpush.msra.mxu1 %v9086_v44  ;;  %3053 = vmatpush.msrb.mxu2 %v9087_v59  ;;  %v14929_v44 = vld [vmem:[#allocation12_spill] sm:$0xff] }
 0x5d4   :  { %v11548_v48 = vpop.f32.mrf.mxu2  ;;  %8735 = vmatmul.msk.f32.vlgmr.msra.gmra.mxu1 %vm1473_vm2, %v2790_v14 }
 0x5d8   :  { %v9090_v55 = vpop.permute.xlu2 %9089 }
 0x5d9   :  { %v9091_v15 = vunpack.i.l.bf16 %v9090_v55  ;;  %v9092_v10 = vunpack.i.h.bf16 %v9090_v55 }
 0x5db   :  { %v9100_v31 = vpop.permute.xlu1 %9099  ;;  %3054 = vmatpush.msrb.mxu2 %v9091_v15 }
 0x5dc   :  { %v9102_v61 = vunpack.i.h.bf16 %v9100_v31  ;;  %v9101_v41 = vunpack.i.l.bf16 %v9100_v31  ;;  %v2181_v33 = vpop.f32.mrf.mxu2  ;;  %8736 = vmatmul.msk.f32.gmra.mxu1 %vm1473_vm2, %v2791_v38  ;;  %v14930_v31 = vld [vmem:[#allocation13_spill] sm:$0xff] }
 0x5dd   :  { %v2493_v34 = vmul.f32 0.25, %v2181_v33  ;;  %3055 = vmatpush.msrb.mxu2 %v9092_v10 }
 0x5de   :  { %3099 = vmatpush.msrb.mxu3 %v9101_v41  ;;  %3141 = vmatpush.msrb.mxu0 %v9102_v61 }
 0x5df   :  { %v11556_v53 = vadd.f32 %v2493_v34, %v10890_v4 }
 0x5e1   :  { %v2547_v50 = vsel %vm1473_vm2, %v11556_v53, -inf }
 0x5e2   :  { %2548 = vmax.xlane.f32.xlu0 %v2547_v50 }
 0x5e4   :  { %8737 = vmatmul.msk.f32.gmra.mxu1 %vm1473_vm2, %v2792_v6  ;;  %v11573_v29 = vpop.f32.mrf.mxu2 }
 0x5ec   :  { %v2187_v46 = vpop.f32.mrf.mxu2 }
 0x5ed   :  { %v2495_v1 = vmul.f32 0.25, %v2187_v46 }
 0x5f4   :  { %v2381_v28 = vpop.f32.mrf.mxu2 }
 0x5f5   :  { %v2505_v41 = vmul.f32 0.25, %v2381_v28 }
 0x5fc   :  { %v2384_v38 = vpop.f32.mrf.mxu2 }
 0x5fd   :  { %v2506_v33 = vmul.f32 0.25, %v2384_v38 }
 0x5ff   :  { %v11610_v50 = vadd.f32 %v2506_v33, %v10890_v4 }
 0x604   :  { %v11568_v32 = vpop.f32.mrf.mxu3  ;;  %v11646_v33 = vpop.f32.mrf.mxu0 }
 0x60c   :  { %v11570_v7 = vpop.f32.mrf.mxu3 }
 0x611   :  { %v2606_v40 = vpop.xlane.xlu2 %2605 }
 0x612   :  { %v2632_v22 = vsub.f32 %v11497_v26, %v2606_v40 }
 0x614   :  { %v2678_v42 = vmul.f32 1.442695, %v2632_v22  ;;  %v11575_v39 = vpop.f32.mrf.mxu3 }
 0x616   :  { %9429 = vpow2.f32 %v2678_v42 }
 0x619   :  { %v2747_v2 = vpop.xlane.xlu2 %2746 }
 0x61a   :  { %9431 = vrcp.f32 %v2747_v2  ;;  %v2586_v2 = vsel %vm1473_vm2, %v11610_v50, -inf }
 0x61c   :  { %v11577_v12 = vpop.eup %9429  ;;  %v2234_v21 = vpop.f32.mrf.mxu3 }
 0x61d   :  { %v2748_v11 = vsel %vm1473_vm2, %v11577_v12, 0.0  ;;  %v2497_v40 = vmul.f32 0.25, %v2234_v21 }
 0x61e   :  { %2749 = vadd.xlane.f32.xlu1 %v2748_v11 }
 0x61f   :  { %v11617_v11 = vadd.f32 %v2497_v40, %v10890_v4 }
 0x620   :  { %v9432_v58 = vpop.eup %9431 }
 0x621   :  { %v9105_v8 = vpop.permute.xlu2 %9104  ;;  %v2799_v62 = vmul.f32 %v9432_v58, %v11505_v17  ;;  %v11591_v17 = vadd.f32 %v2495_v1, %v10890_v4 }
 0x622   :  { %v9106_v16 = vunpack.i.l.bf16 %v9105_v8  ;;  %v9107_v26 = vunpack.i.h.bf16 %v9105_v8  ;;  %v2559_v8 = vsel %vm1473_vm2, %v11617_v11, -inf }
 0x623   :  { %v2553_v37 = vsel %vm1473_vm2, %v11591_v17, -inf }
 0x624   :  { %v2237_v36 = vpop.f32.mrf.mxu3  ;;  %3142 = vmatpush.msrb.mxu0 %v9106_v16  ;;  %v2387_v16 = vpop.f32.mrf.mxu2 }
 0x625   :  { %v2498_v46 = vmul.f32 0.25, %v2237_v36 }
 0x626   :  { %3143 = vmatpush.msrb.mxu0 %v9107_v26  ;;  %v2753_v26 = vpop.xlane.xlu0 %2752 }
 0x627   :  { %8744 = vmatmul.msk.f32.vlgmr.msrb.gmra.mxu0 %vm1473_vm2, %v2799_v62  ;;  %v11627_v58 = vadd.f32 %v2498_v46, %v10890_v4  ;;  %v2507_v62 = vmul.f32 0.25, %v2387_v16 }
 0x629   :  { %v3181_v0 = vpop.permute.xlu2 %3180  ;;  %v2562_v28 = vsel %vm1473_vm2, %v11627_v58, -inf  ;;  %v11632_v36 = vadd.f32 %v2507_v62, %v10890_v4 }
 0x62a   :  { %v3251_v59 = vsel %vm1057_vm12, %v11468_v35, %v3181_v0 }
 0x62b   :  { %v11586_v14 = vadd.f32 %v3251_v59, %v14929_v44  ;;  %v2589_v44 = vsel %vm1473_vm2, %v11632_v36, -inf }
 0x62c   :  { %v2431_v25 = vpop.f32.mrf.mxu3 }
 0x62d   :  { %v3301_v55 = vsel %vm300_vm1, %v11586_v14, 0.0  ;;  %v2508_v0 = vmul.f32 0.25, %v2431_v25 }
 0x62e   :  { %3302 = vadd.xlane.f32.xlu0 %v3301_v55  ;;  %v2494_v55 = vmul.f32 0.25, %v11573_v29 }
 0x62f   :  { %v11639_v38 = vadd.f32 %v2508_v0, %v10890_v4 }
 0x631   :  { %v3183_v15 = vpop.permute.xlu2 %3182 }
 0x632   :  { %v3252_v10 = vsel %vm1057_vm12, %v11478_v63, %v3183_v15  ;;  %v11607_v63 = vadd.f32 %v2505_v41, %v10890_v4 }
 0x633   :  { %v11596_v61 = vadd.f32 %v3252_v10, %v14930_v31  ;;  %v2518_v10 = vadd.f32 %v2494_v55, %v10890_v4  ;;  %v2592_v31 = vsel %vm1473_vm2, %v11639_v38, -inf }
 0x634   :  { %v11598_v35 = vpop.f32.mrf.mxu3  ;;  %v2583_v42 = vsel %vm1473_vm2, %v11607_v63, -inf }
 0x635   :  { %v3304_v34 = vsel %vm300_vm1, %v11596_v61, 0.0  ;;  %v2550_v41 = vsel %vm1473_vm2, %v2518_v10, -inf }
 0x636   :  { %3305 = vadd.xlane.f32.xlu2 %v3304_v34  ;;  %2554 = vmax.xlane.f32.xlu0 %v2553_v37  ;;  %v2972_v34 = vpop.f32.mrf.mxu0 }
 0x637   :  { %3178 = vrot.lane.b32.xlu1 %v11527_v24, %s10022_s24 }
 0x63c   :  { %v2437_v6 = vpop.f32.mrf.mxu3 }
 0x63d   :  { %v2510_v22 = vmul.f32 0.25, %v2437_v6 }
 0x63e   :  { %2584 = vmax.xlane.f32.xlu0 %v2583_v42  ;;  %2587 = vmax.xlane.f32.xlu2 %v2586_v2 }
 0x63f   :  { %v11620_v24 = vadd.f32 %v2510_v22, %v10890_v4  ;;  %v2975_v6 = vpop.f32.mrf.mxu0 }
 0x641   :  { %v2598_v21 = vsel %vm1473_vm2, %v11620_v24, -inf }
 0x646   :  { %2560 = vmax.xlane.f32.xlu0 %v2559_v8  ;;  %2599 = vmax.xlane.f32.xlu2 %v2598_v21 }
 0x64e   :  { %2563 = vmax.xlane.f32.xlu0 %v2562_v28  ;;  %v14931_v28 = vld [vmem:[#allocation11_spill] sm:$0xff] }
 0x651   :  { %v11648_v29 = vpop.f32.mrf.mxu1 }
 0x655   :  { %v2549_v59 = vpop.xlane.xlu0 %2548 }
 0x656   :  { %v2613_v1 = vsub.f32 %v11556_v53, %v2549_v59  ;;  %2590 = vmax.xlane.f32.xlu0 %v2589_v44 }
 0x658   :  { %v2640_v15 = vmul.f32 1.442695, %v2613_v1  ;;  %v2509_v1 = vmul.f32 0.25, %v11598_v35 }
 0x659   :  { %v11651_v37 = vpop.f32.mrf.mxu1 }
 0x65a   :  { %9433 = vpow2.f32 %v2640_v15 }
 0x65e   :  { %2593 = vmax.xlane.f32.xlu0 %v2592_v31  ;;  %v11676_v31 = vadd.f32 %v2509_v1, %v10890_v4 }
 0x660   :  { %v9434_v25 = vpop.eup %9433 }
 0x661   :  { %2551 = vmax.xlane.f32.xlu1 %v2550_v41  ;;  %v2691_v53 = vsel %vm1473_vm2, %v9434_v25, 0.0  ;;  %v3019_v40 = vpop.f32.mrf.mxu1 }
 0x662   :  { %2692 = vadd.xlane.f32.xlu2 %v2691_v53 }
 0x67a   :  { %3198 = vrot.lane.b32.xlu2 %v2972_v34, %s10022_s24 }
 0x682   :  { %3200 = vrot.lane.b32.xlu2 %v2975_v6, %s10022_s24 }
 0x68a   :  { %3206 = vrot.lane.b32.xlu2 %v3019_v40, %s10022_s24 }
 0x691   :  { %v2750_v22 = vpop.xlane.xlu1 %2749 }
 0x692   :  { %9435 = vrcp.f32 %v2750_v22 }
 0x693   :  { %9437 = vrcp.f32 %v2753_v26  ;;  %v2496_v26 = vmul.f32 0.25, %v11575_v39  ;;  %v2595_v39 = vsel %vm1473_vm2, %v11676_v31, -inf }
 0x698   :  { %v9436_v42 = vpop.eup %9435 }
 0x699   :  { %v2800_v2 = vmul.f32 %v9436_v42, %v11577_v12  ;;  %v9438_v46 = vpop.eup %9437 }
 0x69a   :  { %v2801_v8 = vmul.f32 %v9438_v46, %v11481_v57  ;;  %v2520_v57 = vadd.f32 %v2496_v26, %v10890_v4 }
 0x69b   :  { %8745 = vmatmul.msk.f32.gmra.mxu0 %vm1473_vm2, %v2800_v2 }
 0x69c   :  { %v2556_v55 = vsel %vm1473_vm2, %v2520_v57, -inf }
 0x6a1   :  { %v11659_v21 = vpop.xlane.xlu0 %3302 }
 0x6a3   :  { %8746 = vmatmul.msk.f32.gmra.mxu0 %vm1473_vm2, %v2801_v8 }
 0x6a9   :  { %v3179_v16 = vpop.permute.xlu1 %3178  ;;  %v2555_v59 = vpop.xlane.xlu0 %2554 }
 0x6aa   :  { %v3250_v62 = vsel %vm1057_vm12, %v11463_v49, %v3179_v16  ;;  %v2615_v44 = vsub.f32 %v11591_v17, %v2555_v59  ;;  %v11673_v15 = vpop.xlane.xlu2 %3305 }
 0x6ab   :  { %v11664_v0 = vadd.f32 %v3250_v62, %v14931_v28 }
 0x6ac   :  { %v2644_v49 = vmul.f32 1.442695, %v2615_v44 }
 0x6ad   :  { %v3298_v12 = vsel %vm300_vm1, %v11664_v0, 0.0 }
 0x6ae   :  { %3299 = vadd.xlane.f32.xlu1 %v3298_v12  ;;  %9439 = vpow2.f32 %v2644_v49 }
 0x6b1   :  { %v2585_v34 = vpop.xlane.xlu0 %2584 }
 0x6b2   :  { %v2588_v53 = vpop.xlane.xlu2 %2587  ;;  %v2625_v42 = vsub.f32 %v11607_v63, %v2585_v34 }
 0x6b3   :  { %v2626_v63 = vsub.f32 %v11610_v50, %v2588_v53 }
 0x6b4   :  { %v11680_v41 = vpop.eup %9439  ;;  %v2664_v46 = vmul.f32 1.442695, %v2625_v42  ;;  %v14932_v42 = vld [vmem:[#allocation26_spill] sm:$0xff] }
 0x6b5   :  { %v2697_v17 = vsel %vm1473_vm2, %v11680_v41, 0.0 }
 0x6b6   :  { %2557 = vmax.xlane.f32.xlu1 %v2556_v55 }
 0x6b9   :  { %v2561_v16 = vpop.xlane.xlu0 %2560 }
 0x6ba   :  { %v11684_v35 = vpop.xlane.xlu2 %2599  ;;  %v2617_v26 = vsub.f32 %v11617_v11, %v2561_v16 }
 0x6be   :  { %2596 = vmax.xlane.f32.xlu1 %v2595_v39 }
 0x6c1   :  { %v2564_v1 = vpop.xlane.xlu0 %2563 }
 0x6c2   :  { %v2618_v11 = vsub.f32 %v11627_v58, %v2564_v1 }
 0x6c4   :  { %v2650_v39 = vmul.f32 1.442695, %v2618_v11 }
 0x6c6   :  { %2698 = vadd.xlane.f32.xlu1 %v2697_v17 }
 0x6d4   :  { %v2552_v6 = vpop.xlane.xlu1 %2551 }
 0x6d5   :  { %v2614_v40 = vsub.f32 %v2518_v10, %v2552_v6  ;;  %v2693_v22 = vpop.xlane.xlu2 %2692  ;;  %v2648_v10 = vmul.f32 1.442695, %v2617_v26  ;;  %v3372_v26 = vmul.f32 %v11673_v15, %v14932_v42 }
 0x6d6   :  { %9441 = vrcp.f32 %v2693_v22 }
 0x6d7   :  { %v2642_v2 = vmul.f32 1.442695, %v2614_v40 }
 0x6d9   :  { %9443 = vpow2.f32 %v2642_v2 }
 0x6da   :  { %9445 = vpow2.f32 %v2664_v46  ;;  %v3371_v46 = vmul.f32 %v11659_v21, %v14932_v42 }
 0x6db   :  { %9447 = vpow2.f32 %v2648_v10  ;;  %v11728_v10 = vsub.f32 %v11596_v61, %v3372_v26 }
 0x6dc   :  { %v9442_v8 = vpop.eup %9441 }
 0x6dd   :  { %v2781_v62 = vmul.f32 %v9442_v8, %v9434_v25  ;;  %v2666_v25 = vmul.f32 1.442695, %v2626_v63 }
 0x6df   :  { %v9444_v28 = vpop.eup %9443  ;;  %8726 = vmatmul.msk.f32.vlgmr.msra.gmra.mxu2 %vm1473_vm2, %v2781_v62  ;;  %9449 = vpow2.f32 %v2666_v25  ;;  %v3420_v25 = vmul.f32 %v11728_v10, %v11728_v10 }
 0x6e0   :  { %v2694_v12 = vsel %vm1473_vm2, %v9444_v28, 0.0  ;;  %v11690_v59 = vpop.eup %9445  ;;  %9451 = vpow2.f32 %v2650_v39 }
 0x6e1   :  { %2695 = vadd.xlane.f32.xlu0 %v2694_v12  ;;  %v2727_v44 = vsel %vm1473_vm2, %v11690_v59, 0.0  ;;  %v11695_v55 = vpop.eup %9447  ;;  %v3448_v1 = vsel %vm300_vm1, %v3420_v25, 0.0 }
 0x6e2   :  { %v2703_v49 = vsel %vm1473_vm2, %v11695_v55, 0.0 }
 0x6e5   :  { %v9450_v17 = vpop.eup %9449 }
 0x6e6   :  { %v2730_v50 = vsel %vm1473_vm2, %v9450_v17, 0.0  ;;  %v11701_v53 = vpop.eup %9451 }
 0x6e7   :  { %v2706_v34 = vsel %vm1473_vm2, %v11701_v53, 0.0 }
 0x6e9   :  { %2728 = vadd.xlane.f32.xlu0 %v2727_v44  ;;  %v2591_v44 = vpop.xlane.xlu0 %2590 }
 0x6f1   :  { %2704 = vadd.xlane.f32.xlu0 %v2703_v49  ;;  %v2594_v15 = vpop.xlane.xlu0 %2593 }
 0x6f9   :  { %2731 = vadd.xlane.f32.xlu0 %v2730_v50 }
 0x701   :  { %2707 = vadd.xlane.f32.xlu0 %v2706_v34 }
 0x715   :  { %3196 = vrot.lane.b32.xlu0 %v11646_v33, %s10022_s24  ;;  %v11718_v33 = vsub.f32 %v11586_v14, %v3371_v46 }
 0x717   :  { %v3419_v21 = vmul.f32 %v11718_v33, %v11718_v33 }
 0x719   :  { %v3445_v63 = vsel %vm300_vm1, %v3419_v21, 0.0 }
 0x721   :  { %v3300_v58 = vpop.xlane.xlu1 %3299 }
 0x722   :  { %v3370_v2 = vmul.f32 %v3300_v58, %v14932_v42 }
 0x724   :  { %v11713_v16 = vsub.f32 %v11664_v0, %v3370_v2 }
 0x729   :  { %v2558_v6 = vpop.xlane.xlu1 %2557 }
 0x72a   :  { %v2616_v40 = vsub.f32 %v2520_v57, %v2558_v6  ;;  %v3418_v57 = vmul.f32 %v11713_v16, %v11713_v16 }
 0x72c   :  { %v2646_v22 = vmul.f32 1.442695, %v2616_v40  ;;  %v3442_v12 = vsel %vm300_vm1, %v3418_v57, 0.0  ;;  %v3199_v57 = vpop.permute.xlu2 %3198 }
 0x72e   :  { %9453 = vpow2.f32 %v2646_v22 }
 0x731   :  { %v2597_v11 = vpop.xlane.xlu1 %2596 }
 0x734   :  { %v11710_v8 = vpop.eup %9453 }
 0x735   :  { %v2700_v62 = vsel %vm1473_vm2, %v11710_v8, 0.0 }
 0x736   :  { %2701 = vadd.xlane.f32.xlu1 %v2700_v62 }
 0x739   :  { %v2699_v39 = vpop.xlane.xlu1 %2698 }
 0x73e   :  { %3443 = vadd.xlane.f32.xlu1 %v3442_v12  ;;  %v14933_v12 = vld [vmem:[#allocation21_spill] sm:$0xff] }
 0x73f   :  { %3446 = vadd.xlane.f32.xlu0 %v3445_v63 }
 0x747   :  { %3449 = vadd.xlane.f32.xlu0 %v3448_v1 }
 0x754   :  { %v2696_v49 = vpop.xlane.xlu0 %2695 }
 0x755   :  { %9455 = vrcp.f32 %v2696_v49  ;;  %v3201_v49 = vpop.permute.xlu2 %3200 }
 0x756   :  { %9457 = vrcp.f32 %v2699_v39 }
 0x757   :  { %3202 = vrot.lane.b32.xlu1 %v11648_v29, %s10022_s24 }
 0x75b   :  { %v9456_v50 = vpop.eup %9455 }
 0x75c   :  { %v2729_v34 = vpop.xlane.xlu0 %2728  ;;  %v2782_v58 = vmul.f32 %v9456_v50, %v9444_v28  ;;  %v9458_v6 = vpop.eup %9457 }
 0x75d   :  { %9459 = vrcp.f32 %v2729_v34  ;;  %v2783_v22 = vmul.f32 %v9458_v6, %v11680_v41  ;;  %v3260_v41 = vsel %vm1057_vm12, %v11540_v27, %v3199_v57  ;;  %v2627_v27 = vsub.f32 %v11632_v36, %v2591_v44  ;;  %v14935_v34 = vld [vmem:[#allocation22_spill] sm:$0xff] }
 0x75e   :  { %8727 = vmatmul.msk.f32.gmra.mxu2 %vm1473_vm2, %v2782_v58  ;;  %v11748_v63 = vadd.f32 %v3260_v41, %v14933_v12  ;;  %v2630_v36 = vsub.f32 %v11620_v24, %v11684_v35  ;;  %v282_v57 = vld [vmem:[#allocation5 + $0xb0] sm:$0xff]  ;;  %v280_v41 = vld [vmem:[#allocation5 + $0xa0] sm:$0xff] }
 0x75f   :  { %3204 = vrot.lane.b32.xlu1 %v11651_v37, %s10022_s24  ;;  %v2628_v37 = vsub.f32 %v11639_v38, %v2594_v15  ;;  %v14934_v38 = vld [vmem:[#allocation20_spill] sm:$0xff] }
 0x760   :  { %v3328_v1 = vsel %vm300_vm1, %v11748_v63, 0.0 }
 0x761   :  { %v2670_v21 = vmul.f32 1.442695, %v2628_v37  ;;  %v281_v37 = vld [vmem:[#allocation5 + $0xa8] sm:$0xff] }
 0x763   :  { %v9460_v2 = vpop.eup %9459 }
 0x764   :  { %v2705_v40 = vpop.xlane.xlu0 %2704  ;;  %v2793_v29 = vmul.f32 %v9460_v2, %v11690_v59  ;;  %v2629_v59 = vsub.f32 %v11676_v31, %v2597_v11  ;;  %v3261_v31 = vsel %vm1057_vm12, %v11546_v51, %v3201_v49 }
 0x765   :  { %v11766_v58 = vadd.f32 %v3261_v31, %v14935_v34 }
 0x766   :  { %8728 = vmatmul.msk.f32.gmra.mxu2 %vm1473_vm2, %v2783_v22  ;;  %v2672_v39 = vmul.f32 1.442695, %v2629_v59  ;;  %v2674_v22 = vmul.f32 1.442695, %v2630_v36 }
 0x767   :  { %14936 = vst [vmem:[#allocation40_spill] sm:$0xff] %v11766_v58  ;;  %v3331_v44 = vsel %vm300_vm1, %v11766_v58, 0.0 }
 0x76c   :  { %v2732_v46 = vpop.xlane.xlu0 %2731 }
 0x76d   :  { %9461 = vrcp.f32 %v2732_v46 }
 0x76e   :  { %8738 = vmatmul.msk.f32.vlgmr.msrb.gmra.mxu2 %vm1473_vm2, %v2793_v29  ;;  %9463 = vpow2.f32 %v2670_v21 }
 0x76f   :  { %9465 = vpow2.f32 %v2672_v39  ;;  %v2881_v39 = vpop.f32.mrf.mxu2 }
 0x773   :  { %v9462_v28 = vpop.eup %9461 }
 0x774   :  { %v2794_v62 = vmul.f32 %v9462_v28, %v9450_v17  ;;  %v2708_v26 = vpop.xlane.xlu0 %2707  ;;  %v11763_v11 = vpop.eup %9463  ;;  %v283_v28 = vld [vmem:[#allocation5 + $0xb8] sm:$0xff] }
 0x775   :  { %v2736_v6 = vsel %vm1473_vm2, %v11763_v11, 0.0  ;;  %v11774_v51 = vpop.eup %9465  ;;  %3961 = vmatpush.msrb.mxu1 %v283_v28 }
 0x776   :  { %8739 = vmatmul.msk.f32.gmra.mxu2 %vm1473_vm2, %v2794_v62  ;;  %v2739_v29 = vsel %vm1473_vm2, %v11774_v51, 0.0 }
 0x777   :  { %3962 = vmatpush.msrb.mxu1 %v282_v57 }
 0x779   :  { %3963 = vmatpush.msrb.mxu1 %v281_v37  ;;  %v11796_v37 = vld [vmem:[#allocation5 + $0x142] ss:$0 sm:$0xff] }
 0x77b   :  { %3964 = vmatpush.msrb.mxu1 %v280_v41 }
 0x787   :  { %v3197_v25 = vpop.permute.xlu0 %3196 }
 0x788   :  { %v3259_v17 = vsel %vm1057_vm12, %v11533_v43, %v3197_v25  ;;  %v2668_v43 = vmul.f32 1.442695, %v2627_v27 }
 0x789   :  { %v11756_v15 = vadd.f32 %v3259_v17, %v14934_v38  ;;  %3329 = vadd.xlane.f32.xlu1 %v3328_v1 }
 0x78a   :  { %9467 = vpow2.f32 %v2668_v43 }
 0x78b   :  { %v3325_v50 = vsel %vm300_vm1, %v11756_v15, 0.0  ;;  %9469 = vpow2.f32 %v2674_v22 }
 0x78c   :  { %3326 = vadd.xlane.f32.xlu0 %v3325_v50 }
 0x790   :  { %v11776_v2 = vpop.eup %9467 }
 0x791   :  { %2737 = vadd.xlane.f32.xlu1 %v2736_v6  ;;  %v2733_v46 = vsel %vm1473_vm2, %v11776_v2, 0.0  ;;  %v11782_v24 = vpop.eup %9469 }
 0x792   :  { %v2742_v35 = vsel %vm1473_vm2, %v11782_v24, 0.0 }
 0x794   :  { %3332 = vadd.xlane.f32.xlu0 %v3331_v44 }
 0x799   :  { %2740 = vadd.xlane.f32.xlu1 %v2739_v29 }
 0x79c   :  { %2734 = vadd.xlane.f32.xlu0 %v2733_v46 }
 0x7a4   :  { %2743 = vadd.xlane.f32.xlu0 %v2742_v35 }
 0x7a9   :  { %v2702_v62 = vpop.xlane.xlu1 %2701 }
 0x7aa   :  { %9471 = vrcp.f32 %v2702_v62 }
 0x7ab   :  { %9473 = vrcp.f32 %v2705_v40 }
 0x7b0   :  { %v9472_v21 = vpop.eup %9471 }
 0x7b1   :  { %v2784_v12 = vmul.f32 %v9472_v21, %v11710_v8  ;;  %v3444_v59 = vpop.xlane.xlu1 %3443  ;;  %v9474_v27 = vpop.eup %9473 }
 0x7b2   :  { %v3514_v25 = vmul.f32 %v3444_v59, %v14932_v42  ;;  %v3447_v17 = vpop.xlane.xlu0 %3446  ;;  %v2785_v40 = vmul.f32 %v9474_v27, %v11695_v55  ;;  %v11798_v59 = vld [vmem:[#allocation5 + $0x143] ss:$0 sm:$0xff] }
 0x7b3   :  { %v3515_v1 = vmul.f32 %v3447_v17, %v14932_v42  ;;  %8729 = vmatmul.msk.f32.vlgmr.msra.gmra.mxu3 %vm1473_vm2, %v2784_v12 }
 0x7b4   :  { %v3538_v49 = vadd.f32 1e-05, %v3514_v25 }
 0x7b5   :  { %v3539_v38 = vadd.f32 1e-05, %v3515_v1 }
 0x7b6   :  { %9475 = vrsqrt.f32 %v3538_v49  ;;  %vm3568_vm4 = vweird.f32 %v3538_v49 }
 0x7b7   :  { %9477 = vrsqrt.f32 %v3539_v38  ;;  %vm3578_vm7 = vweird.f32 %v3539_v38 }
 0x7b8   :  { %9479 = vrcp.f32 %v2708_v26  ;;  %3184 = vrot.lane.b32.xlu0 %v2881_v39, %s10022_s24 }
 0x7ba   :  { %v3450_v8 = vpop.xlane.xlu0 %3449 }
 0x7bb   :  { %v3516_v50 = vmul.f32 %v3450_v8, %v14932_v42  ;;  %8730 = vmatmul.msk.f32.gmra.mxu3 %vm1473_vm2, %v2785_v40  ;;  %v14937_v40 = vld [vmem:[#allocation23_spill] sm:$0xff] }
 0x7bc   :  { %v9476_v31 = vpop.eup %9475 }
 0x7bd   :  { %v9478_v43 = vpop.eup %9477  ;;  %v3563_v34 = vmul.f32 %v9476_v31, %v3538_v49  ;;  %v3540_v6 = vadd.f32 1e-05, %v3516_v50  ;;  %vm3569_vm3 = vweird.f32 %v9476_v31 }
 0x7be   :  { %v9480_v36 = vpop.eup %9479  ;;  %v3573_v44 = vmul.f32 %v9478_v43, %v3539_v38  ;;  %vm3579_vm5 = vweird.f32 %v9478_v43  ;;  %vm3570_vm6 = vmor %vm3568_vm4, %vm3569_vm3 }
 0x7bf   :  { %v3564_v22 = vmul.f32 %v9476_v31, %v3563_v34  ;;  %9481 = vrsqrt.f32 %v3540_v6  ;;  %v2786_v26 = vmul.f32 %v9480_v36, %v11701_v53  ;;  %vm3580_vm8 = vmor %vm3578_vm7, %vm3579_vm5  ;;  %vm3588_vm10 = vweird.f32 %v3540_v6 }
 0x7c0   :  { %v3574_v29 = vmul.f32 %v9478_v43, %v3573_v44 }
 0x7c1   :  { %v3565_v46 = vmul.f32 0.5, %v3564_v22 }
 0x7c2   :  { %v3575_v35 = vmul.f32 0.5, %v3574_v29 }
 0x7c3   :  { %v3566_v28 = vsub.f32 1.5, %v3565_v46  ;;  %8731 = vmatmul.msk.f32.gmra.mxu3 %vm1473_vm2, %v2786_v26 }
 0x7c4   :  { %v3576_v55 = vsub.f32 1.5, %v3575_v35 }
 0x7c5   :  { %v9482_v62 = vpop.eup %9481  ;;  %v3567_v57 = vmul.f32 %v9476_v31, %v3566_v28 }
 0x7c6   :  { %v3577_v41 = vmul.f32 %v9478_v43, %v3576_v55  ;;  %v3583_v21 = vmul.f32 %v9482_v62, %v3540_v6  ;;  %vm3589_vm9 = vweird.f32 %v9482_v62 }
 0x7c7   :  { %v3571_v12 = vsel %vm3570_vm6, %v9476_v31, %v3567_v57  ;;  %vm3590_vm11 = vmor %vm3588_vm10, %vm3589_vm9 }
 0x7c8   :  { %v3802_v53 = vmul.f32 %v3571_v12, %v11713_v16  ;;  %v3584_v25 = vmul.f32 %v9482_v62, %v3583_v21  ;;  %v3581_v17 = vsel %vm3580_vm8, %v9478_v43, %v3577_v41 }
 0x7c9   :  { %v3203_v1 = vpop.permute.xlu1 %3202  ;;  %v3803_v38 = vmul.f32 %v3581_v17, %v11718_v33 }
 0x7ca   :  { %v3827_v27 = vmul.f32 %v11796_v37, %v3802_v53  ;;  %v3585_v39 = vmul.f32 0.5, %v3584_v25  ;;  %v3262_v49 = vsel %vm1057_vm12, %v11515_v9, %v3203_v1 }
 0x7cb   :  { %v11805_v8 = vadd.f32 %v3262_v49, %v14937_v40  ;;  %v3828_v9 = vmul.f32 %v11796_v37, %v3803_v38  ;;  %v299_v49 = vld [vmem:[#allocation5 + $0x138] sm:$0xff]  ;;  %v298_v40 = vld [vmem:[#allocation5 + $0x130] sm:$0xff] }
 0x7cc   :  { %v3852_v50 = vadd.f32 %v11798_v59, %v3827_v27  ;;  %v3586_v31 = vsub.f32 1.5, %v3585_v39  ;;  %4254 = vmatpush.msra.mxu2 %v299_v49  ;;  %v295_v38 = vld [vmem:[#allocation5 + $0x118] sm:$0xff] }
 0x7cd   :  { %14938 = vst [vmem:[#allocation46_spill] sm:$0xff] %v11805_v8  ;;  %v3334_v16 = vsel %vm300_vm1, %v11805_v8, 0.0  ;;  %v3853_v44 = vadd.f32 %v11798_v59, %v3828_v9  ;;  %v290_v9 = vld [vmem:[#allocation5 + $0xf0] sm:$0xff] }
 0x7ce   :  { %v3587_v43 = vmul.f32 %v9482_v62, %v3586_v31  ;;  %8747 = vmatmul.msk.f32.vlgmr.msrb.gmra.mxu1 %vm300_vm1, %v3852_v50  ;;  %3335 = vadd.xlane.f32.xlu2 %v3334_v16  ;;  %v297_v50 = vld [vmem:[#allocation5 + $0x128] sm:$0xff]  ;;  %v294_v31 = vld [vmem:[#allocation5 + $0x110] sm:$0xff]  ;;  %v292_v16 = vld [vmem:[#allocation5 + $0x100] sm:$0xff] }
 0x7cf   :  { %4255 = vmatpush.msra.mxu2 %v298_v40 }
 0x7d0   :  { %v3591_v34 = vsel %vm3590_vm11, %v9482_v62, %v3587_v43  ;;  %v291_v43 = vld [vmem:[#allocation5 + $0xf8] sm:$0xff] }
 0x7d1   :  { %v3804_v36 = vmul.f32 %v3591_v34, %v11728_v10  ;;  %v11822_v10 = vpop.permute.xlu1 %3204  ;;  %4256 = vmatpush.msra.mxu2 %v297_v50  ;;  %v289_v34 = vld [vmem:[#allocation5 + $0xe8] sm:$0xff] }
 0x7d3   :  { %v3829_v33 = vmul.f32 %v11796_v37, %v3804_v36  ;;  %v11840_v36 = vpop.permute.xlu2 %3206 }
 0x7d5   :  { %v3854_v22 = vadd.f32 %v11798_v59, %v3829_v33  ;;  %v287_v33 = vld [vmem:[#allocation5 + $0xd8] sm:$0xff] }
 0x7d6   :  { %8748 = vmatmul.msk.f32.gmra.mxu1 %vm300_vm1, %v3853_v44  ;;  %v288_v44 = vld [vmem:[#allocation5 + $0xe0] sm:$0xff] }
 0x7de   :  { %8749 = vmatmul.msk.f32.gmra.mxu1 %vm300_vm1, %v3854_v22 }
 0x7e1   :  { %v2884_v29 = vpop.f32.mrf.mxu2 }
 0x7e6   :  { %3186 = vrot.lane.b32.xlu2 %v2884_v29, %s10022_s24  ;;  %v286_v29 = vld [vmem:[#allocation5 + $0xd0] sm:$0xff] }
 0x7e9   :  { %v2887_v6 = vpop.f32.mrf.mxu2 }
 0x7ee   :  { %3188 = vrot.lane.b32.xlu2 %v2887_v6, %s10022_s24  ;;  %v285_v6 = vld [vmem:[#allocation5 + $0xc8] sm:$0xff] }
 0x7f1   :  { %v3057_v46 = vpop.f32.mrf.mxu2 }
 0x7f2   :  { %3208 = vrot.lane.b32.xlu0 %v3057_v46, %s10022_s24 }
 0x7f9   :  { %v3060_v26 = vpop.f32.mrf.mxu2 }
 0x7fa   :  { %3210 = vrot.lane.b32.xlu0 %v3060_v26, %s10022_s24  ;;  %v284_v26 = vld [vmem:[#allocation5 + $0xc0] sm:$0xff] }
 0x7fc   :  { %v11825_v35 = vpop.xlane.xlu1 %3329 }
 0x7ff   :  { %v11827_v28 = vpop.xlane.xlu0 %3326 }
 0x804   :  { %v2738_v55 = vpop.xlane.xlu1 %2737 }
 0x805   :  { %9483 = vrcp.f32 %v2738_v55 }
 0x807   :  { %v11829_v62 = vpop.xlane.xlu0 %3332 }
 0x80b   :  { %v9484_v57 = vpop.eup %9483 }
 0x80c   :  { %v2796_v41 = vmul.f32 %v9484_v57, %v11763_v11  ;;  %v2741_v21 = vpop.xlane.xlu1 %2740  ;;  %v11846_v57 = vld [vmem:[#allocation5 + $0x145] ss:$0 sm:$0xff] }
 0x80d   :  { %9485 = vrcp.f32 %v2741_v21 }
 0x80e   :  { %8741 = vmatmul.msk.f32.vlgmr.msrb.gmra.mxu3 %vm1473_vm2, %v2796_v41 }
 0x80f   :  { %v2735_v12 = vpop.xlane.xlu0 %2734 }
 0x810   :  { %9487 = vrcp.f32 %v2735_v12 }
 0x813   :  { %v9486_v53 = vpop.eup %9485 }
 0x814   :  { %v2797_v25 = vmul.f32 %v9486_v53, %v11774_v51  ;;  %v296_v51 = vld [vmem:[#allocation5 + $0x120] sm:$0xff] }
 0x815   :  { %4257 = vmatpush.msra.mxu2 %v296_v51 }
 0x816   :  { %v9488_v17 = vpop.eup %9487  ;;  %8742 = vmatmul.msk.f32.gmra.mxu3 %vm1473_vm2, %v2797_v25 }
 0x817   :  { %v2744_v1 = vpop.xlane.xlu0 %2743  ;;  %v2795_v27 = vmul.f32 %v9488_v17, %v11776_v2  ;;  %4258 = vmatpush.msra.mxu2 %v295_v38  ;;  %v293_v2 = vld [vmem:[#allocation5 + $0x108] sm:$0xff] }
 0x818   :  { %9489 = vrcp.f32 %v2744_v1 }
 0x819   :  { %8740 = vmatmul.msk.f32.gmra.mxu2 %vm1473_vm2, %v2795_v27 }
 0x81a   :  { %4259 = vmatpush.msra.mxu2 %v294_v31 }
 0x81c   :  { %4260 = vmatpush.msra.mxu2 %v293_v2 }
 0x81e   :  { %v9490_v39 = vpop.eup %9489  ;;  %4261 = vmatpush.msra.mxu2 %v292_v16 }
 0x81f   :  { %v2798_v11 = vmul.f32 %v9490_v39, %v11782_v24  ;;  %v14939_v39 = vld [vmem:[#allocation16_spill] sm:$0xff] }
 0x820   :  { %4262 = vmatpush.msra.mxu2 %v291_v43 }
 0x821   :  { %8743 = vmatmul.msk.f32.gmra.mxu3 %vm1473_vm2, %v2798_v11 }
 0x822   :  { %4263 = vmatpush.msra.mxu2 %v290_v9 }
 0x824   :  { %4264 = vmatpush.msra.mxu2 %v289_v34 }
 0x826   :  { %4265 = vmatpush.msra.mxu2 %v288_v44 }
 0x828   :  { %4266 = vmatpush.msra.mxu2 %v287_v33 }
 0x82a   :  { %4267 = vmatpush.msra.mxu2 %v286_v29 }
 0x82c   :  { %4268 = vmatpush.msra.mxu2 %v285_v6 }
 0x82e   :  { %4269 = vmatpush.msra.mxu2 %v284_v26 }
 0x836   :  { %v2925_v24 = vpop.f32.mrf.mxu3 }
 0x837   :  { %3190 = vrot.lane.b32.xlu2 %v2925_v24, %s10022_s24 }
 0x83e   :  { %v2928_v22 = vpop.f32.mrf.mxu3 }
 0x83f   :  { %3192 = vrot.lane.b32.xlu1 %v2928_v22, %s10022_s24 }
 0x841   :  { %v11843_v46 = vpop.xlane.xlu2 %3335 }
 0x846   :  { %v2931_v55 = vpop.f32.mrf.mxu3 }
 0x847   :  { %3194 = vrot.lane.b32.xlu1 %v2931_v55, %s10022_s24 }
 0x849   :  { %v3187_v41 = vpop.permute.xlu2 %3186 }
 0x84a   :  { %v3254_v2 = vsel %vm1057_vm12, %v11517_v45, %v3187_v41 }
 0x84b   :  { %v3966_v21 = vpop.f32.mrf.mxu1 }
 0x84c   :  { %v3967_v12 = vadd.f32 %v11846_v57, %v3966_v21 }
 0x84e   :  { %v4062_v53 = vmul.f32 0.044715, %v3967_v12  ;;  %v4038_v26 = vmul.f32 0.5, %v3967_v12 }
 0x850   :  { %v4086_v25 = vmul.f32 %v4062_v53, %v3967_v12 }
 0x851   :  { %v3189_v17 = vpop.permute.xlu2 %3188 }
 0x852   :  { %v4110_v1 = vmul.f32 %v4086_v25, %v3967_v12  ;;  %v3255_v27 = vsel %vm1057_vm12, %v11523_v13, %v3189_v17  ;;  %v14940_v13 = vld [vmem:[#allocation15_spill] sm:$0xff] }
 0x853   :  { %v11852_v11 = vadd.f32 %v3255_v27, %v14939_v39  ;;  %v3969_v49 = vpop.f32.mrf.mxu1  ;;  %v11860_v24 = vadd.f32 %v3254_v2, %v14940_v13  ;;  %v14941_v2 = vld [vmem:[#allocation17_spill] sm:$0xff] }
 0x854   :  { %v4134_v40 = vadd.f32 %v4110_v1, %v3967_v12  ;;  %v3970_v50 = vadd.f32 %v11846_v57, %v3969_v49  ;;  %v14942_v13 = vld [vmem:[#allocation25_spill] sm:$0xff] }
 0x855   :  { %v3313_v51 = vsel %vm300_vm1, %v11852_v11, 0.0  ;;  %v3310_v6 = vsel %vm300_vm1, %v11860_v24, 0.0 }
 0x856   :  { %v4158_v38 = vmul.f32 0.7978846, %v4134_v40  ;;  %v4063_v31 = vmul.f32 0.044715, %v3970_v50  ;;  %3314 = vadd.xlane.f32.xlu0 %v3313_v51  ;;  %v4039_v1 = vmul.f32 0.5, %v3970_v50 }
 0x858   :  { %9491 = vtanh.f32 %v4158_v38  ;;  %v4087_v16 = vmul.f32 %v4063_v31, %v3970_v50 }
 0x85a   :  { %v4111_v43 = vmul.f32 %v4087_v16, %v3970_v50 }
 0x85b   :  { %v3972_v9 = vpop.f32.mrf.mxu1 }
 0x85c   :  { %v3973_v34 = vadd.f32 %v11846_v57, %v3972_v9  ;;  %v4135_v44 = vadd.f32 %v4111_v43, %v3970_v50  ;;  %v3264_v50 = vsel %vm1057_vm12, %v11529_v47, %v11840_v36 }
 0x85d   :  { %v11876_v9 = vadd.f32 %v3264_v50, %v14942_v13 }
 0x85e   :  { %v9492_v33 = vpop.eup %9491  ;;  %v4064_v22 = vmul.f32 0.044715, %v3973_v34  ;;  %v4159_v29 = vmul.f32 0.7978846, %v4135_v44  ;;  %v4040_v40 = vmul.f32 0.5, %v3973_v34 }
 0x85f   :  { %v4206_v55 = vadd.f32 1.0, %v9492_v33 }
 0x860   :  { %3311 = vadd.xlane.f32.xlu2 %v3310_v6  ;;  %9493 = vtanh.f32 %v4159_v29  ;;  %v4088_v45 = vmul.f32 %v4064_v22, %v3973_v34  ;;  %v14943_v6 = vld [vmem:[#allocation18_spill] sm:$0xff] }
 0x861   :  { %v4230_v41 = vmul.f32 %v4206_v55, %v4038_v26  ;;  %v3185_v55 = vpop.permute.xlu0 %3184 }
 0x862   :  { %v4112_v21 = vmul.f32 %v4088_v45, %v3973_v34  ;;  %v3253_v45 = vsel %vm1057_vm12, %v11507_v5, %v3185_v55 }
 0x863   :  { %4270 = vmatmul.f32.vlgmr.msra.gmra.mxu2 %v4230_v41  ;;  %v14944_v41 = vld [vmem:[#allocation14_spill] sm:$0xff] }
 0x864   :  { %v4136_v53 = vadd.f32 %v4112_v21, %v3973_v34  ;;  %v11892_v21 = vadd.f32 %v3253_v45, %v14944_v41 }
 0x866   :  { %v9494_v25 = vpop.eup %9493  ;;  %v4160_v17 = vmul.f32 0.7978846, %v4136_v53 }
 0x867   :  { %v4207_v27 = vadd.f32 1.0, %v9494_v25 }
 0x868   :  { %9495 = vtanh.f32 %v4160_v17 }
 0x869   :  { %v4231_v39 = vmul.f32 %v4207_v27, %v4039_v1  ;;  %v3209_v27 = vpop.permute.xlu0 %3208 }
 0x86b   :  { %4273 = vmatmul.f32.gmra.mxu2 %v4231_v39  ;;  %v3263_v39 = vsel %vm1057_vm12, %v11521_v60, %v11822_v10  ;;  %v14947_v60 = vld [vmem:[#allocation19_spill] sm:$0xff] }
 0x86e   :  { %v9496_v49 = vpop.eup %9495 }
 0x86f   :  { %v4208_v51 = vadd.f32 1.0, %v9496_v49  ;;  %v14945_v49 = vld [vmem:[#allocation24_spill] sm:$0xff] }
 0x871   :  { %v4232_v38 = vmul.f32 %v4208_v51, %v4040_v40  ;;  %v11909_v40 = vadd.f32 %v3263_v39, %v14945_v49  ;;  %v3145_v39 = vpop.f32.mrf.mxu0 }
 0x873   :  { %4276 = vmatmul.f32.gmra.mxu2 %v4232_v38  ;;  %14946 = vst [vmem:[#allocation38_spill] sm:$0xff] %v11909_v40 }
 0x891   :  { %v3191_v12 = vpop.permute.xlu2 %3190  ;;  %v3101_v44 = vpop.f32.mrf.mxu3 }
 0x892   :  { %v3256_v31 = vsel %vm1057_vm12, %v11490_v3, %v3191_v12  ;;  %v3340_v3 = vsel %vm300_vm1, %v11876_v9, 0.0  ;;  %v3337_v12 = vsel %vm300_vm1, %v11909_v40, 0.0 }
 0x893   :  { %v11868_v16 = vadd.f32 %v3256_v31, %v14941_v2  ;;  %v11913_v31 = vpop.permute.xlu0 %3210 }
 0x895   :  { %v3316_v43 = vsel %vm300_vm1, %v11868_v16, 0.0 }
 0x896   :  { %3317 = vadd.xlane.f32.xlu2 %v3316_v43 }
 0x899   :  { %v3104_v33 = vpop.f32.mrf.mxu3 }
 0x89c   :  { %v3063_v34 = vpop.f32.mrf.mxu2 }
 0x89d   :  { %3212 = vrot.lane.b32.xlu1 %v3063_v34, %s10022_s24 }
 0x89e   :  { %3341 = vadd.xlane.f32.xlu2 %v3340_v3 }
 0x8a4   :  { %v3107_v47 = vpop.f32.mrf.mxu3 }
 0x8b1   :  { %v3193_v22 = vpop.permute.xlu1 %3192 }
 0x8b2   :  { %v3257_v29 = vsel %vm1057_vm12, %v11499_v20, %v3193_v22  ;;  %v3307_v20 = vsel %vm300_vm1, %v11892_v21, 0.0 }
 0x8b3   :  { %v11884_v26 = vadd.f32 %v3257_v29, %v14943_v6 }
 0x8b5   :  { %v3319_v36 = vsel %vm300_vm1, %v11884_v26, 0.0 }
 0x8b6   :  { %3320 = vadd.xlane.f32.xlu0 %v3319_v36  ;;  %3218 = vrot.lane.b32.xlu2 %v3107_v47, %s10022_s24  ;;  %v3380_v36 = vmul.f32 %v11825_v35, %v14932_v42 }
 0x8b8   :  { %v11945_v55 = vsub.f32 %v11748_v63, %v3380_v36 }
 0x8b9   :  { %v3195_v51 = vpop.permute.xlu1 %3194 }
 0x8ba   :  { %v3258_v2 = vsel %vm1057_vm12, %v11509_v54, %v3195_v51  ;;  %v3265_v54 = vsel %vm1057_vm12, %v11553_v23, %v3209_v27  ;;  %v3428_v41 = vmul.f32 %v11945_v55, %v11945_v55 }
 0x8bb   :  { %v11922_v10 = vadd.f32 %v3258_v2, %v14947_v60 }
 0x8bd   :  { %v3322_v3 = vsel %vm300_vm1, %v11922_v10, 0.0 }
 0x8c7   :  { %3308 = vadd.xlane.f32.xlu1 %v3307_v20 }
 0x8ca   :  { %3216 = vrot.lane.b32.xlu0 %v3104_v33, %s10022_s24  ;;  %v14948_v33 = vld [vmem:[#allocation27_spill] sm:$0xff] }
 0x8cb   :  { %v11932_v22 = vadd.f32 %v3265_v54, %v14948_v33 }
 0x8cd   :  { %14949 = vst [vmem:[#allocation64_spill] sm:$0xff] %v11932_v22  ;;  %v3343_v47 = vsel %vm300_vm1, %v11932_v22, 0.0 }
 0x8d3   :  { %v3312_v53 = vpop.xlane.xlu2 %3311 }
 0x8d4   :  { %v3374_v25 = vmul.f32 %v3312_v53, %v14932_v42  ;;  %v3472_v53 = vsel %vm300_vm1, %v3428_v41, 0.0 }
 0x8d6   :  { %v11899_v17 = vsub.f32 %v11860_v24, %v3374_v25 }
 0x8d8   :  { %v3422_v1 = vmul.f32 %v11899_v17, %v11899_v17 }
 0x8da   :  { %v3454_v5 = vsel %vm300_vm1, %v3422_v1, 0.0 }
 0x8df   :  { %3455 = vadd.xlane.f32.xlu2 %v3454_v5 }
 0x8e0   :  { %3214 = vrot.lane.b32.xlu1 %v3101_v44, %s10022_s24  ;;  %v3315_v44 = vpop.xlane.xlu0 %3314 }
 0x8e1   :  { %v3375_v29 = vmul.f32 %v3315_v44, %v14932_v42 }
 0x8e3   :  { %v11936_v6 = vsub.f32 %v11852_v11, %v3375_v29 }
 0x8e5   :  { %v3423_v23 = vmul.f32 %v11936_v6, %v11936_v6 }
 0x8e7   :  { %v3457_v45 = vsel %vm300_vm1, %v3423_v23, 0.0  ;;  %v3382_v23 = vmul.f32 %v11843_v46, %v14932_v42 }
 0x909   :  { %v3318_v38 = vpop.xlane.xlu2 %3317 }
 0x90a   :  { %v3376_v43 = vmul.f32 %v3318_v38, %v14932_v42  ;;  %3338 = vadd.xlane.f32.xlu1 %v3337_v12  ;;  %v3379_v38 = vmul.f32 %v11827_v28, %v14932_v42 }
 0x90c   :  { %v11919_v50 = vsub.f32 %v11868_v16, %v3376_v43  ;;  %v11967_v43 = vsub.f32 %v11756_v15, %v3379_v38 }
 0x90e   :  { %v3424_v13 = vmul.f32 %v11919_v50, %v11919_v50  ;;  %v3427_v28 = vmul.f32 %v11967_v43, %v11967_v43 }
 0x90f   :  { %v3213_v27 = vpop.permute.xlu1 %3212 }
 0x910   :  { %v3460_v34 = vsel %vm300_vm1, %v3424_v13, 0.0  ;;  %v3148_v13 = vpop.f32.mrf.mxu0  ;;  %v3469_v54 = vsel %vm300_vm1, %v3427_v28, 0.0  ;;  %v3267_v29 = vsel %vm1057_vm12, %v11564_v19, %v3213_v27 }
 0x911   :  { %3461 = vadd.xlane.f32.xlu2 %v3460_v34  ;;  %v3381_v34 = vmul.f32 %v11829_v62, %v14932_v42 }
 0x912   :  { %3323 = vadd.xlane.f32.xlu1 %v3322_v3 }
 0x913   :  { %v11976_v3 = vsub.f32 %v11766_v58, %v3381_v34  ;;  %v12015_v34 = vpop.xlane.xlu2 %3341 }
 0x915   :  { %v3429_v44 = vmul.f32 %v11976_v3, %v11976_v3 }
 0x917   :  { %v3475_v33 = vsel %vm300_vm1, %v3429_v44, 0.0 }
 0x918   :  { %v3151_v19 = vpop.f32.mrf.mxu0 }
 0x91a   :  { %3344 = vadd.xlane.f32.xlu1 %v3343_v47  ;;  %v14950_v47 = vld [vmem:[#allocation29_spill] sm:$0xff] }
 0x91b   :  { %v11985_v62 = vadd.f32 %v3267_v29, %v14950_v47  ;;  %v12023_v29 = vpop.permute.xlu2 %3218 }
 0x91d   :  { %v3349_v36 = vsel %vm300_vm1, %v11985_v62, 0.0 }
 0x922   :  { %3458 = vadd.xlane.f32.xlu1 %v3457_v45  ;;  %v11992_v45 = vsub.f32 %v11805_v8, %v3382_v23 }
 0x924   :  { %v3430_v41 = vmul.f32 %v11992_v45, %v11992_v45 }
 0x929   :  { %v3321_v20 = vpop.xlane.xlu0 %3320 }
 0x92a   :  { %v3377_v25 = vmul.f32 %v3321_v20, %v14932_v42  ;;  %3473 = vadd.xlane.f32.xlu1 %v3472_v53  ;;  %v3478_v20 = vsel %vm300_vm1, %v3430_v41, 0.0 }
 0x92c   :  { %v11953_v35 = vsub.f32 %v11884_v26, %v3377_v25 }
 0x92e   :  { %v3425_v1 = vmul.f32 %v11953_v35, %v11953_v35 }
 0x930   :  { %v3463_v5 = vsel %vm300_vm1, %v3425_v1, 0.0 }
 0x931   :  { %3464 = vadd.xlane.f32.xlu2 %v3463_v5 }
 0x93a   :  { %v3309_v49 = vpop.xlane.xlu1 %3308 }
 0x93b   :  { %v3373_v51 = vmul.f32 %v3309_v49, %v14932_v42 }
 0x93c   :  { %v12027_v41 = vpop.permute.xlu0 %3216 }
 0x93d   :  { %v11962_v12 = vsub.f32 %v11892_v21, %v3373_v51 }
 0x93f   :  { %v3421_v2 = vmul.f32 %v11962_v12, %v11962_v12 }
 0x941   :  { %v3451_v60 = vsel %vm300_vm1, %v3421_v2, 0.0 }
 0x942   :  { %3452 = vadd.xlane.f32.xlu0 %v3451_v60 }
 0x943   :  { %3222 = vrot.lane.b32.xlu1 %v3148_v13, %s10022_s24 }
 0x94a   :  { %3470 = vadd.xlane.f32.xlu0 %v3469_v54 }
 0x952   :  { %3476 = vadd.xlane.f32.xlu0 %v3475_v33  ;;  %v11998_v53 = vpop.permute.xlu1 %3214  ;;  %v3456_v47 = vpop.xlane.xlu2 %3455 }
 0x95a   :  { %3350 = vadd.xlane.f32.xlu0 %v3349_v36  ;;  %v3518_v36 = vmul.f32 %v3456_v47, %v14932_v42 }
 0x95c   :  { %v3542_v23 = vadd.f32 1e-05, %v3518_v36 }
 0x95e   :  { %9497 = vrsqrt.f32 %v3542_v23  ;;  %vm3608_vm3 = vweird.f32 %v3542_v23 }
 0x96d   :  { %3479 = vadd.xlane.f32.xlu1 %v3478_v20 }
 0x96e   :  { %3224 = vrot.lane.b32.xlu0 %v3151_v19, %s10022_s24 }
 0x97d   :  { %v3339_v25 = vpop.xlane.xlu1 %3338 }
 0x97e   :  { %v3383_v49 = vmul.f32 %v3339_v25, %v14932_v42 }
 0x980   :  { %v12010_v60 = vsub.f32 %v11909_v40, %v3383_v49 }
 0x982   :  { %v3431_v54 = vmul.f32 %v12010_v60, %v12010_v60 }
 0x984   :  { %v3481_v33 = vsel %vm300_vm1, %v3431_v54, 0.0 }
 0x985   :  { %v3324_v1 = vpop.xlane.xlu1 %3323 }
 0x986   :  { %v3378_v5 = vmul.f32 %v3324_v1, %v14932_v42  ;;  %v9498_v1 = vpop.eup %9497 }
 0x987   :  { %vm3609_vm14 = vweird.f32 %v9498_v1 }
 0x988   :  { %v12002_v46 = vsub.f32 %v11922_v10, %v3378_v5  ;;  %v3462_v5 = vpop.xlane.xlu2 %3461  ;;  %vm3610_vm4 = vmor %vm3608_vm3, %vm3609_vm14 }
 0x98a   :  { %v3426_v27 = vmul.f32 %v12002_v46, %v12002_v46 }
 0x98c   :  { %v3466_v51 = vsel %vm300_vm1, %v3426_v27, 0.0 }
 0x98d   :  { %v3345_v38 = vpop.xlane.xlu1 %3344  ;;  %3467 = vadd.xlane.f32.xlu2 %v3466_v51  ;;  %v3603_v51 = vmul.f32 %v9498_v1, %v3542_v23 }
 0x98e   :  { %v3385_v2 = vmul.f32 %v3345_v38, %v14932_v42  ;;  %v3520_v38 = vmul.f32 %v3462_v5, %v14932_v42  ;;  %v3266_v5 = vsel %vm1057_vm12, %v11562_v30, %v11913_v31 }
 0x990   :  { %v12013_v13 = vsub.f32 %v11932_v22, %v3385_v2  ;;  %v3604_v2 = vmul.f32 %v9498_v1, %v3603_v51 }
 0x992   :  { %v3433_v28 = vmul.f32 %v12013_v13, %v12013_v13  ;;  %v3605_v47 = vmul.f32 0.5, %v3604_v2  ;;  %v14951_v2 = vld [vmem:[#allocation28_spill] sm:$0xff] }
 0x993   :  { %v12042_v8 = vadd.f32 %v3266_v5, %v14951_v2 }
 0x994   :  { %v3487_v44 = vsel %vm300_vm1, %v3433_v28, 0.0  ;;  %v12032_v28 = vadd.f32 1e-05, %v3520_v38  ;;  %v3606_v4 = vsub.f32 1.5, %v3605_v47 }
 0x995   :  { %3488 = vadd.xlane.f32.xlu1 %v3487_v44  ;;  %v3459_v20 = vpop.xlane.xlu1 %3458 }
 0x996   :  { %v3519_v19 = vmul.f32 %v3459_v20, %v14932_v42  ;;  %v3607_v58 = vmul.f32 %v9498_v1, %v3606_v4  ;;  %v3268_v4 = vsel %vm1057_vm12, %v11537_v52, %v11998_v53  ;;  %vm3628_vm9 = vweird.f32 %v12032_v28 }
 0x998   :  { %3482 = vadd.xlane.f32.xlu0 %v3481_v33  ;;  %v3543_v25 = vadd.f32 1e-05, %v3519_v19 }
 0x99a   :  { %9499 = vrsqrt.f32 %v3543_v25  ;;  %vm3618_vm6 = vweird.f32 %v3543_v25 }
 0x9a0   :  { %v9500_v44 = vpop.eup %9499 }
 0x9a1   :  { %v3613_v20 = vmul.f32 %v9500_v44, %v3543_v25  ;;  %vm3619_vm5 = vweird.f32 %v9500_v44 }
 0x9a2   :  { %vm3620_vm7 = vmor %vm3618_vm6, %vm3619_vm5 }
 0x9a4   :  { %v3465_v54 = vpop.xlane.xlu2 %3464 }
 0x9a5   :  { %3220 = vrot.lane.b32.xlu2 %v3145_v39, %s10022_s24  ;;  %v3521_v36 = vmul.f32 %v3465_v54, %v14932_v42 }
 0x9a7   :  { %v12036_v22 = vadd.f32 1e-05, %v3521_v36 }
 0x9b5   :  { %v3453_v27 = vpop.xlane.xlu0 %3452 }
 0x9b6   :  { %v3517_v49 = vmul.f32 %v3453_v27, %v14932_v42 }
 0x9b8   :  { %v3541_v39 = vadd.f32 1e-05, %v3517_v49  ;;  %v3614_v49 = vmul.f32 %v9500_v44, %v3613_v20  ;;  %v3346_v20 = vsel %vm300_vm1, %v12042_v8, 0.0 }
 0x9ba   :  { %9501 = vrsqrt.f32 %v3541_v39  ;;  %v3615_v47 = vmul.f32 0.5, %v3614_v49  ;;  %vm3598_vm15 = vweird.f32 %v3541_v39 }
 0x9bb   :  { %9503 = vrsqrt.f32 %v12032_v28 }
 0x9bc   :  { %9505 = vrsqrt.f32 %v12036_v22  ;;  %v3616_v5 = vsub.f32 1.5, %v3615_v47  ;;  %v3269_v47 = vsel %vm1057_vm12, %v11542_v18, %v12027_v41 }
 0x9be   :  { %v3617_v2 = vmul.f32 %v9500_v44, %v3616_v5 }
 0x9c0   :  { %v9502_v33 = vpop.eup %9501 }
 0x9c1   :  { %v3593_v19 = vmul.f32 %v9502_v33, %v3541_v39  ;;  %v9504_v38 = vpop.eup %9503  ;;  %vm3599_vm13 = vweird.f32 %v9502_v33  ;;  %v14952_v39 = vld [vmem:[#allocation31_spill] sm:$0xff] }
 0x9c2   :  { %v3623_v54 = vmul.f32 %v9504_v38, %v12032_v28  ;;  %vm3600_vm0 = vmor %vm3598_vm15, %vm3599_vm13  ;;  %vm3629_vm8 = vweird.f32 %v9504_v38  ;;  %vm3638_vm13 = vweird.f32 %v12036_v22 }
 0x9c3   :  { %v3594_v27 = vmul.f32 %v9502_v33, %v3593_v19  ;;  %v3611_v19 = vsel %vm3610_vm4, %v9498_v1, %v3607_v58  ;;  %v3621_v1 = vsel %vm3620_vm7, %v9500_v44, %v3617_v2  ;;  %vm3630_vm10 = vmor %vm3628_vm9, %vm3629_vm8  ;;  %v14954_v2 = vld [vmem:[#allocation33_spill] sm:$0xff] }
 0x9c4   :  { %v3806_v23 = vmul.f32 %v3611_v19, %v11899_v17 }
 0x9c5   :  { %v3595_v51 = vmul.f32 0.5, %v3594_v27  ;;  %v3624_v27 = vmul.f32 %v9504_v38, %v3623_v54 }
 0x9c6   :  { %v3831_v52 = vmul.f32 %v11796_v37, %v3806_v23 }
 0x9c7   :  { %v3596_v40 = vsub.f32 1.5, %v3595_v51  ;;  %v9506_v51 = vpop.eup %9505  ;;  %v3625_v49 = vmul.f32 0.5, %v3624_v27 }
 0x9c8   :  { %v3633_v58 = vmul.f32 %v9506_v51, %v12036_v22  ;;  %v3856_v25 = vadd.f32 %v11798_v59, %v3831_v52  ;;  %vm3639_vm11 = vweird.f32 %v9506_v51  ;;  %v3471_v22 = vpop.xlane.xlu0 %3470 }
 0x9c9   :  { %v3597_v36 = vmul.f32 %v9502_v33, %v3596_v40  ;;  %v3626_v53 = vsub.f32 1.5, %v3625_v49  ;;  %vm3640_vm14 = vmor %vm3638_vm13, %vm3639_vm11 }
 0x9ca   :  { %v3634_v54 = vmul.f32 %v9506_v51, %v3633_v58 }
 0x9cb   :  { %v3601_v30 = vsel %vm3600_vm0, %v9502_v33, %v3597_v36  ;;  %v12055_v33 = vadd.f32 %v3268_v4, %v14952_v39  ;;  %v3384_v36 = vmul.f32 %v12015_v34, %v14932_v42  ;;  %v3627_v44 = vmul.f32 %v9504_v38, %v3626_v53 }
 0x9cc   :  { %v3805_v31 = vmul.f32 %v3601_v30, %v11962_v12  ;;  %v3807_v30 = vmul.f32 %v3621_v1, %v11936_v6  ;;  %v3635_v19 = vmul.f32 0.5, %v3634_v54 }
 0x9cd   :  { %v3352_v17 = vsel %vm300_vm1, %v12055_v33, 0.0  ;;  %v12077_v41 = vsub.f32 %v11876_v9, %v3384_v36  ;;  %v3631_v34 = vsel %vm3630_vm10, %v9504_v38, %v3627_v44 }
 0x9ce   :  { %3347 = vadd.xlane.f32.xlu2 %v3346_v20  ;;  %v3830_v40 = vmul.f32 %v11796_v37, %v3805_v31  ;;  %v14953_v31 = vld [vmem:[#allocation32_spill] sm:$0xff]  ;;  %v3832_v18 = vmul.f32 %v11796_v37, %v3807_v30  ;;  %v3636_v6 = vsub.f32 1.5, %v3635_v19  ;;  %v3808_v27 = vmul.f32 %v3631_v34, %v11919_v50 }
 0x9cf   :  { %v12071_v20 = vadd.f32 %v3269_v47, %v14953_v31  ;;  %v3432_v28 = vmul.f32 %v12077_v41, %v12077_v41  ;;  %v3270_v50 = vsel %vm1057_vm12, %v11548_v48, %v12023_v29  ;;  %v3523_v48 = vmul.f32 %v3471_v22, %v14932_v42 }
 0x9d0   :  { %v3855_v12 = vadd.f32 %v11798_v59, %v3830_v40  ;;  %v3857_v5 = vadd.f32 %v11798_v59, %v3832_v18  ;;  %v3637_v40 = vmul.f32 %v9506_v51, %v3636_v6  ;;  %v3833_v38 = vmul.f32 %v11796_v37, %v3808_v27  ;;  %v3477_v29 = vpop.xlane.xlu0 %3476 }
 0x9d1   :  { %v3355_v4 = vsel %vm300_vm1, %v12071_v20, 0.0  ;;  %v3484_v39 = vsel %vm300_vm1, %v3432_v28, 0.0  ;;  %v12095_v58 = vadd.f32 %v3270_v50, %v14954_v2  ;;  %v3547_v1 = vadd.f32 1e-05, %v3523_v48 }
 0x9d2   :  { %8750 = vmatmul.msk.f32.gmra.mxu1 %vm300_vm1, %v3855_v12  ;;  %v3641_v23 = vsel %vm3640_vm14, %v9506_v51, %v3637_v40  ;;  %v3858_v49 = vadd.f32 %v11798_v59, %v3833_v38  ;;  %v3525_v44 = vmul.f32 %v3477_v29, %v14932_v42 }
 0x9d3   :  { %v3809_v12 = vmul.f32 %v3641_v23, %v11953_v35  ;;  %v3358_v51 = vsel %vm300_vm1, %v12095_v58, 0.0  ;;  %v3474_v35 = vpop.xlane.xlu1 %3473  ;;  %9507 = vrsqrt.f32 %v3547_v1  ;;  %v14955_v23 = vld [vmem:[#allocation30_spill] sm:$0xff]  ;;  %vm3658_vm5 = vweird.f32 %v3547_v1 }
 0x9d4   :  { %v3524_v54 = vmul.f32 %v3474_v35, %v14932_v42  ;;  %v12114_v6 = vadd.f32 1e-05, %v3525_v44 }
 0x9d5   :  { %v3834_v52 = vmul.f32 %v11796_v37, %v3809_v12 }
 0x9d6   :  { %3353 = vadd.xlane.f32.xlu2 %v3352_v17  ;;  %v12105_v17 = vadd.f32 1e-05, %v3524_v54  ;;  %vm3678_vm11 = vweird.f32 %v12114_v6 }
 0x9d7   :  { %v3859_v53 = vadd.f32 %v11798_v59, %v3834_v52 }
 0x9d8   :  { %v12107_v36 = vpop.xlane.xlu0 %3350  ;;  %9509 = vrsqrt.f32 %v12105_v17  ;;  %vm3668_vm8 = vweird.f32 %v12105_v17 }
 0x9da   :  { %8751 = vmatmul.msk.f32.gmra.mxu1 %vm300_vm1, %v3856_v25  ;;  %v9508_v25 = vpop.eup %9507 }
 0x9db   :  { %v3223_v47 = vpop.permute.xlu1 %3222  ;;  %v3653_v18 = vmul.f32 %v9508_v25, %v3547_v1  ;;  %vm3659_vm0 = vweird.f32 %v9508_v25 }
 0x9dc   :  { %vm3660_vm6 = vmor %vm3658_vm5, %vm3659_vm0 }
 0x9dd   :  { %v3654_v27 = vmul.f32 %v9508_v25, %v3653_v18 }
 0x9de   :  { %3356 = vadd.xlane.f32.xlu2 %v3355_v4  ;;  %v12112_v34 = vpop.eup %9509 }
 0x9df   :  { %v3663_v38 = vmul.f32 %v12112_v34, %v12105_v17  ;;  %v3655_v2 = vmul.f32 0.5, %v3654_v27  ;;  %vm3669_vm7 = vweird.f32 %v12112_v34 }
 0x9e0   :  { %vm3670_vm9 = vmor %vm3668_vm8, %vm3669_vm7 }
 0x9e1   :  { %v3656_v29 = vsub.f32 1.5, %v3655_v2 }
 0x9e2   :  { %8752 = vmatmul.msk.f32.gmra.mxu1 %vm300_vm1, %v3857_v5  ;;  %v3225_v5 = vpop.permute.xlu0 %3224 }
 0x9e3   :  { %v3480_v4 = vpop.xlane.xlu1 %3479 }
 0x9e4   :  { %v3526_v12 = vmul.f32 %v3480_v4, %v14932_v42  ;;  %v3657_v4 = vmul.f32 %v9508_v25, %v3656_v29 }
 0x9e6   :  { %3485 = vadd.xlane.f32.xlu2 %v3484_v39  ;;  %v12133_v35 = vadd.f32 1e-05, %v3526_v12  ;;  %v3661_v2 = vsel %vm3660_vm6, %v9508_v25, %v3657_v4 }
 0x9ea   :  { %8753 = vmatmul.msk.f32.gmra.mxu1 %vm300_vm1, %v3858_v49  ;;  %v3272_v49 = vsel %vm1057_vm12, %v11568_v32, %v3223_v47 }
 0x9ee   :  { %3359 = vadd.xlane.f32.xlu2 %v3358_v51 }
 0x9f2   :  { %8754 = vmatmul.msk.f32.gmra.mxu1 %vm300_vm1, %v3859_v53  ;;  %v14956_v53 = vld [vmem:[#allocation34_spill] sm:$0xff] }
 0x9f3   :  { %v12131_v48 = vadd.f32 %v3272_v49, %v14956_v53 }
 0x9f5   :  { %v3364_v18 = vsel %vm300_vm1, %v12131_v48, 0.0 }
 0xa00   :  { %v3468_v30 = vpop.xlane.xlu2 %3467 }
 0xa01   :  { %v3522_v31 = vmul.f32 %v3468_v30, %v14932_v42 }
 0xa03   :  { %v3546_v19 = vadd.f32 1e-05, %v3522_v31 }
 0xa05   :  { %9511 = vrsqrt.f32 %v3546_v19  ;;  %vm3648_vm3 = vweird.f32 %v3546_v19 }
 0xa06   :  { %9513 = vrsqrt.f32 %v12114_v6 }
 0xa07   :  { %9515 = vrsqrt.f32 %v12133_v35 }
 0xa08   :  { %v3221_v40 = vpop.permute.xlu2 %3220 }
 0xa09   :  { %v3271_v28 = vsel %vm1057_vm12, %v11566_v56, %v3221_v40  ;;  %v3664_v56 = vmul.f32 %v12112_v34, %v3663_v38 }
 0xa0a   :  { %v12121_v39 = vadd.f32 %v3271_v28, %v14955_v23  ;;  %v3273_v28 = vsel %vm1057_vm12, %v11570_v7, %v3225_v5  ;;  %v3811_v7 = vmul.f32 %v3661_v2, %v11967_v43 }
 0xa0b   :  { %v9512_v50 = vpop.eup %9511  ;;  %v3483_v30 = vpop.xlane.xlu0 %3482  ;;  %v3665_v44 = vmul.f32 0.5, %v3664_v56 }
 0xa0c   :  { %v3643_v22 = vmul.f32 %v9512_v50, %v3546_v19  ;;  %v3361_v52 = vsel %vm300_vm1, %v12121_v39, 0.0  ;;  %v9514_v31 = vpop.eup %9513  ;;  %vm3649_vm15 = vweird.f32 %v9512_v50  ;;  %v3527_v47 = vmul.f32 %v3483_v30, %v14932_v42 }
 0xa0d   :  { %3362 = vadd.xlane.f32.xlu2 %v3361_v52  ;;  %v3673_v27 = vmul.f32 %v9514_v31, %v12114_v6  ;;  %vm3650_vm4 = vmor %vm3648_vm3, %vm3649_vm15  ;;  %v3666_v49 = vsub.f32 1.5, %v3665_v44  ;;  %v14957_v52 = vld [vmem:[#allocation35_spill] sm:$0xff]  ;;  %v3836_v53 = vmul.f32 %v11796_v37, %v3811_v7  ;;  %vm3679_vm10 = vweird.f32 %v9514_v31 }
 0xa0e   :  { %v3644_v51 = vmul.f32 %v9512_v50, %v3643_v22  ;;  %v3551_v12 = vadd.f32 1e-05, %v3527_v47  ;;  %v12144_v56 = vadd.f32 %v3273_v28, %v14957_v52  ;;  %vm3680_vm13 = vmor %vm3678_vm11, %vm3679_vm10  ;;  %vm3688_vm15 = vweird.f32 %v12133_v35 }
 0xa0f   :  { %v3674_v22 = vmul.f32 %v9514_v31, %v3673_v27  ;;  %v3667_v5 = vmul.f32 %v12112_v34, %v3666_v49 }
 0xa10   :  { %v3645_v54 = vmul.f32 0.5, %v3644_v51  ;;  %v9516_v51 = vpop.eup %9515  ;;  %9517 = vrsqrt.f32 %v3551_v12  ;;  %v3367_v25 = vsel %vm300_vm1, %v12144_v56, 0.0 }
 0xa11   :  { %v3671_v43 = vsel %vm3670_vm9, %v12112_v34, %v3667_v5  ;;  %vm3689_vm14 = vweird.f32 %v9516_v51 }
 0xa12   :  { %v3646_v32 = vsub.f32 1.5, %v3645_v54  ;;  %v3812_v44 = vmul.f32 %v3671_v43, %v11945_v55  ;;  %vm3690_vm0 = vmor %vm3688_vm15, %vm3689_vm14 }
 0xa14   :  { %v3647_v40 = vmul.f32 %v9512_v50, %v3646_v32  ;;  %v3861_v32 = vadd.f32 %v11798_v59, %v3836_v53  ;;  %v3837_v17 = vmul.f32 %v11796_v37, %v3812_v44  ;;  %v3489_v53 = vpop.xlane.xlu1 %3488 }
 0xa15   :  { %3365 = vadd.xlane.f32.xlu2 %v3364_v18 }
 0xa16   :  { %v3651_v38 = vsel %vm3650_vm4, %v9512_v50, %v3647_v40  ;;  %v3683_v50 = vmul.f32 %v9516_v51, %v12133_v35  ;;  %v9518_v30 = vpop.eup %9517  ;;  %v3862_v55 = vadd.f32 %v11798_v59, %v3837_v17  ;;  %vm3698_vm4 = vweird.f32 %v3551_v12 }
 0xa17   :  { %v3810_v23 = vmul.f32 %v3651_v38, %v12002_v46  ;;  %v3675_v46 = vmul.f32 0.5, %v3674_v22  ;;  %v3693_v4 = vmul.f32 %v9518_v30, %v3551_v12  ;;  %vm3699_vm3 = vweird.f32 %v9518_v30 }
 0xa18   :  { %v3684_v54 = vmul.f32 %v9516_v51, %v3683_v50  ;;  %vm3700_vm5 = vmor %vm3698_vm4, %vm3699_vm3  ;;  %v3387_v12 = vmul.f32 %v12107_v36, %v14932_v42  ;;  %v3529_v36 = vmul.f32 %v3489_v53, %v14932_v42 }
 0xa19   :  { %v3835_v19 = vmul.f32 %v11796_v37, %v3810_v23  ;;  %v3676_v29 = vsub.f32 1.5, %v3675_v46  ;;  %v3694_v40 = vmul.f32 %v9518_v30, %v3693_v4 }
 0xa1a   :  { %v3685_v18 = vmul.f32 0.5, %v3684_v54  ;;  %v12189_v50 = vsub.f32 %v11985_v62, %v3387_v12 }
 0xa1b   :  { %v3860_v1 = vadd.f32 %v11798_v59, %v3835_v19  ;;  %v3677_v47 = vmul.f32 %v9514_v31, %v3676_v29  ;;  %v3695_v23 = vmul.f32 0.5, %v3694_v40 }
 0xa1c   :  { %v3686_v34 = vsub.f32 1.5, %v3685_v18  ;;  %v3435_v54 = vmul.f32 %v12189_v50, %v12189_v50 }
 0xa1d   :  { %8755 = vmatmul.msk.f32.gmra.mxu1 %vm300_vm1, %v3860_v1  ;;  %3368 = vadd.xlane.f32.xlu2 %v3367_v25  ;;  %v3681_v27 = vsel %vm3680_vm13, %v9514_v31, %v3677_v47  ;;  %v3696_v2 = vsub.f32 1.5, %v3695_v23 }
 0xa1e   :  { %v3813_v28 = vmul.f32 %v3681_v27, %v11976_v3  ;;  %v3687_v38 = vmul.f32 %v9516_v51, %v3686_v34  ;;  %v3493_v4 = vsel %vm300_vm1, %v3435_v54, 0.0 }
 0xa1f   :  { %v3697_v52 = vmul.f32 %v9518_v30, %v3696_v2 }
 0xa20   :  { %v3838_v6 = vmul.f32 %v11796_v37, %v3813_v28  ;;  %v3691_v49 = vsel %vm3690_vm0, %v9516_v51, %v3687_v38  ;;  %v12175_v51 = vld [vmem:[#allocation5 + $0x142] ss:$0 sm:$0xff] }
 0xa21   :  { %v3814_v31 = vmul.f32 %v3691_v49, %v11992_v45  ;;  %v3701_v19 = vsel %vm3700_vm5, %v9518_v30, %v3697_v52 }
 0xa22   :  { %v3863_v22 = vadd.f32 %v11798_v59, %v3838_v6  ;;  %v3815_v35 = vmul.f32 %v3701_v19, %v12010_v60 }
 0xa23   :  { %v3839_v3 = vmul.f32 %v11796_v37, %v3814_v31 }
 0xa24   :  { %v3840_v45 = vmul.f32 %v12175_v51, %v3815_v35 }
 0xa25   :  { %8756 = vmatmul.msk.f32.gmra.mxu1 %vm300_vm1, %v3861_v32  ;;  %v3864_v7 = vadd.f32 %v11798_v59, %v3839_v3  ;;  %v12201_v32 = vadd.f32 1e-05, %v3529_v36 }
 0xa26   :  { %v3865_v46 = vadd.f32 %v11798_v59, %v3840_v45 }
 0xa27   :  { %9519 = vrsqrt.f32 %v12201_v32  ;;  %vm3718_vm10 = vweird.f32 %v12201_v32 }
 0xa2d   :  { %8757 = vmatmul.msk.f32.gmra.mxu1 %vm300_vm1, %v3862_v55 }
 0xa35   :  { %8758 = vmatmul.msk.f32.gmra.mxu1 %vm300_vm1, %v3863_v22  ;;  %v12215_v22 = vpop.eup %9519 }
 0xa36   :  { %v3713_v45 = vmul.f32 %v12215_v22, %v12201_v32  ;;  %vm3719_vm7 = vweird.f32 %v12215_v22 }
 0xa37   :  { %vm3720_vm11 = vmor %vm3718_vm10, %vm3719_vm7 }
 0xa3d   :  { %8759 = vmatmul.msk.f32.gmra.mxu1 %vm300_vm1, %v3864_v7 }
 0xa41   :  { %v3348_v1 = vpop.xlane.xlu2 %3347 }
 0xa42   :  { %v3386_v5 = vmul.f32 %v3348_v1, %v14932_v42 }
 0xa44   :  { %v12183_v37 = vsub.f32 %v12042_v8, %v3386_v5 }
 0xa45   :  { %8760 = vmatmul.msk.f32.gmra.mxu1 %vm300_vm1, %v3865_v46 }
 0xa46   :  { %v3434_v60 = vmul.f32 %v12183_v37, %v12183_v37 }
 0xa48   :  { %v3490_v25 = vsel %vm300_vm1, %v3434_v60, 0.0  ;;  %v3714_v60 = vmul.f32 %v12215_v22, %v3713_v45 }
 0xa49   :  { %3491 = vadd.xlane.f32.xlu1 %v3490_v25  ;;  %v3354_v43 = vpop.xlane.xlu2 %3353 }
 0xa4a   :  { %v3388_v59 = vmul.f32 %v3354_v43, %v14932_v42 }
 0xa4c   :  { %v12195_v29 = vsub.f32 %v12055_v33, %v3388_v59 }
 0xa4e   :  { %v3436_v30 = vmul.f32 %v12195_v29, %v12195_v29 }
 0xa4f   :  { %v3975_v44 = vpop.f32.mrf.mxu1 }
 0xa50   :  { %v3976_v47 = vadd.f32 %v11846_v57, %v3975_v44  ;;  %v3496_v18 = vsel %vm300_vm1, %v3436_v30, 0.0 }
 0xa51   :  { %3497 = vadd.xlane.f32.xlu0 %v3496_v18  ;;  %v3357_v17 = vpop.xlane.xlu2 %3356  ;;  %3494 = vadd.xlane.f32.xlu1 %v3493_v4 }
 0xa52   :  { %v4065_v27 = vmul.f32 0.044715, %v3976_v47  ;;  %v3389_v34 = vmul.f32 %v3357_v17, %v14932_v42  ;;  %v4041_v54 = vmul.f32 0.5, %v3976_v47  ;;  %v3715_v17 = vmul.f32 0.5, %v3714_v60 }
 0xa54   :  { %v12209_v40 = vsub.f32 %v12071_v20, %v3389_v34  ;;  %v4089_v28 = vmul.f32 %v4065_v27, %v3976_v47 }
 0xa56   :  { %v3437_v55 = vmul.f32 %v12209_v40, %v12209_v40  ;;  %v4113_v38 = vmul.f32 %v4089_v28, %v3976_v47 }
 0xa57   :  { %v3978_v23 = vpop.f32.mrf.mxu1 }
 0xa58   :  { %v3979_v6 = vadd.f32 %v11846_v57, %v3978_v23  ;;  %v3499_v49 = vsel %vm300_vm1, %v3437_v55, 0.0  ;;  %v4137_v2 = vadd.f32 %v4113_v38, %v3976_v47 }
 0xa59   :  { %v3486_v31 = vpop.xlane.xlu2 %3485  ;;  %3500 = vadd.xlane.f32.xlu1 %v3499_v49 }
 0xa5a   :  { %v4066_v52 = vmul.f32 0.044715, %v3979_v6  ;;  %v3528_v3 = vmul.f32 %v3486_v31, %v14932_v42  ;;  %v4161_v19 = vmul.f32 0.7978846, %v4137_v2  ;;  %v3716_v31 = vsub.f32 1.5, %v3715_v17 }
 0xa5c   :  { %v3552_v35 = vadd.f32 1e-05, %v3528_v3  ;;  %9521 = vtanh.f32 %v4161_v19  ;;  %v4090_v7 = vmul.f32 %v4066_v52, %v3979_v6  ;;  %v3717_v60 = vmul.f32 %v12215_v22, %v3716_v31 }
 0xa5e   :  { %9523 = vrsqrt.f32 %v3552_v35  ;;  %v4114_v1 = vmul.f32 %v4090_v7, %v3979_v6  ;;  %vm3708_vm8 = vweird.f32 %v3552_v35 }
 0xa5f   :  { %v3981_v5 = vpop.f32.mrf.mxu1 }
 0xa60   :  { %v3982_v46 = vadd.f32 %v11846_v57, %v3981_v5  ;;  %v4138_v12 = vadd.f32 %v4114_v1, %v3979_v6  ;;  %v4042_v1 = vmul.f32 0.5, %v3979_v6 }
 0xa61   :  { %v3360_v25 = vpop.xlane.xlu2 %3359 }
 0xa62   :  { %v9522_v53 = vpop.eup %9521  ;;  %v4067_v43 = vmul.f32 0.044715, %v3982_v46  ;;  %v3390_v59 = vmul.f32 %v3360_v25, %v14932_v42  ;;  %v4162_v36 = vmul.f32 0.7978846, %v4138_v12 }
 0xa63   :  { %v4209_v30 = vadd.f32 1.0, %v9522_v53 }
 0xa64   :  { %v9524_v44 = vpop.eup %9523  ;;  %v12224_v18 = vsub.f32 %v12095_v58, %v3390_v59  ;;  %9525 = vtanh.f32 %v4162_v36  ;;  %v4091_v4 = vmul.f32 %v4067_v43, %v3982_v46 }
 0xa65   :  { %v3703_v27 = vmul.f32 %v9524_v44, %v3552_v35  ;;  %v4233_v34 = vmul.f32 %v4209_v30, %v4041_v54  ;;  %vm3709_vm6 = vweird.f32 %v9524_v44 }
 0xa66   :  { %v3438_v28 = vmul.f32 %v12224_v18, %v12224_v18  ;;  %v4115_v55 = vmul.f32 %v4091_v4, %v3982_v46  ;;  %vm3710_vm9 = vmor %vm3708_vm8, %vm3709_vm6  ;;  %v3721_v4 = vsel %vm3720_vm11, %v12215_v22, %v3717_v60 }
 0xa67   :  { %v3704_v38 = vmul.f32 %v9524_v44, %v3703_v27  ;;  %v3984_v23 = vpop.f32.mrf.mxu1  ;;  %4279 = vmatmul.f32.gmra.mxu2 %v4233_v34  ;;  %v3817_v32 = vmul.f32 %v3721_v4, %v12013_v13 }
 0xa68   :  { %v3985_v49 = vadd.f32 %v11846_v57, %v3984_v23  ;;  %v3502_v47 = vsel %vm300_vm1, %v3438_v28, 0.0  ;;  %v4139_v2 = vadd.f32 %v4115_v55, %v3982_v46  ;;  %v4043_v28 = vmul.f32 0.5, %v3982_v46 }
 0xa69   :  { %v3705_v52 = vmul.f32 0.5, %v3704_v38  ;;  %3503 = vadd.xlane.f32.xlu2 %v3502_v47  ;;  %v3842_v22 = vmul.f32 %v12175_v51, %v3817_v32 }
 0xa6a   :  { %v9526_v3 = vpop.eup %9525  ;;  %v4068_v19 = vmul.f32 0.044715, %v3985_v49  ;;  %v4163_v7 = vmul.f32 0.7978846, %v4139_v2  ;;  %v4044_v46 = vmul.f32 0.5, %v3985_v49 }
 0xa6b   :  { %v3706_v45 = vsub.f32 1.5, %v3705_v52  ;;  %v4210_v5 = vadd.f32 1.0, %v9526_v3 }
 0xa6c   :  { %9527 = vtanh.f32 %v4163_v7  ;;  %v4092_v12 = vmul.f32 %v4068_v19, %v3985_v49  ;;  %v4271_v19 = vpop.f32.mrf.mxu2 }
 0xa6d   :  { %v3707_v25 = vmul.f32 %v9524_v44, %v3706_v45  ;;  %v4234_v53 = vmul.f32 %v4210_v5, %v4042_v1 }
 0xa6e   :  { %v4116_v43 = vmul.f32 %v4092_v12, %v3985_v49 }
 0xa6f   :  { %v3711_v59 = vsel %vm3710_vm9, %v9524_v44, %v3707_v25  ;;  %v3987_v36 = vpop.f32.mrf.mxu1  ;;  %4282 = vmatmul.f32.gmra.mxu2 %v4234_v53  ;;  %v12238_v44 = vld [vmem:[#allocation5 + $0x143] ss:$0 sm:$0xff]  ;;  %v4343_v53 = vadd.f32 %v4271_v19, %v11664_v0 }
 0xa70   :  { %v3816_v6 = vmul.f32 %v3711_v59, %v12077_v41  ;;  %v3988_v54 = vadd.f32 %v11846_v57, %v3987_v36  ;;  %v4140_v30 = vadd.f32 %v4116_v43, %v3985_v49  ;;  %v3867_v13 = vadd.f32 %v12238_v44, %v3842_v22  ;;  %v12252_v43 = vld [vmem:[#allocation5 + $0x146] ss:$0 sm:$0xff] }
 0xa71   :  { %v12257_v4 = vadd.f32 %v12252_v43, %v4343_v53 }
 0xa72   :  { %v9528_v17 = vpop.eup %9527  ;;  %v4069_v27 = vmul.f32 0.044715, %v3988_v54  ;;  %v3841_v35 = vmul.f32 %v12175_v51, %v3816_v6  ;;  %v4164_v34 = vmul.f32 0.7978846, %v4140_v30  ;;  %v4045_v12 = vmul.f32 0.5, %v3988_v54 }
 0xa73   :  { %v4211_v55 = vadd.f32 1.0, %v9528_v17  ;;  %14958 = vst [vmem:[#allocation65_spill] sm:$0xff] %v12257_v4 }
 0xa74   :  { %v3866_v38 = vadd.f32 %v12238_v44, %v3841_v35  ;;  %9529 = vtanh.f32 %v4164_v34  ;;  %v4093_v41 = vmul.f32 %v4069_v27, %v3988_v54  ;;  %v4274_v30 = vpop.f32.mrf.mxu2  ;;  %v4423_v27 = vsel %vm300_vm1, %v12257_v4, 0.0 }
 0xa75   :  { %v4235_v23 = vmul.f32 %v4211_v55, %v4043_v28  ;;  %v4344_v0 = vadd.f32 %v4274_v30, %v11586_v14 }
 0xa76   :  { %8761 = vmatmul.msk.f32.gmra.mxu1 %vm300_vm1, %v3866_v38  ;;  %v4117_v57 = vmul.f32 %v4093_v41, %v3988_v54 }
 0xa77   :  { %4285 = vmatmul.f32.gmra.mxu2 %v4235_v23  ;;  %v12270_v55 = vadd.f32 %v12252_v43, %v4344_v0 }
 0xa78   :  { %v4141_v47 = vadd.f32 %v4117_v57, %v3988_v54 }
 0xa79   :  { %14959 = vst [vmem:[#allocation43_spill] sm:$0xff] %v12270_v55  ;;  %v4426_v23 = vsel %vm300_vm1, %v12270_v55, 0.0 }
 0xa7a   :  { %v9530_v2 = vpop.eup %9529  ;;  %v4165_v31 = vmul.f32 0.7978846, %v4141_v47 }
 0xa7b   :  { %v4212_v52 = vadd.f32 1.0, %v9530_v2  ;;  %v12284_v2 = vld [vmem:[#allocation5 + $0x145] ss:$0 sm:$0xff] }
 0xa7c   :  { %9531 = vtanh.f32 %v4165_v31  ;;  %v4277_v38 = vpop.f32.mrf.mxu2 }
 0xa7d   :  { %v4236_v3 = vmul.f32 %v4212_v52, %v4044_v46  ;;  %v4345_v41 = vadd.f32 %v4277_v38, %v11596_v61 }
 0xa7e   :  { %8762 = vmatmul.msk.f32.gmra.mxu1 %vm300_vm1, %v3867_v13 }
 0xa7f   :  { %4288 = vmatmul.f32.gmra.mxu2 %v4236_v3  ;;  %v12282_v47 = vadd.f32 %v12252_v43, %v4345_v41 }
 0xa80   :  { %v3363_v7 = vpop.xlane.xlu2 %3362 }
 0xa81   :  { %v3391_v45 = vmul.f32 %v3363_v7, %v14932_v42  ;;  %14960 = vst [vmem:[#allocation53_spill] sm:$0xff] %v12282_v47  ;;  %v4429_v52 = vsel %vm300_vm1, %v12282_v47, 0.0 }
 0xa82   :  { %v9532_v1 = vpop.eup %9531 }
 0xa83   :  { %v12247_v5 = vsub.f32 %v12121_v39, %v3391_v45  ;;  %v4213_v60 = vadd.f32 1.0, %v9532_v1 }
 0xa85   :  { %v4237_v25 = vmul.f32 %v4213_v60, %v4045_v12  ;;  %v3439_v49 = vmul.f32 %v12247_v5, %v12247_v5 }
 0xa87   :  { %4291 = vmatmul.f32.gmra.mxu2 %v4237_v25  ;;  %v3505_v59 = vsel %vm300_vm1, %v3439_v49, 0.0 }
 0xa88   :  { %3506 = vadd.xlane.f32.xlu0 %v3505_v59  ;;  %v3366_v36 = vpop.xlane.xlu2 %3365 }
 0xa89   :  { %v3392_v6 = vmul.f32 %v3366_v36, %v14932_v42 }
 0xa8b   :  { %v12260_v54 = vsub.f32 %v12131_v48, %v3392_v6 }
 0xa8d   :  { %v3440_v17 = vmul.f32 %v12260_v54, %v12260_v54 }
 0xa8f   :  { %v3508_v35 = vsel %vm300_vm1, %v3440_v17, 0.0 }
 0xa90   :  { %4424 = vadd.xlane.f32.xlu0 %v4423_v27  ;;  %3509 = vadd.xlane.f32.xlu1 %v3508_v35  ;;  %v3369_v34 = vpop.xlane.xlu2 %3368 }
 0xa91   :  { %v3393_v28 = vmul.f32 %v3369_v34, %v14932_v42 }
 0xa93   :  { %v12273_v32 = vsub.f32 %v12144_v56, %v3393_v28 }
 0xa95   :  { %v3441_v14 = vmul.f32 %v12273_v32, %v12273_v32 }
 0xa97   :  { %v3511_v57 = vsel %vm300_vm1, %v3441_v14, 0.0 }
 0xa98   :  { %4427 = vadd.xlane.f32.xlu1 %v4426_v23  ;;  %3512 = vadd.xlane.f32.xlu2 %v3511_v57 }
 0xa9a   :  { %v3990_v22 = vpop.f32.mrf.mxu1 }
 0xa9b   :  { %v3991_v31 = vadd.f32 %v12284_v2, %v3990_v22 }
 0xa9d   :  { %v4070_v46 = vmul.f32 0.044715, %v3991_v31  ;;  %v4046_v30 = vmul.f32 0.5, %v3991_v31 }
 0xa9f   :  { %v4094_v61 = vmul.f32 %v4070_v46, %v3991_v31 }
 0xaa0   :  { %4430 = vadd.xlane.f32.xlu2 %v4429_v52 }
 0xaa1   :  { %v4118_v13 = vmul.f32 %v4094_v61, %v3991_v31 }
 0xaa2   :  { %v3993_v3 = vpop.f32.mrf.mxu1 }
 0xaa3   :  { %v3994_v19 = vadd.f32 %v12284_v2, %v3993_v3  ;;  %v4142_v7 = vadd.f32 %v4118_v13, %v3991_v31 }
 0xaa5   :  { %v4071_v45 = vmul.f32 0.044715, %v3994_v19  ;;  %v4166_v1 = vmul.f32 0.7978846, %v4142_v7  ;;  %v4047_v57 = vmul.f32 0.5, %v3994_v19 }
 0xaa7   :  { %9533 = vtanh.f32 %v4166_v1  ;;  %v4095_v12 = vmul.f32 %v4071_v45, %v3994_v19 }
 0xaa9   :  { %v4119_v60 = vmul.f32 %v4095_v12, %v3994_v19 }
 0xaaa   :  { %v3996_v25 = vpop.f32.mrf.mxu1 }
 0xaab   :  { %v3997_v49 = vadd.f32 %v12284_v2, %v3996_v25  ;;  %v4143_v53 = vadd.f32 %v4119_v60, %v3994_v19 }
 0xaad   :  { %v9534_v59 = vpop.eup %9533  ;;  %v4072_v36 = vmul.f32 0.044715, %v3997_v49  ;;  %v4167_v6 = vmul.f32 0.7978846, %v4143_v53  ;;  %v4048_v25 = vmul.f32 0.5, %v3997_v49 }
 0xaae   :  { %v4214_v17 = vadd.f32 1.0, %v9534_v59 }
 0xaaf   :  { %9535 = vtanh.f32 %v4167_v6  ;;  %v4096_v0 = vmul.f32 %v4072_v36, %v3997_v49 }
 0xab0   :  { %v4238_v27 = vmul.f32 %v4214_v17, %v4046_v30 }
 0xab1   :  { %v4120_v35 = vmul.f32 %v4096_v0, %v3997_v49 }
 0xab2   :  { %v3999_v34 = vpop.f32.mrf.mxu1  ;;  %4294 = vmatmul.f32.gmra.mxu2 %v4238_v27 }
 0xab3   :  { %v4000_v28 = vadd.f32 %v12284_v2, %v3999_v34  ;;  %v4144_v38 = vadd.f32 %v4120_v35, %v3997_v49 }
 0xab5   :  { %v9536_v14 = vpop.eup %9535  ;;  %v4073_v41 = vmul.f32 0.044715, %v4000_v28  ;;  %v4168_v23 = vmul.f32 0.7978846, %v4144_v38 }
 0xab6   :  { %v4215_v22 = vadd.f32 1.0, %v9536_v14 }
 0xab7   :  { %9537 = vtanh.f32 %v4168_v23  ;;  %v4097_v46 = vmul.f32 %v4073_v41, %v4000_v28  ;;  %v4049_v23 = vmul.f32 0.5, %v4000_v28 }
 0xab8   :  { %v4239_v52 = vmul.f32 %v4215_v22, %v4047_v57 }
 0xab9   :  { %v4121_v61 = vmul.f32 %v4097_v46, %v4000_v28 }
 0xaba   :  { %v4002_v31 = vpop.f32.mrf.mxu1  ;;  %4297 = vmatmul.f32.gmra.mxu2 %v4239_v52 }
 0xabb   :  { %v4003_v13 = vadd.f32 %v12284_v2, %v4002_v31  ;;  %v4145_v3 = vadd.f32 %v4121_v61, %v4000_v28 }
 0xabc   :  { %v3492_v7 = vpop.xlane.xlu1 %3491 }
 0xabd   :  { %v9538_v45 = vpop.eup %9537  ;;  %v4074_v1 = vmul.f32 0.044715, %v4003_v13  ;;  %v3530_v12 = vmul.f32 %v3492_v7, %v14932_v42  ;;  %v4169_v60 = vmul.f32 0.7978846, %v4145_v3 }
 0xabe   :  { %v4216_v53 = vadd.f32 1.0, %v9538_v45 }
 0xabf   :  { %v3554_v59 = vadd.f32 1e-05, %v3530_v12  ;;  %9539 = vtanh.f32 %v4169_v60  ;;  %v4098_v19 = vmul.f32 %v4074_v1, %v4003_v13 }
 0xac0   :  { %v4240_v36 = vmul.f32 %v4216_v53, %v4048_v25 }
 0xac1   :  { %9541 = vrsqrt.f32 %v3554_v59  ;;  %v4122_v6 = vmul.f32 %v4098_v19, %v4003_v13  ;;  %vm3728_vm14 = vweird.f32 %v3554_v59 }
 0xac2   :  { %v4005_v30 = vpop.f32.mrf.mxu1  ;;  %4300 = vmatmul.f32.gmra.mxu2 %v4240_v36  ;;  %v4050_v36 = vmul.f32 0.5, %v4003_v13 }
 0xac3   :  { %v4006_v17 = vadd.f32 %v12284_v2, %v4005_v30  ;;  %v4146_v0 = vadd.f32 %v4122_v6, %v4003_v13 }
 0xac4   :  { %v3495_v27 = vpop.xlane.xlu1 %3494  ;;  %v3498_v35 = vpop.xlane.xlu0 %3497 }
 0xac5   :  { %v9540_v34 = vpop.eup %9539  ;;  %v4075_v38 = vmul.f32 0.044715, %v4006_v17  ;;  %v3531_v14 = vmul.f32 %v3495_v27, %v14932_v42  ;;  %v3532_v49 = vmul.f32 %v3498_v35, %v14932_v42  ;;  %v4170_v41 = vmul.f32 0.7978846, %v4146_v0 }
 0xac6   :  { %v4217_v57 = vadd.f32 1.0, %v9540_v34 }
 0xac7   :  { %v9542_v22 = vpop.eup %9541  ;;  %v3555_v46 = vadd.f32 1e-05, %v3531_v14  ;;  %v3556_v52 = vadd.f32 1e-05, %v3532_v49  ;;  %9543 = vtanh.f32 %v4170_v41  ;;  %v4099_v61 = vmul.f32 %v4075_v38, %v4006_v17 }
 0xac8   :  { %v3723_v31 = vmul.f32 %v9542_v22, %v3554_v59  ;;  %v4241_v3 = vmul.f32 %v4217_v57, %v4049_v23  ;;  %vm3729_vm13 = vweird.f32 %v9542_v22 }
 0xac9   :  { %9545 = vrsqrt.f32 %v3555_v46  ;;  %v4123_v7 = vmul.f32 %v4099_v61, %v4006_v17  ;;  %vm3730_vm15 = vmor %vm3728_vm14, %vm3729_vm13  ;;  %vm3738_vm3 = vweird.f32 %v3555_v46  ;;  %vm3748_vm6 = vweird.f32 %v3556_v52 }
 0xaca   :  { %v3724_v45 = vmul.f32 %v9542_v22, %v3723_v31  ;;  %9547 = vrsqrt.f32 %v3556_v52  ;;  %4303 = vmatmul.f32.gmra.mxu2 %v4241_v3 }
 0xacb   :  { %v4147_v1 = vadd.f32 %v4123_v7, %v4006_v17 }
 0xacc   :  { %v3725_v12 = vmul.f32 0.5, %v3724_v45  ;;  %v3501_v60 = vpop.xlane.xlu1 %3500  ;;  %v4051_v45 = vmul.f32 0.5, %v4006_v17 }
 0xacd   :  { %v9544_v25 = vpop.eup %9543  ;;  %v3533_v53 = vmul.f32 %v3501_v60, %v14932_v42  ;;  %v4171_v28 = vmul.f32 0.7978846, %v4147_v1 }
 0xace   :  { %v3726_v19 = vsub.f32 1.5, %v3725_v12  ;;  %v4218_v6 = vadd.f32 1.0, %v9544_v25 }
 0xacf   :  { %v9546_v30 = vpop.eup %9545  ;;  %v3557_v0 = vadd.f32 1e-05, %v3533_v53  ;;  %9549 = vtanh.f32 %v4171_v28 }
 0xad0   :  { %v9548_v27 = vpop.eup %9547  ;;  %v3727_v35 = vmul.f32 %v9542_v22, %v3726_v19  ;;  %v3733_v34 = vmul.f32 %v9546_v30, %v3555_v46  ;;  %v4242_v38 = vmul.f32 %v4218_v6, %v4050_v36  ;;  %vm3739_vm0 = vweird.f32 %v9546_v30 }
 0xad1   :  { %v3743_v14 = vmul.f32 %v9548_v27, %v3556_v52  ;;  %9551 = vrsqrt.f32 %v3557_v0  ;;  %vm3749_vm4 = vweird.f32 %v9548_v27  ;;  %vm3740_vm5 = vmor %vm3738_vm3, %vm3739_vm0  ;;  %vm3758_vm9 = vweird.f32 %v3557_v0 }
 0xad2   :  { %v3731_v49 = vsel %vm3730_vm15, %v9542_v22, %v3727_v35  ;;  %v3734_v41 = vmul.f32 %v9546_v30, %v3733_v34  ;;  %4306 = vmatmul.f32.gmra.mxu2 %v4242_v38  ;;  %vm3750_vm7 = vmor %vm3748_vm6, %vm3749_vm4 }
 0xad3   :  { %v3818_v23 = vmul.f32 %v3731_v49, %v12183_v37  ;;  %v3744_v57 = vmul.f32 %v9548_v27, %v3743_v14 }
 0xad4   :  { %v3735_v61 = vmul.f32 0.5, %v3734_v41 }
 0xad5   :  { %v9550_v13 = vpop.eup %9549  ;;  %v3745_v31 = vmul.f32 0.5, %v3744_v57  ;;  %v3843_v3 = vmul.f32 %v12175_v51, %v3818_v23 }
 0xad6   :  { %v3736_v7 = vsub.f32 1.5, %v3735_v61  ;;  %v4219_v59 = vadd.f32 1.0, %v9550_v13 }
 0xad7   :  { %v9552_v1 = vpop.eup %9551  ;;  %v3746_v12 = vsub.f32 1.5, %v3745_v31  ;;  %v3868_v60 = vadd.f32 %v12238_v44, %v3843_v3 }
 0xad8   :  { %v3737_v22 = vmul.f32 %v9546_v30, %v3736_v7  ;;  %v3753_v25 = vmul.f32 %v9552_v1, %v3557_v0  ;;  %v4243_v53 = vmul.f32 %v4219_v59, %v4051_v45  ;;  %vm3759_vm8 = vweird.f32 %v9552_v1 }
 0xad9   :  { %v3747_v37 = vmul.f32 %v9548_v27, %v3746_v12  ;;  %8763 = vmatmul.msk.f32.gmra.mxu1 %vm300_vm1, %v3868_v60  ;;  %vm3760_vm10 = vmor %vm3758_vm9, %vm3759_vm8 }
 0xada   :  { %v3741_v28 = vsel %vm3740_vm5, %v9546_v30, %v3737_v22  ;;  %v3754_v19 = vmul.f32 %v9552_v1, %v3753_v25  ;;  %4309 = vmatmul.f32.gmra.mxu2 %v4243_v53 }
 0xadb   :  { %v3819_v17 = vmul.f32 %v3741_v28, %v12189_v50  ;;  %v3751_v36 = vsel %vm3750_vm7, %v9548_v27, %v3747_v37 }
 0xadc   :  { %v3755_v46 = vmul.f32 0.5, %v3754_v19  ;;  %v3504_v6 = vpop.xlane.xlu2 %3503  ;;  %v3820_v14 = vmul.f32 %v3751_v36, %v12195_v29 }
 0xadd   :  { %v3534_v35 = vmul.f32 %v3504_v6, %v14932_v42  ;;  %v3844_v34 = vmul.f32 %v12175_v51, %v3819_v17 }
 0xade   :  { %v3756_v38 = vsub.f32 1.5, %v3755_v46  ;;  %v3845_v50 = vmul.f32 %v12175_v51, %v3820_v14 }
 0xadf   :  { %v3558_v49 = vadd.f32 1e-05, %v3534_v35  ;;  %v3869_v41 = vadd.f32 %v12238_v44, %v3844_v34 }
 0xae0   :  { %v3757_v30 = vmul.f32 %v9552_v1, %v3756_v38  ;;  %v3870_v57 = vadd.f32 %v12238_v44, %v3845_v50 }
 0xae1   :  { %9553 = vrsqrt.f32 %v3558_v49  ;;  %8764 = vmatmul.msk.f32.gmra.mxu1 %vm300_vm1, %v3869_v41  ;;  %vm3768_vm13 = vweird.f32 %v3558_v49 }
 0xae2   :  { %v3761_v52 = vsel %vm3760_vm10, %v9552_v1, %v3757_v30 }
 0xae3   :  { %v3821_v23 = vmul.f32 %v3761_v52, %v12209_v40 }
 0xae5   :  { %v3846_v31 = vmul.f32 %v12175_v51, %v3821_v23 }
 0xae7   :  { %v9554_v27 = vpop.eup %9553  ;;  %v3871_v0 = vadd.f32 %v12238_v44, %v3846_v31 }
 0xae8   :  { %v3763_v61 = vmul.f32 %v9554_v27, %v3558_v49  ;;  %vm3769_vm11 = vweird.f32 %v9554_v27 }
 0xae9   :  { %8765 = vmatmul.msk.f32.gmra.mxu1 %vm300_vm1, %v3870_v57  ;;  %vm3770_vm14 = vmor %vm3768_vm13, %vm3769_vm11 }
 0xaea   :  { %v3764_v29 = vmul.f32 %v9554_v27, %v3763_v61  ;;  %v4280_v13 = vpop.f32.mrf.mxu2 }
 0xaec   :  { %v3765_v3 = vmul.f32 0.5, %v3764_v29 }
 0xaee   :  { %v3766_v7 = vsub.f32 1.5, %v3765_v3 }
 0xaf0   :  { %v3767_v45 = vmul.f32 %v9554_v27, %v3766_v7 }
 0xaf1   :  { %8766 = vmatmul.msk.f32.gmra.mxu1 %vm300_vm1, %v3871_v0 }
 0xaf2   :  { %v3771_v40 = vsel %vm3770_vm14, %v9554_v27, %v3767_v45  ;;  %v4283_v59 = vpop.f32.mrf.mxu2 }
 0xaf3   :  { %v3822_v1 = vmul.f32 %v3771_v40, %v12224_v18  ;;  %v4347_v12 = vadd.f32 %v4283_v59, %v11860_v24  ;;  %v4008_v60 = vpop.f32.mrf.mxu1 }
 0xaf4   :  { %v4009_v22 = vadd.f32 %v12284_v2, %v4008_v60 }
 0xaf5   :  { %v12319_v25 = vadd.f32 %v12252_v43, %v4347_v12  ;;  %v3847_v53 = vmul.f32 %v12175_v51, %v3822_v1  ;;  %v4346_v12 = vadd.f32 %v4280_v13, %v11892_v21 }
 0xaf6   :  { %v4076_v37 = vmul.f32 0.044715, %v4009_v22  ;;  %v4052_v40 = vmul.f32 0.5, %v4009_v22 }
 0xaf7   :  { %14961 = vst [vmem:[#allocation54_spill] sm:$0xff] %v12319_v25  ;;  %v4435_v28 = vsel %vm300_vm1, %v12319_v25, 0.0  ;;  %v3872_v19 = vadd.f32 %v12238_v44, %v3847_v53 }
 0xaf8   :  { %4436 = vadd.xlane.f32.xlu1 %v4435_v28  ;;  %v4100_v17 = vmul.f32 %v4076_v37, %v4009_v22 }
 0xaf9   :  { %8767 = vmatmul.msk.f32.gmra.mxu1 %vm300_vm1, %v3872_v19 }
 0xafa   :  { %v4124_v18 = vmul.f32 %v4100_v17, %v4009_v22  ;;  %v4286_v46 = vpop.f32.mrf.mxu2 }
 0xafb   :  { %v4011_v24 = vpop.f32.mrf.mxu1  ;;  %v3507_v36 = vpop.xlane.xlu0 %3506 }
 0xafc   :  { %v4012_v6 = vadd.f32 %v12284_v2, %v4011_v24  ;;  %v3535_v35 = vmul.f32 %v3507_v36, %v14932_v42  ;;  %v4148_v34 = vadd.f32 %v4124_v18, %v4009_v22  ;;  %v12342_v22 = vadd.f32 %v12252_v43, %v4346_v12 }
 0xafe   :  { %v4077_v38 = vmul.f32 0.044715, %v4012_v6  ;;  %v3559_v14 = vadd.f32 1e-05, %v3535_v35  ;;  %v4172_v49 = vmul.f32 0.7978846, %v4148_v34 }
 0xaff   :  { %14962 = vst [vmem:[#allocation51_spill] sm:$0xff] %v12342_v22 }
 0xb00   :  { %9555 = vrsqrt.f32 %v3559_v14  ;;  %v4101_v41 = vmul.f32 %v4077_v38, %v4012_v6  ;;  %vm3778_vm0 = vweird.f32 %v3559_v14 }
 0xb01   :  { %9557 = vtanh.f32 %v4172_v49 }
 0xb02   :  { %v4125_v30 = vmul.f32 %v4101_v41, %v4012_v6  ;;  %v12330_v29 = vpop.f32.mrf.mxu2 }
 0xb03   :  { %v3510_v50 = vpop.xlane.xlu1 %3509  ;;  %v4425_v52 = vpop.xlane.xlu0 %4424 }
 0xb04   :  { %v3536_v27 = vmul.f32 %v3510_v50, %v14932_v42  ;;  %v4495_v23 = vmul.f32 %v4425_v52, %v14932_v42  ;;  %v4149_v57 = vadd.f32 %v4125_v30, %v4012_v6  ;;  %v4053_v50 = vmul.f32 0.5, %v4012_v6 }
 0xb06   :  { %v9556_v61 = vpop.eup %9555  ;;  %v3560_v31 = vadd.f32 1e-05, %v3536_v27  ;;  %v12333_v3 = vsub.f32 %v12257_v4, %v4495_v23  ;;  %v4173_v7 = vmul.f32 0.7978846, %v4149_v57  ;;  %v4432_v57 = vsel %vm300_vm1, %v12342_v22, 0.0 }
 0xb07   :  { %v9558_v0 = vpop.eup %9557  ;;  %v3773_v45 = vmul.f32 %v9556_v61, %v3559_v14  ;;  %vm3779_vm15 = vweird.f32 %v9556_v61 }
 0xb08   :  { %9559 = vrsqrt.f32 %v3560_v31  ;;  %v4220_v59 = vadd.f32 1.0, %v9558_v0  ;;  %v4543_v1 = vmul.f32 %v12333_v3, %v12333_v3  ;;  %vm3780_vm3 = vmor %vm3778_vm0, %vm3779_vm15  ;;  %vm3788_vm5 = vweird.f32 %v3560_v31 }
 0xb09   :  { %v3774_v60 = vmul.f32 %v9556_v61, %v3773_v45  ;;  %9561 = vtanh.f32 %v4173_v7  ;;  %v4348_v7 = vadd.f32 %v4286_v46, %v11852_v11 }
 0xb0a   :  { %v4244_v53 = vmul.f32 %v4220_v59, %v4052_v40  ;;  %v4567_v37 = vsel %vm300_vm1, %v4543_v1, 0.0  ;;  %v4292_v41 = vpop.f32.mrf.mxu2 }
 0xb0b   :  { %v3775_v28 = vmul.f32 0.5, %v3774_v60  ;;  %v4428_v19 = vpop.xlane.xlu1 %4427  ;;  %v3513_v17 = vpop.xlane.xlu2 %3512  ;;  %4568 = vadd.xlane.f32.xlu0 %v4567_v37  ;;  %v4350_v59 = vadd.f32 %v4292_v41, %v11884_v26  ;;  %v12358_v11 = vadd.f32 %v12252_v43, %v4348_v7  ;;  %v4402_v41 = vld [vmem:[#allocation5 + $0x160] sm:$0xff] }
 0xb0c   :  { %v4496_v18 = vmul.f32 %v4428_v19, %v14932_v42  ;;  %v3537_v24 = vmul.f32 %v3513_v17, %v14932_v42  ;;  %4312 = vmatmul.f32.gmra.mxu2 %v4244_v53  ;;  %8968 = vmatpush.msra.mxu3 %v4402_v41 }
 0xb0d   :  { %v3776_v36 = vsub.f32 1.5, %v3775_v28  ;;  %14963 = vst [vmem:[#allocation57_spill] sm:$0xff] %v12358_v11  ;;  %v12365_v53 = vadd.f32 %v12252_v43, %v4350_v59  ;;  %5086 = vmatpush.msrb.mxu2 %v4402_v41 }
 0xb0e   :  { %v9560_v21 = vpop.eup %9559  ;;  %v12345_v13 = vsub.f32 %v12270_v55, %v4496_v18  ;;  %v3561_v35 = vadd.f32 1e-05, %v3537_v24  ;;  %v4349_v18 = vadd.f32 %v12330_v29, %v11868_v16 }
 0xb0f   :  { %v9562_v34 = vpop.eup %9561  ;;  %v3777_v38 = vmul.f32 %v9556_v61, %v3776_v36  ;;  %v3783_v49 = vmul.f32 %v9560_v21, %v3560_v31  ;;  %vm3789_vm4 = vweird.f32 %v9560_v21  ;;  %14964 = vst [vmem:[#allocation59_spill] sm:$0xff] %v12365_v53  ;;  %v4438_v31 = vsel %vm300_vm1, %v12358_v11, 0.0 }
 0xb10   :  { %9563 = vrsqrt.f32 %v3561_v35  ;;  %v4544_v30 = vmul.f32 %v12345_v13, %v12345_v13  ;;  %v4221_v52 = vadd.f32 1.0, %v9562_v34  ;;  %vm3790_vm6 = vmor %vm3788_vm5, %vm3789_vm4  ;;  %v12380_v16 = vadd.f32 %v12252_v43, %v4349_v18 }
 0xb11   :  { %v3781_v27 = vsel %vm3780_vm3, %v9556_v61, %v3777_v38  ;;  %v3784_v23 = vmul.f32 %v9560_v21, %v3783_v49  ;;  %v4444_v38 = vsel %vm300_vm1, %v12365_v53, 0.0  ;;  %vm3798_vm8 = vweird.f32 %v3561_v35 }
 0xb12   :  { %v3823_v0 = vmul.f32 %v3781_v27, %v12247_v5  ;;  %v4570_v14 = vsel %vm300_vm1, %v4544_v30, 0.0  ;;  %v4245_v45 = vmul.f32 %v4221_v52, %v4053_v50  ;;  %14965 = vst [vmem:[#allocation58_spill] sm:$0xff] %v12380_v16  ;;  %v4441_v52 = vsel %vm300_vm1, %v12380_v16, 0.0 }
 0xb13   :  { %v3785_v40 = vmul.f32 0.5, %v3784_v23  ;;  %4571 = vadd.xlane.f32.xlu2 %v4570_v14  ;;  %v4431_v1 = vpop.xlane.xlu2 %4430  ;;  %4433 = vadd.xlane.f32.xlu0 %v4432_v57 }
 0xb14   :  { %v4497_v6 = vmul.f32 %v4431_v1, %v14932_v42  ;;  %4315 = vmatmul.f32.gmra.mxu2 %v4245_v45  ;;  %v3848_v61 = vmul.f32 %v12175_v51, %v3823_v0 }
 0xb15   :  { %v3786_v12 = vsub.f32 1.5, %v3785_v40 }
 0xb16   :  { %v9564_v60 = vpop.eup %9563  ;;  %v12361_v5 = vsub.f32 %v12282_v47, %v4497_v6  ;;  %v3873_v46 = vadd.f32 %v12238_v44, %v3848_v61  ;;  %v14969_v6 = vld [vmem:[#allocation40_spill] sm:$0xff] }
 0xb17   :  { %v3787_v26 = vmul.f32 %v9560_v21, %v3786_v12  ;;  %v3793_v37 = vmul.f32 %v9564_v60, %v3561_v35  ;;  %vm3799_vm7 = vweird.f32 %v9564_v60  ;;  %v4401_v12 = vld [vmem:[#allocation5 + $0x158] sm:$0xff] }
 0xb18   :  { %8768 = vmatmul.msk.f32.gmra.mxu1 %vm300_vm1, %v3873_v46  ;;  %v4545_v28 = vmul.f32 %v12361_v5, %v12361_v5  ;;  %vm3800_vm9 = vmor %vm3798_vm8, %vm3799_vm7  ;;  %5087 = vmatpush.msrb.mxu2 %v4401_v12  ;;  %v14971_v46 = vld [vmem:[#allocation46_spill] sm:$0xff] }
 0xb19   :  { %v3791_v19 = vsel %vm3790_vm6, %v9560_v21, %v3787_v26  ;;  %v3794_v17 = vmul.f32 %v9564_v60, %v3793_v37  ;;  %8969 = vmatpush.msra.mxu3 %v4401_v12 }
 0xb1a   :  { %v3824_v24 = vmul.f32 %v3791_v19, %v12260_v54  ;;  %v4573_v36 = vsel %vm300_vm1, %v4545_v28, 0.0 }
 0xb1b   :  { %v3795_v34 = vmul.f32 0.5, %v3794_v17  ;;  %4439 = vadd.xlane.f32.xlu2 %v4438_v31  ;;  %4574 = vadd.xlane.f32.xlu1 %v4573_v36 }
 0xb1c   :  { %4445 = vadd.xlane.f32.xlu0 %v4444_v38  ;;  %v3849_v21 = vmul.f32 %v12175_v51, %v3824_v24 }
 0xb1d   :  { %v3796_v49 = vsub.f32 1.5, %v3795_v34  ;;  %v14973_v34 = vld [vmem:[#allocation38_spill] sm:$0xff] }
 0xb1e   :  { %v3874_v54 = vadd.f32 %v12238_v44, %v3849_v21 }
 0xb1f   :  { %v3797_v29 = vmul.f32 %v9564_v60, %v3796_v49 }
 0xb20   :  { %8769 = vmatmul.msk.f32.gmra.mxu1 %vm300_vm1, %v3874_v54 }
 0xb21   :  { %v3801_v30 = vsel %vm3800_vm9, %v9564_v60, %v3797_v29 }
 0xb22   :  { %v3825_v50 = vmul.f32 %v3801_v30, %v12273_v32 }
 0xb23   :  { %4442 = vadd.xlane.f32.xlu1 %v4441_v52 }
 0xb24   :  { %v3850_v27 = vmul.f32 %v12175_v51, %v3825_v50 }
 0xb26   :  { %v3875_v23 = vadd.f32 %v12238_v44, %v3850_v27 }
 0xb28   :  { %8770 = vmatmul.msk.f32.gmra.mxu1 %vm300_vm1, %v3875_v23 }
 0xb35   :  { %v4295_v35 = vpop.f32.mrf.mxu2 }
 0xb36   :  { %v4351_v57 = vadd.f32 %v4295_v35, %v11922_v10 }
 0xb38   :  { %v12392_v7 = vadd.f32 %v12252_v43, %v4351_v57 }
 0xb3a   :  { %14966 = vst [vmem:[#allocation36_spill] sm:$0xff] %v12392_v7  ;;  %v4447_v0 = vsel %vm300_vm1, %v12392_v7, 0.0 }
 0xb3b   :  { %4448 = vadd.xlane.f32.xlu2 %v4447_v0 }
 0xb3d   :  { %v4298_v32 = vpop.f32.mrf.mxu2 }
 0xb3e   :  { %v4352_v14 = vadd.f32 %v4298_v32, %v11756_v15 }
 0xb40   :  { %v12398_v45 = vadd.f32 %v12252_v43, %v4352_v14 }
 0xb42   :  { %14967 = vst [vmem:[#allocation37_spill] sm:$0xff] %v12398_v45  ;;  %v4450_v51 = vsel %vm300_vm1, %v12398_v45, 0.0 }
 0xb43   :  { %4451 = vadd.xlane.f32.xlu1 %v4450_v51 }
 0xb45   :  { %v4301_v44 = vpop.f32.mrf.mxu2 }
 0xb46   :  { %v4353_v10 = vadd.f32 %v4301_v44, %v11748_v63 }
 0xb48   :  { %v12404_v40 = vadd.f32 %v12252_v43, %v4353_v10 }
 0xb4a   :  { %14968 = vst [vmem:[#allocation49_spill] sm:$0xff] %v12404_v40  ;;  %v4453_v59 = vsel %vm300_vm1, %v12404_v40, 0.0 }
 0xb4b   :  { %4454 = vadd.xlane.f32.xlu0 %v4453_v59 }
 0xb4d   :  { %v4304_v1 = vpop.f32.mrf.mxu2 }
 0xb4e   :  { %v4354_v15 = vadd.f32 %v4304_v1, %v14969_v6 }
 0xb50   :  { %v12410_v61 = vadd.f32 %v12252_v43, %v4354_v15 }
 0xb52   :  { %14970 = vst [vmem:[#allocation41_spill] sm:$0xff] %v12410_v61  ;;  %v4456_v60 = vsel %vm300_vm1, %v12410_v61, 0.0 }
 0xb53   :  { %4457 = vadd.xlane.f32.xlu2 %v4456_v60 }
 0xb55   :  { %v4307_v63 = vpop.f32.mrf.mxu2 }
 0xb56   :  { %v4355_v26 = vadd.f32 %v4307_v63, %v14971_v46  ;;  %v4014_v37 = vpop.f32.mrf.mxu1 }
 0xb57   :  { %v4015_v28 = vadd.f32 %v12284_v2, %v4014_v37 }
 0xb58   :  { %v12417_v19 = vadd.f32 %v12252_v43, %v4355_v26 }
 0xb59   :  { %v4078_v17 = vmul.f32 0.044715, %v4015_v28  ;;  %v4054_v51 = vmul.f32 0.5, %v4015_v28 }
 0xb5a   :  { %14972 = vst [vmem:[#allocation42_spill] sm:$0xff] %v12417_v19  ;;  %v4459_v18 = vsel %vm300_vm1, %v12417_v19, 0.0 }
 0xb5b   :  { %4460 = vadd.xlane.f32.xlu1 %v4459_v18  ;;  %v4102_v24 = vmul.f32 %v4078_v17, %v4015_v28 }
 0xb5d   :  { %v4310_v31 = vpop.f32.mrf.mxu2  ;;  %v4126_v36 = vmul.f32 %v4102_v24, %v4015_v28 }
 0xb5e   :  { %v4356_v38 = vadd.f32 %v4310_v31, %v14973_v34  ;;  %v4017_v21 = vpop.f32.mrf.mxu1 }
 0xb5f   :  { %v4018_v49 = vadd.f32 %v12284_v2, %v4017_v21  ;;  %v4150_v54 = vadd.f32 %v4126_v36, %v4015_v28 }
 0xb60   :  { %v12424_v29 = vadd.f32 %v12252_v43, %v4356_v38 }
 0xb61   :  { %v4079_v41 = vmul.f32 0.044715, %v4018_v49  ;;  %v4174_v30 = vmul.f32 0.7978846, %v4150_v54  ;;  %v4055_v26 = vmul.f32 0.5, %v4018_v49 }
 0xb62   :  { %14974 = vst [vmem:[#allocation52_spill] sm:$0xff] %v12424_v29  ;;  %v4462_v50 = vsel %vm300_vm1, %v12424_v29, 0.0 }
 0xb63   :  { %4463 = vadd.xlane.f32.xlu0 %v4462_v50  ;;  %9565 = vtanh.f32 %v4174_v30  ;;  %v4103_v52 = vmul.f32 %v4079_v41, %v4018_v49 }
 0xb65   :  { %v4127_v27 = vmul.f32 %v4103_v52, %v4018_v49 }
 0xb66   :  { %v4020_v23 = vpop.f32.mrf.mxu1 }
 0xb67   :  { %v4021_v35 = vadd.f32 %v12284_v2, %v4020_v23  ;;  %v4151_v57 = vadd.f32 %v4127_v27, %v4018_v49 }
 0xb69   :  { %v9566_v0 = vpop.eup %9565  ;;  %v4080_v32 = vmul.f32 0.044715, %v4021_v35  ;;  %v4175_v14 = vmul.f32 0.7978846, %v4151_v57  ;;  %v4056_v54 = vmul.f32 0.5, %v4021_v35 }
 0xb6a   :  { %v4222_v44 = vadd.f32 1.0, %v9566_v0 }
 0xb6b   :  { %9567 = vtanh.f32 %v4175_v14  ;;  %v4104_v10 = vmul.f32 %v4080_v32, %v4021_v35  ;;  %v4400_v14 = vld [vmem:[#allocation5 + $0x150] sm:$0xff] }
 0xb6c   :  { %v4246_v59 = vmul.f32 %v4222_v44, %v4054_v51  ;;  %8970 = vmatpush.msra.mxu3 %v4400_v14  ;;  %5088 = vmatpush.msrb.mxu2 %v4400_v14  ;;  %v4399_v14 = vld [vmem:[#allocation5 + $0x148] sm:$0xff] }
 0xb6d   :  { %v4128_v1 = vmul.f32 %v4104_v10, %v4021_v35  ;;  %v4437_v10 = vpop.xlane.xlu1 %4436 }
 0xb6e   :  { %v4023_v6 = vpop.f32.mrf.mxu1  ;;  %4318 = vmatmul.f32.gmra.mxu2 %v4246_v59  ;;  %8971 = vmatpush.msra.mxu3 %v4399_v14 }
 0xb6f   :  { %v4024_v15 = vadd.f32 %v12284_v2, %v4023_v6  ;;  %v4152_v12 = vadd.f32 %v4128_v1, %v4021_v35  ;;  %v4499_v6 = vmul.f32 %v4437_v10, %v14932_v42  ;;  %5089 = vmatpush.msrb.mxu2 %v4399_v14 }
 0xb71   :  { %v9568_v60 = vpop.eup %9567  ;;  %v4081_v63 = vmul.f32 0.044715, %v4024_v15  ;;  %v4176_v46 = vmul.f32 0.7978846, %v4152_v12  ;;  %v4057_v57 = vmul.f32 0.5, %v4024_v15 }
 0xb72   :  { %v4223_v37 = vadd.f32 1.0, %v9568_v60 }
 0xb73   :  { %9569 = vtanh.f32 %v4176_v46  ;;  %v4105_v17 = vmul.f32 %v4081_v63, %v4024_v15  ;;  %v12438_v46 = vsub.f32 %v12319_v25, %v4499_v6 }
 0xb74   :  { %v4247_v18 = vmul.f32 %v4223_v37, %v4055_v26 }
 0xb75   :  { %v4129_v24 = vmul.f32 %v4105_v17, %v4024_v15 }
 0xb76   :  { %v4026_v28 = vpop.f32.mrf.mxu1  ;;  %4321 = vmatmul.f32.gmra.mxu2 %v4247_v18 }
 0xb77   :  { %v4027_v31 = vadd.f32 %v12284_v2, %v4026_v28  ;;  %v4153_v36 = vadd.f32 %v4129_v24, %v4024_v15 }
 0xb79   :  { %v9570_v34 = vpop.eup %9569  ;;  %v4082_v38 = vmul.f32 0.044715, %v4027_v31  ;;  %v4177_v21 = vmul.f32 0.7978846, %v4153_v36  ;;  %v4058_v44 = vmul.f32 0.5, %v4027_v31  ;;  %v4547_v36 = vmul.f32 %v12438_v46, %v12438_v46 }
 0xb7a   :  { %v4224_v41 = vadd.f32 1.0, %v9570_v34 }
 0xb7b   :  { %9571 = vtanh.f32 %v4177_v21  ;;  %v4106_v30 = vmul.f32 %v4082_v38, %v4027_v31 }
 0xb7c   :  { %v4248_v50 = vmul.f32 %v4224_v41, %v4056_v54  ;;  %v4579_v41 = vsel %vm300_vm1, %v4547_v36, 0.0 }
 0xb7d   :  { %v4130_v52 = vmul.f32 %v4106_v30, %v4027_v31 }
 0xb7e   :  { %4324 = vmatmul.f32.gmra.mxu2 %v4248_v50  ;;  %v4569_v12 = vpop.xlane.xlu0 %4568 }
 0xb7f   :  { %v4154_v49 = vadd.f32 %v4130_v52, %v4027_v31  ;;  %v4639_v63 = vmul.f32 %v4569_v12, %v14932_v42 }
 0xb81   :  { %v9572_v27 = vpop.eup %9571  ;;  %v4178_v23 = vmul.f32 0.7978846, %v4154_v49  ;;  %v12443_v18 = vadd.f32 1e-05, %v4639_v63 }
 0xb82   :  { %v4225_v0 = vadd.f32 1.0, %v9572_v27 }
 0xb83   :  { %9573 = vtanh.f32 %v4178_v23  ;;  %vm4693_vm11 = vweird.f32 %v12443_v18 }
 0xb84   :  { %v4249_v32 = vmul.f32 %v4225_v0, %v4057_v57  ;;  %9575 = vrsqrt.f32 %v12443_v18 }
 0xb86   :  { %4327 = vmatmul.f32.gmra.mxu2 %v4249_v32  ;;  %v4572_v34 = vpop.xlane.xlu2 %4571 }
 0xb87   :  { %v4640_v54 = vmul.f32 %v4572_v34, %v14932_v42 }
 0xb89   :  { %v9574_v51 = vpop.eup %9573  ;;  %v12457_v23 = vadd.f32 1e-05, %v4640_v54 }
 0xb8a   :  { %v4226_v35 = vadd.f32 1.0, %v9574_v51  ;;  %v9576_v57 = vpop.eup %9575 }
 0xb8b   :  { %vm4694_vm10 = vweird.f32 %v9576_v57  ;;  %vm4703_vm15 = vweird.f32 %v12457_v23 }
 0xb8c   :  { %v4250_v59 = vmul.f32 %v4226_v35, %v4058_v44  ;;  %v4688_v44 = vmul.f32 %v9576_v57, %v12443_v18  ;;  %vm4695_vm13 = vmor %vm4693_vm11, %vm4694_vm10  ;;  %v12469_v18 = vld [vmem:[#allocation5 + $0x209] ss:$0 sm:$0xff] }
 0xb8e   :  { %4330 = vmatmul.f32.gmra.mxu2 %v4250_v59  ;;  %v4575_v0 = vpop.xlane.xlu1 %4574  ;;  %v4689_v12 = vmul.f32 %v9576_v57, %v4688_v44 }
 0xb8f   :  { %v4313_v1 = vpop.f32.mrf.mxu2  ;;  %v4641_v35 = vmul.f32 %v4575_v0, %v14932_v42 }
 0xb90   :  { %v4357_v60 = vadd.f32 %v4313_v1, %v11876_v9  ;;  %v14976_v9 = vld [vmem:[#allocation64_spill] sm:$0xff]  ;;  %v4690_v36 = vmul.f32 0.5, %v4689_v12 }
 0xb92   :  { %v12434_v15 = vadd.f32 %v12252_v43, %v4357_v60  ;;  %v4665_v60 = vadd.f32 1e-05, %v4641_v35 }
 0xb94   :  { %14975 = vst [vmem:[#allocation44_spill] sm:$0xff] %v12434_v15  ;;  %v4465_v26 = vsel %vm300_vm1, %v12434_v15, 0.0  ;;  %vm4713_vm4 = vweird.f32 %v4665_v60 }
 0xb95   :  { %4466 = vadd.xlane.f32.xlu2 %v4465_v26  ;;  %v4029_v37 = vpop.f32.mrf.mxu1 }
 0xb96   :  { %v4030_v17 = vadd.f32 %v12284_v2, %v4029_v37 }
 0xb97   :  { %v4316_v24 = vpop.f32.mrf.mxu2 }
 0xb98   :  { %v4083_v28 = vmul.f32 0.044715, %v4030_v17  ;;  %v4358_v31 = vadd.f32 %v4316_v24, %v14976_v9 }
 0xb9a   :  { %v12449_v38 = vadd.f32 %v12252_v43, %v4358_v31  ;;  %v4107_v21 = vmul.f32 %v4083_v28, %v4030_v17  ;;  %v4059_v28 = vmul.f32 0.5, %v4030_v17 }
 0xb9c   :  { %14977 = vst [vmem:[#allocation39_spill] sm:$0xff] %v12449_v38  ;;  %v4468_v30 = vsel %vm300_vm1, %v12449_v38, 0.0  ;;  %v4131_v52 = vmul.f32 %v4107_v21, %v4030_v17 }
 0xb9d   :  { %4580 = vadd.xlane.f32.xlu2 %v4579_v41  ;;  %4469 = vadd.xlane.f32.xlu1 %v4468_v30  ;;  %v4032_v50 = vpop.f32.mrf.mxu1  ;;  %v4691_v30 = vsub.f32 1.5, %v4690_v36 }
 0xb9e   :  { %v4033_v49 = vadd.f32 %v12284_v2, %v4032_v50  ;;  %v4155_v27 = vadd.f32 %v4131_v52, %v4030_v17 }
 0xba0   :  { %v4084_v43 = vmul.f32 0.044715, %v4033_v49  ;;  %v4179_v32 = vmul.f32 0.7978846, %v4155_v27  ;;  %v4060_v27 = vmul.f32 0.5, %v4033_v49 }
 0xba2   :  { %v4108_v51 = vmul.f32 %v4084_v43, %v4033_v49  ;;  %9577 = vtanh.f32 %v4179_v32  ;;  %v4692_v32 = vmul.f32 %v9576_v57, %v4691_v30 }
 0xba3   :  { %9579 = vrsqrt.f32 %v12457_v23 }
 0xba4   :  { %v4132_v10 = vmul.f32 %v4108_v51, %v4033_v49  ;;  %v4696_v35 = vsel %vm4695_vm13, %v9576_v57, %v4692_v32 }
 0xba5   :  { %v4035_v59 = vpop.f32.mrf.mxu1 }
 0xba6   :  { %v4036_v1 = vadd.f32 %v12284_v2, %v4035_v59  ;;  %v4156_v6 = vadd.f32 %v4132_v10, %v4033_v49  ;;  %v12465_v49 = vld [vmem:[#allocation5 + $0x208] ss:$0 sm:$0xff] }
 0xba8   :  { %v4085_v63 = vmul.f32 0.044715, %v4036_v1  ;;  %v4180_v26 = vmul.f32 0.7978846, %v4156_v6  ;;  %v9578_v37 = vpop.eup %9577  ;;  %v4061_v6 = vmul.f32 0.5, %v4036_v1 }
 0xba9   :  { %v9580_v24 = vpop.eup %9579  ;;  %v4227_v9 = vadd.f32 1.0, %v9578_v37 }
 0xbaa   :  { %9581 = vtanh.f32 %v4180_v26  ;;  %v4109_v31 = vmul.f32 %v4085_v63, %v4036_v1  ;;  %v4698_v54 = vmul.f32 %v9580_v24, %v12457_v23  ;;  %v4927_v26 = vmul.f32 %v4696_v35, %v12333_v3 }
 0xbab   :  { %9583 = vrsqrt.f32 %v4665_v60  ;;  %v4251_v34 = vmul.f32 %v4227_v9, %v4059_v28  ;;  %vm4704_vm14 = vweird.f32 %v9580_v24 }
 0xbac   :  { %v4133_v21 = vmul.f32 %v4109_v31, %v4036_v1  ;;  %v4699_v52 = vmul.f32 %v9580_v24, %v4698_v54  ;;  %v4952_v9 = vmul.f32 %v12465_v49, %v4927_v26  ;;  %vm4705_vm0 = vmor %vm4703_vm15, %vm4704_vm14 }
 0xbad   :  { %4333 = vmatmul.f32.gmra.mxu2 %v4251_v34 }
 0xbae   :  { %v4157_v41 = vadd.f32 %v4133_v21, %v4036_v1  ;;  %v4700_v14 = vmul.f32 0.5, %v4699_v52  ;;  %v4977_v1 = vadd.f32 %v12469_v18, %v4952_v9 }
 0xbb0   :  { %v9582_v2 = vpop.eup %9581  ;;  %v4181_v50 = vmul.f32 0.7978846, %v4157_v41  ;;  %v4701_v10 = vsub.f32 1.5, %v4700_v14 }
 0xbb1   :  { %v4228_v43 = vadd.f32 1.0, %v9582_v2  ;;  %v9584_v0 = vpop.eup %9583 }
 0xbb2   :  { %9585 = vtanh.f32 %v4181_v50  ;;  %v4708_v51 = vmul.f32 %v9584_v0, %v4665_v60  ;;  %v4702_v37 = vmul.f32 %v9580_v24, %v4701_v10  ;;  %vm4714_vm3 = vweird.f32 %v9584_v0  ;;  %v12484_v50 = vld [vmem:[#allocation5 + $0x146] ss:$0 sm:$0xff] }
 0xbb3   :  { %v4252_v17 = vmul.f32 %v4228_v43, %v4060_v27  ;;  %vm4715_vm5 = vmor %vm4713_vm4, %vm4714_vm3 }
 0xbb4   :  { %v4709_v59 = vmul.f32 %v9584_v0, %v4708_v51  ;;  %v4706_v57 = vsel %vm4705_vm0, %v9580_v24, %v4702_v37  ;;  %v4440_v51 = vpop.xlane.xlu2 %4439 }
 0xbb5   :  { %4336 = vmatmul.f32.gmra.mxu2 %v4252_v17  ;;  %v4928_v36 = vmul.f32 %v4706_v57, %v12345_v13  ;;  %v4434_v13 = vpop.xlane.xlu0 %4433  ;;  %v4500_v35 = vmul.f32 %v4440_v51, %v14932_v42 }
 0xbb6   :  { %v4710_v28 = vmul.f32 0.5, %v4709_v59  ;;  %v4498_v60 = vmul.f32 %v4434_v13, %v14932_v42 }
 0xbb7   :  { %v4953_v3 = vmul.f32 %v12465_v49, %v4928_v36  ;;  %v12509_v59 = vsub.f32 %v12358_v11, %v4500_v35 }
 0xbb8   :  { %v9586_v44 = vpop.eup %9585  ;;  %v4711_v31 = vsub.f32 1.5, %v4710_v28  ;;  %v12490_v52 = vsub.f32 %v12342_v22, %v4498_v60 }
 0xbb9   :  { %v4229_v12 = vadd.f32 1.0, %v9586_v44  ;;  %v4978_v54 = vadd.f32 %v12469_v18, %v4953_v3  ;;  %v4548_v28 = vmul.f32 %v12509_v59, %v12509_v59 }
 0xbba   :  { %v4712_v34 = vmul.f32 %v9584_v0, %v4711_v31  ;;  %v4546_v17 = vmul.f32 %v12490_v52, %v12490_v52 }
 0xbbb   :  { %v4253_v63 = vmul.f32 %v4229_v12, %v4061_v6  ;;  %v4443_v12 = vpop.xlane.xlu1 %4442  ;;  %v4582_v57 = vsel %vm300_vm1, %v4548_v28, 0.0 }
 0xbbc   :  { %v4716_v23 = vsel %vm4715_vm5, %v9584_v0, %v4712_v34  ;;  %v4576_v14 = vsel %vm300_vm1, %v4546_v17, 0.0  ;;  %v4501_v26 = vmul.f32 %v4443_v12, %v14932_v42 }
 0xbbd   :  { %4339 = vmatmul.f32.gmra.mxu2 %v4253_v63  ;;  %v4929_v21 = vmul.f32 %v4716_v23, %v12361_v5 }
 0xbbe   :  { %v12521_v9 = vsub.f32 %v12380_v16, %v4501_v26 }
 0xbbf   :  { %v4954_v24 = vmul.f32 %v12465_v49, %v4929_v21 }
 0xbc1   :  { %v4979_v41 = vadd.f32 %v12469_v18, %v4954_v24 }
 0xbc3   :  { %v4452_v17 = vpop.xlane.xlu1 %4451 }
 0xbc4   :  { %v4504_v51 = vmul.f32 %v4452_v17, %v14932_v42 }
 0xbc5   :  { %8771 = vmatmul.msk.f32.vlgmr.msrb.gmra.mxu2 %vm300_vm1, %v4977_v1  ;;  %v4446_v1 = vpop.xlane.xlu0 %4445 }
 0xbc6   :  { %v4502_v34 = vmul.f32 %v4446_v1, %v14932_v42 }
 0xbcd   :  { %8772 = vmatmul.msk.f32.gmra.mxu2 %vm300_vm1, %v4978_v54  ;;  %v12535_v54 = vsub.f32 %v12365_v53, %v4502_v34 }
 0xbd5   :  { %8773 = vmatmul.msk.f32.gmra.mxu2 %vm300_vm1, %v4979_v41  ;;  %v4550_v41 = vmul.f32 %v12535_v54, %v12535_v54 }
 0xbd7   :  { %v4588_v13 = vsel %vm300_vm1, %v4550_v41, 0.0 }
 0xbf1   :  { %v4319_v2 = vpop.f32.mrf.mxu2 }
 0xbf2   :  { %v4359_v30 = vadd.f32 %v4319_v2, %v12042_v8 }
 0xbf4   :  { %v12487_v5 = vadd.f32 %v12484_v50, %v4359_v30 }
 0xbf6   :  { %14978 = vst [vmem:[#allocation56_spill] sm:$0xff] %v12487_v5  ;;  %v4471_v27 = vsel %vm300_vm1, %v12487_v5, 0.0 }
 0xbf7   :  { %4472 = vadd.xlane.f32.xlu0 %v4471_v27 }
 0xbf9   :  { %v4322_v43 = vpop.f32.mrf.mxu2 }
 0xbfa   :  { %v4360_v0 = vadd.f32 %v4322_v43, %v11985_v62 }
 0xbfc   :  { %v12498_v8 = vadd.f32 %v12484_v50, %v4360_v0 }
 0xbfe   :  { %14979 = vst [vmem:[#allocation60_spill] sm:$0xff] %v12498_v8  ;;  %v4474_v32 = vsel %vm300_vm1, %v12498_v8, 0.0 }
 0xbff   :  { %4475 = vadd.xlane.f32.xlu2 %v4474_v32  ;;  %4577 = vadd.xlane.f32.xlu0 %v4576_v14 }
 0xc01   :  { %v4325_v44 = vpop.f32.mrf.mxu2 }
 0xc02   :  { %v4361_v10 = vadd.f32 %v4325_v44, %v12055_v33 }
 0xc04   :  { %v12506_v62 = vadd.f32 %v12484_v50, %v4361_v10 }
 0xc06   :  { %14980 = vst [vmem:[#allocation48_spill] sm:$0xff] %v12506_v62  ;;  %v4477_v6 = vsel %vm300_vm1, %v12506_v62, 0.0 }
 0xc07   :  { %4478 = vadd.xlane.f32.xlu1 %v4477_v6  ;;  %v12561_v6 = vsub.f32 %v12398_v45, %v4504_v51 }
 0xc09   :  { %v4328_v63 = vpop.f32.mrf.mxu2 }
 0xc0a   :  { %v4362_v37 = vadd.f32 %v4328_v63, %v12071_v20  ;;  %v4549_v20 = vmul.f32 %v12521_v9, %v12521_v9 }
 0xc0c   :  { %v12518_v33 = vadd.f32 %v12484_v50, %v4362_v37  ;;  %v4585_v21 = vsel %vm300_vm1, %v4549_v20, 0.0 }
 0xc0e   :  { %14981 = vst [vmem:[#allocation45_spill] sm:$0xff] %v12518_v33  ;;  %v4480_v31 = vsel %vm300_vm1, %v12518_v33, 0.0 }
 0xc0f   :  { %4583 = vadd.xlane.f32.xlu1 %v4582_v57  ;;  %4481 = vadd.xlane.f32.xlu0 %v4480_v31 }
 0xc11   :  { %v4331_v36 = vpop.f32.mrf.mxu2 }
 0xc12   :  { %v4363_v3 = vadd.f32 %v4331_v36, %v12095_v58  ;;  %v4449_v58 = vpop.xlane.xlu2 %4448  ;;  %v4552_v36 = vmul.f32 %v12561_v6, %v12561_v6 }
 0xc13   :  { %v4503_v60 = vmul.f32 %v4449_v58, %v14932_v42 }
 0xc14   :  { %v12531_v23 = vadd.f32 %v12484_v50, %v4363_v3 }
 0xc15   :  { %v12548_v43 = vsub.f32 %v12392_v7, %v4503_v60 }
 0xc16   :  { %14982 = vst [vmem:[#allocation47_spill] sm:$0xff] %v12531_v23  ;;  %v4483_v24 = vsel %vm300_vm1, %v12531_v23, 0.0 }
 0xc17   :  { %4586 = vadd.xlane.f32.xlu0 %v4585_v21  ;;  %4484 = vadd.xlane.f32.xlu2 %v4483_v24  ;;  %v4594_v24 = vsel %vm300_vm1, %v4552_v36, 0.0 }
 0xc1a   :  { %v4458_v32 = vpop.xlane.xlu2 %4457 }
 0xc1b   :  { %v4506_v44 = vmul.f32 %v4458_v32, %v14932_v42 }
 0xc1d   :  { %v12564_v12 = vsub.f32 %v12410_v61, %v4506_v44  ;;  %v12606_v44 = vld [vmem:[#allocation5 + $0x20c] ss:$0 sm:$0xff] }
 0xc1f   :  { %4589 = vadd.xlane.f32.xlu2 %v4588_v13  ;;  %v4554_v1 = vmul.f32 %v12564_v12, %v12564_v12 }
 0xc21   :  { %v4600_v21 = vsel %vm300_vm1, %v4554_v1, 0.0 }
 0xc22   :  { %v4467_v37 = vpop.xlane.xlu2 %4466 }
 0xc23   :  { %v4509_v57 = vmul.f32 %v4467_v37, %v14932_v42  ;;  %v4461_v37 = vpop.xlane.xlu1 %4460 }
 0xc25   :  { %v12580_v3 = vsub.f32 %v12434_v15, %v4509_v57 }
 0xc2b   :  { %v4470_v36 = vpop.xlane.xlu1 %4469 }
 0xc30   :  { %v4334_v2 = vpop.f32.mrf.mxu2 }
 0xc31   :  { %v4364_v30 = vadd.f32 %v4334_v2, %v12121_v39  ;;  %v4551_v39 = vmul.f32 %v12548_v43, %v12548_v43 }
 0xc33   :  { %v12545_v27 = vadd.f32 %v12484_v50, %v4364_v30  ;;  %v4591_v63 = vsel %vm300_vm1, %v4551_v39, 0.0 }
 0xc35   :  { %14983 = vst [vmem:[#allocation61_spill] sm:$0xff] %v12545_v27  ;;  %v4486_v0 = vsel %vm300_vm1, %v12545_v27, 0.0 }
 0xc36   :  { %4487 = vadd.xlane.f32.xlu1 %v4486_v0 }
 0xc38   :  { %v4337_v14 = vpop.f32.mrf.mxu2 }
 0xc39   :  { %v4365_v35 = vadd.f32 %v4337_v14, %v12131_v48  ;;  %v4455_v48 = vpop.xlane.xlu0 %4454 }
 0xc3a   :  { %v4505_v20 = vmul.f32 %v4455_v48, %v14932_v42 }
 0xc3b   :  { %v12558_v10 = vadd.f32 %v12484_v50, %v4365_v35 }
 0xc3c   :  { %v12587_v41 = vsub.f32 %v12404_v40, %v4505_v20 }
 0xc3d   :  { %14984 = vst [vmem:[#allocation63_spill] sm:$0xff] %v12558_v10  ;;  %v4489_v26 = vsel %vm300_vm1, %v12558_v10, 0.0 }
 0xc3e   :  { %4592 = vadd.xlane.f32.xlu1 %v4591_v63  ;;  %4490 = vadd.xlane.f32.xlu0 %v4489_v26  ;;  %v4553_v60 = vmul.f32 %v12587_v41, %v12587_v41  ;;  %v4581_v63 = vpop.xlane.xlu2 %4580 }
 0xc3f   :  { %v4643_v26 = vmul.f32 %v4581_v63, %v14932_v42 }
 0xc40   :  { %v4340_v28 = vpop.f32.mrf.mxu2  ;;  %v4597_v17 = vsel %vm300_vm1, %v4553_v60, 0.0 }
 0xc41   :  { %v4366_v31 = vadd.f32 %v4340_v28, %v12144_v56  ;;  %v4464_v13 = vpop.xlane.xlu0 %4463  ;;  %v4667_v48 = vadd.f32 1e-05, %v4643_v26 }
 0xc42   :  { %v4508_v2 = vmul.f32 %v4464_v13, %v14932_v42 }
 0xc43   :  { %v12577_v34 = vadd.f32 %v12484_v50, %v4366_v31  ;;  %v4557_v50 = vmul.f32 %v12580_v3, %v12580_v3  ;;  %9587 = vrsqrt.f32 %v4667_v48  ;;  %vm4733_vm10 = vweird.f32 %v4667_v48 }
 0xc44   :  { %v12598_v0 = vsub.f32 %v12424_v29, %v4508_v2 }
 0xc45   :  { %14985 = vst [vmem:[#allocation62_spill] sm:$0xff] %v12577_v34  ;;  %v4492_v56 = vsel %vm300_vm1, %v12577_v34, 0.0  ;;  %v4609_v30 = vsel %vm300_vm1, %v4557_v50, 0.0 }
 0xc46   :  { %4601 = vadd.xlane.f32.xlu1 %v4600_v21  ;;  %4595 = vadd.xlane.f32.xlu0 %v4594_v24  ;;  %v4556_v14 = vmul.f32 %v12598_v0, %v12598_v0 }
 0xc47   :  { %4493 = vadd.xlane.f32.xlu2 %v4492_v56 }
 0xc48   :  { %v12589_v58 = vpop.f32.mrf.mxu2  ;;  %v4606_v51 = vsel %vm300_vm1, %v4556_v14, 0.0  ;;  %v4507_v14 = vmul.f32 %v4461_v37, %v14932_v42 }
 0xc49   :  { %v9588_v56 = vpop.eup %9587 }
 0xc4a   :  { %vm4734_vm7 = vweird.f32 %v9588_v56 }
 0xc4b   :  { %vm4735_vm11 = vmor %vm4733_vm10, %vm4734_vm7 }
 0xc4e   :  { %4610 = vadd.xlane.f32.xlu1 %v4609_v30  ;;  %v4728_v30 = vmul.f32 %v9588_v56, %v4667_v48 }
 0xc4f   :  { %4598 = vadd.xlane.f32.xlu2 %v4597_v17 }
 0xc50   :  { %v12601_v32 = vpop.f32.mrf.mxu2 }
 0xc57   :  { %4607 = vadd.xlane.f32.xlu2 %v4606_v51 }
 0xc58   :  { %v5097_v35 = vpop.f32.mrf.mxu2 }
 0xc59   :  { %v12609_v39 = vadd.f32 %v12606_v44, %v5097_v35  ;;  %v4729_v35 = vmul.f32 %v9588_v56, %v4728_v30 }
 0xc5b   :  { %5170 = vrot.lane.b32.xlu0 %v12609_v39, %s10018_s21 }
 0xc6a   :  { %v4473_v28 = vpop.xlane.xlu0 %4472 }
 0xc6b   :  { %v4511_v57 = vmul.f32 %v4473_v28, %v14932_v42  ;;  %v12631_v28 = vsub.f32 %v12417_v19, %v4507_v14 }
 0xc6d   :  { %v12616_v31 = vsub.f32 %v12487_v5, %v4511_v57  ;;  %v4730_v57 = vmul.f32 0.5, %v4729_v35 }
 0xc6f   :  { %v4559_v1 = vmul.f32 %v12616_v31, %v12616_v31 }
 0xc71   :  { %v4615_v20 = vsel %vm300_vm1, %v4559_v1, 0.0 }
 0xc72   :  { %v4476_v21 = vpop.xlane.xlu2 %4475  ;;  %4616 = vadd.xlane.f32.xlu2 %v4615_v20  ;;  %v4578_v24 = vpop.xlane.xlu0 %4577  ;;  %v4510_v20 = vmul.f32 %v4470_v36, %v14932_v42 }
 0xc73   :  { %v4512_v13 = vmul.f32 %v4476_v21, %v14932_v42  ;;  %v4642_v50 = vmul.f32 %v4578_v24, %v14932_v42  ;;  %v4555_v24 = vmul.f32 %v12631_v28, %v12631_v28 }
 0xc75   :  { %v12624_v2 = vsub.f32 %v12498_v8, %v4512_v13  ;;  %v4666_v60 = vadd.f32 1e-05, %v4642_v50  ;;  %v4731_v13 = vsub.f32 1.5, %v4730_v57  ;;  %v4603_v35 = vsel %vm300_vm1, %v4555_v24, 0.0 }
 0xc76   :  { %v12645_v57 = vadd.f32 %v12606_v44, %v12589_v58 }
 0xc77   :  { %9589 = vrsqrt.f32 %v4666_v60  ;;  %v4560_v17 = vmul.f32 %v12624_v2, %v12624_v2  ;;  %v4732_v36 = vmul.f32 %v9588_v56, %v4731_v13  ;;  %vm4723_vm8 = vweird.f32 %v4666_v60 }
 0xc79   :  { %v4618_v51 = vsel %vm300_vm1, %v4560_v17, 0.0  ;;  %v12640_v17 = vsub.f32 %v12449_v38, %v4510_v20  ;;  %v4736_v13 = vsel %vm4735_vm11, %v9588_v56, %v4732_v36 }
 0xc7a   :  { %v4479_v63 = vpop.xlane.xlu1 %4478  ;;  %4619 = vadd.xlane.f32.xlu1 %v4618_v51 }
 0xc7b   :  { %v4558_v20 = vmul.f32 %v12640_v17, %v12640_v17  ;;  %v4513_v24 = vmul.f32 %v4479_v63, %v14932_v42 }
 0xc7d   :  { %v9590_v26 = vpop.eup %9589 }
 0xc7e   :  { %v4718_v1 = vmul.f32 %v9590_v26, %v4666_v60  ;;  %vm4724_vm6 = vweird.f32 %v9590_v26 }
 0xc7f   :  { %vm4725_vm9 = vmor %vm4723_vm8, %vm4724_vm6 }
 0xc80   :  { %v4719_v21 = vmul.f32 %v9590_v26, %v4718_v1 }
 0xc82   :  { %v4720_v50 = vmul.f32 0.5, %v4719_v21  ;;  %v4584_v37 = vpop.xlane.xlu1 %4583  ;;  %v12636_v8 = vpop.xlane.xlu0 %4481 }
 0xc83   :  { %v4644_v30 = vmul.f32 %v4584_v37, %v14932_v42 }
 0xc84   :  { %v4721_v14 = vsub.f32 1.5, %v4720_v50 }
 0xc85   :  { %v4668_v51 = vadd.f32 1e-05, %v4644_v30  ;;  %4604 = vadd.xlane.f32.xlu0 %v4603_v35  ;;  %v12658_v35 = vsub.f32 %v12506_v62, %v4513_v24 }
 0xc86   :  { %v4722_v1 = vmul.f32 %v9590_v26, %v4721_v14  ;;  %v4931_v14 = vmul.f32 %v4736_v13, %v12438_v46 }
 0xc87   :  { %9591 = vrsqrt.f32 %v4668_v51  ;;  %vm4743_vm14 = vweird.f32 %v4668_v51 }
 0xc88   :  { %v4726_v21 = vsel %vm4725_vm9, %v9590_v26, %v4722_v1  ;;  %v4612_v26 = vsel %vm300_vm1, %v4558_v20, 0.0  ;;  %v12664_v1 = vadd.f32 %v12606_v44, %v12601_v32  ;;  %v4956_v46 = vmul.f32 %v12465_v49, %v4931_v14 }
 0xc89   :  { %v4930_v50 = vmul.f32 %v4726_v21, %v12490_v52  ;;  %v4561_v21 = vmul.f32 %v12658_v35, %v12658_v35 }
 0xc8a   :  { %5166 = vrot.lane.b32.xlu2 %v12645_v57, %s10018_s21  ;;  %v4587_v60 = vpop.xlane.xlu0 %4586  ;;  %v4485_v37 = vpop.xlane.xlu2 %4484  ;;  %v4981_v32 = vadd.f32 %v12469_v18, %v4956_v46 }
 0xc8b   :  { %v4645_v48 = vmul.f32 %v4587_v60, %v14932_v42  ;;  %v4955_v58 = vmul.f32 %v12465_v49, %v4930_v50 }
 0xc8d   :  { %v9592_v30 = vpop.eup %9591  ;;  %v4669_v52 = vadd.f32 1e-05, %v4645_v48  ;;  %v4980_v56 = vadd.f32 %v12469_v18, %v4955_v58  ;;  %4613 = vadd.xlane.f32.xlu0 %v4612_v26  ;;  %v4621_v48 = vsel %vm300_vm1, %v4561_v21, 0.0 }
 0xc8e   :  { %v4738_v63 = vmul.f32 %v9592_v30, %v4668_v51  ;;  %vm4744_vm13 = vweird.f32 %v9592_v30 }
 0xc8f   :  { %9593 = vrsqrt.f32 %v4669_v52  ;;  %8774 = vmatmul.msk.f32.gmra.mxu2 %vm300_vm1, %v4980_v56  ;;  %vm4745_vm15 = vmor %vm4743_vm14, %vm4744_vm13  ;;  %vm4753_vm3 = vweird.f32 %v4669_v52 }
 0xc90   :  { %v4739_v36 = vmul.f32 %v9592_v30, %v4738_v63 }
 0xc92   :  { %v4740_v20 = vmul.f32 0.5, %v4739_v36  ;;  %v4590_v50 = vpop.xlane.xlu2 %4589 }
 0xc93   :  { %5168 = vrot.lane.b32.xlu1 %v12664_v1, %s10018_s21  ;;  %v4646_v13 = vmul.f32 %v4590_v50, %v14932_v42 }
 0xc94   :  { %v4741_v24 = vsub.f32 1.5, %v4740_v20 }
 0xc95   :  { %v9594_v60 = vpop.eup %9593  ;;  %v4670_v56 = vadd.f32 1e-05, %v4646_v13  ;;  %4622 = vadd.xlane.f32.xlu0 %v4621_v48 }
 0xc96   :  { %v4742_v58 = vmul.f32 %v9592_v30, %v4741_v24  ;;  %v4748_v26 = vmul.f32 %v9594_v60, %v4669_v52  ;;  %vm4754_vm0 = vweird.f32 %v9594_v60 }
 0xc97   :  { %8775 = vmatmul.msk.f32.gmra.mxu2 %vm300_vm1, %v4981_v32  ;;  %9595 = vrsqrt.f32 %v4670_v56  ;;  %vm4755_vm4 = vmor %vm4753_vm3, %vm4754_vm0  ;;  %vm4763_vm6 = vweird.f32 %v4670_v56 }
 0xc98   :  { %v4746_v14 = vsel %vm4745_vm15, %v9592_v30, %v4742_v58  ;;  %v4749_v63 = vmul.f32 %v9594_v60, %v4748_v26 }
 0xc99   :  { %v4932_v36 = vmul.f32 %v4746_v14, %v12509_v59  ;;  %v4515_v14 = vmul.f32 %v4485_v37, %v14932_v42 }
 0xc9a   :  { %v4750_v20 = vmul.f32 0.5, %v4749_v63 }
 0xc9b   :  { %v4957_v50 = vmul.f32 %v12465_v49, %v4932_v36  ;;  %v12685_v52 = vsub.f32 %v12531_v23, %v4515_v14 }
 0xc9c   :  { %v4751_v62 = vsub.f32 1.5, %v4750_v20 }
 0xc9d   :  { %v4982_v21 = vadd.f32 %v12469_v18, %v4957_v50  ;;  %v9596_v46 = vpop.eup %9595 }
 0xc9e   :  { %v4752_v51 = vmul.f32 %v9594_v60, %v4751_v62  ;;  %v4758_v24 = vmul.f32 %v9596_v46, %v4670_v56  ;;  %vm4764_vm5 = vweird.f32 %v9596_v46  ;;  %v4563_v56 = vmul.f32 %v12685_v52, %v12685_v52 }
 0xc9f   :  { %8776 = vmatmul.msk.f32.gmra.mxu2 %vm300_vm1, %v4982_v21  ;;  %vm4765_vm7 = vmor %vm4763_vm6, %vm4764_vm5 }
 0xca0   :  { %v4756_v13 = vsel %vm4755_vm4, %v9594_v60, %v4752_v51  ;;  %v4759_v48 = vmul.f32 %v9596_v46, %v4758_v24 }
 0xca1   :  { %v4933_v30 = vmul.f32 %v4756_v13, %v12521_v9  ;;  %v4627_v13 = vsel %vm300_vm1, %v4563_v56, 0.0 }
 0xca2   :  { %v4760_v32 = vmul.f32 0.5, %v4759_v48 }
 0xca3   :  { %v4958_v59 = vmul.f32 %v12465_v49, %v4933_v30 }
 0xca4   :  { %v4761_v58 = vsub.f32 1.5, %v4760_v32 }
 0xca5   :  { %v4983_v26 = vadd.f32 %v12469_v18, %v4958_v59 }
 0xca6   :  { %v4762_v63 = vmul.f32 %v9596_v46, %v4761_v58 }
 0xca7   :  { %8777 = vmatmul.msk.f32.gmra.mxu2 %vm300_vm1, %v4983_v26 }
 0xca8   :  { %v4766_v62 = vsel %vm4765_vm7, %v9596_v46, %v4762_v63  ;;  %v4514_v46 = vmul.f32 %v12636_v8, %v14932_v42 }
 0xca9   :  { %v4934_v9 = vmul.f32 %v4766_v62, %v12535_v54  ;;  %v4488_v60 = vpop.xlane.xlu1 %4487 }
 0xcaa   :  { %v4516_v36 = vmul.f32 %v4488_v60, %v14932_v42  ;;  %v12705_v48 = vsub.f32 %v12518_v33, %v4514_v46 }
 0xcab   :  { %v4959_v20 = vmul.f32 %v12465_v49, %v4934_v9 }
 0xcac   :  { %v12691_v50 = vsub.f32 %v12545_v27, %v4516_v36  ;;  %v4562_v8 = vmul.f32 %v12705_v48, %v12705_v48 }
 0xcad   :  { %v4984_v37 = vadd.f32 %v12469_v18, %v4959_v20 }
 0xcae   :  { %v4564_v21 = vmul.f32 %v12691_v50, %v12691_v50  ;;  %v4624_v36 = vsel %vm300_vm1, %v4562_v8, 0.0 }
 0xcaf   :  { %8778 = vmatmul.msk.f32.gmra.mxu2 %vm300_vm1, %v4984_v37 }
 0xcb0   :  { %v4630_v54 = vsel %vm300_vm1, %v4564_v21, 0.0 }
 0xcb1   :  { %v4593_v51 = vpop.xlane.xlu1 %4592  ;;  %4631 = vadd.xlane.f32.xlu0 %v4630_v54  ;;  %v4491_v24 = vpop.xlane.xlu0 %4490 }
 0xcb2   :  { %v4647_v30 = vmul.f32 %v4593_v51, %v14932_v42  ;;  %v4517_v59 = vmul.f32 %v4491_v24, %v14932_v42 }
 0xcb3   :  { %4628 = vadd.xlane.f32.xlu2 %v4627_v13 }
 0xcb4   :  { %v4671_v32 = vadd.f32 1e-05, %v4647_v30  ;;  %v12713_v9 = vsub.f32 %v12558_v10, %v4517_v59 }
 0xcb6   :  { %9597 = vrsqrt.f32 %v4671_v32  ;;  %v4565_v24 = vmul.f32 %v12713_v9, %v12713_v9  ;;  %vm4773_vm9 = vweird.f32 %v4671_v32 }
 0xcb9   :  { %v4602_v58 = vpop.xlane.xlu1 %4601  ;;  %v4596_v26 = vpop.xlane.xlu0 %4595 }
 0xcba   :  { %v4650_v14 = vmul.f32 %v4602_v58, %v14932_v42  ;;  %v4494_v63 = vpop.xlane.xlu2 %4493  ;;  %v4648_v62 = vmul.f32 %v4596_v26, %v14932_v42  ;;  %v4633_v26 = vsel %vm300_vm1, %v4565_v24, 0.0 }
 0xcbb   :  { %v4518_v60 = vmul.f32 %v4494_v63, %v14932_v42 }
 0xcbc   :  { %v9598_v20 = vpop.eup %9597  ;;  %v12717_v37 = vadd.f32 1e-05, %v4650_v14  ;;  %v4672_v56 = vadd.f32 1e-05, %v4648_v62 }
 0xcbd   :  { %4625 = vadd.xlane.f32.xlu1 %v4624_v36  ;;  %v4768_v21 = vmul.f32 %v9598_v20, %v4671_v32  ;;  %v12720_v46 = vsub.f32 %v12577_v34, %v4518_v60  ;;  %vm4774_vm8 = vweird.f32 %v9598_v20 }
 0xcbe   :  { %9599 = vrsqrt.f32 %v12717_v37  ;;  %vm4775_vm10 = vmor %vm4773_vm9, %vm4774_vm8  ;;  %vm4783_vm13 = vweird.f32 %v4672_v56  ;;  %vm4803_vm5 = vweird.f32 %v12717_v37 }
 0xcbf   :  { %v4769_v54 = vmul.f32 %v9598_v20, %v4768_v21  ;;  %9601 = vrsqrt.f32 %v4672_v56  ;;  %v4566_v51 = vmul.f32 %v12720_v46, %v12720_v46 }
 0xcc1   :  { %v4770_v13 = vmul.f32 0.5, %v4769_v54  ;;  %v4636_v30 = vsel %vm300_vm1, %v4566_v51, 0.0 }
 0xcc2   :  { %v4599_v59 = vpop.xlane.xlu2 %4598  ;;  %4637 = vadd.xlane.f32.xlu2 %v4636_v30 }
 0xcc3   :  { %v4771_v8 = vsub.f32 1.5, %v4770_v13  ;;  %v4649_v58 = vmul.f32 %v4599_v59, %v14932_v42 }
 0xcc4   :  { %v9600_v14 = vpop.eup %9599 }
 0xcc5   :  { %4634 = vadd.xlane.f32.xlu1 %v4633_v26  ;;  %v9602_v63 = vpop.eup %9601  ;;  %v4772_v62 = vmul.f32 %v9598_v20, %v4771_v8  ;;  %v4673_v60 = vadd.f32 1e-05, %v4649_v58  ;;  %v4798_v36 = vmul.f32 %v9600_v14, %v12717_v37  ;;  %vm4804_vm0 = vweird.f32 %v9600_v14 }
 0xcc6   :  { %v4778_v21 = vmul.f32 %v9602_v63, %v4672_v56  ;;  %vm4784_vm11 = vweird.f32 %v9602_v63  ;;  %vm4805_vm6 = vmor %vm4803_vm5, %vm4804_vm0 }
 0xcc7   :  { %v4776_v54 = vsel %vm4775_vm10, %v9598_v20, %v4772_v62  ;;  %9603 = vrsqrt.f32 %v4673_v60  ;;  %v4799_v30 = vmul.f32 %v9600_v14, %v4798_v36  ;;  %vm4785_vm14 = vmor %vm4783_vm13, %vm4784_vm11  ;;  %vm4793_vm3 = vweird.f32 %v4673_v60 }
 0xcc8   :  { %v4935_v51 = vmul.f32 %v4776_v54, %v12548_v43  ;;  %v4779_v13 = vmul.f32 %v9602_v63, %v4778_v21 }
 0xcc9   :  { %v4800_v58 = vmul.f32 0.5, %v4799_v30 }
 0xcca   :  { %v4780_v34 = vmul.f32 0.5, %v4779_v13  ;;  %v4960_v59 = vmul.f32 %v12465_v49, %v4935_v51 }
 0xccb   :  { %v4801_v36 = vsub.f32 1.5, %v4800_v58 }
 0xccc   :  { %v4781_v24 = vsub.f32 1.5, %v4780_v34  ;;  %v4985_v26 = vadd.f32 %v12469_v18, %v4960_v59 }
 0xccd   :  { %v9604_v8 = vpop.eup %9603  ;;  %v5171_v32 = vpop.permute.xlu0 %5170  ;;  %v4802_v13 = vmul.f32 %v9600_v14, %v4801_v36 }
 0xcce   :  { %v4782_v10 = vmul.f32 %v9602_v63, %v4781_v24  ;;  %v4788_v23 = vmul.f32 %v9604_v8, %v4673_v60  ;;  %8779 = vmatmul.msk.f32.gmra.mxu2 %vm300_vm1, %v4985_v26  ;;  %8795 = vmatpush.xpose.msk.msra.mxu0 %vm1057_vm12, %v5171_v32  ;;  %vm4794_vm15 = vweird.f32 %v9604_v8 }
 0xccf   :  { %vm4795_vm4 = vmor %vm4793_vm3, %vm4794_vm15 }
 0xcd0   :  { %v4786_v43 = vsel %vm4785_vm14, %v9602_v63, %v4782_v10  ;;  %v4789_v20 = vmul.f32 %v9604_v8, %v4788_v23  ;;  %v12744_v63 = vpack.i.bf16 %v12664_v1, %v12609_v39 }
 0xcd1   :  { %v4936_v62 = vmul.f32 %v4786_v43, %v12561_v6  ;;  %v4806_v6 = vsel %vm4805_vm6, %v9600_v14, %v4802_v13  ;;  %v4608_v14 = vpop.xlane.xlu2 %4607 }
 0xcd2   :  { %v4790_v34 = vmul.f32 0.5, %v4789_v20  ;;  %v4938_v59 = vmul.f32 %v4806_v6, %v12564_v12  ;;  %v4652_v24 = vmul.f32 %v4608_v14, %v14932_v42 }
 0xcd3   :  { %v4961_v21 = vmul.f32 %v12465_v49, %v4936_v62 }
 0xcd4   :  { %v4791_v54 = vsub.f32 1.5, %v4790_v34  ;;  %v4963_v37 = vmul.f32 %v12465_v49, %v4938_v59  ;;  %v4676_v26 = vadd.f32 1e-05, %v4652_v24 }
 0xcd5   :  { %v4986_v51 = vadd.f32 %v12469_v18, %v4961_v21 }
 0xcd6   :  { %v4792_v56 = vmul.f32 %v9604_v8, %v4791_v54  ;;  %9605 = vrsqrt.f32 %v4676_v26  ;;  %vm4823_vm10 = vweird.f32 %v4676_v26 }
 0xcd7   :  { %8780 = vmatmul.msk.f32.gmra.mxu2 %vm300_vm1, %v4986_v51 }
 0xcd8   :  { %v4796_v23 = vsel %vm4795_vm4, %v9604_v8, %v4792_v56  ;;  %v4611_v8 = vpop.xlane.xlu1 %4610 }
 0xcd9   :  { %v4937_v10 = vmul.f32 %v4796_v23, %v12587_v41  ;;  %v4988_v41 = vadd.f32 %v12469_v18, %v4963_v37  ;;  %v4653_v12 = vmul.f32 %v4611_v8, %v14932_v42 }
 0xcdb   :  { %v4962_v30 = vmul.f32 %v12465_v49, %v4937_v10  ;;  %v12757_v32 = vadd.f32 1e-05, %v4653_v12 }
 0xcdc   :  { %v9606_v58 = vpop.eup %9605 }
 0xcdd   :  { %v4987_v60 = vadd.f32 %v12469_v18, %v4962_v30  ;;  %9607 = vrsqrt.f32 %v12757_v32  ;;  %v4818_v62 = vmul.f32 %v9606_v58, %v4676_v26  ;;  %vm4824_vm8 = vweird.f32 %v9606_v58 }
 0xcde   :  { %9109 = vrot.lane.b32.xlu1 %v12744_v63, %s10019_s22  ;;  %vm4825_vm13 = vmor %vm4823_vm10, %vm4824_vm8  ;;  %vm4833_vm15 = vweird.f32 %v12757_v32 }
 0xcdf   :  { %8781 = vmatmul.msk.f32.gmra.mxu2 %vm300_vm1, %v4987_v60  ;;  %v4819_v54 = vmul.f32 %v9606_v58, %v4818_v62 }
 0xce1   :  { %v4820_v6 = vmul.f32 0.5, %v4819_v54 }
 0xce3   :  { %v12761_v13 = vpop.eup %9607  ;;  %v4821_v24 = vsub.f32 1.5, %v4820_v6 }
 0xce4   :  { %v4828_v59 = vmul.f32 %v12761_v13, %v12757_v32  ;;  %vm4834_vm14 = vweird.f32 %v12761_v13 }
 0xce5   :  { %v4617_v21 = vpop.xlane.xlu2 %4616  ;;  %vm4835_vm0 = vmor %vm4833_vm15, %vm4834_vm14 }
 0xce6   :  { %v4655_v23 = vmul.f32 %v4617_v21, %v14932_v42  ;;  %v4829_v8 = vmul.f32 %v12761_v13, %v4828_v59  ;;  %v4822_v21 = vmul.f32 %v9606_v58, %v4821_v24 }
 0xce7   :  { %8782 = vmatmul.msk.f32.gmra.mxu2 %vm300_vm1, %v4988_v41 }
 0xce8   :  { %v12771_v41 = vadd.f32 1e-05, %v4655_v23  ;;  %v4826_v59 = vsel %vm4825_vm13, %v9606_v58, %v4822_v21 }
 0xced   :  { %v4620_v34 = vpop.xlane.xlu1 %4619  ;;  %v5167_v12 = vpop.permute.xlu2 %5166 }
 0xcee   :  { %v4656_v54 = vmul.f32 %v4620_v34, %v14932_v42 }
 0xcf8   :  { %v4605_v43 = vpop.xlane.xlu0 %4604 }
 0xcf9   :  { %v4651_v20 = vmul.f32 %v4605_v43, %v14932_v42 }
 0xcfb   :  { %v4675_v36 = vadd.f32 1e-05, %v4651_v20 }
 0xcfd   :  { %9609 = vrsqrt.f32 %v4675_v36  ;;  %vm4813_vm9 = vweird.f32 %v4675_v36 }
 0xd00   :  { %v4614_v51 = vpop.xlane.xlu0 %4613 }
 0xd01   :  { %v4654_v56 = vmul.f32 %v4614_v51, %v14932_v42  ;;  %v4830_v51 = vmul.f32 0.5, %v4829_v8 }
 0xd03   :  { %v9610_v10 = vpop.eup %9609  ;;  %v12765_v30 = vadd.f32 1e-05, %v4654_v56  ;;  %v4831_v34 = vsub.f32 1.5, %v4830_v51 }
 0xd04   :  { %v4808_v60 = vmul.f32 %v9610_v10, %v4675_v36  ;;  %vm4814_vm7 = vweird.f32 %v9610_v10 }
 0xd05   :  { %v5169_v37 = vpop.permute.xlu1 %5168  ;;  %9611 = vrsqrt.f32 %v12765_v30  ;;  %vm4815_vm11 = vmor %vm4813_vm9, %vm4814_vm7  ;;  %vm4843_vm4 = vweird.f32 %v12765_v30  ;;  %vm4853_vm7 = vweird.f32 %v12771_v41 }
 0xd06   :  { %8796 = vmatpush.xpose.msk.msra.mxu0 %vm1057_vm12, %v5169_v37  ;;  %v4809_v14 = vmul.f32 %v9610_v10, %v4808_v60  ;;  %9613 = vrsqrt.f32 %v12771_v41  ;;  %v12783_v60 = vadd.f32 1e-05, %v4656_v54 }
 0xd08   :  { %v4810_v43 = vmul.f32 0.5, %v4809_v14  ;;  %v4623_v24 = vpop.xlane.xlu0 %4622  ;;  %9615 = vrsqrt.f32 %v12783_v60  ;;  %vm4863_vm10 = vweird.f32 %v12783_v60 }
 0xd0a   :  { %8797 = vmatpush.xpose.msk.msra.mxu0 %vm1057_vm12, %v5167_v12  ;;  %v4811_v20 = vsub.f32 1.5, %v4810_v43  ;;  %v4940_v43 = vmul.f32 %v4826_v59, %v12598_v0 }
 0xd0b   :  { %v12776_v62 = vpop.eup %9611 }
 0xd0c   :  { %v4812_v56 = vmul.f32 %v9610_v10, %v4811_v20  ;;  %v4838_v23 = vmul.f32 %v12776_v62, %v12765_v30  ;;  %v12786_v14 = vpop.eup %9613  ;;  %v4832_v20 = vmul.f32 %v12761_v13, %v4831_v34  ;;  %v4965_v51 = vmul.f32 %v12465_v49, %v4940_v43 }
 0xd0d   :  { %8798 = vmatmul.msk.f32.vlgmr.msra.gmra.mxu0 %vm1057_vm12, %v12645_v57  ;;  %v4848_v58 = vmul.f32 %v12786_v14, %v12771_v41  ;;  %vm4844_vm3 = vweird.f32 %v12776_v62  ;;  %vm4854_vm6 = vweird.f32 %v12786_v14 }
 0xd0e   :  { %v4816_v6 = vsel %vm4815_vm11, %v9610_v10, %v4812_v56  ;;  %v4839_v36 = vmul.f32 %v12776_v62, %v4838_v23  ;;  %v4657_v10 = vmul.f32 %v4623_v24, %v14932_v42  ;;  %v4836_v56 = vsel %vm4835_vm0, %v12761_v13, %v4832_v20  ;;  %vm4845_vm5 = vmor %vm4843_vm4, %vm4844_vm3 }
 0xd0f   :  { %v4939_v37 = vmul.f32 %v4816_v6, %v12631_v28  ;;  %v4849_v0 = vmul.f32 %v12786_v14, %v4848_v58  ;;  %v12812_v6 = vpop.eup %9615  ;;  %v4941_v34 = vmul.f32 %v4836_v56, %v12580_v3  ;;  %v4990_v32 = vadd.f32 %v12469_v18, %v4965_v51  ;;  %vm4855_vm8 = vmor %vm4853_vm7, %vm4854_vm6 }
 0xd10   :  { %v4840_v21 = vmul.f32 0.5, %v4839_v36  ;;  %v12808_v54 = vadd.f32 1e-05, %v4657_v10  ;;  %v4858_v24 = vmul.f32 %v12812_v6, %v12783_v60  ;;  %vm4864_vm9 = vweird.f32 %v12812_v6 }
 0xd11   :  { %v4964_v8 = vmul.f32 %v12465_v49, %v4939_v37  ;;  %v4850_v36 = vmul.f32 0.5, %v4849_v0  ;;  %v4966_v13 = vmul.f32 %v12465_v49, %v4941_v34  ;;  %vm4865_vm11 = vmor %vm4863_vm10, %vm4864_vm9 }
 0xd12   :  { %v5100_v12 = vpop.f32.mrf.mxu2  ;;  %v4841_v23 = vsub.f32 1.5, %v4840_v21  ;;  %9617 = vrsqrt.f32 %v12808_v54  ;;  %v4859_v43 = vmul.f32 %v12812_v6, %v4858_v24  ;;  %vm4873_vm14 = vweird.f32 %v12808_v54 }
 0xd13   :  { %v12792_v26 = vadd.f32 %v12606_v44, %v5100_v12  ;;  %v4989_v28 = vadd.f32 %v12469_v18, %v4964_v8  ;;  %v4851_v12 = vsub.f32 1.5, %v4850_v36  ;;  %v4991_v30 = vadd.f32 %v12469_v18, %v4966_v13 }
 0xd14   :  { %v4842_v8 = vmul.f32 %v12776_v62, %v4841_v23  ;;  %v4860_v51 = vmul.f32 0.5, %v4859_v43 }
 0xd15   :  { %5213 = vrot.lane.b32.xlu2 %v12792_v26, %s10018_s21  ;;  %8799 = vmatmul.msk.f32.gmra.mxu0 %vm1057_vm12, %v12664_v1  ;;  %v4852_v0 = vmul.f32 %v12786_v14, %v4851_v12 }
 0xd16   :  { %8783 = vmatmul.msk.f32.vlgmr.msra.gmra.mxu3 %vm300_vm1, %v4989_v28  ;;  %v4846_v58 = vsel %vm4845_vm5, %v12776_v62, %v4842_v8  ;;  %v4861_v34 = vsub.f32 1.5, %v4860_v51 }
 0xd17   :  { %v4942_v21 = vmul.f32 %v4846_v58, %v12640_v17 }
 0xd18   :  { %v12839_v28 = vpop.eup %9617  ;;  %v4862_v58 = vmul.f32 %v12812_v6, %v4861_v34 }
 0xd19   :  { %v4868_v56 = vmul.f32 %v12839_v28, %v12808_v54  ;;  %v4967_v23 = vmul.f32 %v12465_v49, %v4942_v21  ;;  %vm4874_vm13 = vweird.f32 %v12839_v28 }
 0xd1a   :  { %v5103_v59 = vpop.f32.mrf.mxu2  ;;  %vm4875_vm15 = vmor %vm4873_vm14, %vm4874_vm13 }
 0xd1b   :  { %v12815_v37 = vadd.f32 %v12606_v44, %v5103_v59  ;;  %v4856_v59 = vsel %vm4855_vm8, %v12786_v14, %v4852_v0  ;;  %v4869_v36 = vmul.f32 %v12839_v28, %v4868_v56  ;;  %v4992_v14 = vadd.f32 %v12469_v18, %v4967_v23 }
 0xd1c   :  { %v4943_v12 = vmul.f32 %v4856_v59, %v12616_v31  ;;  %v4866_v0 = vsel %vm4865_vm11, %v12812_v6, %v4862_v58 }
 0xd1d   :  { %5215 = vrot.lane.b32.xlu0 %v12815_v37, %s10018_s21  ;;  %8800 = vmatmul.msk.f32.gmra.mxu0 %vm1057_vm12, %v12609_v39  ;;  %v12830_v3 = vpack.i.bf16 %v12792_v26, %v12815_v37  ;;  %v4944_v59 = vmul.f32 %v4866_v0, %v12624_v2 }
 0xd1e   :  { %8784 = vmatmul.msk.f32.gmra.mxu3 %vm300_vm1, %v4990_v32 }
 0xd1f   :  { %9114 = vrot.lane.b32.xlu2 %v12830_v3, %s10019_s22 }
 0xd22   :  { %v5106_v10 = vpop.f32.mrf.mxu2 }
 0xd23   :  { %v12842_v20 = vadd.f32 %v12606_v44, %v5106_v10  ;;  %v4870_v10 = vmul.f32 0.5, %v4869_v36 }
 0xd24   :  { %v4632_v32 = vpop.xlane.xlu0 %4631 }
 0xd25   :  { %5217 = vrot.lane.b32.xlu0 %v12842_v20, %s10018_s21  ;;  %v12865_v41 = vpack.i.bf16 %v12842_v20, %v12645_v57  ;;  %v4660_v43 = vmul.f32 %v4632_v32, %v14932_v42  ;;  %v4871_v51 = vsub.f32 1.5, %v4870_v10 }
 0xd26   :  { %8785 = vmatmul.msk.f32.gmra.mxu3 %vm300_vm1, %v4991_v30  ;;  %v4629_v62 = vpop.xlane.xlu2 %4628  ;;  %v4968_v30 = vmul.f32 %v12465_v49, %v4943_v12 }
 0xd27   :  { %v4659_v17 = vmul.f32 %v4629_v62, %v14932_v42  ;;  %14986 = vst [vmem:[#allocation50_spill] sm:$0xff] %v12865_v41  ;;  %v12879_v31 = vadd.f32 1e-05, %v4660_v43  ;;  %v4872_v49 = vmul.f32 %v12839_v28, %v4871_v51 }
 0xd28   :  { %v4993_v34 = vadd.f32 %v12469_v18, %v4968_v30  ;;  %v12912_v30 = vld [vmem:[#allocation5 + $0x209] ss:$0 sm:$0xff] }
 0xd29   :  { %v12858_v24 = vadd.f32 1e-05, %v4659_v17  ;;  %v4876_v36 = vsel %vm4875_vm15, %v12839_v28, %v4872_v49  ;;  %vm4903_vm9 = vweird.f32 %v12879_v31 }
 0xd2a   :  { %v5109_v8 = vpop.f32.mrf.mxu2  ;;  %v4945_v10 = vmul.f32 %v4876_v36, %v12658_v35 }
 0xd2b   :  { %v12861_v13 = vadd.f32 %v12606_v44, %v5109_v8  ;;  %9619 = vrsqrt.f32 %v12858_v24  ;;  %vm4893_vm6 = vweird.f32 %v12858_v24 }
 0xd2c   :  { %9621 = vrsqrt.f32 %v12879_v31 }
 0xd2d   :  { %9119 = vrot.lane.b32.xlu0 %v12865_v41, %s10019_s22  ;;  %5260 = vrot.lane.b32.xlu2 %v12861_v13, %s10018_s21 }
 0xd2e   :  { %8786 = vmatmul.msk.f32.gmra.mxu3 %vm300_vm1, %v4992_v14 }
 0xd30   :  { %v4626_v21 = vpop.xlane.xlu1 %4625 }
 0xd31   :  { %v4658_v56 = vmul.f32 %v4626_v21, %v14932_v42  ;;  %v12884_v62 = vpop.eup %9619 }
 0xd32   :  { %v5112_v23 = vpop.f32.mrf.mxu2  ;;  %v4888_v6 = vmul.f32 %v12884_v62, %v12858_v24  ;;  %v9622_v43 = vpop.eup %9621  ;;  %vm4894_vm4 = vweird.f32 %v12884_v62 }
 0xd33   :  { %v4682_v17 = vadd.f32 1e-05, %v4658_v56  ;;  %v12889_v60 = vadd.f32 %v12606_v44, %v5112_v23  ;;  %v12902_v44 = vld [vmem:[#allocation5 + $0x208] ss:$0 sm:$0xff]  ;;  %v4898_v28 = vmul.f32 %v9622_v43, %v12879_v31  ;;  %vm4895_vm7 = vmor %vm4893_vm6, %vm4894_vm4  ;;  %vm4904_vm8 = vweird.f32 %v9622_v43 }
 0xd34   :  { %v4969_v2 = vmul.f32 %v12902_v44, %v4944_v59  ;;  %v4889_v32 = vmul.f32 %v12884_v62, %v4888_v6  ;;  %v4970_v59 = vmul.f32 %v12902_v44, %v4945_v10  ;;  %vm4905_vm10 = vmor %vm4903_vm9, %vm4904_vm8 }
 0xd35   :  { %14987 = vst [vmem:[#allocation12_spill] sm:$0xff] %v12889_v60  ;;  %9623 = vrsqrt.f32 %v4682_v17  ;;  %6203 = vrot.lane.b32.xlu2 %v12645_v57, %s10017_s1  ;;  %5262 = vrot.lane.b32.xlu0 %v12889_v60, %s10018_s21  ;;  %v4638_v8 = vpop.xlane.xlu2 %4637  ;;  %vm4883_vm3 = vweird.f32 %v4682_v17 }
 0xd36   :  { %8787 = vmatmul.msk.f32.gmra.mxu3 %vm300_vm1, %v4993_v34  ;;  %v4662_v21 = vmul.f32 %v4638_v8, %v14932_v42  ;;  %v4994_v0 = vadd.f32 %v12912_v30, %v4969_v2  ;;  %v4890_v51 = vmul.f32 0.5, %v4889_v32  ;;  %v4899_v34 = vmul.f32 %v9622_v43, %v4898_v28 }
 0xd37   :  { %v4995_v36 = vadd.f32 %v12912_v30, %v4970_v59 }
 0xd38   :  { %v4635_v18 = vpop.xlane.xlu1 %4634  ;;  %v12922_v23 = vadd.f32 1e-05, %v4662_v21  ;;  %v4891_v49 = vsub.f32 1.5, %v4890_v51  ;;  %v4900_v32 = vmul.f32 0.5, %v4899_v34 }
 0xd39   :  { %v4661_v12 = vmul.f32 %v4635_v18, %v14932_v42 }
 0xd3a   :  { %v4892_v8 = vmul.f32 %v12884_v62, %v4891_v49 }
 0xd3b   :  { %v9624_v14 = vpop.eup %9623  ;;  %v12908_v58 = vadd.f32 1e-05, %v4661_v12 }
 0xd3c   :  { %v4878_v54 = vmul.f32 %v9624_v14, %v4682_v17  ;;  %vm4884_vm0 = vweird.f32 %v9624_v14  ;;  %v4896_v21 = vsel %vm4895_vm7, %v12884_v62, %v4892_v8 }
 0xd3d   :  { %9625 = vrsqrt.f32 %v12908_v58  ;;  %6259 = vrot.lane.b32.xlu2 %v12792_v26, %s10016_s0  ;;  %6211 = vrot.lane.b32.xlu0 %v12664_v1, %s10016_s0  ;;  %vm4885_vm5 = vmor %vm4883_vm3, %vm4884_vm0  ;;  %vm4913_vm13 = vweird.f32 %v12908_v58  ;;  %vm4923_vm0 = vweird.f32 %v12922_v23 }
 0xd3e   :  { %v4879_v56 = vmul.f32 %v9624_v14, %v4878_v54  ;;  %8788 = vmatmul.msk.f32.gmra.mxu3 %vm300_vm1, %v4994_v0  ;;  %9627 = vrsqrt.f32 %v12922_v23  ;;  %v4901_v54 = vsub.f32 1.5, %v4900_v32 }
 0xd40   :  { %v4880_v35 = vmul.f32 0.5, %v4879_v56 }
 0xd42   :  { %v4881_v6 = vsub.f32 1.5, %v4880_v35  ;;  %v4902_v35 = vmul.f32 %v9622_v43, %v4901_v54 }
 0xd43   :  { %v9626_v18 = vpop.eup %9625 }
 0xd44   :  { %v4882_v2 = vmul.f32 %v9624_v14, %v4881_v6  ;;  %v4908_v12 = vmul.f32 %v9626_v18, %v12908_v58  ;;  %v9628_v51 = vpop.eup %9627  ;;  %v4906_v62 = vsel %vm4905_vm10, %v9622_v43, %v4902_v35  ;;  %vm4914_vm11 = vweird.f32 %v9626_v18 }
 0xd45   :  { %6209 = vrot.lane.b32.xlu0 %v12645_v57, %s10016_s0  ;;  %v4918_v57 = vmul.f32 %v9628_v51, %v12922_v23  ;;  %vm4915_vm14 = vmor %vm4913_vm13, %vm4914_vm11  ;;  %vm4924_vm15 = vweird.f32 %v9628_v51 }
 0xd46   :  { %v4886_v10 = vsel %vm4885_vm5, %v9624_v14, %v4882_v2  ;;  %8789 = vmatmul.msk.f32.gmra.mxu3 %vm300_vm1, %v4995_v36  ;;  %v4909_v0 = vmul.f32 %v9626_v18, %v4908_v12  ;;  %v4947_v14 = vmul.f32 %v4896_v21, %v12685_v52  ;;  %v4948_v2 = vmul.f32 %v4906_v62, %v12691_v50  ;;  %vm4925_vm3 = vmor %vm4923_vm0, %vm4924_vm15 }
 0xd47   :  { %v4946_v17 = vmul.f32 %v4886_v10, %v12705_v48  ;;  %v4919_v34 = vmul.f32 %v9628_v51, %v4918_v57 }
 0xd48   :  { %v4910_v59 = vmul.f32 0.5, %v4909_v0  ;;  %v4972_v24 = vmul.f32 %v12902_v44, %v4947_v14  ;;  %v4973_v31 = vmul.f32 %v12902_v44, %v4948_v2 }
 0xd49   :  { %v4971_v28 = vmul.f32 %v12902_v44, %v4946_v17  ;;  %v4920_v32 = vmul.f32 0.5, %v4919_v34 }
 0xd4a   :  { %v4911_v49 = vsub.f32 1.5, %v4910_v59  ;;  %v4997_v36 = vadd.f32 %v12912_v30, %v4972_v24  ;;  %v4998_v10 = vadd.f32 %v12912_v30, %v4973_v31 }
 0xd4b   :  { %v4996_v56 = vadd.f32 %v12912_v30, %v4971_v28  ;;  %v4921_v43 = vsub.f32 1.5, %v4920_v32 }
 0xd4c   :  { %v4912_v8 = vmul.f32 %v9626_v18, %v4911_v49 }
 0xd4d   :  { %6263 = vrot.lane.b32.xlu0 %v12842_v20, %s10016_s0  ;;  %v4922_v17 = vmul.f32 %v9628_v51, %v4921_v43 }
 0xd4e   :  { %8790 = vmatmul.msk.f32.gmra.mxu3 %vm300_vm1, %v4996_v56  ;;  %v4916_v12 = vsel %vm4915_vm14, %v9626_v18, %v4912_v8  ;;  %v14988_v56 = vld [vmem:[#allocation55_spill] sm:$0xff] }
 0xd4f   :  { %v4949_v50 = vmul.f32 %v4916_v12, %v12713_v9  ;;  %v4926_v54 = vsel %vm4925_vm3, %v9628_v51, %v4922_v17 }
 0xd50   :  { %v9110_v48 = vpop.permute.xlu1 %9109  ;;  %v4950_v21 = vmul.f32 %v4926_v54, %v12720_v46 }
 0xd51   :  { %v9111_v52 = vunpack.i.l.bf16 %v9110_v48  ;;  %v9112_v6 = vunpack.i.h.bf16 %v9110_v48  ;;  %v4974_v58 = vmul.f32 %v12902_v44, %v4949_v50  ;;  %v5115_v24 = vpop.f32.mrf.mxu2  ;;  %v12985_v50 = vld [vmem:[#allocation5 + $0x20c] ss:$0 sm:$0xff] }
 0xd52   :  { %v4975_v9 = vmul.f32 %v12902_v44, %v4950_v21 }
 0xd53   :  { %5882 = vmatpush.msra.mxu1 %v9111_v52  ;;  %v4999_v18 = vadd.f32 %v12912_v30, %v4974_v58 }
 0xd54   :  { %v5000_v0 = vadd.f32 %v12912_v30, %v4975_v9 }
 0xd55   :  { %5883 = vmatpush.msra.mxu1 %v9112_v6  ;;  %6261 = vrot.lane.b32.xlu0 %v12815_v37, %s10016_s0 }
 0xd56   :  { %8791 = vmatmul.msk.f32.gmra.mxu3 %vm300_vm1, %v4997_v36 }
 0xd5a   :  { %v5118_v43 = vpop.f32.mrf.mxu2 }
 0xd5b   :  { %v12995_v17 = vadd.f32 %v12985_v50, %v5118_v43 }
 0xd5d   :  { %6205 = vrot.lane.b32.xlu0 %v12664_v1, %s10017_s1 }
 0xd5e   :  { %8792 = vmatmul.msk.f32.gmra.mxu3 %vm300_vm1, %v4998_v10  ;;  %v12988_v10 = vadd.f32 %v12985_v50, %v5115_v24 }
 0xd60   :  { %14989 = vst [vmem:[#allocation13_spill] sm:$0xff] %v12988_v10 }
 0xd62   :  { %v5121_v58 = vpop.f32.mrf.mxu2 }
 0xd63   :  { %v13002_v21 = vadd.f32 %v12985_v50, %v5121_v58 }
 0xd66   :  { %8793 = vmatmul.msk.f32.gmra.mxu3 %vm300_vm1, %v4999_v18  ;;  %v13010_v18 = vpack.i.bf16 %v12995_v17, %v13002_v21 }
 0xd6e   :  { %8794 = vmatmul.msk.f32.gmra.mxu3 %vm300_vm1, %v5000_v0  ;;  %v5124_v0 = vpop.f32.mrf.mxu2 }
 0xd6f   :  { %v5214_v44 = vpop.permute.xlu2 %5213 }
 0xd79   :  { %v9115_v52 = vpop.permute.xlu2 %9114 }
 0xd7a   :  { %v9116_v8 = vunpack.i.l.bf16 %v9115_v52  ;;  %v9117_v31 = vunpack.i.h.bf16 %v9115_v52 }
 0xd8a   :  { %v5201_v1 = vpop.f32.mrf.mxu0 }
 0xd8b   :  { %v5539_v28 = vmul.f32 0.25, %v5201_v1  ;;  %v13019_v1 = vadd.f32 %v12985_v50, %v5124_v0 }
 0xd8d   :  { %v12966_v23 = vadd.f32 %v5539_v28, %v14988_v56 }
 0xd8f   :  { %v5216_v14 = vpop.permute.xlu0 %5215  ;;  %v5587_v51 = vsel %vm1473_vm2, %v12966_v23, -inf }
 0xd90   :  { %5588 = vmax.xlane.f32.xlu1 %v5587_v51 }
 0xd92   :  { %v5204_v46 = vpop.f32.mrf.mxu0 }
 0xd93   :  { %v5540_v35 = vmul.f32 0.25, %v5204_v46 }
 0xd95   :  { %v12971_v57 = vadd.f32 %v5540_v35, %v14988_v56 }
 0xd97   :  { %v5218_v59 = vpop.permute.xlu0 %5217  ;;  %v5590_v30 = vsel %vm1473_vm2, %v12971_v57, -inf }
 0xd98   :  { %5591 = vmax.xlane.f32.xlu2 %v5590_v30  ;;  %8801 = vmatpush.xpose.msk.msrb.mxu0 %vm1057_vm12, %v5218_v59 }
 0xd99   :  { %v5127_v62 = vpop.f32.mrf.mxu3 }
 0xd9a   :  { %v5207_v48 = vpop.f32.mrf.mxu0 }
 0xd9b   :  { %v5541_v34 = vmul.f32 0.25, %v5207_v48 }
 0xd9c   :  { %8802 = vmatpush.xpose.msk.msrb.mxu0 %vm1057_vm12, %v5216_v14  ;;  %v13032_v14 = vadd.f32 %v12985_v50, %v5127_v62 }
 0xd9d   :  { %v12978_v49 = vadd.f32 %v5541_v34, %v14988_v56 }
 0xd9f   :  { %v9120_v6 = vpop.permute.xlu0 %9119  ;;  %v5593_v2 = vsel %vm1473_vm2, %v12978_v49, -inf }
 0xda0   :  { %v9122_v36 = vunpack.i.h.bf16 %v9120_v6  ;;  %v9121_v32 = vunpack.i.l.bf16 %v9120_v6  ;;  %5594 = vmax.xlane.f32.xlu0 %v5593_v2  ;;  %8803 = vmatpush.xpose.msk.msrb.mxu0 %vm1057_vm12, %v5214_v44 }
 0xda1   :  { %v5130_v12 = vpop.f32.mrf.mxu3 }
 0xda2   :  { %5884 = vmatpush.msra.mxu1 %v9121_v32  ;;  %5926 = vmatpush.msrb.mxu3 %v9122_v36  ;;  %v5261_v32 = vpop.permute.xlu2 %5260 }
 0xda3   :  { %8804 = vmatmul.msk.f32.vlgmr.msrb.gmra.mxu0 %vm1057_vm12, %v12792_v26 }
 0xda4   :  { %5927 = vmatpush.msrb.mxu3 %v9116_v8 }
 0xda6   :  { %5928 = vmatpush.msrb.mxu3 %v9117_v31 }
 0xda7   :  { %v5263_v30 = vpop.permute.xlu0 %5262 }
 0xda9   :  { %5264 = vrot.lane.b32.xlu1 %v12988_v10, %s10018_s21  ;;  %v5133_v54 = vpop.f32.mrf.mxu3 }
 0xdaa   :  { %v13044_v46 = vadd.f32 %v12985_v50, %v5133_v54  ;;  %v13114_v58 = vpop.permute.xlu2 %6203 }
 0xdab   :  { %8805 = vmatmul.msk.f32.gmra.mxu0 %vm1057_vm12, %v12815_v37 }
 0xdaf   :  { %v13088_v6 = vpop.permute.xlu0 %6211 }
 0xdb0   :  { %5307 = vrot.lane.b32.xlu2 %v12995_v17, %s10018_s21 }
 0xdb1   :  { %6213 = vrot.lane.b32.xlu1 %v12609_v39, %s10016_s0  ;;  %v5136_v9 = vpop.f32.mrf.mxu3 }
 0xdb3   :  { %8806 = vmatmul.msk.f32.gmra.mxu0 %vm1057_vm12, %v12842_v20 }
 0xdb4   :  { %5309 = vrot.lane.b32.xlu0 %v13002_v21, %s10018_s21 }
 0xdb8   :  { %6253 = vrot.lane.b32.xlu2 %v12792_v26, %s10017_s1  ;;  %v13027_v26 = vpack.i.bf16 %v13019_v1, %v12861_v13 }
 0xdb9   :  { %9124 = vrot.lane.b32.xlu1 %v13010_v18, %s10019_s22  ;;  %v5139_v28 = vpop.f32.mrf.mxu3 }
 0xdba   :  { %v13061_v44 = vadd.f32 %v12985_v50, %v5139_v28  ;;  %v13129_v28 = vpop.permute.xlu2 %6259 }
 0xdbc   :  { %6313 = vrot.lane.b32.xlu0 %v12988_v10, %s10016_s0  ;;  %v9143_v24 = vpack.i.bf16 %v12988_v10, %v13061_v44 }
 0xdc0   :  { %6255 = vrot.lane.b32.xlu2 %v12815_v37, %s10017_s1  ;;  %v13039_v37 = vadd.f32 %v12985_v50, %v5130_v12  ;;  %v13110_v12 = vpop.permute.xlu0 %6209 }
 0xdc1   :  { %5311 = vrot.lane.b32.xlu1 %v13019_v1, %s10018_s21  ;;  %v5142_v51 = vpop.f32.mrf.mxu3 }
 0xdc2   :  { %v13052_v35 = vpack.i.bf16 %v13039_v37, %v13044_v46  ;;  %v13081_v62 = vadd.f32 %v12985_v50, %v5142_v51 }
 0xdc4   :  { %9129 = vrot.lane.b32.xlu0 %v13027_v26, %s10019_s22  ;;  %14990 = vst [vmem:[#allocation11_spill] sm:$0xff] %v13052_v35  ;;  %v13095_v36 = vpack.i.bf16 %v13081_v62, %v13032_v14 }
 0xdc6   :  { %14992 = vst [vmem:[#allocation20_spill] sm:$0xff] %v13095_v36 }
 0xdc8   :  { %5354 = vrot.lane.b32.xlu2 %v13032_v14, %s10018_s21 }
 0xdc9   :  { %6207 = vrot.lane.b32.xlu1 %v12609_v39, %s10017_s1  ;;  %v5145_v39 = vpop.f32.mrf.mxu3 }
 0xdca   :  { %v13108_v43 = vadd.f32 %v12985_v50, %v5145_v39 }
 0xdcc   :  { %5356 = vrot.lane.b32.xlu0 %v13039_v37, %s10018_s21 }
 0xdd0   :  { %6311 = vrot.lane.b32.xlu2 %v12889_v60, %s10016_s0 }
 0xdd1   :  { %6257 = vrot.lane.b32.xlu1 %v12842_v20, %s10017_s1  ;;  %v13066_v20 = vadd.f32 %v12985_v50, %v5136_v9  ;;  %v5148_v59 = vpop.f32.mrf.mxu3  ;;  %v13124_v9 = vpop.permute.xlu0 %6263 }
 0xdd2   :  { %v13084_v34 = vadd.f32 %v12985_v50, %v5148_v59 }
 0xdd3   :  { %14991 = vst [vmem:[#allocation21_spill] sm:$0xff] %v13066_v20  ;;  %v9138_v48 = vpack.i.bf16 %v12889_v60, %v13066_v20 }
 0xdd4   :  { %9134 = vrot.lane.b32.xlu0 %v13052_v35, %s10019_s22 }
 0xdd8   :  { %6303 = vrot.lane.b32.xlu2 %v12861_v13, %s10017_s1 }
 0xdd9   :  { %5358 = vrot.lane.b32.xlu1 %v13044_v46, %s10018_s21  ;;  %v5151_v52 = vpop.f32.mrf.mxu3 }
 0xdda   :  { %v13091_v2 = vadd.f32 %v12985_v50, %v5151_v52 }
 0xddc   :  { %5403 = vrot.lane.b32.xlu0 %v13061_v44, %s10018_s21  ;;  %v13103_v8 = vpack.i.bf16 %v13084_v34, %v13091_v2 }
 0xdde   :  { %14993 = vst [vmem:[#allocation22_spill] sm:$0xff] %v13103_v8 }
 0xde0   :  { %5401 = vrot.lane.b32.xlu2 %v13066_v20, %s10018_s21 }
 0xde1   :  { %6309 = vrot.lane.b32.xlu1 %v12861_v13, %s10016_s0  ;;  %v5154_v31 = vpop.f32.mrf.mxu3 }
 0xde2   :  { %v13134_v51 = vadd.f32 %v12985_v50, %v5154_v31 }
 0xde4   :  { %6359 = vrot.lane.b32.xlu0 %v12995_v17, %s10016_s0 }
 0xde8   :  { %9139 = vrot.lane.b32.xlu2 %v9138_v48, %s10019_s22  ;;  %v13146_v48 = vpop.permute.xlu0 %6261 }
 0xde9   :  { %9144 = vrot.lane.b32.xlu1 %v9143_v24, %s10019_s22  ;;  %v5157_v54 = vpop.f32.mrf.mxu3 }
 0xdea   :  { %v13127_v0 = vadd.f32 %v12985_v50, %v5157_v54 }
 0xdec   :  { %5450 = vrot.lane.b32.xlu0 %v13084_v34, %s10018_s21  ;;  %v13142_v39 = vpack.i.bf16 %v13134_v51, %v13127_v0 }
 0xdee   :  { %14994 = vst [vmem:[#allocation23_spill] sm:$0xff] %v13142_v39 }
 0xdf0   :  { %9149 = vrot.lane.b32.xlu2 %v13095_v36, %s10019_s22  ;;  %v13158_v31 = vpop.permute.xlu0 %6205 }
 0xdf1   :  { %5405 = vrot.lane.b32.xlu1 %v13081_v62, %s10018_s21  ;;  %v5160_v33 = vpop.f32.mrf.mxu3 }
 0xdf2   :  { %v13172_v5 = vadd.f32 %v12985_v50, %v5160_v33 }
 0xdf4   :  { %9154 = vrot.lane.b32.xlu0 %v13103_v8, %s10019_s22  ;;  %v13208_v42 = vpack.i.bf16 %v13172_v5, %v13108_v43 }
 0xdf6   :  { %14997 = vst [vmem:[#allocation17_spill] sm:$0xff] %v13208_v42 }
 0xdf8   :  { %5448 = vrot.lane.b32.xlu2 %v13108_v43, %s10018_s21 }
 0xdf9   :  { %6305 = vrot.lane.b32.xlu1 %v12889_v60, %s10017_s1 }
 0xdfc   :  { %6409 = vrot.lane.b32.xlu0 %v13032_v14, %s10016_s0 }
 0xe00   :  { %6363 = vrot.lane.b32.xlu2 %v13019_v1, %s10016_s0 }
 0xe01   :  { %5452 = vrot.lane.b32.xlu1 %v13091_v2, %s10018_s21 }
 0xe03   :  { %v13154_v24 = vpop.xlane.xlu1 %5588 }
 0xe04   :  { %5497 = vrot.lane.b32.xlu0 %v13127_v0, %s10018_s21 }
 0xe08   :  { %6361 = vrot.lane.b32.xlu2 %v13002_v21, %s10016_s0 }
 0xe09   :  { %6307 = vrot.lane.b32.xlu1 %v12988_v10, %s10017_s1 }
 0xe0b   :  { %v13144_v59 = vpop.xlane.xlu2 %5591 }
 0xe0c   :  { %9159 = vrot.lane.b32.xlu0 %v13142_v39, %s10019_s22 }
 0xe10   :  { %5495 = vrot.lane.b32.xlu2 %v13134_v51, %s10018_s21 }
 0xe11   :  { %6357 = vrot.lane.b32.xlu1 %v13019_v1, %s10017_s1 }
 0xe13   :  { %v5308_v52 = vpop.permute.xlu2 %5307  ;;  %v13169_v38 = vpop.xlane.xlu0 %5594 }
 0xe14   :  { %6461 = vrot.lane.b32.xlu0 %v13061_v44, %s10016_s0 }
 0xe18   :  { %6353 = vrot.lane.b32.xlu2 %v12995_v17, %s10017_s1 }
 0xe19   :  { %6411 = vrot.lane.b32.xlu1 %v13039_v37, %s10016_s0 }
 0xe1b   :  { %v5265_v54 = vpop.permute.xlu1 %5264  ;;  %v13164_v27 = vpop.permute.xlu2 %6253 }
 0xe1c   :  { %14995 = vst [vmem:[#allocation16_spill] sm:$0xff] %v13164_v27  ;;  %6453 = vrot.lane.b32.xlu0 %v13066_v20, %s10017_s1  ;;  %8807 = vmatpush.xpose.msk.msra.mxu0 %vm1057_vm12, %v5265_v54 }
 0xe20   :  { %6355 = vrot.lane.b32.xlu2 %v13002_v21, %s10017_s1  ;;  %8808 = vmatpush.xpose.msk.msra.mxu0 %vm1057_vm12, %v5263_v30 }
 0xe21   :  { %5499 = vrot.lane.b32.xlu1 %v13172_v5, %s10018_s21 }
 0xe23   :  { %v13179_v29 = vpop.permute.xlu1 %6213  ;;  %v13181_v61 = vpop.permute.xlu2 %6255 }
 0xe24   :  { %14996 = vst [vmem:[#allocation15_spill] sm:$0xff] %v13181_v61  ;;  %8809 = vmatpush.xpose.msk.msra.mxu0 %vm1057_vm12, %v5261_v32 }
 0xe26   :  { %v5310_v54 = vpop.permute.xlu0 %5309 }
 0xe27   :  { %8810 = vmatmul.msk.f32.vlgmr.msra.gmra.mxu0 %vm1057_vm12, %v12861_v13 }
 0xe28   :  { %6413 = vrot.lane.b32.xlu2 %v13044_v46, %s10016_s0 }
 0xe29   :  { %6463 = vrot.lane.b32.xlu1 %v13081_v62, %s10016_s0 }
 0xe2b   :  { %v9125_v33 = vpop.permute.xlu1 %9124  ;;  %v5355_v50 = vpop.permute.xlu2 %5354 }
 0xe2c   :  { %v9126_v45 = vunpack.i.l.bf16 %v9125_v33  ;;  %v9127_v16 = vunpack.i.h.bf16 %v9125_v33 }
 0xe2e   :  { %v13190_v30 = vpop.permute.xlu0 %6313 }
 0xe2f   :  { %8811 = vmatmul.msk.f32.gmra.mxu0 %vm1057_vm12, %v12889_v60 }
 0xe30   :  { %6403 = vrot.lane.b32.xlu2 %v13032_v14, %s10017_s1 }
 0xe31   :  { %6459 = vrot.lane.b32.xlu1 %v13066_v20, %s10016_s0 }
 0xe33   :  { %v5312_v13 = vpop.permute.xlu1 %5311  ;;  %v13198_v32 = vpop.permute.xlu2 %6311 }
 0xe34   :  { %8813 = vmatpush.xpose.msk.msrb.mxu0 %vm1057_vm12, %v5312_v13  ;;  %v5248_v13 = vpop.f32.mrf.mxu0 }
 0xe35   :  { %v5542_v7 = vmul.f32 0.25, %v5248_v13 }
 0xe36   :  { %v13201_v15 = vpop.permute.xlu0 %9129 }
 0xe37   :  { %v9132_v40 = vunpack.i.h.bf16 %v13201_v15  ;;  %8812 = vmatmul.msk.f32.gmra.mxu0 %vm1057_vm12, %v12988_v10 }
 0xe38   :  { %6405 = vrot.lane.b32.xlu2 %v13039_v37, %s10017_s1  ;;  %8814 = vmatpush.xpose.msk.msrb.mxu0 %vm1057_vm12, %v5310_v54  ;;  %v13223_v54 = vadd.f32 %v5542_v7, %v14988_v56 }
 0xe39   :  { %9164 = vrot.lane.b32.xlu1 %v13208_v42, %s10019_s22  ;;  %6014 = vmatpush.msra.mxu2 %v9132_v40 }
 0xe3a   :  { %v5596_v33 = vsel %vm1473_vm2, %v13223_v54, -inf }
 0xe3b   :  { %v13215_v53 = vpop.permute.xlu1 %6207  ;;  %v13217_v47 = vpop.permute.xlu2 %6303  ;;  %6015 = vmatpush.msra.mxu2 %v9126_v45 }
 0xe3c   :  { %14998 = vst [vmem:[#allocation25_spill] sm:$0xff] %v13217_v47  ;;  %8815 = vmatpush.xpose.msk.msrb.mxu0 %vm1057_vm12, %v5308_v52  ;;  %v5660_v52 = vsub.f32 %v12971_v57, %v13144_v59  ;;  %v5251_v13 = vpop.f32.mrf.mxu0 }
 0xe3d   :  { %6016 = vmatpush.msra.mxu2 %v9127_v16 }
 0xe3e   :  { %v5357_v11 = vpop.permute.xlu0 %5356 }
 0xe3f   :  { %8816 = vmatmul.msk.f32.vlgmr.msrb.gmra.mxu0 %vm1057_vm12, %v12995_v17 }
 0xe43   :  { %v13225_v22 = vpop.permute.xlu1 %6257  ;;  %v5402_v40 = vpop.permute.xlu2 %5401 }
 0xe44   :  { %14999 = vst [vmem:[#allocation18_spill] sm:$0xff] %v13225_v22 }
 0xe46   :  { %5597 = vmax.xlane.f32.xlu0 %v5596_v33  ;;  %v13229_v25 = vpop.permute.xlu0 %9134  ;;  %v5685_v33 = vmul.f32 1.442695, %v5660_v52  ;;  %v5254_v52 = vpop.f32.mrf.mxu0 }
 0xe47   :  { %v14829_v45 = vunpack.i.l.bf16 %v13229_v25  ;;  %8817 = vmatmul.msk.f32.gmra.mxu0 %vm1057_vm12, %v13002_v21  ;;  %v14831_v16 = vunpack.i.h.bf16 %v13229_v25  ;;  %v5659_v21 = vsub.f32 %v12966_v23, %v13154_v24  ;;  %v15003_v39 = vunpack.i.l.bf16 %v13229_v25 }
 0xe48   :  { %9629 = vpow2.f32 %v5685_v33 }
 0xe49   :  { %8972 = vmatpush.msrb.mxu1 %v14829_v45  ;;  %v5683_v57 = vmul.f32 1.442695, %v5659_v21 }
 0xe4b   :  { %v5359_v7 = vpop.permute.xlu1 %5358  ;;  %v13237_v17 = vpop.permute.xlu2 %9139  ;;  %8973 = vmatpush.msrb.mxu1 %v14831_v16  ;;  %9631 = vpow2.f32 %v5683_v57 }
 0xe4c   :  { %8819 = vmatpush.xpose.msk.msra.mxu0 %vm1057_vm12, %v5359_v7  ;;  %v9142_v42 = vunpack.i.h.bf16 %v13237_v17 }
 0xe4e   :  { %v13262_v59 = vpop.eup %9629 }
 0xe4f   :  { %8818 = vmatmul.msk.f32.gmra.mxu0 %vm1057_vm12, %v13019_v1 }
 0xe50   :  { %8820 = vmatpush.xpose.msk.msra.mxu0 %vm1057_vm12, %v5357_v11  ;;  %v5661_v11 = vsub.f32 %v12978_v49, %v13169_v38  ;;  %v5404_v49 = vpop.permute.xlu0 %5403 }
 0xe51   :  { %v13265_v21 = vpop.eup %9631 }
 0xe52   :  { %v5687_v24 = vmul.f32 1.442695, %v5661_v11  ;;  %v5731_v38 = vsel %vm1473_vm2, %v13265_v21, 0.0 }
 0xe53   :  { %v13249_v45 = vpop.permute.xlu1 %6309  ;;  %v13251_v19 = vpop.permute.xlu2 %9149 }
 0xe54   :  { %v9152_v16 = vunpack.i.h.bf16 %v13251_v19  ;;  %v14832_v7 = vunpack.i.l.bf16 %v13251_v19  ;;  %8821 = vmatpush.xpose.msk.msra.mxu0 %vm1057_vm12, %v5355_v50  ;;  %v9141_v50 = vunpack.i.l.bf16 %v13237_v17  ;;  %9633 = vpow2.f32 %v5687_v24 }
 0xe56   :  { %8974 = vmatpush.msrb.mxu1 %v14832_v7  ;;  %6102 = vmatpush.msra.mxu3 %v9152_v16  ;;  %v5544_v16 = vmul.f32 0.25, %v5254_v52 }
 0xe57   :  { %8822 = vmatmul.msk.f32.vlgmr.msra.gmra.mxu0 %vm1057_vm12, %v13032_v14  ;;  %v5734_v14 = vsel %vm1473_vm2, %v13262_v59, 0.0 }
 0xe58   :  { %v13275_v57 = vadd.f32 %v5544_v16, %v14988_v56 }
 0xe5a   :  { %v13277_v11 = vpop.eup %9633 }
 0xe5b   :  { %v9145_v23 = vpop.permute.xlu1 %9144  ;;  %v5737_v24 = vsel %vm1473_vm2, %v13277_v11, 0.0 }
 0xe5c   :  { %v9146_v1 = vunpack.i.l.bf16 %v9145_v23  ;;  %v9147_v7 = vunpack.i.h.bf16 %v9145_v23 }
 0xe5e   :  { %6103 = vmatpush.msra.mxu3 %v9146_v1  ;;  %v5543_v1 = vmul.f32 0.25, %v5251_v13 }
 0xe5f   :  { %8823 = vmatmul.msk.f32.gmra.mxu0 %vm1057_vm12, %v13039_v37  ;;  %v5602_v37 = vsel %vm1473_vm2, %v13275_v57, -inf }
 0xe60   :  { %6104 = vmatpush.msra.mxu3 %v9141_v50  ;;  %v13289_v50 = vpop.permute.xlu0 %6359  ;;  %v13292_v16 = vadd.f32 %v5543_v1, %v14988_v56 }
 0xe61   :  { %5735 = vadd.xlane.f32.xlu2 %v5734_v14 }
 0xe62   :  { %v5599_v14 = vsel %vm1473_vm2, %v13292_v16, -inf }
 0xe63   :  { %v5406_v33 = vpop.permute.xlu1 %5405  ;;  %5732 = vadd.xlane.f32.xlu1 %v5731_v38 }
 0xe64   :  { %8825 = vmatpush.xpose.msk.msrb.mxu0 %vm1057_vm12, %v5406_v33 }
 0xe67   :  { %8824 = vmatmul.msk.f32.gmra.mxu0 %vm1057_vm12, %v13044_v46 }
 0xe68   :  { %8826 = vmatpush.xpose.msk.msrb.mxu0 %vm1057_vm12, %v5404_v49  ;;  %v5451_v38 = vpop.permute.xlu0 %5450 }
 0xe69   :  { %5603 = vmax.xlane.f32.xlu2 %v5602_v37 }
 0xe6b   :  { %v13286_v52 = vpop.permute.xlu1 %6305  ;;  %5738 = vadd.xlane.f32.xlu1 %v5737_v24 }
 0xe6c   :  { %15000 = vst [vmem:[#allocation14_spill] sm:$0xff] %v13286_v52  ;;  %8827 = vmatpush.xpose.msk.msrb.mxu0 %vm1057_vm12, %v5402_v40  ;;  %v5449_v40 = vpop.permute.xlu2 %5448 }
 0xe6f   :  { %8828 = vmatmul.msk.f32.vlgmr.msrb.gmra.mxu0 %vm1057_vm12, %v13066_v20  ;;  %v15004_v20 = vunpack.i.h.bf16 %v13229_v25 }
 0xe70   :  { %v13307_v33 = vpop.permute.xlu0 %9154 }
 0xe73   :  { %v5453_v13 = vpop.permute.xlu1 %5452  ;;  %5600 = vmax.xlane.f32.xlu1 %v5599_v14 }
 0xe74   :  { %8831 = vmatpush.xpose.msk.msra.mxu0 %vm1057_vm12, %v5453_v13  ;;  %v13311_v1 = vpop.permute.xlu2 %6363 }
 0xe77   :  { %8829 = vmatmul.msk.f32.gmra.mxu0 %vm1057_vm12, %v13061_v44 }
 0xe78   :  { %8832 = vmatpush.xpose.msk.msra.mxu0 %vm1057_vm12, %v5451_v38  ;;  %v13317_v14 = vpop.permute.xlu0 %6409 }
 0xe7b   :  { %v13302_v49 = vpop.permute.xlu1 %6307 }
 0xe7c   :  { %15001 = vst [vmem:[#allocation24_spill] sm:$0xff] %v13302_v49  ;;  %8833 = vmatpush.xpose.msk.msra.mxu0 %vm1057_vm12, %v5449_v40  ;;  %v13321_v13 = vpop.permute.xlu2 %6361 }
 0xe7f   :  { %8830 = vmatmul.msk.f32.gmra.mxu0 %vm1057_vm12, %v13081_v62 }
 0xe80   :  { %v5498_v40 = vpop.permute.xlu0 %5497 }
 0xe83   :  { %v13309_v37 = vpop.permute.xlu1 %6357 }
 0xe84   :  { %15002 = vst [vmem:[#allocation19_spill] sm:$0xff] %v13309_v37  ;;  %v5496_v55 = vpop.permute.xlu2 %5495 }
 0xe87   :  { %8834 = vmatmul.msk.f32.vlgmr.msra.gmra.mxu0 %vm1057_vm12, %v13108_v43 }
 0xe8b   :  { %v13315_v24 = vpop.permute.xlu1 %6411 }
 0xe8f   :  { %8835 = vmatmul.msk.f32.gmra.mxu0 %vm1057_vm12, %v13084_v34 }
 0xe93   :  { %v5500_v38 = vpop.permute.xlu1 %5499 }
 0xe94   :  { %8837 = vmatpush.xpose.msk.msrb.mxu0 %vm1057_vm12, %v5500_v38  ;;  %v9131_v38 = vunpack.i.l.bf16 %v13201_v15 }
 0xe97   :  { %8836 = vmatmul.msk.f32.gmra.mxu0 %vm1057_vm12, %v13091_v2 }
 0xe98   :  { %8838 = vmatpush.xpose.msk.msrb.mxu0 %vm1057_vm12, %v5498_v40 }
 0xe9b   :  { %v13327_v4 = vpop.permute.xlu1 %6463 }
 0xe9c   :  { %8839 = vmatpush.xpose.msk.msrb.mxu0 %vm1057_vm12, %v5496_v55  ;;  %v15005_v55 = vunpack.i.l.bf16 %v13251_v19 }
 0xe9f   :  { %8840 = vmatmul.msk.f32.vlgmr.msrb.gmra.mxu0 %vm1057_vm12, %v13134_v51 }
 0xea0   :  { %5970 = vmatpush.msra.mxu0 %v9147_v7 }
 0xea2   :  { %5971 = vmatpush.msra.mxu0 %v9142_v42  ;;  %v9160_v42 = vpop.permute.xlu0 %9159 }
 0xea3   :  { %v13336_v40 = vpop.permute.xlu1 %6459 }
 0xea4   :  { %5972 = vmatpush.msra.mxu0 %v9131_v38  ;;  %v5295_v23 = vpop.f32.mrf.mxu0  ;;  %v9161_v38 = vunpack.i.l.bf16 %v9160_v42 }
 0xea5   :  { %v5545_v8 = vmul.f32 0.25, %v5295_v23  ;;  %v9162_v23 = vunpack.i.h.bf16 %v9160_v42 }
 0xea6   :  { %6058 = vmatpush.msrb.mxu0 %v15003_v39  ;;  %v13349_v39 = vpop.permute.xlu2 %6353 }
 0xea7   :  { %v13343_v17 = vadd.f32 %v5545_v8, %v14988_v56  ;;  %8841 = vmatmul.msk.f32.gmra.mxu0 %vm1057_vm12, %v13127_v0  ;;  %15006 = vst [vmem:[#allocation27_spill] sm:$0xff] %v13349_v39 }
 0xea8   :  { %6059 = vmatpush.msrb.mxu0 %v15004_v20 }
 0xea9   :  { %v5605_v15 = vsel %vm1473_vm2, %v13343_v17, -inf }
 0xeaa   :  { %6060 = vmatpush.msrb.mxu0 %v15005_v55  ;;  %5606 = vmax.xlane.f32.xlu2 %v5605_v15  ;;  %v13361_v15 = vpop.permute.xlu0 %6461 }
 0xeab   :  { %v13351_v7 = vpop.permute.xlu1 %9164 }
 0xeac   :  { %v9167_v25 = vunpack.i.h.bf16 %v13351_v7  ;;  %v5298_v20 = vpop.f32.mrf.mxu0 }
 0xead   :  { %v5546_v19 = vmul.f32 0.25, %v5298_v20 }
 0xeae   :  { %6190 = vmatpush.msrb.mxu2 %v9167_v25  ;;  %v13363_v36 = vpop.permute.xlu2 %6355 }
 0xeaf   :  { %v13355_v8 = vadd.f32 %v5546_v19, %v14988_v56  ;;  %8842 = vmatmul.msk.f32.gmra.mxu0 %vm1057_vm12, %v13172_v5  ;;  %15007 = vst [vmem:[#allocation29_spill] sm:$0xff] %v13363_v36 }
 0xeb0   :  { %6191 = vmatpush.msrb.mxu2 %v9161_v38 }
 0xeb1   :  { %v5608_v55 = vsel %vm1473_vm2, %v13355_v8, -inf }
 0xeb2   :  { %5609 = vmax.xlane.f32.xlu2 %v5608_v55  ;;  %6192 = vmatpush.msrb.mxu2 %v9162_v23  ;;  %v13370_v38 = vpop.permute.xlu0 %6453 }
 0xeb3   :  { %15008 = vst [vmem:[#allocation28_spill] sm:$0xff] %v13370_v38 }
 0xeb4   :  { %v5301_v20 = vpop.f32.mrf.mxu0 }
 0xeb5   :  { %v5547_v37 = vmul.f32 0.25, %v5301_v20 }
 0xeb6   :  { %v13372_v49 = vpop.permute.xlu2 %6413 }
 0xeb7   :  { %v13366_v25 = vadd.f32 %v5547_v37, %v14988_v56 }
 0xeb9   :  { %v5611_v42 = vsel %vm1473_vm2, %v13366_v25, -inf }
 0xeba   :  { %5612 = vmax.xlane.f32.xlu0 %v5611_v42  ;;  %v5598_v37 = vpop.xlane.xlu0 %5597 }
 0xebb   :  { %v5662_v47 = vsub.f32 %v13223_v54, %v5598_v37 }
 0xebc   :  { %v5342_v19 = vpop.f32.mrf.mxu0 }
 0xebd   :  { %v5548_v39 = vmul.f32 0.25, %v5342_v19 }
 0xebe   :  { %v13382_v42 = vpop.permute.xlu2 %6403 }
 0xebf   :  { %v13375_v23 = vadd.f32 %v5548_v39, %v14988_v56  ;;  %15009 = vst [vmem:[#allocation31_spill] sm:$0xff] %v13382_v42  ;;  %v5689_v39 = vmul.f32 1.442695, %v5662_v47 }
 0xec1   :  { %v5614_v55 = vsel %vm1473_vm2, %v13375_v23, -inf  ;;  %9635 = vpow2.f32 %v5689_v39 }
 0xec2   :  { %5615 = vmax.xlane.f32.xlu2 %v5614_v55 }
 0xec4   :  { %v5345_v20 = vpop.f32.mrf.mxu0 }
 0xec5   :  { %v5549_v36 = vmul.f32 0.25, %v5345_v20 }
 0xec7   :  { %v13380_v52 = vadd.f32 %v5549_v36, %v14988_v56  ;;  %v13392_v36 = vpop.permute.xlu2 %6405  ;;  %v13394_v54 = vpop.eup %9635 }
 0xec8   :  { %15010 = vst [vmem:[#allocation32_spill] sm:$0xff] %v13392_v36 }
 0xec9   :  { %v5617_v19 = vsel %vm1473_vm2, %v13380_v52, -inf }
 0xeca   :  { %5618 = vmax.xlane.f32.xlu0 %v5617_v19 }
 0xecc   :  { %v5348_v38 = vpop.f32.mrf.mxu0 }
 0xecd   :  { %v5550_v35 = vmul.f32 0.25, %v5348_v38  ;;  %v5740_v38 = vsel %vm1473_vm2, %v13394_v54, 0.0 }
 0xecf   :  { %v13388_v22 = vadd.f32 %v5550_v35, %v14988_v56 }
 0xed1   :  { %v5620_v55 = vsel %vm1473_vm2, %v13388_v22, -inf }
 0xed2   :  { %5621 = vmax.xlane.f32.xlu2 %v5620_v55 }
 0xed4   :  { %v5389_v20 = vpop.f32.mrf.mxu0  ;;  %v5736_v19 = vpop.xlane.xlu2 %5735 }
 0xed5   :  { %v5551_v60 = vmul.f32 0.25, %v5389_v20 }
 0xed6   :  { %v5733_v37 = vpop.xlane.xlu1 %5732 }
 0xed7   :  { %9637 = vrcp.f32 %v5733_v37  ;;  %v13397_v47 = vadd.f32 %v5551_v60, %v14988_v56 }
 0xed8   :  { %9639 = vrcp.f32 %v5736_v19 }
 0xed9   :  { %v5623_v35 = vsel %vm1473_vm2, %v13397_v47, -inf }
 0xeda   :  { %5624 = vmax.xlane.f32.xlu0 %v5623_v35  ;;  %5741 = vadd.xlane.f32.xlu2 %v5740_v38 }
 0xedc   :  { %v5392_v39 = vpop.f32.mrf.mxu0 }
 0xedd   :  { %v9638_v55 = vpop.eup %9637  ;;  %v5552_v20 = vmul.f32 0.25, %v5392_v39 }
 0xede   :  { %v5827_v10 = vmul.f32 %v9638_v55, %v13265_v21  ;;  %v5739_v36 = vpop.xlane.xlu1 %5738  ;;  %v9640_v35 = vpop.eup %9639 }
 0xedf   :  { %v13405_v37 = vadd.f32 %v5552_v20, %v14988_v56  ;;  %9641 = vrcp.f32 %v5739_v36  ;;  %v5828_v21 = vmul.f32 %v9640_v35, %v13262_v59 }
 0xee0   :  { %8843 = vmatmul.msk.f32.vlgmr.msra.gmra.mxu1 %vm1473_vm2, %v5827_v10 }
 0xee1   :  { %8867 = vmatpush.xpose.msk.msra.mxu1 %vm1057_vm12, %v13179_v29  ;;  %v5626_v60 = vsel %vm1473_vm2, %v13405_v37, -inf }
 0xee2   :  { %5627 = vmax.xlane.f32.xlu1 %v5626_v60 }
 0xee4   :  { %v5395_v38 = vpop.f32.mrf.mxu0 }
 0xee5   :  { %v5553_v19 = vmul.f32 0.25, %v5395_v38  ;;  %8868 = vmatpush.xpose.msk.msra.mxu1 %vm1057_vm12, %v13088_v6  ;;  %v9642_v10 = vpop.eup %9641 }
 0xee6   :  { %v5829_v20 = vmul.f32 %v9642_v10, %v13277_v11 }
 0xee7   :  { %v13416_v39 = vadd.f32 %v5553_v19, %v14988_v56 }
 0xee8   :  { %8844 = vmatmul.msk.f32.gmra.mxu1 %vm1473_vm2, %v5828_v21 }
 0xee9   :  { %8869 = vmatpush.xpose.msk.msra.mxu1 %vm1057_vm12, %v13110_v12  ;;  %v5629_v29 = vsel %vm1473_vm2, %v13416_v39, -inf }
 0xeea   :  { %5630 = vmax.xlane.f32.xlu1 %v5629_v29 }
 0xeec   :  { %v5436_v36 = vpop.f32.mrf.mxu0 }
 0xeed   :  { %v5554_v55 = vmul.f32 0.25, %v5436_v36  ;;  %v5601_v36 = vpop.xlane.xlu1 %5600 }
 0xeef   :  { %v13425_v6 = vadd.f32 %v5554_v55, %v14988_v56 }
 0xef0   :  { %8845 = vmatmul.msk.f32.gmra.mxu1 %vm1473_vm2, %v5829_v20 }
 0xef1   :  { %v5632_v59 = vsel %vm1473_vm2, %v13425_v6, -inf }
 0xef2   :  { %5633 = vmax.xlane.f32.xlu0 %v5632_v59  ;;  %v5663_v59 = vsub.f32 %v13292_v16, %v5601_v36 }
 0xef4   :  { %v5439_v60 = vpop.f32.mrf.mxu0 }
 0xef5   :  { %v5555_v12 = vmul.f32 0.25, %v5439_v60 }
 0xef7   :  { %v13431_v35 = vadd.f32 %v5555_v12, %v14988_v56  ;;  %v5691_v12 = vmul.f32 1.442695, %v5663_v59 }
 0xef9   :  { %v5635_v38 = vsel %vm1473_vm2, %v13431_v35, -inf  ;;  %9643 = vpow2.f32 %v5691_v12 }
 0xefa   :  { %5636 = vmax.xlane.f32.xlu0 %v5635_v38 }
 0xefc   :  { %v5442_v19 = vpop.f32.mrf.mxu0 }
 0xefd   :  { %v5556_v11 = vmul.f32 0.25, %v5442_v19  ;;  %v5604_v19 = vpop.xlane.xlu2 %5603 }
 0xeff   :  { %v13436_v21 = vadd.f32 %v5556_v11, %v14988_v56  ;;  %v13452_v41 = vpop.eup %9643 }
 0xf01   :  { %v5638_v29 = vsel %vm1473_vm2, %v13436_v21, -inf }
 0xf02   :  { %5639 = vmax.xlane.f32.xlu1 %v5638_v29  ;;  %v5664_v29 = vsub.f32 %v13275_v57, %v5604_v19 }
 0xf04   :  { %v5483_v10 = vpop.f32.mrf.mxu0 }
 0xf05   :  { %v5557_v55 = vmul.f32 0.25, %v5483_v10 }
 0xf07   :  { %v13441_v20 = vadd.f32 %v5557_v55, %v14988_v56  ;;  %v5693_v55 = vmul.f32 1.442695, %v5664_v29 }
 0xf09   :  { %v5641_v60 = vsel %vm1473_vm2, %v13441_v20, -inf  ;;  %9645 = vpow2.f32 %v5693_v55 }
 0xf0a   :  { %5642 = vmax.xlane.f32.xlu1 %v5641_v60  ;;  %v5743_v60 = vsel %vm1473_vm2, %v13452_v41, 0.0 }
 0xf0c   :  { %v5486_v38 = vpop.f32.mrf.mxu0 }
 0xf0d   :  { %v5558_v11 = vmul.f32 0.25, %v5486_v38 }
 0xf0f   :  { %v13447_v61 = vadd.f32 %v5558_v11, %v14988_v56  ;;  %v13461_v11 = vpop.eup %9645 }
 0xf10   :  { %v5746_v55 = vsel %vm1473_vm2, %v13461_v11, 0.0 }
 0xf11   :  { %v5644_v10 = vsel %vm1473_vm2, %v13447_v61, -inf }
 0xf12   :  { %5645 = vmax.xlane.f32.xlu0 %v5644_v10 }
 0xf14   :  { %v5489_v16 = vpop.f32.mrf.mxu0 }
 0xf15   :  { %v5559_v36 = vmul.f32 0.25, %v5489_v16 }
 0xf17   :  { %v13455_v59 = vadd.f32 %v5559_v36, %v14988_v56 }
 0xf19   :  { %v5647_v57 = vsel %vm1473_vm2, %v13455_v59, -inf }
 0xf1a   :  { %5744 = vadd.xlane.f32.xlu0 %v5743_v60  ;;  %5648 = vmax.xlane.f32.xlu1 %v5647_v57 }
 0xf1c   :  { %v5530_v12 = vpop.f32.mrf.mxu0 }
 0xf1d   :  { %v5560_v38 = vmul.f32 0.25, %v5530_v12  ;;  %v5607_v19 = vpop.xlane.xlu2 %5606 }
 0xf1e   :  { %v5665_v29 = vsub.f32 %v13343_v17, %v5607_v19 }
 0xf1f   :  { %v13465_v10 = vadd.f32 %v5560_v38, %v14988_v56 }
 0xf20   :  { %v5695_v16 = vmul.f32 1.442695, %v5665_v29 }
 0xf21   :  { %v5650_v36 = vsel %vm1473_vm2, %v13465_v10, -inf }
 0xf22   :  { %9647 = vpow2.f32 %v5695_v16  ;;  %5747 = vadd.xlane.f32.xlu1 %v5746_v55  ;;  %5651 = vmax.xlane.f32.xlu2 %v5650_v36 }
 0xf24   :  { %v5533_v60 = vpop.f32.mrf.mxu0 }
 0xf25   :  { %v5610_v57 = vpop.xlane.xlu2 %5609  ;;  %v5561_v12 = vmul.f32 0.25, %v5533_v60 }
 0xf26   :  { %v5666_v42 = vsub.f32 %v13355_v8, %v5610_v57 }
 0xf27   :  { %v13475_v17 = vadd.f32 %v5561_v12, %v14988_v56 }
 0xf28   :  { %v13472_v27 = vpop.eup %9647  ;;  %v5697_v38 = vmul.f32 1.442695, %v5666_v42 }
 0xf29   :  { %v5749_v19 = vsel %vm1473_vm2, %v13472_v27, 0.0  ;;  %v5653_v29 = vsel %vm1473_vm2, %v13475_v17, -inf }
 0xf2a   :  { %9649 = vpow2.f32 %v5697_v38  ;;  %5750 = vadd.xlane.f32.xlu2 %v5749_v19  ;;  %5654 = vmax.xlane.f32.xlu1 %v5653_v29 }
 0xf2c   :  { %v5536_v16 = vpop.f32.mrf.mxu0 }
 0xf2d   :  { %v5613_v55 = vpop.xlane.xlu0 %5612  ;;  %v5562_v36 = vmul.f32 0.25, %v5536_v16 }
 0xf2e   :  { %v5667_v8 = vsub.f32 %v13366_v25, %v5613_v55 }
 0xf2f   :  { %v13485_v57 = vadd.f32 %v5562_v36, %v14988_v56 }
 0xf30   :  { %v13482_v60 = vpop.eup %9649  ;;  %v5699_v42 = vmul.f32 1.442695, %v5667_v8 }
 0xf31   :  { %v5752_v12 = vsel %vm1473_vm2, %v13482_v60, 0.0  ;;  %v5656_v38 = vsel %vm1473_vm2, %v13485_v57, -inf }
 0xf32   :  { %9651 = vpow2.f32 %v5699_v42  ;;  %5753 = vadd.xlane.f32.xlu1 %v5752_v12  ;;  %5657 = vmax.xlane.f32.xlu2 %v5656_v38 }
 0xf35   :  { %v5616_v19 = vpop.xlane.xlu2 %5615 }
 0xf36   :  { %v5668_v29 = vsub.f32 %v13375_v23, %v5616_v19 }
 0xf38   :  { %v13492_v16 = vpop.eup %9651  ;;  %v5701_v25 = vmul.f32 1.442695, %v5668_v29 }
 0xf39   :  { %v5755_v55 = vsel %vm1473_vm2, %v13492_v16, 0.0 }
 0xf3a   :  { %9653 = vpow2.f32 %v5701_v25  ;;  %5756 = vadd.xlane.f32.xlu1 %v5755_v55 }
 0xf3d   :  { %v5619_v36 = vpop.xlane.xlu0 %5618 }
 0xf3e   :  { %v5669_v8 = vsub.f32 %v13380_v52, %v5619_v36 }
 0xf40   :  { %v13497_v42 = vpop.eup %9653  ;;  %v5703_v56 = vmul.f32 1.442695, %v5669_v8 }
 0xf41   :  { %v5758_v12 = vsel %vm1473_vm2, %v13497_v42, 0.0 }
 0xf42   :  { %9655 = vpow2.f32 %v5703_v56  ;;  %5759 = vadd.xlane.f32.xlu1 %v5758_v12 }
 0xf45   :  { %v5622_v23 = vpop.xlane.xlu2 %5621 }
 0xf46   :  { %v5670_v38 = vsub.f32 %v13388_v22, %v5622_v23 }
 0xf48   :  { %v13502_v19 = vpop.eup %9655  ;;  %v5705_v29 = vmul.f32 1.442695, %v5670_v38 }
 0xf49   :  { %v5761_v25 = vsel %vm1473_vm2, %v13502_v19, 0.0 }
 0xf4a   :  { %9657 = vpow2.f32 %v5705_v29  ;;  %5762 = vadd.xlane.f32.xlu0 %v5761_v25 }
 0xf4d   :  { %v5742_v52 = vpop.xlane.xlu2 %5741  ;;  %v5625_v55 = vpop.xlane.xlu0 %5624 }
 0xf4e   :  { %9659 = vrcp.f32 %v5742_v52  ;;  %v5671_v36 = vsub.f32 %v13397_v47, %v5625_v55 }
 0xf50   :  { %v13507_v8 = vpop.eup %9657  ;;  %v5707_v56 = vmul.f32 1.442695, %v5671_v36 }
 0xf51   :  { %v5764_v12 = vsel %vm1473_vm2, %v13507_v8, 0.0 }
 0xf52   :  { %9661 = vpow2.f32 %v5707_v56  ;;  %5765 = vadd.xlane.f32.xlu1 %v5764_v12 }
 0xf54   :  { %v9660_v22 = vpop.eup %9659 }
 0xf55   :  { %v5830_v23 = vmul.f32 %v9660_v22, %v13394_v54  ;;  %v5628_v38 = vpop.xlane.xlu1 %5627 }
 0xf56   :  { %v5672_v29 = vsub.f32 %v13405_v37, %v5628_v38 }
 0xf57   :  { %8846 = vmatmul.msk.f32.vlgmr.msrb.gmra.mxu3 %vm1473_vm2, %v5830_v23 }
 0xf58   :  { %v13514_v25 = vpop.eup %9661  ;;  %v5709_v52 = vmul.f32 1.442695, %v5672_v29  ;;  %8873 = vmatpush.xpose.msk.msrb.mxu3 %vm1057_vm12, %v13124_v9 }
 0xf59   :  { %v5767_v47 = vsel %vm1473_vm2, %v13514_v25, 0.0 }
 0xf5a   :  { %9663 = vpow2.f32 %v5709_v52  ;;  %5768 = vadd.xlane.f32.xlu1 %v5767_v47 }
 0xf5c   :  { %8874 = vmatpush.xpose.msk.msrb.mxu3 %vm1057_vm12, %v13146_v48 }
 0xf5d   :  { %v5631_v54 = vpop.xlane.xlu1 %5630 }
 0xf5e   :  { %v5673_v55 = vsub.f32 %v13416_v39, %v5631_v54 }
 0xf60   :  { %v13523_v37 = vpop.eup %9663  ;;  %v5711_v36 = vmul.f32 1.442695, %v5673_v55  ;;  %8875 = vmatpush.xpose.msk.msrb.mxu3 %vm1057_vm12, %v13129_v28 }
 0xf61   :  { %v5770_v9 = vsel %vm1473_vm2, %v13523_v37, 0.0 }
 0xf62   :  { %9665 = vpow2.f32 %v5711_v36  ;;  %5771 = vadd.xlane.f32.xlu0 %v5770_v9 }
 0xf65   :  { %v5634_v56 = vpop.xlane.xlu0 %5633 }
 0xf66   :  { %v5674_v12 = vsub.f32 %v13425_v6, %v5634_v56 }
 0xf68   :  { %v13530_v22 = vpop.eup %9665  ;;  %v5713_v48 = vmul.f32 1.442695, %v5674_v12 }
 0xf69   :  { %v5773_v39 = vsel %vm1473_vm2, %v13530_v22, 0.0 }
 0xf6a   :  { %9667 = vpow2.f32 %v5713_v48  ;;  %5774 = vadd.xlane.f32.xlu1 %v5773_v39 }
 0xf6d   :  { %v5637_v23 = vpop.xlane.xlu0 %5636 }
 0xf6e   :  { %v5675_v38 = vsub.f32 %v13431_v35, %v5637_v23 }
 0xf70   :  { %v13535_v28 = vpop.eup %9667  ;;  %v5715_v29 = vmul.f32 1.442695, %v5675_v38 }
 0xf71   :  { %v5776_v52 = vsel %vm1473_vm2, %v13535_v28, 0.0 }
 0xf72   :  { %9669 = vpow2.f32 %v5715_v29  ;;  %5777 = vadd.xlane.f32.xlu2 %v5776_v52 }
 0xf75   :  { %v5640_v6 = vpop.xlane.xlu1 %5639 }
 0xf76   :  { %v5676_v47 = vsub.f32 %v13436_v21, %v5640_v6 }
 0xf78   :  { %v13540_v54 = vpop.eup %9669  ;;  %v5717_v55 = vmul.f32 1.442695, %v5676_v47 }
 0xf79   :  { %v5779_v36 = vsel %vm1473_vm2, %v13540_v54, 0.0 }
 0xf7a   :  { %9671 = vpow2.f32 %v5717_v55  ;;  %5780 = vadd.xlane.f32.xlu0 %v5779_v36 }
 0xf7d   :  { %v5643_v56 = vpop.xlane.xlu1 %5642 }
 0xf80   :  { %v13544_v35 = vpop.eup %9671 }
 0xf81   :  { %v5782_v9 = vsel %vm1473_vm2, %v13544_v35, 0.0 }
 0xf82   :  { %5783 = vadd.xlane.f32.xlu2 %v5782_v9 }
 0xf83   :  { %6455 = vrot.lane.b32.xlu1 %v13061_v44, %s10017_s1 }
 0xf85   :  { %v5646_v12 = vpop.xlane.xlu0 %5645 }
 0xf8d   :  { %v5649_v21 = vpop.xlane.xlu1 %5648  ;;  %v5745_v48 = vpop.xlane.xlu0 %5744 }
 0xf8e   :  { %9673 = vrcp.f32 %v5745_v48  ;;  %6457 = vrot.lane.b32.xlu0 %v13081_v62, %s10017_s1  ;;  %v5679_v52 = vsub.f32 %v13455_v59, %v5649_v21  ;;  %v9156_v48 = vunpack.i.l.bf16 %v13307_v33  ;;  %v9157_v59 = vunpack.i.h.bf16 %v13307_v33 }
 0xf8f   :  { %v9166_v21 = vunpack.i.l.bf16 %v13351_v7  ;;  %v5677_v33 = vsub.f32 %v13441_v20, %v5643_v56 }
 0xf90   :  { %v5723_v62 = vmul.f32 1.442695, %v5679_v52 }
 0xf94   :  { %v9674_v39 = vpop.eup %9673 }
 0xf95   :  { %v5748_v23 = vpop.xlane.xlu1 %5747  ;;  %v5652_v38 = vpop.xlane.xlu2 %5651  ;;  %v5831_v29 = vmul.f32 %v9674_v39, %v13452_v41  ;;  %v5678_v39 = vsub.f32 %v13447_v61, %v5646_v12 }
 0xf96   :  { %9675 = vrcp.f32 %v5748_v23 }
 0xf97   :  { %8847 = vmatmul.msk.f32.gmra.mxu3 %vm1473_vm2, %v5831_v29  ;;  %v5721_v23 = vmul.f32 1.442695, %v5678_v39 }
 0xf9a   :  { %6407 = vrot.lane.b32.xlu2 %v13044_v46, %s10017_s1 }
 0xf9c   :  { %v9676_v6 = vpop.eup %9675 }
 0xf9d   :  { %v5751_v47 = vpop.xlane.xlu2 %5750  ;;  %v5832_v55 = vmul.f32 %v9676_v6, %v13461_v11  ;;  %v5655_v36 = vpop.xlane.xlu1 %5654  ;;  %v5719_v6 = vmul.f32 1.442695, %v5677_v33 }
 0xf9e   :  { %9677 = vrcp.f32 %v5751_v47 }
 0xf9f   :  { %8848 = vmatmul.msk.f32.gmra.mxu3 %vm1473_vm2, %v5832_v55  ;;  %9679 = vpow2.f32 %v5723_v62 }
 0xfa4   :  { %v9678_v9 = vpop.eup %9677 }
 0xfa5   :  { %v5833_v41 = vmul.f32 %v9678_v9, %v13472_v27  ;;  %v5754_v46 = vpop.xlane.xlu1 %5753  ;;  %v13564_v11 = vpop.eup %9679 }
 0xfa6   :  { %9681 = vrcp.f32 %v5754_v46  ;;  %v5791_v27 = vsel %vm1473_vm2, %v13564_v11, 0.0 }
 0xfa7   :  { %8849 = vmatmul.msk.f32.vlgmr.msra.gmra.mxu0 %vm1473_vm2, %v5833_v41  ;;  %9683 = vpow2.f32 %v5721_v23 }
 0xfa8   :  { %6146 = vmatpush.msra.mxu0 %v9156_v48 }
 0xfaa   :  { %6147 = vmatpush.msra.mxu0 %v9157_v59 }
 0xfac   :  { %6148 = vmatpush.msra.mxu0 %v9166_v21  ;;  %v9682_v29 = vpop.eup %9681 }
 0xfad   :  { %5792 = vadd.xlane.f32.xlu1 %v5791_v27  ;;  %v5757_v61 = vpop.xlane.xlu1 %5756  ;;  %v5834_v12 = vmul.f32 %v9682_v29, %v13482_v60  ;;  %v13572_v52 = vpop.eup %9683  ;;  %v5680_v60 = vsub.f32 %v13465_v10, %v5652_v38 }
 0xfae   :  { %9685 = vrcp.f32 %v5757_v61  ;;  %v5788_v62 = vsel %vm1473_vm2, %v13572_v52, 0.0  ;;  %v5658_v29 = vpop.xlane.xlu2 %5657 }
 0xfaf   :  { %8850 = vmatmul.msk.f32.gmra.mxu0 %vm1473_vm2, %v5834_v12  ;;  %v5725_v41 = vmul.f32 1.442695, %v5680_v60 }
 0xfb4   :  { %v9686_v7 = vpop.eup %9685 }
 0xfb5   :  { %v5760_v47 = vpop.xlane.xlu1 %5759  ;;  %v5835_v55 = vmul.f32 %v9686_v7, %v13492_v16  ;;  %v5681_v16 = vsub.f32 %v13475_v17, %v5655_v36 }
 0xfb6   :  { %9687 = vrcp.f32 %v5760_v47 }
 0xfb7   :  { %8851 = vmatmul.msk.f32.gmra.mxu0 %vm1473_vm2, %v5835_v55  ;;  %9689 = vpow2.f32 %v5719_v6  ;;  %v5727_v38 = vmul.f32 1.442695, %v5681_v16 }
 0xfb8   :  { %5789 = vadd.xlane.f32.xlu0 %v5788_v62 }
 0xfbc   :  { %v9688_v9 = vpop.eup %9687 }
 0xfbd   :  { %v5763_v20 = vpop.xlane.xlu0 %5762  ;;  %v5836_v56 = vmul.f32 %v9688_v9, %v13497_v42  ;;  %v13580_v48 = vpop.eup %9689 }
 0xfbe   :  { %9691 = vrcp.f32 %v5763_v20  ;;  %v5785_v39 = vsel %vm1473_vm2, %v13580_v48, 0.0 }
 0xfbf   :  { %8852 = vmatmul.msk.f32.vlgmr.msra.gmra.mxu2 %vm1473_vm2, %v5836_v56  ;;  %9693 = vpow2.f32 %v5725_v41  ;;  %v13700_v41 = vpop.f32.mrf.mxu1 }
 0xfc0   :  { %8885 = vmatpush.xpose.msk.msra.mxu2 %vm1057_vm12, %v13311_v1 }
 0xfc3   :  { %5786 = vadd.xlane.f32.xlu2 %v5785_v39 }
 0xfc4   :  { %v9692_v10 = vpop.eup %9691  ;;  %8886 = vmatpush.xpose.msk.msra.mxu2 %vm1057_vm12, %v13321_v13 }
 0xfc5   :  { %v5766_v42 = vpop.xlane.xlu1 %5765  ;;  %v5837_v46 = vmul.f32 %v9692_v10, %v13502_v19  ;;  %v13593_v17 = vpop.eup %9693 }
 0xfc6   :  { %9695 = vrcp.f32 %v5766_v42  ;;  %6511 = vrot.lane.b32.xlu1 %v13084_v34, %s10016_s0  ;;  %v5794_v1 = vsel %vm1473_vm2, %v13593_v17, 0.0 }
 0xfc7   :  { %8853 = vmatmul.msk.f32.gmra.mxu2 %vm1473_vm2, %v5837_v46  ;;  %9697 = vpow2.f32 %v5727_v38 }
 0xfc8   :  { %8887 = vmatpush.xpose.msk.msra.mxu2 %vm1057_vm12, %v13289_v50 }
 0xfcb   :  { %5795 = vadd.xlane.f32.xlu2 %v5794_v1 }
 0xfcc   :  { %v9696_v13 = vpop.eup %9695  ;;  %6509 = vrot.lane.b32.xlu0 %v13108_v43, %s10016_s0 }
 0xfcd   :  { %v5769_v19 = vpop.xlane.xlu1 %5768  ;;  %v5838_v36 = vmul.f32 %v9696_v13, %v13507_v8  ;;  %v13605_v59 = vpop.eup %9697 }
 0xfce   :  { %9699 = vrcp.f32 %v5769_v19  ;;  %6563 = vrot.lane.b32.xlu1 %v13172_v5, %s10016_s0  ;;  %v5797_v50 = vsel %vm1473_vm2, %v13605_v59, 0.0 }
 0xfcf   :  { %8854 = vmatmul.msk.f32.gmra.mxu2 %vm1473_vm2, %v5838_v36 }
 0xfd3   :  { %5798 = vadd.xlane.f32.xlu2 %v5797_v50 }
 0xfd4   :  { %v9700_v21 = vpop.eup %9699  ;;  %6561 = vrot.lane.b32.xlu0 %v13127_v0, %s10016_s0 }
 0xfd5   :  { %v5839_v23 = vmul.f32 %v9700_v21, %v13514_v25  ;;  %v5772_v27 = vpop.xlane.xlu0 %5771 }
 0xfd6   :  { %9701 = vrcp.f32 %v5772_v27  ;;  %6559 = vrot.lane.b32.xlu1 %v13134_v51, %s10016_s0  ;;  %v15021_v27 = vld [vmem:[#allocation25_spill] sm:$0xff] }
 0xfd7   :  { %8855 = vmatmul.msk.f32.vlgmr.msrb.gmra.mxu0 %vm1473_vm2, %v5839_v23 }
 0xfd8   :  { %8879 = vmatpush.xpose.msk.msrb.mxu0 %vm1057_vm12, %v13190_v30 }
 0xfdc   :  { %v9702_v8 = vpop.eup %9701  ;;  %8880 = vmatpush.xpose.msk.msrb.mxu0 %vm1057_vm12, %v13198_v32  ;;  %6553 = vrot.lane.b32.xlu0 %v13134_v51, %s10017_s1 }
 0xfdd   :  { %v5840_v25 = vmul.f32 %v9702_v8, %v13523_v37  ;;  %v5775_v61 = vpop.xlane.xlu1 %5774 }
 0xfde   :  { %9703 = vrcp.f32 %v5775_v61  ;;  %9169 = vrot.lane.b32.xlu1 %v12744_v63, %s10020_s23  ;;  %v15022_v61 = vld [vmem:[#allocation14_spill] sm:$0xff] }
 0xfdf   :  { %8856 = vmatmul.msk.f32.vlgmr.msrb.gmra.mxu1 %vm1473_vm2, %v5840_v25 }
 0xfe0   :  { %8881 = vmatpush.xpose.msk.msrb.mxu0 %vm1057_vm12, %v13249_v45  ;;  %8891 = vmatpush.xpose.msk.msrb.mxu1 %vm1057_vm12, %v13372_v49 }
 0xfe4   :  { %v9704_v30 = vpop.eup %9703  ;;  %8892 = vmatpush.xpose.msk.msrb.mxu1 %vm1057_vm12, %v13315_v24  ;;  %9179 = vrot.lane.b32.xlu0 %v12830_v3, %s10020_s23  ;;  %v15013_v24 = vld [vmem:[#allocation50_spill] sm:$0xff] }
 0xfe5   :  { %v5778_v51 = vpop.xlane.xlu2 %5777  ;;  %v5841_v32 = vmul.f32 %v9704_v30, %v13530_v22 }
 0xfe6   :  { %9705 = vrcp.f32 %v5778_v51  ;;  %6555 = vrot.lane.b32.xlu1 %v13127_v0, %s10017_s1 }
 0xfe7   :  { %8857 = vmatmul.msk.f32.gmra.mxu1 %vm1473_vm2, %v5841_v32 }
 0xfe8   :  { %8893 = vmatpush.xpose.msk.msrb.mxu1 %vm1057_vm12, %v13317_v14  ;;  %v15014_v14 = vld [vmem:[#allocation15_spill] sm:$0xff] }
 0xfeb   :  { %6513 = vrot.lane.b32.xlu2 %v13091_v2, %s10016_s0 }
 0xfec   :  { %v9706_v63 = vpop.eup %9705  ;;  %9189 = vrot.lane.b32.xlu0 %v13027_v26, %s10020_s23 }
 0xfed   :  { %v5842_v3 = vmul.f32 %v9706_v63, %v13535_v28  ;;  %v5781_v45 = vpop.xlane.xlu0 %5780  ;;  %v15018_v28 = vld [vmem:[#allocation18_spill] sm:$0xff]  ;;  %v15023_v63 = vld [vmem:[#allocation24_spill] sm:$0xff] }
 0xfee   :  { %9707 = vrcp.f32 %v5781_v45  ;;  %9194 = vrot.lane.b32.xlu1 %v13010_v18, %s10020_s23 }
 0xfef   :  { %8858 = vmatmul.msk.f32.vlgmr.msra.gmra.mxu3 %vm1473_vm2, %v5842_v3  ;;  %8870 = vmatmul.msk.f32.vlgmr.msra.gmra.mxu1 %vm1057_vm12, %v13114_v58  ;;  %v15011_v58 = vld [vmem:[#allocation16_spill] sm:$0xff] }
 0xff0   :  { %8897 = vmatpush.xpose.msk.msra.mxu3 %vm1057_vm12, %v13327_v4 }
 0xff3   :  { %6503 = vrot.lane.b32.xlu2 %v13108_v43, %s10017_s1  ;;  %v5682_v43 = vsub.f32 %v13485_v57, %v5658_v29 }
 0xff4   :  { %v9708_v0 = vpop.eup %9707  ;;  %8898 = vmatpush.xpose.msk.msra.mxu3 %vm1057_vm12, %v13361_v15 }
 0xff5   :  { %v5784_v26 = vpop.xlane.xlu2 %5783  ;;  %v5843_v49 = vmul.f32 %v9708_v0, %v13540_v54  ;;  %v15019_v54 = vld [vmem:[#allocation11_spill] sm:$0xff]  ;;  %v6456_v12 = vpop.permute.xlu1 %6455 }
 0xff6   :  { %9709 = vrcp.f32 %v5784_v26 }
 0xff7   :  { %8859 = vmatmul.msk.f32.gmra.mxu3 %vm1473_vm2, %v5843_v49  ;;  %8871 = vmatmul.msk.f32.gmra.mxu1 %vm1057_vm12, %v13158_v31  ;;  %v15012_v31 = vld [vmem:[#allocation31_spill] sm:$0xff] }
 0xff8   :  { %8899 = vmatpush.xpose.msk.msra.mxu3 %vm1057_vm12, %v13336_v40  ;;  %v15017_v40 = vld [vmem:[#allocation12_spill] sm:$0xff] }
 0xffb   :  { %6505 = vrot.lane.b32.xlu2 %v13084_v34, %s10017_s1  ;;  %v5729_v34 = vmul.f32 1.442695, %v5682_v43  ;;  %v15024_v43 = vld [vmem:[#allocation55_spill] sm:$0xff] }
 0xffc   :  { %v9710_v4 = vpop.eup %9709 }
 0xffd   :  { %v5844_v18 = vmul.f32 %v9710_v4, %v13544_v35  ;;  %9711 = vpow2.f32 %v5729_v34  ;;  %v6408_v22 = vpop.permute.xlu2 %6407  ;;  %v15020_v35 = vld [vmem:[#allocation28_spill] sm:$0xff] }
 0xfff   :  { %8860 = vmatmul.msk.f32.gmra.mxu3 %vm1473_vm2, %v5844_v18  ;;  %8872 = vmatmul.msk.f32.gmra.mxu1 %vm1057_vm12, %v13215_v53  ;;  %v15015_v53 = vld [vmem:[#allocation32_spill] sm:$0xff] }
0x1000   :  { %v6458_v33 = vpop.permute.xlu0 %6457 }
0x1003   :  { %6507 = vrot.lane.b32.xlu2 %v13091_v2, %s10017_s1  ;;  %v15016_v2 = vld [vmem:[#allocation13_spill] sm:$0xff]  ;;  %v13683_v57 = vpop.eup %9711 }
0x1004   :  { %v9183_v15 = vpack.i.bf16 %v15017_v40, %v15016_v2  ;;  %v5800_v37 = vsel %vm1473_vm2, %v13683_v57, 0.0 }
0x1007   :  { %8876 = vmatmul.msk.f32.vlgmr.msrb.gmra.mxu3 %vm1057_vm12, %v15011_v58  ;;  %8894 = vmatmul.msk.f32.vlgmr.msrb.gmra.mxu1 %vm1057_vm12, %v15012_v31 }
0x100b   :  { %9174 = vrot.lane.b32.xlu2 %v15013_v24, %s10020_s23 }
0x100f   :  { %8877 = vmatmul.msk.f32.gmra.mxu3 %vm1057_vm12, %v15014_v14  ;;  %8895 = vmatmul.msk.f32.gmra.mxu1 %vm1057_vm12, %v15015_v53 }
0x1013   :  { %9184 = vrot.lane.b32.xlu2 %v9183_v15, %s10020_s23 }
0x1016   :  { %5801 = vadd.xlane.f32.xlu0 %v5800_v37 }
0x1017   :  { %8878 = vmatmul.msk.f32.gmra.mxu3 %vm1057_vm12, %v15018_v28  ;;  %8896 = vmatmul.msk.f32.gmra.mxu1 %vm1057_vm12, %v6408_v22 }
0x101b   :  { %9199 = vrot.lane.b32.xlu2 %v15019_v54, %s10020_s23 }
0x101f   :  { %8900 = vmatmul.msk.f32.vlgmr.msra.gmra.mxu3 %vm1057_vm12, %v15020_v35 }
0x1020   :  { %v5793_v7 = vpop.xlane.xlu1 %5792 }
0x1027   :  { %8901 = vmatmul.msk.f32.gmra.mxu3 %vm1057_vm12, %v6456_v12 }
0x102a   :  { %6557 = vrot.lane.b32.xlu0 %v13172_v5, %s10017_s1 }
0x102b   :  { %v5790_v55 = vpop.xlane.xlu0 %5789 }
0x102f   :  { %8902 = vmatmul.msk.f32.gmra.mxu3 %vm1057_vm12, %v6458_v33 }
0x1036   :  { %v5787_v6 = vpop.xlane.xlu2 %5786 }
0x1037   :  { %9713 = vrcp.f32 %v5787_v6 }
0x1038   :  { %v6512_v47 = vpop.permute.xlu1 %6511  ;;  %9715 = vrcp.f32 %v5790_v55 }
0x103d   :  { %v9714_v62 = vpop.eup %9713 }
0x103e   :  { %v5845_v60 = vmul.f32 %v9714_v62, %v13580_v48  ;;  %v5796_v9 = vpop.xlane.xlu2 %5795  ;;  %v6510_v5 = vpop.permute.xlu0 %6509 }
0x103f   :  { %9717 = vrcp.f32 %v5796_v9  ;;  %v9716_v56 = vpop.eup %9715  ;;  %v13708_v48 = vpop.f32.mrf.mxu1 }
0x1040   :  { %v6564_v20 = vpop.permute.xlu1 %6563  ;;  %8861 = vmatmul.msk.f32.vlgmr.msra.gmra.mxu0 %vm1473_vm2, %v5845_v60  ;;  %9719 = vrcp.f32 %v5793_v7  ;;  %v5846_v38 = vmul.f32 %v9716_v56, %v13572_v52 }
0x1045   :  { %v9718_v16 = vpop.eup %9717 }
0x1046   :  { %v5848_v39 = vmul.f32 %v9718_v16, %v13593_v17  ;;  %v5799_v10 = vpop.xlane.xlu2 %5798  ;;  %v9720_v46 = vpop.eup %9719 }
0x1047   :  { %9721 = vrcp.f32 %v5799_v10  ;;  %v6562_v1 = vpop.permute.xlu0 %6561  ;;  %v5847_v17 = vmul.f32 %v9720_v46, %v13564_v11  ;;  %v13718_v23 = vpop.f32.mrf.mxu1 }
0x1048   :  { %v6560_v42 = vpop.permute.xlu1 %6559  ;;  %8862 = vmatmul.msk.f32.gmra.mxu0 %vm1473_vm2, %v5846_v38  ;;  %8864 = vmatmul.msk.f32.vlgmr.msrb.gmra.mxu2 %vm1473_vm2, %v5848_v39 }
0x1049   :  { %8909 = vmatpush.xpose.msk.msrb.mxu2 %vm1057_vm12, %v6564_v20 }
0x104d   :  { %v9722_v13 = vpop.eup %9721  ;;  %8910 = vmatpush.xpose.msk.msrb.mxu2 %vm1057_vm12, %v6562_v1 }
0x104e   :  { %v6514_v19 = vpop.permute.xlu2 %6513  ;;  %v5849_v52 = vmul.f32 %v9722_v13, %v13605_v59  ;;  %v13721_v59 = vpop.f32.mrf.mxu3 }
0x104f   :  { %8903 = vmatpush.xpose.msk.msra.mxu0 %vm1057_vm12, %v6514_v19  ;;  %v13731_v30 = vpop.permute.xlu0 %6553 }
0x1050   :  { %v9170_v36 = vpop.permute.xlu1 %9169  ;;  %8863 = vmatmul.msk.f32.gmra.mxu0 %vm1473_vm2, %v5847_v17  ;;  %8865 = vmatmul.msk.f32.gmra.mxu2 %vm1473_vm2, %v5849_v52 }
0x1051   :  { %v9171_v50 = vunpack.i.l.bf16 %v9170_v36  ;;  %8911 = vmatpush.xpose.msk.msrb.mxu2 %vm1057_vm12, %v6560_v42  ;;  %v9172_v21 = vunpack.i.h.bf16 %v9170_v36 }
0x1053   :  { %8904 = vmatpush.xpose.msk.msra.mxu0 %vm1057_vm12, %v6512_v47  ;;  %6946 = vmatpush.msra.mxu1 %v9171_v50 }
0x1055   :  { %6947 = vmatpush.msra.mxu1 %v9172_v21 }
0x1056   :  { %v6504_v11 = vpop.permute.xlu2 %6503  ;;  %v13727_v25 = vpop.f32.mrf.mxu3 }
0x1057   :  { %8905 = vmatpush.xpose.msk.msra.mxu0 %vm1057_vm12, %v6510_v5  ;;  %v9180_v26 = vpop.permute.xlu0 %9179 }
0x1058   :  { %8882 = vmatmul.msk.f32.vlgmr.msrb.gmra.mxu0 %vm1057_vm12, %v15021_v27  ;;  %v9181_v31 = vunpack.i.l.bf16 %v9180_v26  ;;  %v9182_v14 = vunpack.i.h.bf16 %v9180_v26  ;;  %v6556_v1 = vpop.permute.xlu1 %6555 }
0x105c   :  { %v13725_v8 = vpop.f32.mrf.mxu1 }
0x105e   :  { %v6506_v29 = vpop.permute.xlu2 %6505  ;;  %v13737_v3 = vpop.f32.mrf.mxu3 }
0x105f   :  { %v9190_v22 = vpop.permute.xlu0 %9189 }
0x1060   :  { %8883 = vmatmul.msk.f32.gmra.mxu0 %vm1057_vm12, %v15022_v61  ;;  %v9191_v12 = vunpack.i.l.bf16 %v9190_v22  ;;  %v9192_v26 = vunpack.i.h.bf16 %v9190_v22  ;;  %v15026_v22 = vld [vmem:[#allocation29_spill] sm:$0xff] }
0x1064   :  { %v13733_v51 = vpop.f32.mrf.mxu1 }
0x1066   :  { %v6508_v32 = vpop.permute.xlu2 %6507 }
0x1068   :  { %8884 = vmatmul.msk.f32.gmra.mxu0 %vm1057_vm12, %v15023_v63  ;;  %v9195_v63 = vpop.permute.xlu1 %9194 }
0x106c   :  { %v6244_v45 = vpop.f32.mrf.mxu1 }
0x106d   :  { %v6603_v0 = vmul.f32 0.25, %v6244_v45 }
0x106e   :  { %v9175_v49 = vpop.permute.xlu2 %9174 }
0x106f   :  { %v9177_v4 = vunpack.i.h.bf16 %v9175_v49  ;;  %v9176_v18 = vunpack.i.l.bf16 %v9175_v49  ;;  %v13740_v58 = vadd.f32 %v6603_v0, %v15024_v43 }
0x1070   :  { %8906 = vmatmul.msk.f32.vlgmr.msra.gmra.mxu0 %vm1057_vm12, %v6504_v11 }
0x1071   :  { %6948 = vmatpush.msra.mxu1 %v9176_v18  ;;  %6990 = vmatpush.msrb.mxu3 %v9177_v4  ;;  %v6651_v34 = vsel %vm1473_vm2, %v13740_v58, -inf  ;;  %v15025_v18 = vld [vmem:[#allocation27_spill] sm:$0xff] }
0x1072   :  { %v13745_v24 = vpop.f32.mrf.mxu3  ;;  %6652 = vmax.xlane.f32.xlu1 %v6651_v34 }
0x1073   :  { %6991 = vmatpush.msrb.mxu3 %v9181_v31  ;;  %v9196_v31 = vunpack.i.l.bf16 %v9195_v63 }
0x1074   :  { %v6247_v53 = vpop.f32.mrf.mxu1 }
0x1075   :  { %v6604_v2 = vmul.f32 0.25, %v6247_v53  ;;  %6992 = vmatpush.msrb.mxu3 %v9182_v14  ;;  %v9197_v14 = vunpack.i.h.bf16 %v9195_v63 }
0x1076   :  { %v9185_v40 = vpop.permute.xlu2 %9184 }
0x1077   :  { %v9186_v15 = vunpack.i.l.bf16 %v9185_v40  ;;  %v13748_v37 = vadd.f32 %v6604_v2, %v15024_v43  ;;  %v9187_v28 = vunpack.i.h.bf16 %v9185_v40 }
0x1078   :  { %8907 = vmatmul.msk.f32.gmra.mxu0 %vm1057_vm12, %v6506_v29 }
0x1079   :  { %7034 = vmatpush.msrb.mxu0 %v9186_v15  ;;  %v6654_v54 = vsel %vm1473_vm2, %v13748_v37, -inf }
0x107a   :  { %v13753_v35 = vpop.f32.mrf.mxu3  ;;  %6655 = vmax.xlane.f32.xlu0 %v6654_v54 }
0x107b   :  { %7035 = vmatpush.msrb.mxu0 %v9187_v28 }
0x107c   :  { %v6250_v33 = vpop.f32.mrf.mxu1 }
0x107d   :  { %v6605_v7 = vmul.f32 0.25, %v6250_v33  ;;  %7036 = vmatpush.msrb.mxu0 %v9191_v12  ;;  %v15027_v12 = vld [vmem:[#allocation19_spill] sm:$0xff] }
0x107e   :  { %v9200_v6 = vpop.permute.xlu2 %9199 }
0x107f   :  { %v9201_v47 = vunpack.i.l.bf16 %v9200_v6  ;;  %v13756_v55 = vadd.f32 %v6605_v7, %v15024_v43  ;;  %v9202_v62 = vunpack.i.h.bf16 %v9200_v6 }
0x1080   :  { %8908 = vmatmul.msk.f32.gmra.mxu0 %vm1057_vm12, %v6508_v32 }
0x1081   :  { %7122 = vmatpush.msrb.mxu1 %v9201_v47  ;;  %v6657_v60 = vsel %vm1473_vm2, %v13756_v55, -inf }
0x1082   :  { %v13761_v9 = vpop.f32.mrf.mxu3  ;;  %6658 = vmax.xlane.f32.xlu2 %v6657_v60 }
0x1083   :  { %7123 = vmatpush.msrb.mxu1 %v9202_v62 }
0x1084   :  { %v6444_v20 = vpop.f32.mrf.mxu1 }
0x1085   :  { %v6615_v5 = vmul.f32 0.25, %v6444_v20 }
0x1087   :  { %v13764_v56 = vadd.f32 %v6615_v5, %v15024_v43 }
0x1089   :  { %v5802_v16 = vpop.xlane.xlu0 %5801  ;;  %v6687_v39 = vsel %vm1473_vm2, %v13764_v56, -inf }
0x108a   :  { %9723 = vrcp.f32 %v5802_v16  ;;  %v6294_v10 = vpop.f32.mrf.mxu3  ;;  %6688 = vmax.xlane.f32.xlu1 %v6687_v39 }
0x108b   :  { %v6606_v38 = vmul.f32 0.25, %v6294_v10 }
0x108c   :  { %v6447_v42 = vpop.f32.mrf.mxu1 }
0x108d   :  { %v13769_v46 = vadd.f32 %v6606_v38, %v15024_v43  ;;  %v6616_v19 = vmul.f32 0.25, %v6447_v42 }
0x108f   :  { %v6660_v17 = vsel %vm1473_vm2, %v13769_v46, -inf  ;;  %v13779_v29 = vadd.f32 %v6616_v19, %v15024_v43 }
0x1090   :  { %v9724_v13 = vpop.eup %9723 }
0x1091   :  { %v5850_v52 = vmul.f32 %v9724_v13, %v13683_v57  ;;  %v13786_v57 = vpop.f32.mrf.mxu0  ;;  %v6690_v45 = vsel %vm1473_vm2, %v13779_v29, -inf }
0x1092   :  { %v6297_v36 = vpop.f32.mrf.mxu3  ;;  %6661 = vmax.xlane.f32.xlu1 %v6660_v17 }
0x1093   :  { %v6607_v50 = vmul.f32 0.25, %v6297_v36  ;;  %8866 = vmatmul.msk.f32.gmra.mxu2 %vm1473_vm2, %v5850_v52 }
0x1094   :  { %v6450_v21 = vpop.f32.mrf.mxu1 }
0x1095   :  { %v6617_v11 = vmul.f32 0.25, %v6450_v21  ;;  %v13776_v27 = vadd.f32 %v6607_v50, %v15024_v43  ;;  %v13837_v50 = vpop.f32.mrf.mxu2 }
0x1097   :  { %v6663_v61 = vsel %vm1473_vm2, %v13776_v27, -inf  ;;  %v13784_v32 = vadd.f32 %v6617_v11, %v15024_v43 }
0x1098   :  { %6664 = vmax.xlane.f32.xlu0 %v6663_v61 }
0x1099   :  { %v6693_v0 = vsel %vm1473_vm2, %v13784_v32, -inf  ;;  %v13799_v40 = vpop.f32.mrf.mxu0 }
0x109a   :  { %v6300_v49 = vpop.f32.mrf.mxu3  ;;  %6691 = vmax.xlane.f32.xlu1 %v6690_v45  ;;  %6694 = vmax.xlane.f32.xlu2 %v6693_v0 }
0x109b   :  { %v6608_v4 = vmul.f32 0.25, %v6300_v49  ;;  %8888 = vmatmul.msk.f32.vlgmr.msra.gmra.mxu2 %vm1057_vm12, %v15025_v18 }
0x109c   :  { %7078 = vmatpush.msra.mxu2 %v9192_v26  ;;  %v6558_v47 = vpop.permute.xlu0 %6557 }
0x109d   :  { %v13795_v34 = vadd.f32 %v6608_v4, %v15024_v43  ;;  %v13849_v26 = vpop.f32.mrf.mxu2 }
0x109e   :  { %7079 = vmatpush.msra.mxu2 %v9196_v31 }
0x109f   :  { %v6666_v53 = vsel %vm1473_vm2, %v13795_v34, -inf }
0x10a0   :  { %7080 = vmatpush.msra.mxu2 %v9197_v14 }
0x10a1   :  { %v13810_v33 = vpop.f32.mrf.mxu0 }
0x10a2   :  { %v6494_v2 = vpop.f32.mrf.mxu3  ;;  %6667 = vmax.xlane.f32.xlu2 %v6666_v53 }
0x10a3   :  { %v6618_v15 = vmul.f32 0.25, %v6494_v2  ;;  %8889 = vmatmul.msk.f32.gmra.mxu2 %vm1057_vm12, %v15026_v22 }
0x10a5   :  { %v13804_v28 = vadd.f32 %v6618_v15, %v15024_v43  ;;  %v13863_v22 = vpop.f32.mrf.mxu2 }
0x10a7   :  { %v6696_v54 = vsel %vm1473_vm2, %v13804_v28, -inf }
0x10a8   :  { %6697 = vmax.xlane.f32.xlu0 %v6696_v54 }
0x10a9   :  { %v13814_v7 = vpop.f32.mrf.mxu0 }
0x10aa   :  { %v6497_v39 = vpop.f32.mrf.mxu3 }
0x10ab   :  { %8890 = vmatmul.msk.f32.gmra.mxu2 %vm1057_vm12, %v15027_v12 }
0x10b2   :  { %v6500_v36 = vpop.f32.mrf.mxu3 }
0x10b3   :  { %8912 = vmatmul.msk.f32.vlgmr.msrb.gmra.mxu2 %vm1057_vm12, %v13731_v30  ;;  %v6620_v11 = vmul.f32 0.25, %v6500_v36 }
0x10b5   :  { %v13847_v0 = vadd.f32 %v6620_v11, %v15024_v43 }
0x10b7   :  { %v6702_v4 = vsel %vm1473_vm2, %v13847_v0, -inf }
0x10bb   :  { %8913 = vmatmul.msk.f32.gmra.mxu2 %vm1057_vm12, %v6556_v1  ;;  %v6619_v1 = vmul.f32 0.25, %v6497_v39 }
0x10bd   :  { %v13817_v6 = vpop.f32.mrf.mxu0  ;;  %v13835_v52 = vadd.f32 %v6619_v1, %v15024_v43 }
0x10bf   :  { %v6699_v63 = vsel %vm1473_vm2, %v13835_v52, -inf }
0x10c3   :  { %8914 = vmatmul.msk.f32.gmra.mxu2 %vm1057_vm12, %v6558_v47 }
0x10c5   :  { %v13820_v62 = vpop.f32.mrf.mxu0 }
0x10cb   :  { %v13865_v54 = vpop.f32.mrf.mxu2 }
0x10cd   :  { %v13822_v60 = vpop.f32.mrf.mxu0 }
0x10d3   :  { %v13867_v12 = vpop.f32.mrf.mxu2 }
0x10d5   :  { %v6344_v20 = vpop.f32.mrf.mxu0 }
0x10d6   :  { %v6609_v5 = vmul.f32 0.25, %v6344_v20 }
0x10d8   :  { %v13825_v16 = vadd.f32 %v6609_v5, %v15024_v43 }
0x10da   :  { %v6669_v30 = vsel %vm1473_vm2, %v13825_v16, -inf }
0x10db   :  { %6670 = vmax.xlane.f32.xlu1 %v6669_v30 }
0x10dd   :  { %v6347_v10 = vpop.f32.mrf.mxu0 }
0x10de   :  { %v6610_v38 = vmul.f32 0.25, %v6347_v10 }
0x10e0   :  { %v13830_v42 = vadd.f32 %v6610_v38, %v15024_v43 }
0x10e2   :  { %v6672_v13 = vsel %vm1473_vm2, %v13830_v42, -inf }
0x10e3   :  { %6673 = vmax.xlane.f32.xlu2 %v6672_v13 }
0x10e5   :  { %v6350_v19 = vpop.f32.mrf.mxu0  ;;  %v6653_v47 = vpop.xlane.xlu1 %6652 }
0x10e6   :  { %v6611_v17 = vmul.f32 0.25, %v6350_v19  ;;  %v6723_v30 = vsub.f32 %v13740_v58, %v6653_v47 }
0x10e8   :  { %v13840_v21 = vadd.f32 %v6611_v17, %v15024_v43  ;;  %v6747_v10 = vmul.f32 1.442695, %v6723_v30 }
0x10ea   :  { %v6675_v61 = vsel %vm1473_vm2, %v13840_v21, -inf  ;;  %9725 = vpow2.f32 %v6747_v10 }
0x10eb   :  { %6676 = vmax.xlane.f32.xlu0 %v6675_v61  ;;  %6700 = vmax.xlane.f32.xlu2 %v6699_v63 }
0x10ed   :  { %v6544_v45 = vpop.f32.mrf.mxu0  ;;  %v6656_v13 = vpop.xlane.xlu0 %6655 }
0x10ee   :  { %v6621_v49 = vmul.f32 0.25, %v6544_v45  ;;  %v6724_v36 = vsub.f32 %v13748_v37, %v6656_v13 }
0x10f0   :  { %v13854_v31 = vadd.f32 %v6621_v49, %v15024_v43  ;;  %v6749_v63 = vmul.f32 1.442695, %v6724_v36 }
0x10f2   :  { %v6705_v15 = vsel %vm1473_vm2, %v13854_v31, -inf  ;;  %9727 = vpow2.f32 %v6749_v63 }
0x10f3   :  { %6703 = vmax.xlane.f32.xlu2 %v6702_v4 }
0x10f5   :  { %v6547_v18 = vpop.f32.mrf.mxu0  ;;  %v6659_v20 = vpop.xlane.xlu2 %6658 }
0x10f6   :  { %v6622_v14 = vmul.f32 0.25, %v6547_v18  ;;  %v13881_v18 = vpop.eup %9725 }
0x10f7   :  { %v6795_v47 = vsel %vm1473_vm2, %v13881_v18, 0.0 }
0x10f8   :  { %v13857_v53 = vadd.f32 %v6622_v14, %v15024_v43 }
0x10fa   :  { %v6708_v2 = vsel %vm1473_vm2, %v13857_v53, -inf }
0x10fb   :  { %6709 = vmax.xlane.f32.xlu1 %v6708_v2  ;;  %6706 = vmax.xlane.f32.xlu2 %v6705_v15  ;;  %v6725_v2 = vsub.f32 %v13756_v55, %v6659_v20 }
0x10fd   :  { %v6689_v39 = vpop.xlane.xlu1 %6688 }
0x10fe   :  { %v6735_v11 = vsub.f32 %v13764_v56, %v6689_v39  ;;  %v6751_v39 = vmul.f32 1.442695, %v6725_v2 }
0x1100   :  { %v6771_v49 = vmul.f32 1.442695, %v6735_v11 }
0x1102   :  { %9729 = vpow2.f32 %v6771_v49 }
0x1103   :  { %9731 = vpow2.f32 %v6751_v39 }
0x1105   :  { %v6662_v58 = vpop.xlane.xlu1 %6661 }
0x1106   :  { %v6726_v37 = vsub.f32 %v13769_v46, %v6662_v58 }
0x1108   :  { %v6753_v10 = vmul.f32 1.442695, %v6726_v37 }
0x110a   :  { %9733 = vpow2.f32 %v6753_v10 }
0x110b   :  { %v6665_v49 = vpop.xlane.xlu0 %6664 }
0x110d   :  { %v13872_v38 = vpop.xlane.xlu2 %6694  ;;  %v6692_v20 = vpop.xlane.xlu1 %6691 }
0x110e   :  { %v6736_v36 = vsub.f32 %v13779_v29, %v6692_v20 }
0x1110   :  { %v6773_v63 = vmul.f32 1.442695, %v6736_v36 }
0x1115   :  { %v6668_v14 = vpop.xlane.xlu2 %6667 }
0x1116   :  { %v13869_v5 = vpop.f32.mrf.mxu2  ;;  %v6728_v56 = vsub.f32 %v13795_v34, %v6668_v14  ;;  %v6727_v14 = vsub.f32 %v13776_v27, %v6665_v49 }
0x111b   :  { %v6698_v39 = vpop.xlane.xlu0 %6697 }
0x111c   :  { %v6738_v20 = vsub.f32 %v13804_v28, %v6698_v39 }
0x111e   :  { %v6394_v1 = vpop.f32.mrf.mxu2  ;;  %v6777_v36 = vmul.f32 1.442695, %v6738_v20 }
0x111f   :  { %v6612_v19 = vmul.f32 0.25, %v6394_v1  ;;  %v6757_v1 = vmul.f32 1.442695, %v6728_v56 }
0x1121   :  { %v13875_v17 = vadd.f32 %v6612_v19, %v15024_v43  ;;  %v13893_v19 = vpop.eup %9727  ;;  %9735 = vpow2.f32 %v6757_v1 }
0x1122   :  { %v13895_v46 = vpop.eup %9729  ;;  %v6798_v11 = vsel %vm1473_vm2, %v13893_v19, 0.0  ;;  %9737 = vpow2.f32 %v6773_v63 }
0x1123   :  { %v6678_v61 = vsel %vm1473_vm2, %v13875_v17, -inf  ;;  %v6831_v58 = vsel %vm1473_vm2, %v13895_v46, 0.0 }
0x1124   :  { %6679 = vmax.xlane.f32.xlu0 %v6678_v61 }
0x1126   :  { %v6397_v45 = vpop.f32.mrf.mxu2 }
0x1127   :  { %v6613_v4 = vmul.f32 0.25, %v6397_v45  ;;  %v13907_v45 = vpop.eup %9731 }
0x1128   :  { %v6801_v2 = vsel %vm1473_vm2, %v13907_v45, 0.0 }
0x1129   :  { %v13885_v15 = vadd.f32 %v6613_v4, %v15024_v43  ;;  %v13909_v4 = vpop.eup %9733 }
0x112a   :  { %v13911_v29 = vpop.eup %9735  ;;  %v6804_v37 = vsel %vm1473_vm2, %v13909_v4, 0.0 }
0x112b   :  { %v6681_v30 = vsel %vm1473_vm2, %v13885_v15, -inf  ;;  %v6810_v56 = vsel %vm1473_vm2, %v13911_v29, 0.0 }
0x112c   :  { %6796 = vadd.xlane.f32.xlu0 %v6795_v47  ;;  %6682 = vmax.xlane.f32.xlu2 %v6681_v30  ;;  %v6755_v47 = vmul.f32 1.442695, %v6727_v14  ;;  %v13920_v30 = vpop.eup %9737 }
0x112d   :  { %v6834_v27 = vsel %vm1473_vm2, %v13920_v30, 0.0 }
0x112e   :  { %v6400_v55 = vpop.f32.mrf.mxu2  ;;  %9739 = vpow2.f32 %v6755_v47 }
0x112f   :  { %v6614_v13 = vmul.f32 0.25, %v6400_v55  ;;  %v6550_v55 = vpop.f32.mrf.mxu0  ;;  %9741 = vpow2.f32 %v6777_v36 }
0x1130   :  { %v6623_v1 = vmul.f32 0.25, %v6550_v55 }
0x1131   :  { %v13898_v34 = vadd.f32 %v6614_v13, %v15024_v43 }
0x1133   :  { %v6684_v61 = vsel %vm1473_vm2, %v13898_v34, -inf }
0x1134   :  { %6799 = vadd.xlane.f32.xlu0 %v6798_v11  ;;  %6685 = vmax.xlane.f32.xlu1 %v6684_v61  ;;  %v13924_v10 = vpop.eup %9739  ;;  %v13930_v61 = vadd.f32 %v6623_v1, %v15024_v43  ;;  %v6737_v1 = vsub.f32 %v13784_v32, %v13872_v38 }
0x1135   :  { %6832 = vadd.xlane.f32.xlu2 %v6831_v58  ;;  %v6807_v13 = vsel %vm1473_vm2, %v13924_v10, 0.0 }
0x1136   :  { %v6711_v49 = vsel %vm1473_vm2, %v13930_v61, -inf }
0x113c   :  { %6802 = vadd.xlane.f32.xlu0 %v6801_v2  ;;  %6805 = vadd.xlane.f32.xlu1 %v6804_v37  ;;  %v13936_v2 = vpop.eup %9741 }
0x113d   :  { %6811 = vadd.xlane.f32.xlu2 %v6810_v56 }
0x1144   :  { %6835 = vadd.xlane.f32.xlu0 %v6834_v27 }
0x114c   :  { %6808 = vadd.xlane.f32.xlu0 %v6807_v13 }
0x114e   :  { %v6671_v11 = vpop.xlane.xlu1 %6670 }
0x114f   :  { %v6729_v58 = vsub.f32 %v13825_v16, %v6671_v11  ;;  %v6840_v16 = vsel %vm1473_vm2, %v13936_v2, 0.0 }
0x1151   :  { %v6759_v63 = vmul.f32 1.442695, %v6729_v58  ;;  %v6775_v58 = vmul.f32 1.442695, %v6737_v1  ;;  %v15028_v1 = vld [vmem:[#allocation20_spill] sm:$0xff] }
0x1153   :  { %9743 = vpow2.f32 %v6759_v63 }
0x1154   :  { %6712 = vmax.xlane.f32.xlu0 %v6711_v49 }
0x1156   :  { %v6674_v28 = vpop.xlane.xlu2 %6673 }
0x1157   :  { %v6730_v14 = vsub.f32 %v13830_v42, %v6674_v28 }
0x1159   :  { %v13938_v37 = vpop.eup %9743  ;;  %v6761_v56 = vmul.f32 1.442695, %v6730_v14 }
0x115a   :  { %v6813_v47 = vsel %vm1473_vm2, %v13938_v37, 0.0 }
0x115b   :  { %9745 = vpow2.f32 %v6761_v56  ;;  %6814 = vadd.xlane.f32.xlu2 %v6813_v47 }
0x115c   :  { %6841 = vadd.xlane.f32.xlu0 %v6840_v16 }
0x115e   :  { %v6677_v27 = vpop.xlane.xlu0 %6676  ;;  %v6701_v39 = vpop.xlane.xlu2 %6700 }
0x115f   :  { %v6731_v55 = vsub.f32 %v13840_v21, %v6677_v27  ;;  %v6739_v42 = vsub.f32 %v13835_v52, %v6701_v39 }
0x1161   :  { %v13946_v20 = vpop.eup %9745  ;;  %v6763_v13 = vmul.f32 1.442695, %v6731_v55  ;;  %v6779_v36 = vmul.f32 1.442695, %v6739_v42 }
0x1162   :  { %v6816_v11 = vsel %vm1473_vm2, %v13946_v20, 0.0 }
0x1163   :  { %9747 = vpow2.f32 %v6763_v13  ;;  %6817 = vadd.xlane.f32.xlu1 %v6816_v11 }
0x1164   :  { %9749 = vpow2.f32 %v6779_v36 }
0x1165   :  { %9751 = vpow2.f32 %v6775_v58  ;;  %v15029_v58 = vld [vmem:[#allocation21_spill] sm:$0xff] }
0x1166   :  { %v6704_v63 = vpop.xlane.xlu2 %6703 }
0x1167   :  { %v6740_v49 = vsub.f32 %v13847_v0, %v6704_v63  ;;  %v9208_v63 = vpack.i.bf16 %v15029_v58, %v13061_v44 }
0x1169   :  { %v13953_v21 = vpop.eup %9747  ;;  %v6781_v52 = vmul.f32 1.442695, %v6740_v49  ;;  %v15030_v49 = vld [vmem:[#allocation22_spill] sm:$0xff] }
0x116a   :  { %v13955_v28 = vpop.eup %9749  ;;  %v6819_v32 = vsel %vm1473_vm2, %v13953_v21, 0.0 }
0x116b   :  { %9753 = vpow2.f32 %v6781_v52  ;;  %6820 = vadd.xlane.f32.xlu1 %v6819_v32  ;;  %v6843_v38 = vsel %vm1473_vm2, %v13955_v28, 0.0  ;;  %v13961_v56 = vpop.eup %9751 }
0x116c   :  { %6844 = vadd.xlane.f32.xlu0 %v6843_v38  ;;  %v6837_v55 = vsel %vm1473_vm2, %v13961_v56, 0.0  ;;  %v15031_v38 = vld [vmem:[#allocation23_spill] sm:$0xff] }
0x116e   :  { %v6707_v14 = vpop.xlane.xlu2 %6706  ;;  %v6710_v47 = vpop.xlane.xlu1 %6709 }
0x116f   :  { %v6741_v0 = vsub.f32 %v13854_v31, %v6707_v14  ;;  %v6742_v39 = vsub.f32 %v13857_v53, %v6710_v47 }
0x1171   :  { %v13964_v16 = vpop.eup %9753  ;;  %v6783_v27 = vmul.f32 1.442695, %v6741_v0  ;;  %v6785_v13 = vmul.f32 1.442695, %v6742_v39 }
0x1172   :  { %v6846_v42 = vsel %vm1473_vm2, %v13964_v16, 0.0 }
0x1173   :  { %9204 = vrot.lane.b32.xlu2 %v15028_v1, %s10020_s23  ;;  %6838 = vadd.xlane.f32.xlu1 %v6837_v55  ;;  %9755 = vpow2.f32 %v6783_v27 }
0x1174   :  { %6847 = vadd.xlane.f32.xlu0 %v6846_v42  ;;  %9757 = vpow2.f32 %v6785_v13 }
0x1179   :  { %v13973_v36 = vpop.eup %9755 }
0x117a   :  { %v6849_v31 = vsel %vm1473_vm2, %v13973_v36, 0.0  ;;  %v13977_v53 = vpop.eup %9757 }
0x117b   :  { %v6852_v11 = vsel %vm1473_vm2, %v13977_v53, 0.0 }
0x117c   :  { %6850 = vadd.xlane.f32.xlu0 %v6849_v31  ;;  %v6594_v31 = vpop.f32.mrf.mxu2 }
0x1184   :  { %6853 = vadd.xlane.f32.xlu0 %v6852_v11 }
0x118c   :  { %9209 = vrot.lane.b32.xlu1 %v9208_v63, %s10020_s23 }
0x1194   :  { %9214 = vrot.lane.b32.xlu1 %v15030_v49, %s10020_s23 }
0x1197   :  { %v6680_v52 = vpop.xlane.xlu0 %6679 }
0x1198   :  { %v6732_v32 = vsub.f32 %v13875_v17, %v6680_v52  ;;  %9224 = vrot.lane.b32.xlu0 %v15031_v38, %s10020_s23 }
0x119a   :  { %v6765_v14 = vmul.f32 1.442695, %v6732_v32 }
0x119c   :  { %9759 = vpow2.f32 %v6765_v14 }
0x119f   :  { %v6797_v47 = vpop.xlane.xlu0 %6796  ;;  %v6683_v0 = vpop.xlane.xlu2 %6682 }
0x11a0   :  { %9761 = vrcp.f32 %v6797_v47  ;;  %v6733_v27 = vsub.f32 %v13885_v15, %v6683_v0  ;;  %v6624_v15 = vmul.f32 0.25, %v6594_v31 }
0x11a2   :  { %v13990_v39 = vpop.eup %9759  ;;  %v6767_v44 = vmul.f32 1.442695, %v6733_v27  ;;  %v14001_v49 = vadd.f32 %v6624_v15, %v15024_v43 }
0x11a3   :  { %v6822_v55 = vsel %vm1473_vm2, %v13990_v39, 0.0 }
0x11a4   :  { %9763 = vpow2.f32 %v6767_v44  ;;  %6823 = vadd.xlane.f32.xlu2 %v6822_v55  ;;  %v6714_v14 = vsel %vm1473_vm2, %v14001_v49, -inf }
0x11a6   :  { %v9762_v42 = vpop.eup %9761 }
0x11a7   :  { %v6891_v17 = vmul.f32 %v9762_v42, %v13881_v18  ;;  %v6800_v1 = vpop.xlane.xlu0 %6799  ;;  %v6686_v13 = vpop.xlane.xlu1 %6685 }
0x11a8   :  { %9765 = vrcp.f32 %v6800_v1  ;;  %v6734_v38 = vsub.f32 %v13898_v34, %v6686_v13 }
0x11a9   :  { %8915 = vmatmul.msk.f32.vlgmr.msra.gmra.mxu1 %vm1473_vm2, %v6891_v17 }
0x11aa   :  { %v13996_v11 = vpop.eup %9763  ;;  %v6769_v47 = vmul.f32 1.442695, %v6734_v38 }
0x11ab   :  { %v6825_v58 = vsel %vm1473_vm2, %v13996_v11, 0.0 }
0x11ac   :  { %6826 = vadd.xlane.f32.xlu2 %v6825_v58 }
0x11ae   :  { %v9766_v63 = vpop.eup %9765 }
0x11af   :  { %v6803_v52 = vpop.xlane.xlu0 %6802  ;;  %v6806_v32 = vpop.xlane.xlu1 %6805  ;;  %v6892_v18 = vmul.f32 %v9766_v63, %v13893_v19 }
0x11b0   :  { %9767 = vrcp.f32 %v6803_v52  ;;  %v6833_v19 = vpop.xlane.xlu2 %6832  ;;  %v15032_v52 = vld [vmem:[#allocation17_spill] sm:$0xff] }
0x11b1   :  { %9769 = vrcp.f32 %v6806_v32  ;;  %8916 = vmatmul.msk.f32.gmra.mxu1 %vm1473_vm2, %v6892_v18 }
0x11b2   :  { %9771 = vpow2.f32 %v6769_v47 }
0x11b4   :  { %6715 = vmax.xlane.f32.xlu2 %v6714_v14 }
0x11b6   :  { %v9768_v0 = vpop.eup %9767 }
0x11b7   :  { %v9770_v27 = vpop.eup %9769  ;;  %v6836_v44 = vpop.xlane.xlu0 %6835  ;;  %v6893_v55 = vmul.f32 %v9768_v0, %v13907_v45 }
0x11b8   :  { %v6894_v42 = vmul.f32 %v9770_v27, %v13909_v4  ;;  %v14012_v34 = vpop.eup %9771  ;;  %v6812_v13 = vpop.xlane.xlu2 %6811 }
0x11b9   :  { %8917 = vmatmul.msk.f32.gmra.mxu1 %vm1473_vm2, %v6893_v55  ;;  %v6828_v1 = vsel %vm1473_vm2, %v14012_v34, 0.0 }
0x11ba   :  { %8918 = vmatmul.msk.f32.vlgmr.msrb.gmra.mxu3 %vm1473_vm2, %v6894_v42 }
0x11bf   :  { %v6809_v17 = vpop.xlane.xlu0 %6808 }
0x11c0   :  { %9773 = vrcp.f32 %v6809_v17 }
0x11c1   :  { %9775 = vrcp.f32 %v6812_v13 }
0x11c2   :  { %6829 = vadd.xlane.f32.xlu0 %v6828_v1 }
0x11c6   :  { %v9774_v31 = vpop.eup %9773 }
0x11c7   :  { %v6713_v45 = vpop.xlane.xlu0 %6712  ;;  %v6895_v15 = vmul.f32 %v9774_v31, %v13924_v10  ;;  %v9776_v63 = vpop.eup %9775 }
0x11c8   :  { %v6743_v4 = vsub.f32 %v13930_v61, %v6713_v45  ;;  %v6896_v18 = vmul.f32 %v9776_v63, %v13911_v29 }
0x11c9   :  { %8919 = vmatmul.msk.f32.gmra.mxu3 %vm1473_vm2, %v6895_v15 }
0x11ca   :  { %v6787_v58 = vmul.f32 1.442695, %v6743_v4 }
0x11cc   :  { %9777 = vpow2.f32 %v6787_v58  ;;  %9219 = vrot.lane.b32.xlu2 %v15032_v52, %s10020_s23 }
0x11cd   :  { %9779 = vrcp.f32 %v6833_v19 }
0x11ce   :  { %v6815_v32 = vpop.xlane.xlu2 %6814 }
0x11cf   :  { %9781 = vrcp.f32 %v6815_v32 }
0x11d0   :  { %9783 = vrcp.f32 %v6836_v44 }
0x11d1   :  { %8920 = vmatmul.msk.f32.gmra.mxu3 %vm1473_vm2, %v6896_v18 }
0x11d2   :  { %v14023_v38 = vpop.eup %9777 }
0x11d3   :  { %v6855_v10 = vsel %vm1473_vm2, %v14023_v38, 0.0  ;;  %v9780_v61 = vpop.eup %9779 }
0x11d4   :  { %6856 = vadd.xlane.f32.xlu1 %v6855_v10  ;;  %v6903_v29 = vmul.f32 %v9780_v61, %v13895_v46 }
0x11d5   :  { %v9782_v14 = vpop.eup %9781 }
0x11d6   :  { %v6897_v47 = vmul.f32 %v9782_v14, %v13938_v37  ;;  %v6818_v0 = vpop.xlane.xlu1 %6817  ;;  %v9205_v27 = vpop.permute.xlu2 %9204 }
0x11d7   :  { %9785 = vrcp.f32 %v6818_v0  ;;  %v9207_v55 = vunpack.i.h.bf16 %v9205_v27  ;;  %v9206_v42 = vunpack.i.l.bf16 %v9205_v27  ;;  %v9784_v19 = vpop.eup %9783 }
0x11d8   :  { %8921 = vmatmul.msk.f32.vlgmr.msrb.gmra.mxu0 %vm1473_vm2, %v6897_v47  ;;  %v6904_v37 = vmul.f32 %v9784_v19, %v13920_v30 }
0x11d9   :  { %7124 = vmatpush.msrb.mxu1 %v9206_v42  ;;  %7166 = vmatpush.msra.mxu3 %v9207_v55 }
0x11da   :  { %8927 = vmatmul.msk.f32.vlgmr.msrb.gmra.mxu1 %vm1473_vm2, %v6903_v29 }
0x11dd   :  { %v9786_v17 = vpop.eup %9785 }
0x11de   :  { %v6821_v1 = vpop.xlane.xlu1 %6820  ;;  %v6898_v44 = vmul.f32 %v9786_v17, %v13946_v20  ;;  %v6842_v20 = vpop.xlane.xlu0 %6841 }
0x11df   :  { %9787 = vrcp.f32 %v6821_v1 }
0x11e0   :  { %8922 = vmatmul.msk.f32.gmra.mxu0 %vm1473_vm2, %v6898_v44 }
0x11e2   :  { %8928 = vmatmul.msk.f32.gmra.mxu1 %vm1473_vm2, %v6904_v37 }
0x11e5   :  { %v9788_v13 = vpop.eup %9787 }
0x11e6   :  { %v6839_v46 = vpop.xlane.xlu1 %6838  ;;  %v6899_v31 = vmul.f32 %v9788_v13, %v13953_v21  ;;  %v6845_v4 = vpop.xlane.xlu0 %6844 }
0x11e7   :  { %9789 = vrcp.f32 %v6839_v46 }
0x11e8   :  { %8923 = vmatmul.msk.f32.gmra.mxu0 %vm1473_vm2, %v6899_v31  ;;  %9791 = vrcp.f32 %v6842_v20 }
0x11e9   :  { %9793 = vrcp.f32 %v6845_v4 }
0x11ed   :  { %v9790_v45 = vpop.eup %9789 }
0x11ee   :  { %v6905_v15 = vmul.f32 %v9790_v45, %v13961_v56  ;;  %v9792_v63 = vpop.eup %9791  ;;  %v6848_v21 = vpop.xlane.xlu0 %6847 }
0x11ef   :  { %v6906_v32 = vmul.f32 %v9792_v63, %v13936_v2  ;;  %v9794_v10 = vpop.eup %9793  ;;  %9795 = vrcp.f32 %v6848_v21 }
0x11f0   :  { %8929 = vmatmul.msk.f32.gmra.mxu1 %vm1473_vm2, %v6905_v15  ;;  %v6907_v14 = vmul.f32 %v9794_v10, %v13955_v28 }
0x11f5   :  { %v9796_v47 = vpop.eup %9795 }
0x11f6   :  { %v6908_v0 = vmul.f32 %v9796_v47, %v13964_v16  ;;  %v6851_v27 = vpop.xlane.xlu0 %6850 }
0x11fe   :  { %v9210_v58 = vpop.permute.xlu1 %9209  ;;  %v6854_v19 = vpop.xlane.xlu0 %6853 }
0x11ff   :  { %v9211_v30 = vunpack.i.l.bf16 %v9210_v58  ;;  %v9212_v52 = vunpack.i.h.bf16 %v9210_v58 }
0x1201   :  { %7167 = vmatpush.msra.mxu3 %v9211_v30 }
0x1203   :  { %7168 = vmatpush.msra.mxu3 %v9212_v52 }
0x1204   :  { %8930 = vmatmul.msk.f32.vlgmr.msra.gmra.mxu3 %vm1473_vm2, %v6906_v32 }
0x1206   :  { %v9215_v18 = vpop.permute.xlu1 %9214 }
0x1207   :  { %v9216_v56 = vunpack.i.l.bf16 %v9215_v18  ;;  %v9217_v61 = vunpack.i.h.bf16 %v9215_v18 }
0x1209   :  { %7210 = vmatpush.msra.mxu0 %v9216_v56 }
0x120b   :  { %7211 = vmatpush.msra.mxu0 %v9217_v61 }
0x120c   :  { %8931 = vmatmul.msk.f32.gmra.mxu3 %vm1473_vm2, %v6907_v14 }
0x1214   :  { %8932 = vmatmul.msk.f32.gmra.mxu3 %vm1473_vm2, %v6908_v0 }
0x1217   :  { %v6824_v2 = vpop.xlane.xlu2 %6823 }
0x1218   :  { %9797 = vrcp.f32 %v6824_v2 }
0x121e   :  { %v9798_v55 = vpop.eup %9797 }
0x121f   :  { %v6900_v42 = vmul.f32 %v9798_v55, %v13990_v39  ;;  %v6827_v29 = vpop.xlane.xlu2 %6826  ;;  %v9225_v39 = vpop.permute.xlu0 %9224 }
0x1220   :  { %9799 = vrcp.f32 %v6827_v29  ;;  %v9226_v58 = vunpack.i.l.bf16 %v9225_v39 }
0x1221   :  { %8924 = vmatmul.msk.f32.vlgmr.msra.gmra.mxu2 %vm1473_vm2, %v6900_v42  ;;  %9801 = vrcp.f32 %v6851_v27 }
0x1226   :  { %v9800_v28 = vpop.eup %9799  ;;  %v6950_v17 = vpop.f32.mrf.mxu1 }
0x1227   :  { %7291 = vrot.lane.b32.xlu2 %v6950_v17, %s10022_s24  ;;  %v6716_v1 = vpop.xlane.xlu2 %6715  ;;  %v6901_v16 = vmul.f32 %v9800_v28, %v13996_v11  ;;  %v9802_v13 = vpop.eup %9801  ;;  %v15033_v17 = vld [vmem:[#allocation65_spill] sm:$0xff] }
0x1228   :  { %v6744_v44 = vsub.f32 %v14001_v49, %v6716_v1  ;;  %v6909_v20 = vmul.f32 %v9802_v13, %v13973_v36  ;;  %v9227_v49 = vunpack.i.h.bf16 %v9225_v39 }
0x1229   :  { %8925 = vmatmul.msk.f32.gmra.mxu2 %vm1473_vm2, %v6901_v16 }
0x122a   :  { %v6789_v37 = vmul.f32 1.442695, %v6744_v44 }
0x122c   :  { %9803 = vpow2.f32 %v6789_v37 }
0x122d   :  { %9805 = vrcp.f32 %v6854_v19  ;;  %v14076_v19 = vpop.f32.mrf.mxu2 }
0x122e   :  { %v6953_v46 = vpop.f32.mrf.mxu1 }
0x122f   :  { %v9220_v31 = vpop.permute.xlu2 %9219 }
0x1230   :  { %v9222_v45 = vunpack.i.h.bf16 %v9220_v31  ;;  %v9221_v15 = vunpack.i.l.bf16 %v9220_v31 }
0x1232   :  { %v14052_v4 = vpop.eup %9803  ;;  %7212 = vmatpush.msra.mxu0 %v9221_v15  ;;  %7254 = vmatpush.msrb.mxu2 %v9222_v45 }
0x1233   :  { %8933 = vmatmul.msk.f32.vlgmr.msra.gmra.mxu0 %vm1473_vm2, %v6909_v20  ;;  %v6858_v11 = vsel %vm1473_vm2, %v14052_v4, 0.0  ;;  %v9806_v30 = vpop.eup %9805 }
0x1234   :  { %6859 = vadd.xlane.f32.xlu0 %v6858_v11  ;;  %7255 = vmatpush.msrb.mxu2 %v9226_v58  ;;  %v6910_v36 = vmul.f32 %v9806_v30, %v13977_v53  ;;  %v15034_v11 = vld [vmem:[#allocation43_spill] sm:$0xff] }
0x1235   :  { %v6830_v63 = vpop.xlane.xlu0 %6829  ;;  %v14085_v44 = vpop.f32.mrf.mxu2 }
0x1236   :  { %9807 = vrcp.f32 %v6830_v63  ;;  %v6956_v52 = vpop.f32.mrf.mxu1  ;;  %7256 = vmatpush.msrb.mxu2 %v9227_v49 }
0x1237   :  { %7295 = vrot.lane.b32.xlu2 %v6956_v52, %s10022_s24 }
0x123b   :  { %8934 = vmatmul.msk.f32.gmra.mxu0 %vm1473_vm2, %v6910_v36 }
0x123c   :  { %v9808_v32 = vpop.eup %9807 }
0x123d   :  { %v6902_v21 = vmul.f32 %v9808_v32, %v14012_v34  ;;  %v6994_v18 = vpop.f32.mrf.mxu3  ;;  %v15035_v32 = vld [vmem:[#allocation42_spill] sm:$0xff] }
0x123f   :  { %8926 = vmatmul.msk.f32.gmra.mxu2 %vm1473_vm2, %v6902_v21 }
0x1247   :  { %v6857_v10 = vpop.xlane.xlu1 %6856 }
0x1248   :  { %9809 = vrcp.f32 %v6857_v10  ;;  %7293 = vrot.lane.b32.xlu0 %v6953_v46, %s10022_s24 }
0x124c   :  { %v6997_v56 = vpop.f32.mrf.mxu3 }
0x124e   :  { %v9810_v61 = vpop.eup %9809 }
0x124f   :  { %v6911_v14 = vmul.f32 %v9810_v61, %v14023_v38 }
0x1251   :  { %8935 = vmatmul.msk.f32.gmra.mxu0 %vm1473_vm2, %v6911_v14  ;;  %v15036_v14 = vld [vmem:[#allocation54_spill] sm:$0xff] }
0x1254   :  { %v7000_v47 = vpop.f32.mrf.mxu3 }
0x1255   :  { %7301 = vrot.lane.b32.xlu1 %v7000_v47, %s10022_s24  ;;  %v7038_v53 = vpop.f32.mrf.mxu0 }
0x1257   :  { %v7126_v0 = vpop.f32.mrf.mxu1 }
0x1258   :  { %7315 = vrot.lane.b32.xlu0 %v7126_v0, %s10022_s24 }
0x125d   :  { %v7041_v34 = vpop.f32.mrf.mxu0 }
0x125e   :  { %7305 = vrot.lane.b32.xlu1 %v7041_v34, %s10022_s24 }
0x125f   :  { %v7129_v2 = vpop.f32.mrf.mxu1 }
0x1260   :  { %7317 = vrot.lane.b32.xlu0 %v7129_v2, %s10022_s24 }
0x1265   :  { %v7044_v38 = vpop.f32.mrf.mxu0 }
0x1268   :  { %7297 = vrot.lane.b32.xlu0 %v6994_v18, %s10022_s24 }
0x126d   :  { %v7132_v27 = vpop.f32.mrf.mxu1 }
0x126e   :  { %7319 = vrot.lane.b32.xlu2 %v7132_v27, %s10022_s24  ;;  %v15038_v27 = vld [vmem:[#allocation57_spill] sm:$0xff] }
0x1270   :  { %7307 = vrot.lane.b32.xlu0 %v7044_v38, %s10022_s24 }
0x1276   :  { %7299 = vrot.lane.b32.xlu2 %v6997_v56, %s10022_s24 }
0x127e   :  { %7303 = vrot.lane.b32.xlu2 %v7038_v53, %s10022_s24  ;;  %v15037_v53 = vld [vmem:[#allocation51_spill] sm:$0xff] }
0x1281   :  { %v7292_v42 = vpop.permute.xlu2 %7291 }
0x1282   :  { %v7363_v28 = vsel %vm1057_vm12, %v13700_v41, %v7292_v42 }
0x1283   :  { %v14081_v1 = vadd.f32 %v7363_v28, %v15033_v17 }
0x1285   :  { %v7411_v16 = vsel %vm300_vm1, %v14081_v1, 0.0 }
0x1287   :  { %v7170_v55 = vpop.f32.mrf.mxu3 }
0x1288   :  { %7321 = vrot.lane.b32.xlu1 %v7170_v55, %s10022_s24 }
0x128f   :  { %v7173_v29 = vpop.f32.mrf.mxu3 }
0x1290   :  { %7323 = vrot.lane.b32.xlu1 %v7173_v29, %s10022_s24  ;;  %v15039_v29 = vld [vmem:[#allocation36_spill] sm:$0xff] }
0x1291   :  { %v7296_v20 = vpop.permute.xlu2 %7295 }
0x1292   :  { %v7365_v17 = vsel %vm1057_vm12, %v13718_v23, %v7296_v20 }
0x1297   :  { %v7176_v46 = vpop.f32.mrf.mxu3 }
0x129a   :  { %7412 = vadd.xlane.f32.xlu0 %v7411_v16 }
0x12a4   :  { %v7082_v37 = vpop.f32.mrf.mxu2 }
0x12a5   :  { %7309 = vrot.lane.b32.xlu2 %v7082_v37, %s10022_s24 }
0x12a7   :  { %v6860_v39 = vpop.xlane.xlu0 %6859 }
0x12a8   :  { %9811 = vrcp.f32 %v6860_v39  ;;  %v15040_v39 = vld [vmem:[#allocation53_spill] sm:$0xff] }
0x12ac   :  { %v7085_v13 = vpop.f32.mrf.mxu2 }
0x12ad   :  { %7311 = vrot.lane.b32.xlu1 %v7085_v13, %s10022_s24  ;;  %v14142_v13 = vadd.f32 %v7365_v17, %v15040_v39 }
0x12ae   :  { %v9812_v31 = vpop.eup %9811  ;;  %7325 = vrot.lane.b32.xlu0 %v7176_v46, %s10022_s24 }
0x12af   :  { %v6912_v41 = vmul.f32 %v9812_v31, %v14052_v4  ;;  %v7417_v23 = vsel %vm300_vm1, %v14142_v13, 0.0 }
0x12b1   :  { %8936 = vmatmul.msk.f32.vlgmr.msrb.gmra.mxu2 %vm1473_vm2, %v6912_v41 }
0x12ba   :  { %v7294_v45 = vpop.permute.xlu0 %7293 }
0x12bb   :  { %v7364_v58 = vsel %vm1057_vm12, %v13708_v48, %v7294_v45 }
0x12bc   :  { %v14096_v49 = vadd.f32 %v7364_v58, %v15034_v11 }
0x12be   :  { %v7414_v52 = vsel %vm300_vm1, %v14096_v49, 0.0 }
0x12c2   :  { %v7088_v15 = vpop.f32.mrf.mxu2 }
0x12c3   :  { %7313 = vrot.lane.b32.xlu1 %v7088_v15, %s10022_s24 }
0x12c7   :  { %v7302_v56 = vpop.permute.xlu1 %7301 }
0x12c8   :  { %v7320_v30 = vpop.permute.xlu2 %7319  ;;  %v7368_v2 = vsel %vm1057_vm12, %v13737_v3, %v7302_v56 }
0x12c9   :  { %v14126_v38 = vadd.f32 %v7368_v2, %v15038_v27 }
0x12ca   :  { %v7316_v63 = vpop.permute.xlu0 %7315 }
0x12cb   :  { %v7375_v4 = vsel %vm1057_vm12, %v13814_v7, %v7316_v63  ;;  %v7426_v3 = vsel %vm300_vm1, %v14126_v38, 0.0  ;;  %v15043_v63 = vld [vmem:[#allocation37_spill] sm:$0xff] }
0x12cc   :  { %v14105_v21 = vadd.f32 %v7375_v4, %v15035_v32 }
0x12ce   :  { %7415 = vadd.xlane.f32.xlu2 %v7414_v52  ;;  %v7447_v48 = vsel %vm300_vm1, %v14105_v21, 0.0 }
0x12d0   :  { %v7300_v18 = vpop.permute.xlu2 %7299  ;;  %v7306_v42 = vpop.permute.xlu1 %7305 }
0x12d1   :  { %v7367_v10 = vsel %vm1057_vm12, %v13727_v25, %v7300_v18  ;;  %v7370_v37 = vsel %vm1057_vm12, %v13799_v40, %v7306_v42  ;;  %v15042_v40 = vld [vmem:[#allocation58_spill] sm:$0xff] }
0x12d2   :  { %v14102_v36 = vpop.permute.xlu0 %7317  ;;  %v14112_v47 = vadd.f32 %v7367_v10, %v15036_v14  ;;  %v15045_v14 = vld [vmem:[#allocation49_spill] sm:$0xff] }
0x12d4   :  { %v7423_v25 = vsel %vm300_vm1, %v14112_v47, 0.0 }
0x12d8   :  { %7448 = vadd.xlane.f32.xlu0 %v7447_v48  ;;  %v7304_v31 = vpop.permute.xlu2 %7303  ;;  %v15044_v48 = vld [vmem:[#allocation26_spill] sm:$0xff] }
0x12d9   :  { %v7369_v41 = vsel %vm1057_vm12, %v13786_v57, %v7304_v31 }
0x12da   :  { %v7298_v61 = vpop.permute.xlu0 %7297  ;;  %v14154_v15 = vadd.f32 %v7369_v41, %v15042_v40 }
0x12db   :  { %v7366_v7 = vsel %vm1057_vm12, %v13721_v59, %v7298_v61 }
0x12dc   :  { %v14117_v0 = vadd.f32 %v7366_v7, %v15037_v53  ;;  %v7429_v20 = vsel %vm300_vm1, %v14154_v15, 0.0 }
0x12de   :  { %v7420_v34 = vsel %vm300_vm1, %v14117_v0, 0.0 }
0x12df   :  { %7421 = vadd.xlane.f32.xlu2 %v7420_v34 }
0x12e0   :  { %7424 = vadd.xlane.f32.xlu0 %v7423_v25  ;;  %v7377_v25 = vsel %vm1057_vm12, %v13733_v51, %v7320_v30 }
0x12e2   :  { %v7308_v55 = vpop.permute.xlu0 %7307 }
0x12e3   :  { %v7371_v59 = vsel %vm1057_vm12, %v13810_v33, %v7308_v55  ;;  %v15041_v33 = vld [vmem:[#allocation59_spill] sm:$0xff] }
0x12e4   :  { %v14131_v28 = vadd.f32 %v7371_v59, %v15039_v29  ;;  %v14145_v46 = vadd.f32 %v7370_v37, %v15041_v33  ;;  %v15047_v29 = vld [vmem:[#allocation41_spill] sm:$0xff] }
0x12e6   :  { %v7435_v16 = vsel %vm300_vm1, %v14131_v28, 0.0  ;;  %v7432_v45 = vsel %vm300_vm1, %v14145_v46, 0.0 }
0x12e7   :  { %7427 = vadd.xlane.f32.xlu2 %v7426_v3 }
0x12e8   :  { %7436 = vadd.xlane.f32.xlu0 %v7435_v16 }
0x12ed   :  { %7418 = vadd.xlane.f32.xlu1 %v7417_v23 }
0x12ef   :  { %7433 = vadd.xlane.f32.xlu2 %v7432_v45 }
0x12f5   :  { %7430 = vadd.xlane.f32.xlu1 %v7429_v20 }
0x12fa   :  { %v14165_v4 = vpop.permute.xlu1 %7321 }
0x12ff   :  { %v7310_v58 = vpop.permute.xlu2 %7309 }
0x1300   :  { %v7372_v11 = vsel %vm1057_vm12, %v13837_v50, %v7310_v58 }
0x1301   :  { %v14161_v52 = vadd.f32 %v7372_v11, %v15043_v63 }
0x1302   :  { %v14167_v32 = vpop.permute.xlu1 %7323 }
0x1303   :  { %v7438_v57 = vsel %vm300_vm1, %v14161_v52, 0.0 }
0x1304   :  { %7439 = vadd.xlane.f32.xlu1 %v7438_v57 }
0x130d   :  { %v7413_v18 = vpop.xlane.xlu0 %7412 }
0x130e   :  { %v7483_v10 = vmul.f32 %v7413_v18, %v15044_v48 }
0x1310   :  { %v14176_v7 = vsub.f32 %v14081_v1, %v7483_v10 }
0x1312   :  { %v7531_v34 = vmul.f32 %v14176_v7, %v14176_v7 }
0x1314   :  { %v7555_v2 = vsel %vm300_vm1, %v7531_v34, 0.0 }
0x131f   :  { %v7312_v56 = vpop.permute.xlu1 %7311 }
0x1320   :  { %v7373_v61 = vsel %vm1057_vm12, %v13849_v26, %v7312_v56  ;;  %v15046_v26 = vld [vmem:[#allocation44_spill] sm:$0xff]  ;;  %v14198_v16 = vpop.permute.xlu0 %7325 }
0x1321   :  { %v14173_v50 = vadd.f32 %v7373_v61, %v15045_v14  ;;  %v14186_v27 = vadd.f32 %v7377_v25, %v15046_v26  ;;  %v7214_v26 = vpop.f32.mrf.mxu0 }
0x1323   :  { %v7441_v53 = vsel %vm300_vm1, %v14173_v50, 0.0  ;;  %v7453_v55 = vsel %vm300_vm1, %v14186_v27, 0.0 }
0x1324   :  { %7442 = vadd.xlane.f32.xlu0 %v7441_v53 }
0x132c   :  { %7556 = vadd.xlane.f32.xlu0 %v7555_v2 }
0x1334   :  { %7454 = vadd.xlane.f32.xlu0 %v7453_v55 }
0x1335   :  { %v7314_v59 = vpop.permute.xlu1 %7313 }
0x1336   :  { %v7374_v42 = vsel %vm1057_vm12, %v13863_v22, %v7314_v59 }
0x1337   :  { %v14193_v17 = vadd.f32 %v7374_v42, %v15047_v29  ;;  %v7217_v29 = vpop.f32.mrf.mxu0 }
0x1339   :  { %v7444_v3 = vsel %vm300_vm1, %v14193_v17, 0.0 }
0x133a   :  { %7445 = vadd.xlane.f32.xlu1 %v7444_v3 }
0x1341   :  { %v7416_v51 = vpop.xlane.xlu2 %7415 }
0x1342   :  { %v7484_v30 = vmul.f32 %v7416_v51, %v15044_v48 }
0x1344   :  { %v14201_v37 = vsub.f32 %v14096_v49, %v7484_v30 }
0x1346   :  { %v7532_v39 = vmul.f32 %v14201_v37, %v14201_v37 }
0x1348   :  { %v7558_v22 = vsel %vm300_vm1, %v7532_v39, 0.0 }
0x1349   :  { %7559 = vadd.xlane.f32.xlu2 %v7558_v22 }
0x134b   :  { %v14206_v33 = vpop.xlane.xlu0 %7448 }
0x1352   :  { %v7422_v31 = vpop.xlane.xlu2 %7421 }
0x1353   :  { %v7486_v23 = vmul.f32 %v7422_v31, %v15044_v48  ;;  %v7425_v41 = vpop.xlane.xlu0 %7424 }
0x1354   :  { %v7487_v53 = vmul.f32 %v7425_v41, %v15044_v48 }
0x1355   :  { %v14210_v45 = vsub.f32 %v14117_v0, %v7486_v23  ;;  %v7258_v23 = vpop.f32.mrf.mxu2 }
0x1356   :  { %v14236_v25 = vsub.f32 %v14112_v47, %v7487_v53 }
0x1357   :  { %v7534_v40 = vmul.f32 %v14210_v45, %v14210_v45 }
0x1359   :  { %v7564_v49 = vsel %vm300_vm1, %v7534_v40, 0.0  ;;  %v4406_v40 = vld [vmem:[#allocation5 + $0x180] sm:$0xff] }
0x135a   :  { %7565 = vadd.xlane.f32.xlu1 %v7564_v49  ;;  %v7428_v20 = vpop.xlane.xlu2 %7427  ;;  %8074 = vmatpush.msra.mxu1 %v4406_v40 }
0x135b   :  { %v7488_v58 = vmul.f32 %v7428_v20, %v15044_v48  ;;  %v7437_v11 = vpop.xlane.xlu0 %7436 }
0x135c   :  { %v7491_v57 = vmul.f32 %v7437_v11, %v15044_v48  ;;  %v4404_v11 = vld [vmem:[#allocation5 + $0x170] sm:$0xff] }
0x135d   :  { %v14217_v63 = vsub.f32 %v14126_v38, %v7488_v58  ;;  %v4405_v58 = vld [vmem:[#allocation5 + $0x178] sm:$0xff] }
0x135e   :  { %v14223_v56 = vsub.f32 %v14131_v28, %v7491_v57  ;;  %8075 = vmatpush.msra.mxu1 %v4405_v58  ;;  %v4403_v57 = vld [vmem:[#allocation5 + $0x168] sm:$0xff] }
0x135f   :  { %v7536_v18 = vmul.f32 %v14217_v63, %v14217_v63 }
0x1360   :  { %v7419_v10 = vpop.xlane.xlu1 %7418  ;;  %v7539_v2 = vmul.f32 %v14223_v56, %v14223_v56  ;;  %8076 = vmatpush.msra.mxu1 %v4404_v11 }
0x1361   :  { %v7485_v61 = vmul.f32 %v7419_v10, %v15044_v48  ;;  %v7570_v14 = vsel %vm300_vm1, %v7536_v18, 0.0 }
0x1362   :  { %7571 = vadd.xlane.f32.xlu0 %v7570_v14  ;;  %v7579_v55 = vsel %vm300_vm1, %v7539_v2, 0.0  ;;  %v7434_v22 = vpop.xlane.xlu2 %7433  ;;  %8077 = vmatpush.msra.mxu1 %v4403_v57 }
0x1363   :  { %v14229_v34 = vsub.f32 %v14142_v13, %v7485_v61  ;;  %v7535_v13 = vmul.f32 %v14236_v25, %v14236_v25  ;;  %v7490_v31 = vmul.f32 %v7434_v22, %v15044_v48  ;;  %v14275_v22 = vld [vmem:[#allocation5 + $0x20a] ss:$0 sm:$0xff] }
0x1365   :  { %v7533_v38 = vmul.f32 %v14229_v34, %v14229_v34  ;;  %v7567_v42 = vsel %vm300_vm1, %v7535_v13, 0.0  ;;  %v14255_v41 = vsub.f32 %v14145_v46, %v7490_v31 }
0x1367   :  { %v7561_v28 = vsel %vm300_vm1, %v7533_v38, 0.0  ;;  %v7538_v20 = vmul.f32 %v14255_v41, %v14255_v41 }
0x1368   :  { %7562 = vadd.xlane.f32.xlu2 %v7561_v28  ;;  %v7431_v59 = vpop.xlane.xlu1 %7430 }
0x1369   :  { %v7576_v18 = vsel %vm300_vm1, %v7538_v20, 0.0  ;;  %v7489_v14 = vmul.f32 %v7431_v59, %v15044_v48  ;;  %v7376_v59 = vsel %vm1057_vm12, %v13725_v8, %v14102_v36  ;;  %v14280_v20 = vld [vmem:[#allocation5 + $0x20b] ss:$0 sm:$0xff] }
0x136a   :  { %7580 = vadd.xlane.f32.xlu0 %v7579_v55 }
0x136b   :  { %v14263_v53 = vsub.f32 %v14154_v15, %v7489_v14 }
0x136d   :  { %v7537_v28 = vmul.f32 %v14263_v53, %v14263_v53 }
0x1370   :  { %7568 = vadd.xlane.f32.xlu2 %v7567_v42 }
0x1373   :  { %7329 = vrot.lane.b32.xlu1 %v7217_v29, %s10022_s24  ;;  %v7573_v29 = vsel %vm300_vm1, %v7537_v28, 0.0 }
0x1377   :  { %v7440_v3 = vpop.xlane.xlu1 %7439 }
0x1378   :  { %v7492_v47 = vmul.f32 %v7440_v3, %v15044_v48 }
0x137a   :  { %v14246_v51 = vsub.f32 %v14161_v52, %v7492_v47 }
0x137c   :  { %v7540_v30 = vmul.f32 %v14246_v51, %v14246_v51 }
0x137e   :  { %v7582_v39 = vsel %vm300_vm1, %v7540_v30, 0.0  ;;  %v15048_v30 = vld [vmem:[#allocation52_spill] sm:$0xff] }
0x137f   :  { %7583 = vadd.xlane.f32.xlu0 %v7582_v39  ;;  %v14273_v39 = vadd.f32 %v7376_v59, %v15048_v30  ;;  %v7380_v30 = vsel %vm1057_vm12, %v13761_v9, %v14198_v16  ;;  %v6626_v9 = vmul.f32 0.25, %v14085_v44  ;;  %v7378_v16 = vsel %vm1057_vm12, %v13745_v24, %v14165_v4 }
0x1381   :  { %v7450_v58 = vsel %vm300_vm1, %v14273_v39, 0.0  ;;  %v14342_v44 = vadd.f32 %v6626_v9, %v15024_v43 }
0x1388   :  { %7327 = vrot.lane.b32.xlu2 %v7214_v26, %s10022_s24 }
0x1393   :  { %7333 = vrot.lane.b32.xlu0 %v7258_v23, %s10022_s24  ;;  %v7220_v23 = vpop.f32.mrf.mxu0 }
0x1397   :  { %v7443_v49 = vpop.xlane.xlu0 %7442 }
0x139d   :  { %7577 = vadd.xlane.f32.xlu1 %v7576_v18  ;;  %v15049_v18 = vld [vmem:[#allocation56_spill] sm:$0xff] }
0x139f   :  { %v7557_v10 = vpop.xlane.xlu0 %7556 }
0x13a0   :  { %v7627_v61 = vmul.f32 %v7557_v10, %v15044_v48 }
0x13a2   :  { %v7651_v46 = vadd.f32 1e-05, %v7627_v61 }
0x13a4   :  { %9813 = vrsqrt.f32 %v7651_v46  ;;  %vm7681_vm5 = vweird.f32 %v7651_v46 }
0x13aa   :  { %v9814_v38 = vpop.eup %9813 }
0x13ab   :  { %v7676_v2 = vmul.f32 %v9814_v38, %v7651_v46  ;;  %vm7682_vm4 = vweird.f32 %v9814_v38 }
0x13ac   :  { %vm7683_vm6 = vmor %vm7681_vm5, %vm7682_vm4 }
0x13ad   :  { %v7677_v26 = vmul.f32 %v9814_v38, %v7676_v2  ;;  %v7446_v55 = vpop.xlane.xlu1 %7445  ;;  %v7493_v2 = vmul.f32 %v7443_v49, %v15044_v48 }
0x13ae   :  { %v7494_v42 = vmul.f32 %v7446_v55, %v15044_v48 }
0x13af   :  { %v7678_v13 = vmul.f32 0.5, %v7677_v26  ;;  %v14307_v26 = vsub.f32 %v14173_v50, %v7493_v2 }
0x13b0   :  { %v14278_v31 = vsub.f32 %v14193_v17, %v7494_v42  ;;  %v7379_v17 = vsel %vm1057_vm12, %v13753_v35, %v14167_v32 }
0x13b1   :  { %v7679_v3 = vsub.f32 1.5, %v7678_v13  ;;  %7574 = vadd.xlane.f32.xlu2 %v7573_v29  ;;  %v14294_v10 = vadd.f32 %v7379_v17, %v15049_v18  ;;  %v7541_v29 = vmul.f32 %v14307_v26, %v14307_v26 }
0x13b2   :  { %v7542_v11 = vmul.f32 %v14278_v31, %v14278_v31 }
0x13b3   :  { %v7680_v47 = vmul.f32 %v9814_v38, %v7679_v3  ;;  %v7459_v35 = vsel %vm300_vm1, %v14294_v10, 0.0  ;;  %v7585_v50 = vsel %vm300_vm1, %v7541_v29, 0.0 }
0x13b4   :  { %v7588_v61 = vsel %vm300_vm1, %v7542_v11, 0.0 }
0x13b5   :  { %v7684_v40 = vsel %vm7683_vm6, %v9814_v38, %v7680_v47  ;;  %v6625_v38 = vmul.f32 0.25, %v14076_v19 }
0x13b6   :  { %v7915_v8 = vmul.f32 %v7684_v40, %v14176_v7  ;;  %7331 = vrot.lane.b32.xlu1 %v7220_v23, %s10022_s24 }
0x13b7   :  { %v14303_v32 = vadd.f32 %v6625_v38, %v15024_v43 }
0x13b8   :  { %v7940_v36 = vmul.f32 %v14275_v22, %v7915_v8  ;;  %v14320_v8 = vpop.xlane.xlu0 %7454 }
0x13b9   :  { %7451 = vadd.xlane.f32.xlu2 %v7450_v58  ;;  %v6717_v13 = vsel %vm1473_vm2, %v14303_v32, -inf  ;;  %v15050_v58 = vld [vmem:[#allocation60_spill] sm:$0xff] }
0x13ba   :  { %v7965_v57 = vadd.f32 %v14280_v20, %v7940_v36  ;;  %v14324_v11 = vadd.f32 %v7380_v30, %v15050_v58 }
0x13bc   :  { %8939 = vmatmul.msk.f32.vlgmr.msra.gmra.mxu1 %vm300_vm1, %v7965_v57  ;;  %v7560_v7 = vpop.xlane.xlu2 %7559  ;;  %v7462_v18 = vsel %vm300_vm1, %v14324_v11, 0.0 }
0x13bd   :  { %v7628_v46 = vmul.f32 %v7560_v7, %v15044_v48  ;;  %7589 = vadd.xlane.f32.xlu0 %v7588_v61  ;;  %v7495_v61 = vmul.f32 %v14206_v33, %v15044_v48  ;;  %v6720_v33 = vsel %vm1473_vm2, %v14342_v44, -inf }
0x13bf   :  { %v7652_v14 = vadd.f32 1e-05, %v7628_v46  ;;  %v14347_v2 = vsub.f32 %v14105_v21, %v7495_v61 }
0x13c1   :  { %9815 = vrsqrt.f32 %v7652_v14  ;;  %7460 = vadd.xlane.f32.xlu2 %v7459_v35  ;;  %vm7691_vm8 = vweird.f32 %v7652_v14 }
0x13c7   :  { %v9816_v28 = vpop.eup %9815 }
0x13c8   :  { %v7686_v55 = vmul.f32 %v9816_v28, %v7652_v14  ;;  %vm7692_vm7 = vweird.f32 %v9816_v28 }
0x13c9   :  { %6718 = vmax.xlane.f32.xlu2 %v6717_v13  ;;  %vm7693_vm9 = vmor %vm7691_vm8, %vm7692_vm7 }
0x13ca   :  { %v7687_v19 = vmul.f32 %v9816_v28, %v7686_v55 }
0x13cc   :  { %v7688_v42 = vmul.f32 0.5, %v7687_v19 }
0x13cd   :  { %v7566_v59 = vpop.xlane.xlu1 %7565 }
0x13ce   :  { %v7689_v3 = vsub.f32 1.5, %v7688_v42  ;;  %v7630_v47 = vmul.f32 %v7566_v59, %v15044_v48  ;;  %v7543_v42 = vmul.f32 %v14347_v2, %v14347_v2 }
0x13d0   :  { %v7690_v49 = vmul.f32 %v9816_v28, %v7689_v3  ;;  %v14318_v40 = vadd.f32 1e-05, %v7630_v47 }
0x13d1   :  { %7586 = vadd.xlane.f32.xlu2 %v7585_v50  ;;  %v7591_v50 = vsel %vm300_vm1, %v7543_v42, 0.0 }
0x13d2   :  { %v7694_v23 = vsel %vm7693_vm9, %v9816_v28, %v7690_v49  ;;  %9817 = vrsqrt.f32 %v14318_v40  ;;  %vm7711_vm15 = vweird.f32 %v14318_v40 }
0x13d3   :  { %v7916_v36 = vmul.f32 %v7694_v23, %v14201_v37  ;;  %v15051_v37 = vld [vmem:[#allocation39_spill] sm:$0xff] }
0x13d4   :  { %v14337_v7 = vadd.f32 %v7378_v16, %v15051_v37  ;;  %v15052_v16 = vld [vmem:[#allocation48_spill] sm:$0xff] }
0x13d5   :  { %v7941_v17 = vmul.f32 %v14275_v22, %v7916_v36  ;;  %v7572_v46 = vpop.xlane.xlu0 %7571 }
0x13d6   :  { %v7632_v4 = vmul.f32 %v7572_v46, %v15044_v48  ;;  %v7456_v55 = vsel %vm300_vm1, %v14337_v7, 0.0 }
0x13d7   :  { %v7966_v57 = vadd.f32 %v14280_v20, %v7941_v17 }
0x13d8   :  { %v9818_v38 = vpop.eup %9817  ;;  %v14354_v43 = vadd.f32 1e-05, %v7632_v4 }
0x13d9   :  { %7463 = vadd.xlane.f32.xlu2 %v7462_v18  ;;  %8940 = vmatmul.msk.f32.gmra.mxu1 %vm300_vm1, %v7966_v57  ;;  %v7706_v28 = vmul.f32 %v9818_v38, %v14318_v40  ;;  %vm7712_vm11 = vweird.f32 %v9818_v38 }
0x13da   :  { %vm7713_vm0 = vmor %vm7711_vm15, %vm7712_vm11  ;;  %vm7731_vm7 = vweird.f32 %v14354_v43 }
0x13db   :  { %v7563_v14 = vpop.xlane.xlu2 %7562  ;;  %v7707_v13 = vmul.f32 %v9818_v38, %v7706_v28 }
0x13dc   :  { %v7629_v24 = vmul.f32 %v7563_v14, %v15044_v48 }
0x13dd   :  { %v7708_v47 = vmul.f32 0.5, %v7707_v13 }
0x13de   :  { %v7653_v35 = vadd.f32 1e-05, %v7629_v24 }
0x13df   :  { %v7709_v23 = vsub.f32 1.5, %v7708_v47 }
0x13e0   :  { %9819 = vrsqrt.f32 %v7653_v35  ;;  %7457 = vadd.xlane.f32.xlu1 %v7456_v55  ;;  %vm7701_vm13 = vweird.f32 %v7653_v35 }
0x13e1   :  { %6721 = vmax.xlane.f32.xlu2 %v6720_v33  ;;  %9821 = vrsqrt.f32 %v14354_v43  ;;  %v7710_v46 = vmul.f32 %v9818_v38, %v7709_v23 }
0x13e3   :  { %v7569_v19 = vpop.xlane.xlu2 %7568  ;;  %v7714_v13 = vsel %vm7713_vm0, %v9818_v38, %v7710_v46 }
0x13e4   :  { %v7631_v29 = vmul.f32 %v7569_v19, %v15044_v48  ;;  %v7918_v40 = vmul.f32 %v7714_v13, %v14210_v45 }
0x13e5   :  { %v7330_v61 = vpop.permute.xlu1 %7329 }
0x13e6   :  { %v9820_v59 = vpop.eup %9819  ;;  %v7655_v3 = vadd.f32 1e-05, %v7631_v29  ;;  %v7382_v33 = vsel %vm1057_vm12, %v13820_v62, %v7330_v61  ;;  %v15053_v29 = vld [vmem:[#allocation45_spill] sm:$0xff]  ;;  %v7943_v38 = vmul.f32 %v14275_v22, %v7918_v40 }
0x13e7   :  { %v7696_v49 = vmul.f32 %v9820_v59, %v7653_v35  ;;  %v9822_v17 = vpop.eup %9821  ;;  %vm7702_vm10 = vweird.f32 %v9820_v59  ;;  %v14374_v47 = vadd.f32 %v7382_v33, %v15053_v29  ;;  %v4420_v33 = vld [vmem:[#allocation5 + $0x1f0] sm:$0xff]  ;;  %v4417_v29 = vld [vmem:[#allocation5 + $0x1d8] sm:$0xff]  ;;  %v4415_v40 = vld [vmem:[#allocation5 + $0x1c8] sm:$0xff] }
0x13e8   :  { %9823 = vrsqrt.f32 %v7655_v3  ;;  %7592 = vadd.xlane.f32.xlu1 %v7591_v50  ;;  %v7726_v14 = vmul.f32 %v9822_v17, %v14354_v43  ;;  %vm7703_vm14 = vmor %vm7701_vm13, %vm7702_vm10  ;;  %v7581_v50 = vpop.xlane.xlu0 %7580  ;;  %vm7721_vm4 = vweird.f32 %v7655_v3  ;;  %vm7732_vm6 = vweird.f32 %v9822_v17 }
0x13e9   :  { %v7697_v30 = vmul.f32 %v9820_v59, %v7696_v49  ;;  %vm7733_vm8 = vmor %vm7731_vm7, %vm7732_vm6 }
0x13ea   :  { %v7727_v19 = vmul.f32 %v9822_v17, %v7726_v14 }
0x13eb   :  { %v7698_v36 = vmul.f32 0.5, %v7697_v30  ;;  %v7328_v58 = vpop.permute.xlu2 %7327 }
0x13ec   :  { %v7381_v57 = vsel %vm1057_vm12, %v13817_v6, %v7328_v58  ;;  %v7728_v23 = vmul.f32 0.5, %v7727_v19  ;;  %v4418_v19 = vld [vmem:[#allocation5 + $0x1e0] sm:$0xff] }
0x13ed   :  { %v7699_v9 = vsub.f32 1.5, %v7698_v36  ;;  %v14364_v18 = vadd.f32 %v7381_v57, %v15052_v16 }
0x13ee   :  { %v9824_v37 = vpop.eup %9823  ;;  %v7729_v36 = vsub.f32 1.5, %v7728_v23 }
0x13ef   :  { %v7700_v24 = vmul.f32 %v9820_v59, %v7699_v9  ;;  %v7716_v4 = vmul.f32 %v9824_v37, %v7655_v3  ;;  %v7465_v28 = vsel %vm300_vm1, %v14364_v18, 0.0  ;;  %vm7722_vm3 = vweird.f32 %v9824_v37 }
0x13f0   :  { %7466 = vadd.xlane.f32.xlu2 %v7465_v28  ;;  %vm7723_vm5 = vmor %vm7721_vm4, %vm7722_vm3  ;;  %v7968_v9 = vadd.f32 %v14280_v20, %v7943_v38  ;;  %v7730_v16 = vmul.f32 %v9822_v17, %v7729_v36 }
0x13f1   :  { %v7704_v6 = vsel %vm7703_vm14, %v9820_v59, %v7700_v24  ;;  %v7717_v55 = vmul.f32 %v9824_v37, %v7716_v4  ;;  %v15054_v24 = vld [vmem:[#allocation61_spill] sm:$0xff] }
0x13f2   :  { %v7917_v35 = vmul.f32 %v7704_v6, %v14229_v34  ;;  %v7468_v34 = vsel %vm300_vm1, %v14374_v47, 0.0  ;;  %v7584_v57 = vpop.xlane.xlu0 %7583  ;;  %v7734_v61 = vsel %vm7733_vm8, %v9822_v17, %v7730_v16 }
0x13f3   :  { %v7718_v42 = vmul.f32 0.5, %v7717_v55  ;;  %v7920_v14 = vmul.f32 %v7734_v61, %v14217_v63  ;;  %v4422_v63 = vld [vmem:[#allocation5 + $0x200] sm:$0xff]  ;;  %v7636_v38 = vmul.f32 %v7584_v57, %v15044_v48 }
0x13f4   :  { %v7942_v49 = vmul.f32 %v14275_v22, %v7917_v35  ;;  %8367 = vmatpush.msrb.mxu3 %v4422_v63  ;;  %v4419_v35 = vld [vmem:[#allocation5 + $0x1e8] sm:$0xff] }
0x13f5   :  { %v7719_v30 = vsub.f32 1.5, %v7718_v42  ;;  %v7945_v28 = vmul.f32 %v14275_v22, %v7920_v14  ;;  %v7635_v42 = vmul.f32 %v7581_v50, %v15044_v48  ;;  %v4413_v50 = vld [vmem:[#allocation5 + $0x1b8] sm:$0xff]  ;;  %v14417_v61 = vadd.f32 1e-05, %v7636_v38 }
0x13f6   :  { %v7967_v59 = vadd.f32 %v14280_v20, %v7942_v49  ;;  %v4416_v49 = vld [vmem:[#allocation5 + $0x1d0] sm:$0xff] }
0x13f7   :  { %v7720_v62 = vmul.f32 %v9824_v37, %v7719_v30  ;;  %v7970_v17 = vadd.f32 %v14280_v20, %v7945_v28  ;;  %v14406_v30 = vadd.f32 1e-05, %v7635_v42  ;;  %v4407_v42 = vld [vmem:[#allocation5 + $0x188] sm:$0xff]  ;;  %vm7771_vm6 = vweird.f32 %v14417_v61 }
0x13f8   :  { %8941 = vmatmul.msk.f32.gmra.mxu1 %vm300_vm1, %v7967_v59  ;;  %7469 = vadd.xlane.f32.xlu2 %v7468_v34  ;;  %v4414_v59 = vld [vmem:[#allocation5 + $0x1c0] sm:$0xff] }
0x13f9   :  { %v7724_v58 = vsel %vm7723_vm5, %v9824_v37, %v7720_v62  ;;  %vm7761_vm3 = vweird.f32 %v14406_v30 }
0x13fa   :  { %v7919_v45 = vmul.f32 %v7724_v58, %v14236_v25  ;;  %v4412_v58 = vld [vmem:[#allocation5 + $0x1b0] sm:$0xff] }
0x13fc   :  { %v7944_v3 = vmul.f32 %v14275_v22, %v7919_v45 }
0x13fe   :  { %v7969_v25 = vadd.f32 %v14280_v20, %v7944_v3  ;;  %v4411_v3 = vld [vmem:[#allocation5 + $0x1a8] sm:$0xff] }
0x1400   :  { %8942 = vmatmul.msk.f32.gmra.mxu1 %vm300_vm1, %v7968_v9 }
0x1405   :  { %v7334_v46 = vpop.permute.xlu0 %7333 }
0x1406   :  { %v7384_v37 = vsel %vm1057_vm12, %v13865_v54, %v7334_v46  ;;  %v4421_v54 = vld [vmem:[#allocation5 + $0x1f8] sm:$0xff] }
0x1407   :  { %v14393_v4 = vadd.f32 %v7384_v37, %v15054_v24  ;;  %8368 = vmatpush.msrb.mxu3 %v4421_v54  ;;  %v15055_v46 = vld [vmem:[#allocation47_spill] sm:$0xff]  ;;  %v4410_v37 = vld [vmem:[#allocation5 + $0x1a0] sm:$0xff] }
0x1408   :  { %8943 = vmatmul.msk.f32.gmra.mxu1 %vm300_vm1, %v7969_v25 }
0x1409   :  { %v7474_v43 = vsel %vm300_vm1, %v14393_v4, 0.0  ;;  %8369 = vmatpush.msrb.mxu3 %v4420_v33 }
0x140a   :  { %7475 = vadd.xlane.f32.xlu0 %v7474_v43 }
0x140b   :  { %8370 = vmatpush.msrb.mxu3 %v4419_v35 }
0x140d   :  { %8371 = vmatpush.msrb.mxu3 %v4418_v19 }
0x140f   :  { %8372 = vmatpush.msrb.mxu3 %v4417_v29 }
0x1410   :  { %8944 = vmatmul.msk.f32.gmra.mxu1 %vm300_vm1, %v7970_v17  ;;  %v7578_v6 = vpop.xlane.xlu1 %7577  ;;  %v4409_v17 = vld [vmem:[#allocation5 + $0x198] sm:$0xff] }
0x1411   :  { %v7634_v55 = vmul.f32 %v7578_v6, %v15044_v48  ;;  %8373 = vmatpush.msrb.mxu3 %v4416_v49 }
0x1413   :  { %v14402_v13 = vadd.f32 1e-05, %v7634_v55  ;;  %8374 = vmatpush.msrb.mxu3 %v4415_v40  ;;  %v4408_v55 = vld [vmem:[#allocation5 + $0x190] sm:$0xff] }
0x1415   :  { %9825 = vrsqrt.f32 %v14402_v13  ;;  %8375 = vmatpush.msrb.mxu3 %v4414_v59  ;;  %vm7751_vm14 = vweird.f32 %v14402_v13 }
0x1416   :  { %9827 = vrsqrt.f32 %v14406_v30 }
0x1417   :  { %8376 = vmatpush.msrb.mxu3 %v4413_v50 }
0x1419   :  { %8377 = vmatpush.msrb.mxu3 %v4412_v58 }
0x141b   :  { %v14408_v62 = vpop.eup %9825  ;;  %8378 = vmatpush.msrb.mxu3 %v4411_v3 }
0x141c   :  { %v7746_v45 = vmul.f32 %v14408_v62, %v14402_v13  ;;  %v14422_v57 = vpop.eup %9827  ;;  %vm7752_vm10 = vweird.f32 %v14408_v62 }
0x141d   :  { %8379 = vmatpush.msrb.mxu3 %v4410_v37  ;;  %v7756_v63 = vmul.f32 %v14422_v57, %v14406_v30  ;;  %vm7753_vm15 = vmor %vm7751_vm14, %vm7752_vm10  ;;  %vm7762_vm0 = vweird.f32 %v14422_v57 }
0x141e   :  { %v7747_v25 = vmul.f32 %v14408_v62, %v7746_v45  ;;  %vm7763_vm4 = vmor %vm7761_vm3, %vm7762_vm0 }
0x141f   :  { %8380 = vmatpush.msrb.mxu3 %v4409_v17  ;;  %v7757_v29 = vmul.f32 %v14422_v57, %v7756_v63 }
0x1420   :  { %v7748_v33 = vmul.f32 0.5, %v7747_v25 }
0x1421   :  { %8381 = vmatpush.msrb.mxu3 %v4408_v55  ;;  %v7758_v58 = vmul.f32 0.5, %v7757_v29 }
0x1423   :  { %8382 = vmatpush.msrb.mxu3 %v4407_v42 }
0x1424   :  { %v7575_v23 = vpop.xlane.xlu2 %7574 }
0x1425   :  { %v7633_v34 = vmul.f32 %v7575_v23, %v15044_v48 }
0x1427   :  { %v7657_v36 = vadd.f32 1e-05, %v7633_v34 }
0x1428   :  { %v7332_v9 = vpop.permute.xlu1 %7331 }
0x1429   :  { %9829 = vrsqrt.f32 %v7657_v36  ;;  %v7383_v16 = vsel %vm1057_vm12, %v13822_v60, %v7332_v9  ;;  %v7497_v60 = vmul.f32 %v14320_v8, %v15044_v48  ;;  %v14448_v9 = vld [vmem:[#allocation5 + $0x20d] ss:$0 sm:$0xff]  ;;  %vm7741_vm11 = vweird.f32 %v7657_v36 }
0x142a   :  { %v14420_v14 = vadd.f32 %v7383_v16, %v15055_v46  ;;  %9831 = vrsqrt.f32 %v14417_v61 }
0x142b   :  { %v14437_v8 = vsub.f32 %v14186_v27, %v7497_v60 }
0x142c   :  { %v7452_v24 = vpop.xlane.xlu2 %7451  ;;  %v7471_v43 = vsel %vm300_vm1, %v14420_v14, 0.0 }
0x142d   :  { %v7496_v28 = vmul.f32 %v7452_v24, %v15044_v48  ;;  %7472 = vadd.xlane.f32.xlu2 %v7471_v43  ;;  %v7545_v38 = vmul.f32 %v14437_v8, %v14437_v8 }
0x142f   :  { %v9830_v6 = vpop.eup %9829  ;;  %v14434_v54 = vsub.f32 %v14273_v39, %v7496_v28  ;;  %v7749_v39 = vsub.f32 1.5, %v7748_v33  ;;  %v7597_v43 = vsel %vm300_vm1, %v7545_v38, 0.0  ;;  %v7759_v28 = vsub.f32 1.5, %v7758_v58 }
0x1430   :  { %v7736_v35 = vmul.f32 %v9830_v6, %v7657_v36  ;;  %v14443_v59 = vpop.eup %9831  ;;  %v7590_v34 = vpop.xlane.xlu0 %7589  ;;  %vm7742_vm9 = vweird.f32 %v9830_v6 }
0x1431   :  { %v7544_v19 = vmul.f32 %v14434_v54, %v14434_v54  ;;  %v7766_v16 = vmul.f32 %v14443_v59, %v14417_v61  ;;  %v7638_v3 = vmul.f32 %v7590_v34, %v15044_v48  ;;  %v7750_v37 = vmul.f32 %v14408_v62, %v7749_v39  ;;  %vm7743_vm13 = vmor %vm7741_vm11, %vm7742_vm9 }
0x1432   :  { %v7737_v49 = vmul.f32 %v9830_v6, %v7736_v35  ;;  %vm7772_vm5 = vweird.f32 %v14443_v59 }
0x1433   :  { %v7594_v40 = vsel %vm300_vm1, %v7544_v19, 0.0  ;;  %v7767_v63 = vmul.f32 %v14443_v59, %v7766_v16  ;;  %v14465_v33 = vadd.f32 1e-05, %v7638_v3  ;;  %v7754_v35 = vsel %vm7753_vm15, %v14408_v62, %v7750_v37  ;;  %vm7773_vm7 = vmor %vm7771_vm6, %vm7772_vm5 }
0x1434   :  { %v7738_v23 = vmul.f32 0.5, %v7737_v49  ;;  %7595 = vadd.xlane.f32.xlu1 %v7594_v40  ;;  %v7461_v50 = vpop.xlane.xlu2 %7460 }
0x1435   :  { %v7499_v27 = vmul.f32 %v7461_v50, %v15044_v48  ;;  %v7768_v49 = vmul.f32 0.5, %v7767_v63  ;;  %9833 = vrsqrt.f32 %v14465_v33 }
0x1436   :  { %v7739_v45 = vsub.f32 1.5, %v7738_v23 }
0x1437   :  { %v14454_v46 = vsub.f32 %v14294_v10, %v7499_v27  ;;  %v7769_v34 = vsub.f32 1.5, %v7768_v49 }
0x1438   :  { %v7740_v25 = vmul.f32 %v9830_v6, %v7739_v45 }
0x1439   :  { %v8079_v24 = vpop.f32.mrf.mxu1  ;;  %v7547_v60 = vmul.f32 %v14454_v46, %v14454_v46  ;;  %v7770_v30 = vmul.f32 %v14443_v59, %v7769_v34 }
0x143a   :  { %v7744_v17 = vsel %vm7743_vm13, %v9830_v6, %v7740_v25  ;;  %v8080_v10 = vadd.f32 %v14448_v9, %v8079_v24  ;;  %v7760_v6 = vmul.f32 %v14422_v57, %v7759_v28  ;;  %vm7791_vm13 = vweird.f32 %v14465_v33 }
0x143b   :  { %v7921_v55 = vmul.f32 %v7744_v17, %v14263_v53  ;;  %v7603_v36 = vsel %vm300_vm1, %v7547_v60, 0.0  ;;  %v7922_v53 = vmul.f32 %v7754_v35, %v14255_v41  ;;  %v14479_v58 = vpop.eup %9833  ;;  %v7774_v37 = vsel %vm7773_vm7, %v14443_v59, %v7770_v30 }
0x143c   :  { %v8175_v19 = vmul.f32 0.044715, %v8080_v10  ;;  %7598 = vadd.xlane.f32.xlu1 %v7597_v43  ;;  %7604 = vadd.xlane.f32.xlu2 %v7603_v36  ;;  %v6719_v42 = vpop.xlane.xlu2 %6718  ;;  %v7764_v23 = vsel %vm7763_vm4, %v14422_v57, %v7760_v6  ;;  %v7786_v57 = vmul.f32 %v14479_v58, %v14465_v33  ;;  %v8151_v60 = vmul.f32 0.5, %v8080_v10 }
0x143d   :  { %v7946_v13 = vmul.f32 %v14275_v22, %v7921_v55  ;;  %v7947_v50 = vmul.f32 %v14275_v22, %v7922_v53  ;;  %v7923_v45 = vmul.f32 %v7764_v23, %v14223_v56  ;;  %v7924_v63 = vmul.f32 %v7774_v37, %v14246_v51 }
0x143e   :  { %v8199_v29 = vmul.f32 %v8175_v19, %v8080_v10  ;;  %v7787_v24 = vmul.f32 %v14479_v58, %v7786_v57  ;;  %v6745_v61 = vsub.f32 %v14303_v32, %v6719_v42  ;;  %vm7792_vm9 = vweird.f32 %v14479_v58 }
0x143f   :  { %v7971_v40 = vadd.f32 %v14280_v20, %v7946_v13  ;;  %v7972_v3 = vadd.f32 %v14280_v20, %v7947_v50  ;;  %v7948_v56 = vmul.f32 %v14275_v22, %v7923_v45  ;;  %v7949_v51 = vmul.f32 %v14275_v22, %v7924_v63  ;;  %vm7793_vm14 = vmor %vm7791_vm13, %vm7792_vm9 }
0x1440   :  { %v8223_v39 = vmul.f32 %v8199_v29, %v8080_v10  ;;  %v7788_v19 = vmul.f32 0.5, %v7787_v24  ;;  %v6791_v29 = vmul.f32 1.442695, %v6745_v61 }
0x1441   :  { %8945 = vmatmul.msk.f32.gmra.mxu1 %vm300_vm1, %v7971_v40  ;;  %v7973_v59 = vadd.f32 %v14280_v20, %v7948_v56  ;;  %v7974_v50 = vadd.f32 %v14280_v20, %v7949_v51 }
0x1442   :  { %v8247_v62 = vadd.f32 %v8223_v39, %v8080_v10 }
0x1444   :  { %v8271_v27 = vmul.f32 0.7978846, %v8247_v62  ;;  %v7587_v38 = vpop.xlane.xlu2 %7586 }
0x1445   :  { %v7637_v41 = vmul.f32 %v7587_v38, %v15044_v48 }
0x1446   :  { %9835 = vtanh.f32 %v8271_v27 }
0x1447   :  { %v7661_v16 = vadd.f32 1e-05, %v7637_v41 }
0x1449   :  { %9837 = vrsqrt.f32 %v7661_v16  ;;  %8946 = vmatmul.msk.f32.gmra.mxu1 %vm300_vm1, %v7972_v3  ;;  %vm7781_vm10 = vweird.f32 %v7661_v16 }
0x144a   :  { %9839 = vpow2.f32 %v6791_v29 }
0x144c   :  { %v9836_v25 = vpop.eup %9835  ;;  %v7464_v43 = vpop.xlane.xlu2 %7463 }
0x144d   :  { %v7500_v28 = vmul.f32 %v7464_v43, %v15044_v48  ;;  %v8319_v17 = vadd.f32 1.0, %v9836_v25 }
0x144f   :  { %v9838_v55 = vpop.eup %9837  ;;  %v14497_v36 = vsub.f32 %v14324_v11, %v7500_v28  ;;  %v8343_v35 = vmul.f32 %v8319_v17, %v8151_v60  ;;  %v7789_v11 = vsub.f32 1.5, %v7788_v19 }
0x1450   :  { %v7776_v13 = vmul.f32 %v9838_v55, %v7661_v16  ;;  %vm7782_vm8 = vweird.f32 %v9838_v55  ;;  %v14524_v43 = vpop.eup %9839 }
0x1451   :  { %8947 = vmatmul.msk.f32.gmra.mxu1 %vm300_vm1, %v7973_v59  ;;  %8383 = vmatmul.f32.vlgmr.msrb.gmra.mxu3 %v8343_v35  ;;  %v7548_v10 = vmul.f32 %v14497_v36, %v14497_v36  ;;  %v7790_v41 = vmul.f32 %v14479_v58, %v7789_v11  ;;  %vm7783_vm11 = vmor %vm7781_vm10, %vm7782_vm8  ;;  %v6861_v59 = vsel %vm1473_vm2, %v14524_v43, 0.0 }
0x1452   :  { %v7777_v6 = vmul.f32 %v9838_v55, %v7776_v13 }
0x1453   :  { %v7458_v49 = vpop.xlane.xlu1 %7457  ;;  %v7606_v32 = vsel %vm300_vm1, %v7548_v10, 0.0  ;;  %v7794_v25 = vsel %vm7793_vm14, %v14479_v58, %v7790_v41 }
0x1454   :  { %v7778_v42 = vmul.f32 0.5, %v7777_v6  ;;  %v7498_v53 = vmul.f32 %v7458_v49, %v15044_v48  ;;  %7607 = vadd.xlane.f32.xlu0 %v7606_v32  ;;  %v6722_v40 = vpop.xlane.xlu2 %6721  ;;  %v7926_v63 = vmul.f32 %v7794_v25, %v14278_v31 }
0x1455   :  { %v6746_v39 = vsub.f32 %v14342_v44, %v6722_v40 }
0x1456   :  { %v7779_v62 = vsub.f32 1.5, %v7778_v42  ;;  %v14508_v23 = vsub.f32 %v14337_v7, %v7498_v53  ;;  %v8082_v34 = vpop.f32.mrf.mxu1  ;;  %v7951_v35 = vmul.f32 %v14275_v22, %v7926_v63 }
0x1457   :  { %v6793_v27 = vmul.f32 1.442695, %v6746_v39  ;;  %v8083_v38 = vadd.f32 %v14448_v9, %v8082_v34 }
0x1458   :  { %v7780_v45 = vmul.f32 %v9838_v55, %v7779_v62  ;;  %v7546_v44 = vmul.f32 %v14508_v23, %v14508_v23  ;;  %v7976_v51 = vadd.f32 %v14280_v20, %v7951_v35 }
0x1459   :  { %9841 = vpow2.f32 %v6793_v27  ;;  %v8176_v30 = vmul.f32 0.044715, %v8083_v38  ;;  %8948 = vmatmul.msk.f32.gmra.mxu1 %vm300_vm1, %v7974_v50  ;;  %v8152_v11 = vmul.f32 0.5, %v8083_v38 }
0x145a   :  { %v7784_v3 = vsel %vm7783_vm11, %v9838_v55, %v7780_v45  ;;  %v7600_v57 = vsel %vm300_vm1, %v7546_v44, 0.0 }
0x145b   :  { %v7925_v37 = vmul.f32 %v7784_v3, %v14307_v26  ;;  %v7593_v56 = vpop.xlane.xlu1 %7592  ;;  %7601 = vadd.xlane.f32.xlu1 %v7600_v57  ;;  %v8200_v16 = vmul.f32 %v8176_v30, %v8083_v38 }
0x145c   :  { %v7639_v24 = vmul.f32 %v7593_v56, %v15044_v48 }
0x145d   :  { %v7950_v60 = vmul.f32 %v14275_v22, %v7925_v37  ;;  %v8224_v33 = vmul.f32 %v8200_v16, %v8083_v38 }
0x145e   :  { %v7663_v28 = vadd.f32 1e-05, %v7639_v24 }
0x145f   :  { %v14527_v17 = vpop.eup %9841  ;;  %v7975_v55 = vadd.f32 %v14280_v20, %v7950_v60  ;;  %v8248_v26 = vadd.f32 %v8224_v33, %v8083_v38 }
0x1460   :  { %9843 = vrsqrt.f32 %v7663_v28  ;;  %v6864_v61 = vsel %vm1473_vm2, %v14527_v17, 0.0  ;;  %vm7801_vm0 = vweird.f32 %v7663_v28 }
0x1461   :  { %8949 = vmatmul.msk.f32.gmra.mxu1 %vm300_vm1, %v7975_v55  ;;  %6865 = vadd.xlane.f32.xlu2 %v6864_v61  ;;  %v8272_v58 = vmul.f32 0.7978846, %v8248_v26 }
0x1463   :  { %6862 = vadd.xlane.f32.xlu1 %v6861_v59  ;;  %9845 = vtanh.f32 %v8272_v58  ;;  %v7467_v19 = vpop.xlane.xlu2 %7466 }
0x1464   :  { %v7501_v31 = vmul.f32 %v7467_v19, %v15044_v48 }
0x1466   :  { %v9844_v13 = vpop.eup %9843  ;;  %v14539_v6 = vsub.f32 %v14364_v18, %v7501_v31 }
0x1467   :  { %v7796_v10 = vmul.f32 %v9844_v13, %v7663_v28  ;;  %vm7802_vm15 = vweird.f32 %v9844_v13 }
0x1468   :  { %v7549_v32 = vmul.f32 %v14539_v6, %v14539_v6  ;;  %vm7803_vm3 = vmor %vm7801_vm0, %vm7802_vm15 }
0x1469   :  { %v9846_v29 = vpop.eup %9845  ;;  %v7797_v49 = vmul.f32 %v9844_v13, %v7796_v10  ;;  %8950 = vmatmul.msk.f32.gmra.mxu1 %vm300_vm1, %v7976_v51 }
0x146a   :  { %v8320_v42 = vadd.f32 1.0, %v9846_v29  ;;  %v7609_v40 = vsel %vm300_vm1, %v7549_v32, 0.0 }
0x146b   :  { %v7798_v53 = vmul.f32 0.5, %v7797_v49  ;;  %v7470_v39 = vpop.xlane.xlu2 %7469  ;;  %7610 = vadd.xlane.f32.xlu1 %v7609_v40 }
0x146c   :  { %v8344_v62 = vmul.f32 %v8320_v42, %v8152_v11  ;;  %v7502_v50 = vmul.f32 %v7470_v39, %v15044_v48 }
0x146d   :  { %v7799_v34 = vsub.f32 1.5, %v7798_v53 }
0x146e   :  { %8386 = vmatmul.f32.gmra.mxu3 %v8344_v62  ;;  %v14548_v41 = vsub.f32 %v14374_v47, %v7502_v50 }
0x146f   :  { %v7800_v27 = vmul.f32 %v9844_v13, %v7799_v34 }
0x1470   :  { %v7550_v38 = vmul.f32 %v14548_v41, %v14548_v41 }
0x1471   :  { %v7804_v45 = vsel %vm7803_vm3, %v9844_v13, %v7800_v27 }
0x1472   :  { %v7927_v44 = vmul.f32 %v7804_v45, %v14347_v2  ;;  %v7612_v30 = vsel %vm300_vm1, %v7550_v38, 0.0 }
0x1473   :  { %7613 = vadd.xlane.f32.xlu0 %v7612_v30 }
0x1474   :  { %v7952_v3 = vmul.f32 %v14275_v22, %v7927_v44 }
0x1475   :  { %v8085_v57 = vpop.f32.mrf.mxu1 }
0x1476   :  { %v8086_v37 = vadd.f32 %v14448_v9, %v8085_v57  ;;  %v7977_v56 = vadd.f32 %v14280_v20, %v7952_v3 }
0x1478   :  { %v8177_v16 = vmul.f32 0.044715, %v8086_v37  ;;  %8951 = vmatmul.msk.f32.gmra.mxu1 %vm300_vm1, %v7977_v56  ;;  %v8153_v49 = vmul.f32 0.5, %v8086_v37 }
0x147a   :  { %v8201_v47 = vmul.f32 %v8177_v16, %v8086_v37 }
0x147c   :  { %v8225_v25 = vmul.f32 %v8201_v47, %v8086_v37 }
0x147d   :  { %v8088_v24 = vpop.f32.mrf.mxu1  ;;  %v7476_v60 = vpop.xlane.xlu0 %7475 }
0x147e   :  { %v8089_v33 = vadd.f32 %v14448_v9, %v8088_v24  ;;  %v7504_v2 = vmul.f32 %v7476_v60, %v15044_v48  ;;  %v8249_v28 = vadd.f32 %v8225_v25, %v8086_v37 }
0x1480   :  { %v8178_v63 = vmul.f32 0.044715, %v8089_v33  ;;  %v14561_v55 = vsub.f32 %v14393_v4, %v7504_v2  ;;  %v8273_v26 = vmul.f32 0.7978846, %v8249_v28  ;;  %v8154_v45 = vmul.f32 0.5, %v8089_v33 }
0x1482   :  { %v7552_v61 = vmul.f32 %v14561_v55, %v14561_v55  ;;  %9847 = vtanh.f32 %v8273_v26  ;;  %v8202_v58 = vmul.f32 %v8178_v63, %v8089_v33 }
0x1484   :  { %v7618_v59 = vsel %vm300_vm1, %v7552_v61, 0.0  ;;  %v8226_v35 = vmul.f32 %v8202_v58, %v8089_v33 }
0x1485   :  { %v8091_v19 = vpop.f32.mrf.mxu1  ;;  %7619 = vadd.xlane.f32.xlu1 %v7618_v59 }
0x1486   :  { %v8092_v31 = vadd.f32 %v14448_v9, %v8091_v19  ;;  %v8250_v13 = vadd.f32 %v8226_v35, %v8089_v33 }
0x1488   :  { %v9848_v10 = vpop.eup %9847  ;;  %v8179_v51 = vmul.f32 0.044715, %v8092_v31  ;;  %v8274_v29 = vmul.f32 0.7978846, %v8250_v13  ;;  %v8155_v16 = vmul.f32 0.5, %v8092_v31 }
0x1489   :  { %v8321_v32 = vadd.f32 1.0, %v9848_v10 }
0x148a   :  { %9849 = vtanh.f32 %v8274_v29  ;;  %v8203_v11 = vmul.f32 %v8179_v51, %v8092_v31 }
0x148b   :  { %v8345_v42 = vmul.f32 %v8321_v32, %v8153_v49 }
0x148c   :  { %v8227_v53 = vmul.f32 %v8203_v11, %v8092_v31 }
0x148d   :  { %v8094_v40 = vpop.f32.mrf.mxu1  ;;  %8388 = vmatmul.f32.gmra.mxu3 %v8345_v42 }
0x148e   :  { %v8095_v39 = vadd.f32 %v14448_v9, %v8094_v40  ;;  %v8251_v62 = vadd.f32 %v8227_v53, %v8092_v31 }
0x1490   :  { %v9850_v34 = vpop.eup %9849  ;;  %v8180_v50 = vmul.f32 0.044715, %v8095_v39  ;;  %v8275_v27 = vmul.f32 0.7978846, %v8251_v62  ;;  %v8156_v28 = vmul.f32 0.5, %v8095_v39 }
0x1491   :  { %v8322_v38 = vadd.f32 1.0, %v9850_v34 }
0x1492   :  { %9851 = vtanh.f32 %v8275_v27  ;;  %v8204_v44 = vmul.f32 %v8180_v50, %v8095_v39 }
0x1493   :  { %v8346_v30 = vmul.f32 %v8322_v38, %v8154_v45 }
0x1494   :  { %v8228_v3 = vmul.f32 %v8204_v44, %v8095_v39 }
0x1495   :  { %8390 = vmatmul.f32.gmra.mxu3 %v8346_v30 }
0x1496   :  { %v8252_v57 = vadd.f32 %v8228_v3, %v8095_v39 }
0x1498   :  { %v9852_v37 = vpop.eup %9851  ;;  %v8276_v56 = vmul.f32 0.7978846, %v8252_v57 }
0x1499   :  { %v8323_v47 = vadd.f32 1.0, %v9852_v37 }
0x149a   :  { %9853 = vtanh.f32 %v8276_v56 }
0x149b   :  { %v8347_v25 = vmul.f32 %v8323_v47, %v8155_v16 }
0x149d   :  { %8393 = vmatmul.f32.gmra.mxu3 %v8347_v25 }
0x14a0   :  { %v9854_v24 = vpop.eup %9853  ;;  %v7473_v60 = vpop.xlane.xlu2 %7472 }
0x14a1   :  { %v7503_v2 = vmul.f32 %v7473_v60, %v15044_v48  ;;  %v8324_v33 = vadd.f32 1.0, %v9854_v24 }
0x14a3   :  { %v14570_v63 = vsub.f32 %v14420_v14, %v7503_v2  ;;  %v8348_v26 = vmul.f32 %v8324_v33, %v8156_v28 }
0x14a5   :  { %8395 = vmatmul.f32.gmra.mxu3 %v8348_v26  ;;  %v7551_v61 = vmul.f32 %v14570_v63, %v14570_v63 }
0x14a7   :  { %v7596_v58 = vpop.xlane.xlu1 %7595  ;;  %v7615_v59 = vsel %vm300_vm1, %v7551_v61, 0.0 }
0x14a8   :  { %v7640_v35 = vmul.f32 %v7596_v58, %v15044_v48  ;;  %7616 = vadd.xlane.f32.xlu2 %v7615_v59 }
0x14aa   :  { %v7664_v19 = vadd.f32 1e-05, %v7640_v35 }
0x14ac   :  { %9855 = vrsqrt.f32 %v7664_v19  ;;  %vm7811_vm5 = vweird.f32 %v7664_v19 }
0x14af   :  { %v7599_v31 = vpop.xlane.xlu1 %7598  ;;  %v7605_v40 = vpop.xlane.xlu2 %7604 }
0x14b0   :  { %v7641_v13 = vmul.f32 %v7599_v31, %v15044_v48  ;;  %v7643_v45 = vmul.f32 %v7605_v40, %v15044_v48 }
0x14b2   :  { %v9856_v10 = vpop.eup %9855  ;;  %v7665_v51 = vadd.f32 1e-05, %v7641_v13  ;;  %v14582_v56 = vadd.f32 1e-05, %v7643_v45 }
0x14b3   :  { %v7806_v14 = vmul.f32 %v9856_v10, %v7664_v19  ;;  %vm7812_vm4 = vweird.f32 %v9856_v10 }
0x14b4   :  { %9857 = vrsqrt.f32 %v7665_v51  ;;  %vm7813_vm6 = vmor %vm7811_vm5, %vm7812_vm4  ;;  %vm7821_vm8 = vweird.f32 %v7665_v51  ;;  %vm7841_vm10 = vweird.f32 %v14582_v56 }
0x14b5   :  { %v7807_v29 = vmul.f32 %v9856_v10, %v7806_v14  ;;  %9859 = vrsqrt.f32 %v14582_v56 }
0x14b7   :  { %v7808_v49 = vmul.f32 0.5, %v7807_v29 }
0x14b9   :  { %v7809_v32 = vsub.f32 1.5, %v7808_v49 }
0x14ba   :  { %v9858_v11 = vpop.eup %9857 }
0x14bb   :  { %v7810_v42 = vmul.f32 %v9856_v10, %v7809_v32  ;;  %v7816_v53 = vmul.f32 %v9858_v11, %v7665_v51  ;;  %vm7822_vm7 = vweird.f32 %v9858_v11 }
0x14bc   :  { %vm7823_vm9 = vmor %vm7821_vm8, %vm7822_vm7 }
0x14bd   :  { %v7814_v39 = vsel %vm7813_vm6, %v9856_v10, %v7810_v42  ;;  %v7817_v62 = vmul.f32 %v9858_v11, %v7816_v53 }
0x14be   :  { %v7928_v34 = vmul.f32 %v7814_v39, %v14434_v54  ;;  %v8097_v50 = vpop.f32.mrf.mxu1 }
0x14bf   :  { %v7818_v27 = vmul.f32 0.5, %v7817_v62  ;;  %v8098_v38 = vadd.f32 %v14448_v9, %v8097_v50 }
0x14c0   :  { %v7953_v44 = vmul.f32 %v14275_v22, %v7928_v34 }
0x14c1   :  { %v7819_v30 = vsub.f32 1.5, %v7818_v27  ;;  %v8181_v3 = vmul.f32 0.044715, %v8098_v38  ;;  %v8157_v42 = vmul.f32 0.5, %v8098_v38 }
0x14c2   :  { %v7978_v57 = vadd.f32 %v14280_v20, %v7953_v44 }
0x14c3   :  { %v7820_v37 = vmul.f32 %v9858_v11, %v7819_v30  ;;  %v8205_v16 = vmul.f32 %v8181_v3, %v8098_v38 }
0x14c4   :  { %8952 = vmatmul.msk.f32.gmra.mxu1 %vm300_vm1, %v7978_v57 }
0x14c5   :  { %v7824_v54 = vsel %vm7823_vm9, %v9858_v11, %v7820_v37  ;;  %v8229_v47 = vmul.f32 %v8205_v16, %v8098_v38 }
0x14c6   :  { %v7929_v25 = vmul.f32 %v7824_v54, %v14437_v8  ;;  %v8100_v24 = vpop.f32.mrf.mxu1  ;;  %v14592_v8 = vpop.eup %9859 }
0x14c7   :  { %v8101_v60 = vadd.f32 %v14448_v9, %v8100_v24  ;;  %v7608_v2 = vpop.xlane.xlu0 %7607  ;;  %v8253_v28 = vadd.f32 %v8229_v47, %v8098_v38  ;;  %vm7842_vm13 = vweird.f32 %v14592_v8 }
0x14c8   :  { %v7954_v33 = vmul.f32 %v14275_v22, %v7929_v25  ;;  %v7644_v61 = vmul.f32 %v7608_v2, %v15044_v48  ;;  %vm14636_vm0 = vmor %vm7841_vm10, %vm7842_vm13 }
0x14c9   :  { %v8182_v26 = vmul.f32 0.044715, %v8101_v60  ;;  %v8277_v58 = vmul.f32 0.7978846, %v8253_v28  ;;  %v8158_v24 = vmul.f32 0.5, %v8101_v60 }
0x14ca   :  { %v7979_v59 = vadd.f32 %v14280_v20, %v7954_v33  ;;  %v14594_v19 = vadd.f32 1e-05, %v7644_v61  ;;  %v7836_v20 = vmul.f32 %v14592_v8, %v14582_v56 }
0x14cb   :  { %9861 = vtanh.f32 %v8277_v58  ;;  %v8206_v35 = vmul.f32 %v8182_v26, %v8101_v60 }
0x14cc   :  { %8953 = vmatmul.msk.f32.gmra.mxu1 %vm300_vm1, %v7979_v59  ;;  %9863 = vrsqrt.f32 %v14594_v19  ;;  %v7837_v62 = vmul.f32 %v14592_v8, %v7836_v20 }
0x14cd   :  { %v8230_v31 = vmul.f32 %v8206_v35, %v8101_v60 }
0x14ce   :  { %v8103_v13 = vpop.f32.mrf.mxu1  ;;  %v7602_v10 = vpop.xlane.xlu1 %7601  ;;  %v7838_v3 = vmul.f32 0.5, %v7837_v62 }
0x14cf   :  { %v14597_v51 = vadd.f32 %v14448_v9, %v8103_v13  ;;  %v7642_v22 = vmul.f32 %v7602_v10, %v15044_v48  ;;  %v8254_v14 = vadd.f32 %v8230_v31, %v8101_v60 }
0x14d0   :  { %v7839_v61 = vsub.f32 1.5, %v7838_v3 }
0x14d1   :  { %v9862_v29 = vpop.eup %9861  ;;  %v8183_v49 = vmul.f32 0.044715, %v14597_v51  ;;  %v7666_v32 = vadd.f32 1e-05, %v7642_v22  ;;  %v8278_v11 = vmul.f32 0.7978846, %v8254_v14 }
0x14d2   :  { %v8325_v53 = vadd.f32 1.0, %v9862_v29  ;;  %v14607_v45 = vpop.eup %9863 }
0x14d3   :  { %9865 = vrsqrt.f32 %v7666_v32  ;;  %v8207_v39 = vmul.f32 %v8183_v49, %v14597_v51  ;;  %v7846_v16 = vmul.f32 %v14607_v45, %v14594_v19  ;;  %v7840_v49 = vmul.f32 %v14592_v8, %v7839_v61 }
0x14d4   :  { %v8349_v40 = vmul.f32 %v8325_v53, %v8157_v42  ;;  %9867 = vtanh.f32 %v8278_v11  ;;  %v6866_v47 = vpop.xlane.xlu2 %6865  ;;  %vm7831_vm14 = vweird.f32 %v7666_v32  ;;  %vm7852_vm3 = vweird.f32 %v14607_v45 }
0x14d5   :  { %v8231_v27 = vmul.f32 %v8207_v39, %v14597_v51  ;;  %v7847_v35 = vmul.f32 %v14607_v45, %v7846_v16 }
0x14d6   :  { %v8106_v34 = vpop.f32.mrf.mxu1  ;;  %8397 = vmatmul.f32.gmra.mxu3 %v8349_v40  ;;  %v6863_v50 = vpop.xlane.xlu1 %6862 }
0x14d7   :  { %v14610_v44 = vadd.f32 %v14448_v9, %v8106_v34  ;;  %9869 = vrcp.f32 %v6863_v50  ;;  %v8255_v38 = vadd.f32 %v8231_v27, %v14597_v51  ;;  %v7848_v53 = vmul.f32 0.5, %v7847_v35 }
0x14d8   :  { %v8159_v34 = vmul.f32 0.5, %v14597_v51 }
0x14d9   :  { %v9866_v30 = vpop.eup %9865  ;;  %v8184_v57 = vmul.f32 0.044715, %v14610_v44  ;;  %v8279_v25 = vmul.f32 0.7978846, %v8255_v38  ;;  %v7849_v16 = vsub.f32 1.5, %v7848_v53 }
0x14da   :  { %v9868_v37 = vpop.eup %9867  ;;  %v7826_v54 = vmul.f32 %v9866_v30, %v7666_v32  ;;  %vm7832_vm11 = vweird.f32 %v9866_v30  ;;  %v7844_v32 = vsel %vm14636_vm0, %v14592_v8, %v7840_v49 }
0x14db   :  { %v8326_v2 = vadd.f32 1.0, %v9868_v37  ;;  %v8208_v28 = vmul.f32 %v8184_v57, %v14610_v44  ;;  %9871 = vtanh.f32 %v8279_v25  ;;  %vm7833_vm15 = vmor %vm7831_vm14, %vm7832_vm11  ;;  %v14650_v25 = vld [vmem:[#allocation5 + $0x20a] ss:$0 sm:$0xff]  ;;  %v7850_v35 = vmul.f32 %v14607_v45, %v7849_v16 }
0x14dc   :  { %v7827_v33 = vmul.f32 %v9866_v30, %v7826_v54  ;;  %9873 = vrcp.f32 %v6866_v47  ;;  %vm8472_vm11 = vcmask 1041409  }
0x14dd   :  { %v9870_v26 = vpop.eup %9869  ;;  %v8350_v58 = vmul.f32 %v8326_v2, %v8158_v24  ;;  %v8232_v59 = vmul.f32 %v8208_v28, %v14610_v44 }
0x14de   :  { %v7828_v31 = vmul.f32 0.5, %v7827_v33  ;;  %v8109_v13 = vpop.f32.mrf.mxu1  ;;  %v6913_v10 = vmul.f32 %v9870_v26, %v14524_v43  ;;  %v7611_v60 = vpop.xlane.xlu1 %7610  ;;  %v14661_v26 = vld [vmem:[#allocation5 + $0x20b] ss:$0 sm:$0xff] }
0x14df   :  { %v14621_v22 = vadd.f32 %v14448_v9, %v8109_v13  ;;  %8400 = vmatmul.f32.gmra.mxu3 %v8350_v58  ;;  %v8256_v14 = vadd.f32 %v8232_v59, %v14610_v44  ;;  %v7645_v29 = vmul.f32 %v7611_v60, %v15044_v48 }
0x14e0   :  { %v7829_v20 = vsub.f32 1.5, %v7828_v31  ;;  %8937 = vmatmul.msk.f32.gmra.mxu2 %vm1473_vm2, %v6913_v10  ;;  %v8160_v31 = vmul.f32 0.5, %v14610_v44 }
0x14e1   :  { %v8185_v43 = vmul.f32 0.044715, %v14621_v22  ;;  %v8280_v11 = vmul.f32 0.7978846, %v8256_v14  ;;  %v9872_v42 = vpop.eup %9871  ;;  %v14630_v39 = vadd.f32 1e-05, %v7645_v29 }
0x14e2   :  { %v7830_v40 = vmul.f32 %v9866_v30, %v7829_v20  ;;  %v9874_v62 = vpop.eup %9873  ;;  %v8327_v50 = vadd.f32 1.0, %v9872_v42 }
0x14e3   :  { %9875 = vtanh.f32 %v8280_v11  ;;  %v8209_v27 = vmul.f32 %v8185_v43, %v14621_v22  ;;  %v6914_v56 = vmul.f32 %v9874_v62, %v14527_v17  ;;  %v14658_v17 = vpop.f32.mrf.mxu3  ;;  %vm7861_vm6 = vweird.f32 %v14630_v39 }
0x14e4   :  { %v7834_v3 = vsel %vm7833_vm15, %v9866_v30, %v7830_v40  ;;  %9877 = vrsqrt.f32 %v14630_v39  ;;  %v8351_v51 = vmul.f32 %v8327_v50, %v8159_v34 }
0x14e5   :  { %v7930_v57 = vmul.f32 %v7834_v3, %v14508_v23  ;;  %v8233_v37 = vmul.f32 %v8209_v27, %v14621_v22  ;;  %v7931_v23 = vmul.f32 %v7844_v32, %v14454_v46  ;;  %v8161_v27 = vmul.f32 0.5, %v14621_v22 }
0x14e6   :  { %v8112_v54 = vpop.f32.mrf.mxu1  ;;  %v7614_v30 = vpop.xlane.xlu0 %7613 }
0x14e7   :  { %v14648_v47 = vadd.f32 %v14448_v9, %v8112_v54  ;;  %8402 = vmatmul.f32.gmra.mxu3 %v8351_v51  ;;  %v7955_v24 = vmul.f32 %v14650_v25, %v7930_v57  ;;  %v8257_v8 = vadd.f32 %v8233_v37, %v14621_v22  ;;  %v7646_v2 = vmul.f32 %v7614_v30, %v15044_v48 }
0x14e8   :  { %8938 = vmatmul.msk.f32.gmra.mxu2 %vm1473_vm2, %v6914_v56  ;;  %vm7851_vm2 = vweird.f32 %v14594_v19  ;;  %v7956_v29 = vmul.f32 %v14650_v25, %v7931_v23 }
0x14e9   :  { %v9876_v28 = vpop.eup %9875  ;;  %v8186_v33 = vmul.f32 0.044715, %v14648_v47  ;;  %v7980_v61 = vadd.f32 %v14661_v26, %v7955_v24  ;;  %v8281_v58 = vmul.f32 0.7978846, %v8257_v8  ;;  %v7670_v46 = vadd.f32 1e-05, %v7646_v2  ;;  %vm7853_vm4 = vmor %vm7851_vm2, %vm7852_vm3 }
0x14ea   :  { %v9878_v59 = vpop.eup %9877  ;;  %v8328_v13 = vadd.f32 1.0, %v9876_v28  ;;  %v7854_v49 = vsel %vm7853_vm4, %v14607_v45, %v7850_v35  ;;  %v7981_v62 = vadd.f32 %v14661_v26, %v7956_v29  ;;  %vm8475_vm4 = vcmask 1042434  }
0x14eb   :  { %v7856_v10 = vmul.f32 %v9878_v59, %v14630_v39  ;;  %8954 = vmatmul.msk.f32.gmra.mxu1 %vm300_vm1, %v7980_v61  ;;  %9879 = vtanh.f32 %v8281_v58  ;;  %v8210_v60 = vmul.f32 %v8186_v33, %v14648_v47  ;;  %v7932_v53 = vmul.f32 %v7854_v49, %v14497_v36 }
0x14ec   :  { %9881 = vrsqrt.f32 %v7670_v46  ;;  %v8352_v14 = vmul.f32 %v8328_v13, %v8160_v31  ;;  %vm7862_vm5 = vweird.f32 %v9878_v59  ;;  %v8162_v39 = vmul.f32 0.5, %v14648_v47 }
0x14ed   :  { %v7857_v20 = vmul.f32 %v9878_v59, %v7856_v10  ;;  %v8234_v44 = vmul.f32 %v8210_v60, %v14648_v47  ;;  %vm7863_vm7 = vmor %vm7861_vm6, %vm7862_vm5  ;;  %v7957_v51 = vmul.f32 %v14650_v25, %v7932_v53  ;;  %vm7871_vm9 = vweird.f32 %v7670_v46 }
0x14ee   :  { %vm8478_vm5 = vcmask 1043459   ;;  %vm8481_vm6 = vcmask 1044484  }
0x14ef   :  { %v7858_v43 = vmul.f32 0.5, %v7857_v20  ;;  %8404 = vmatmul.f32.gmra.mxu3 %v8352_v14  ;;  %v8258_v11 = vadd.f32 %v8234_v44, %v14648_v47  ;;  %v7982_v8 = vadd.f32 %v14661_v26, %v7957_v51 }
0x14f1   :  { %v9880_v42 = vpop.eup %9879  ;;  %v7859_v19 = vsub.f32 1.5, %v7858_v43  ;;  %v8387_v40 = vpop.f32.mrf.mxu3  ;;  %v8282_v34 = vmul.f32 0.7978846, %v8258_v11  ;;  %v8440_v11 = vadd.f32 %v14658_v17, %v14081_v1 }
0x14f2   :  { %v9882_v50 = vpop.eup %9881  ;;  %v8329_v38 = vadd.f32 1.0, %v9880_v42  ;;  %v14697_v42 = vld [vmem:[#allocation5 + $0x20e] ss:$0 sm:$0xff] }
0x14f3   :  { %v7860_v3 = vmul.f32 %v9878_v59, %v7859_v19  ;;  %v7866_v32 = vmul.f32 %v9882_v50, %v7670_v46  ;;  %8955 = vmatmul.msk.f32.gmra.mxu1 %vm300_vm1, %v7981_v62  ;;  %9883 = vtanh.f32 %v8282_v34  ;;  %vm7872_vm8 = vweird.f32 %v9882_v50 }
0x14f4   :  { %v8353_v45 = vmul.f32 %v8329_v38, %v8161_v27  ;;  %vm7873_vm10 = vmor %vm7871_vm9, %vm7872_vm8  ;;  %vm8490_vm8 = vcmask 1047559  }
0x14f5   :  { %v7867_v36 = vmul.f32 %v9882_v50, %v7866_v32  ;;  %v8115_v57 = vpop.f32.mrf.mxu1  ;;  %v7864_v37 = vsel %vm7863_vm7, %v9878_v59, %v7860_v3  ;;  %vm8487_vm7 = vcmask 1046534  }
0x14f6   :  { %v8116_v16 = vadd.f32 %v14448_v9, %v8115_v57  ;;  %v7933_v30 = vmul.f32 %v7864_v37, %v14539_v6 }
0x14f7   :  { %v7868_v54 = vmul.f32 0.5, %v7867_v36  ;;  %8407 = vmatmul.f32.gmra.mxu3 %v8353_v45 }
0x14f8   :  { %v8187_v22 = vmul.f32 0.044715, %v8116_v16  ;;  %v7958_v58 = vmul.f32 %v14650_v25, %v7933_v30  ;;  %v8163_v60 = vmul.f32 0.5, %v8116_v16  ;;  %v7620_v20 = vpop.xlane.xlu1 %7619 }
0x14f9   :  { %v9884_v56 = vpop.eup %9883  ;;  %v7869_v24 = vsub.f32 1.5, %v7868_v54  ;;  %v7648_v44 = vmul.f32 %v7620_v20, %v15044_v48 }
0x14fa   :  { %v8330_v23 = vadd.f32 1.0, %v9884_v56  ;;  %v8211_v2 = vmul.f32 %v8187_v22, %v8116_v16  ;;  %v7983_v13 = vadd.f32 %v14661_v26, %v7958_v58 }
0x14fb   :  { %v7870_v28 = vmul.f32 %v9882_v50, %v7869_v24  ;;  %8956 = vmatmul.msk.f32.gmra.mxu1 %vm300_vm1, %v7982_v8  ;;  %v7672_v49 = vadd.f32 1e-05, %v7648_v44 }
0x14fc   :  { %v8354_v33 = vmul.f32 %v8330_v23, %v8162_v39  ;;  %v8235_v61 = vmul.f32 %v8211_v2, %v8116_v16 }
0x14fd   :  { %v7874_v59 = vsel %vm7873_vm10, %v9882_v50, %v7870_v28  ;;  %v8449_v50 = vadd.f32 %v14697_v42, %v8440_v11  ;;  %vm7891_vm3 = vweird.f32 %v7672_v49 }
0x14fe   :  { %v8259_v35 = vadd.f32 %v8235_v61, %v8116_v16  ;;  %v7934_v31 = vmul.f32 %v7874_v59, %v14548_v41 }
0x14ff   :  { %8409 = vmatmul.f32.gmra.mxu3 %v8354_v33 }
0x1500   :  { %v8283_v6 = vmul.f32 0.7978846, %v8259_v35  ;;  %v7959_v47 = vmul.f32 %v14650_v25, %v7934_v31 }
0x1502   :  { %9885 = vtanh.f32 %v8283_v6  ;;  %v7984_v46 = vadd.f32 %v14661_v26, %v7959_v47 }
0x1503   :  { %8957 = vmatmul.msk.f32.gmra.mxu1 %vm300_vm1, %v7983_v13  ;;  %9887 = vrsqrt.f32 %v7672_v49 }
0x1508   :  { %v9886_v10 = vpop.eup %9885 }
0x1509   :  { %v8331_v14 = vadd.f32 1.0, %v9886_v10  ;;  %v9888_v62 = vpop.eup %9887 }
0x150a   :  { %v7886_v3 = vmul.f32 %v9888_v62, %v7672_v49  ;;  %vm7892_vm14 = vweird.f32 %v9888_v62 }
0x150b   :  { %8958 = vmatmul.msk.f32.gmra.mxu1 %vm300_vm1, %v7984_v46  ;;  %v8355_v29 = vmul.f32 %v8331_v14, %v8163_v60  ;;  %vm7893_vm2 = vmor %vm7891_vm3, %vm7892_vm14 }
0x150c   :  { %v7887_v1 = vmul.f32 %v9888_v62, %v7886_v3  ;;  %v14716_v3 = vld [vmem:[#allocation5 + $0x20d] ss:$0 sm:$0xff] }
0x150d   :  { %8411 = vmatmul.f32.gmra.mxu3 %v8355_v29 }
0x150e   :  { %v7888_v36 = vmul.f32 0.5, %v7887_v1 }
0x1510   :  { %v8389_v41 = vpop.f32.mrf.mxu3  ;;  %v7889_v37 = vsub.f32 1.5, %v7888_v36 }
0x1512   :  { %v7890_v22 = vmul.f32 %v9888_v62, %v7889_v37 }
0x1514   :  { %v7894_v8 = vsel %vm7893_vm2, %v9888_v62, %v7890_v22 }
0x1515   :  { %v7936_v23 = vmul.f32 %v7894_v8, %v14561_v55 }
0x1517   :  { %v7961_v28 = vmul.f32 %v14650_v25, %v7936_v23 }
0x1518   :  { %v8391_v43 = vpop.f32.mrf.mxu3 }
0x1519   :  { %v8441_v53 = vadd.f32 %v8391_v43, %v14117_v0  ;;  %v7986_v33 = vadd.f32 %v14661_v26, %v7961_v28 }
0x151b   :  { %v8450_v19 = vadd.f32 %v14697_v42, %v8441_v53  ;;  %v7617_v40 = vpop.xlane.xlu2 %7616 }
0x151c   :  { %v7647_v34 = vmul.f32 %v7617_v40, %v15044_v48 }
0x151d   :  { %v8471_v27 = vrot.slane %v8450_v19, 7 }
0x151e   :  { %v7671_v38 = vadd.f32 1e-05, %v7647_v34 }
0x151f   :  { %v8473_v32 = vsel %vm8472_vm11, %v8471_v27, %v8449_v50 }
0x1520   :  { %9889 = vrsqrt.f32 %v7671_v38  ;;  %v8394_v45 = vpop.f32.mrf.mxu3  ;;  %vm7881_vm15 = vweird.f32 %v7671_v38 }
0x1526   :  { %v9890_v17 = vpop.eup %9889 }
0x1527   :  { %v7876_v57 = vmul.f32 %v9890_v17, %v7671_v38  ;;  %vm7882_vm13 = vweird.f32 %v9890_v17 }
0x1528   :  { %v8396_v0 = vpop.f32.mrf.mxu3  ;;  %vm7883_vm0 = vmor %vm7881_vm15, %vm7882_vm13 }
0x1529   :  { %v7877_v51 = vmul.f32 %v9890_v17, %v7876_v57 }
0x152b   :  { %v7878_v16 = vmul.f32 0.5, %v7877_v51 }
0x152d   :  { %v7879_v54 = vsub.f32 1.5, %v7878_v16 }
0x152f   :  { %v7880_v56 = vmul.f32 %v9890_v17, %v7879_v54 }
0x1531   :  { %v7884_v30 = vsel %vm7883_vm0, %v9890_v17, %v7880_v56 }
0x1532   :  { %v7935_v24 = vmul.f32 %v7884_v30, %v14570_v63 }
0x1534   :  { %v7960_v39 = vmul.f32 %v14650_v25, %v7935_v24 }
0x1536   :  { %v7985_v2 = vadd.f32 %v14661_v26, %v7960_v39 }
0x1538   :  { %8959 = vmatmul.msk.f32.gmra.mxu1 %vm300_vm1, %v7985_v2 }
0x1540   :  { %8960 = vmatmul.msk.f32.gmra.mxu1 %vm300_vm1, %v7986_v33 }
0x1541   :  { %v8118_v61 = vpop.f32.mrf.mxu1 }
0x1542   :  { %v8119_v58 = vadd.f32 %v14448_v9, %v8118_v61 }
0x1544   :  { %v8188_v59 = vmul.f32 0.044715, %v8119_v58  ;;  %v8164_v29 = vmul.f32 0.5, %v8119_v58 }
0x1546   :  { %v8212_v63 = vmul.f32 %v8188_v59, %v8119_v58 }
0x1548   :  { %v8236_v35 = vmul.f32 %v8212_v63, %v8119_v58 }
0x1549   :  { %v8121_v6 = vpop.f32.mrf.mxu1 }
0x154a   :  { %v8122_v31 = vadd.f32 %v14448_v9, %v8121_v6  ;;  %v8260_v55 = vadd.f32 %v8236_v35, %v8119_v58 }
0x154c   :  { %v8189_v13 = vmul.f32 0.044715, %v8122_v31  ;;  %v8284_v47 = vmul.f32 0.7978846, %v8260_v55  ;;  %v8165_v53 = vmul.f32 0.5, %v8122_v31 }
0x154e   :  { %9891 = vtanh.f32 %v8284_v47  ;;  %v8213_v10 = vmul.f32 %v8189_v13, %v8122_v31 }
0x1550   :  { %v8237_v46 = vmul.f32 %v8213_v10, %v8122_v31 }
0x1552   :  { %v8261_v60 = vadd.f32 %v8237_v46, %v8122_v31 }
0x1554   :  { %v9892_v14 = vpop.eup %9891  ;;  %v8285_v20 = vmul.f32 0.7978846, %v8261_v60 }
0x1555   :  { %v8332_v44 = vadd.f32 1.0, %v9892_v14 }
0x1556   :  { %9893 = vtanh.f32 %v8285_v20 }
0x1557   :  { %v8356_v41 = vmul.f32 %v8332_v44, %v8164_v29 }
0x1559   :  { %v8398_v49 = vpop.f32.mrf.mxu3  ;;  %8414 = vmatmul.f32.gmra.mxu3 %v8356_v41 }
0x155a   :  { %v8442_v43 = vadd.f32 %v8398_v49, %v14154_v15 }
0x155c   :  { %v9894_v11 = vpop.eup %9893  ;;  %v8451_v9 = vadd.f32 %v14697_v42, %v8442_v43 }
0x155d   :  { %v8333_v19 = vadd.f32 1.0, %v9894_v11 }
0x155e   :  { %v8474_v40 = vrot.slane %v8451_v9, 6 }
0x155f   :  { %v8357_v62 = vmul.f32 %v8333_v19, %v8165_v53 }
0x1560   :  { %v8476_v34 = vsel %vm8475_vm4, %v8474_v40, %v8473_v32 }
0x1561   :  { %8416 = vmatmul.f32.gmra.mxu3 %v8357_v62 }
0x1562   :  { %v8401_v50 = vpop.f32.mrf.mxu3 }
0x1563   :  { %v7261_v27 = vpop.f32.mrf.mxu2 }
0x1564   :  { %7335 = vrot.lane.b32.xlu0 %v7261_v27, %s10022_s24 }
0x1568   :  { %v8124_v38 = vpop.f32.mrf.mxu1 }
0x1569   :  { %v8125_v45 = vadd.f32 %v14716_v3, %v8124_v38 }
0x156a   :  { %v8403_v15 = vpop.f32.mrf.mxu3 }
0x156b   :  { %v8190_v1 = vmul.f32 0.044715, %v8125_v45  ;;  %v7264_v17 = vpop.f32.mrf.mxu2  ;;  %v8166_v63 = vmul.f32 0.5, %v8125_v45 }
0x156c   :  { %7337 = vrot.lane.b32.xlu2 %v7264_v17, %s10022_s24 }
0x156d   :  { %v8214_v36 = vmul.f32 %v8190_v1, %v8125_v45 }
0x156f   :  { %v8238_v57 = vmul.f32 %v8214_v36, %v8125_v45 }
0x1570   :  { %v8127_v0 = vpop.f32.mrf.mxu1 }
0x1571   :  { %v8128_v32 = vadd.f32 %v14716_v3, %v8127_v0  ;;  %v8262_v51 = vadd.f32 %v8238_v57, %v8125_v45 }
0x1572   :  { %v8405_v37 = vpop.f32.mrf.mxu3 }
0x1573   :  { %v8191_v16 = vmul.f32 0.044715, %v8128_v32  ;;  %v8443_v54 = vadd.f32 %v8405_v37, %v14161_v52  ;;  %v8286_v22 = vmul.f32 0.7978846, %v8262_v51  ;;  %v8167_v20 = vmul.f32 0.5, %v8128_v32 }
0x1575   :  { %v8452_v56 = vadd.f32 %v14697_v42, %v8443_v54  ;;  %9895 = vtanh.f32 %v8286_v22  ;;  %v8215_v30 = vmul.f32 %v8191_v16, %v8128_v32 }
0x1577   :  { %v8477_v24 = vrot.slane %v8452_v56, 5  ;;  %v8239_v8 = vmul.f32 %v8215_v30, %v8128_v32 }
0x1578   :  { %v8130_v39 = vpop.f32.mrf.mxu1 }
0x1579   :  { %v14723_v23 = vsel %vm8478_vm5, %v8477_v24, %v8476_v34  ;;  %v8131_v2 = vadd.f32 %v14716_v3, %v8130_v39  ;;  %v8263_v28 = vadd.f32 %v8239_v8, %v8128_v32 }
0x157a   :  { %v8408_v33 = vpop.f32.mrf.mxu3 }
0x157b   :  { %v9896_v61 = vpop.eup %9895  ;;  %v8192_v58 = vmul.f32 0.044715, %v8131_v2  ;;  %v8287_v59 = vmul.f32 0.7978846, %v8263_v28  ;;  %v8168_v62 = vmul.f32 0.5, %v8131_v2 }
0x157c   :  { %v8334_v52 = vadd.f32 1.0, %v9896_v61 }
0x157d   :  { %9897 = vtanh.f32 %v8287_v59  ;;  %v8216_v35 = vmul.f32 %v8192_v58, %v8131_v2 }
0x157e   :  { %v8358_v6 = vmul.f32 %v8334_v52, %v8166_v63 }
0x157f   :  { %v8240_v31 = vmul.f32 %v8216_v35, %v8131_v2 }
0x1580   :  { %v8133_v55 = vpop.f32.mrf.mxu1  ;;  %8418 = vmatmul.f32.gmra.mxu3 %v8358_v6 }
0x1581   :  { %v8134_v13 = vadd.f32 %v14716_v3, %v8133_v55  ;;  %v8264_v47 = vadd.f32 %v8240_v31, %v8131_v2 }
0x1582   :  { %v8410_v10 = vpop.f32.mrf.mxu3 }
0x1583   :  { %v9898_v46 = vpop.eup %9897  ;;  %v8193_v60 = vmul.f32 0.044715, %v8134_v13  ;;  %v8288_v14 = vmul.f32 0.7978846, %v8264_v47  ;;  %v8169_v17 = vmul.f32 0.5, %v8134_v13 }
0x1584   :  { %v8335_v29 = vadd.f32 1.0, %v9898_v46 }
0x1585   :  { %9899 = vtanh.f32 %v8288_v14  ;;  %v8217_v44 = vmul.f32 %v8193_v60, %v8134_v13 }
0x1586   :  { %v8359_v41 = vmul.f32 %v8335_v29, %v8167_v20  ;;  %v15058_v20 = vld [vmem:[#allocation63_spill] sm:$0xff] }
0x1587   :  { %v8241_v49 = vmul.f32 %v8217_v44, %v8134_v13 }
0x1588   :  { %v8136_v43 = vpop.f32.mrf.mxu1  ;;  %8421 = vmatmul.f32.gmra.mxu3 %v8359_v41 }
0x1589   :  { %v8137_v11 = vadd.f32 %v14716_v3, %v8136_v43  ;;  %v8265_v9 = vadd.f32 %v8241_v49, %v8134_v13  ;;  %v15059_v43 = vld [vmem:[#allocation62_spill] sm:$0xff] }
0x158b   :  { %v9900_v53 = vpop.eup %9899  ;;  %v8194_v19 = vmul.f32 0.044715, %v8137_v11  ;;  %v8289_v40 = vmul.f32 0.7978846, %v8265_v9  ;;  %v8170_v32 = vmul.f32 0.5, %v8137_v11 }
0x158c   :  { %v8336_v34 = vadd.f32 1.0, %v9900_v53 }
0x158d   :  { %9901 = vtanh.f32 %v8289_v40  ;;  %v8218_v50 = vmul.f32 %v8194_v19, %v8137_v11 }
0x158e   :  { %v8360_v27 = vmul.f32 %v8336_v34, %v8168_v62 }
0x158f   :  { %v8242_v38 = vmul.f32 %v8218_v50, %v8137_v11 }
0x1590   :  { %8423 = vmatmul.f32.gmra.mxu3 %v8360_v27  ;;  %v8412_v10 = vpop.f32.mrf.mxu3 }
0x1591   :  { %v8266_v45 = vadd.f32 %v8242_v38, %v8137_v11  ;;  %v8444_v19 = vadd.f32 %v8412_v10, %v14105_v21  ;;  %v8459_v21 = vld [vmem:[#allocation5 + $0x68] sm:$0xff]  ;;  %v9242_v10 = vld [vmem:[#allocation5 + $0x78] ss:$0 sm:$0xff] }
0x1593   :  { %v9902_v15 = vpop.eup %9901  ;;  %v8290_v1 = vmul.f32 0.7978846, %v8266_v45 }
0x1594   :  { %v8337_v36 = vadd.f32 1.0, %v9902_v15 }
0x1595   :  { %9903 = vtanh.f32 %v8290_v1 }
0x1596   :  { %v8361_v57 = vmul.f32 %v8337_v36, %v8169_v17  ;;  %v8460_v36 = vld [vmem:[#allocation5 + $0x70] sm:$0xff] }
0x1597   :  { %8506 = vmatpush.msrb.mxu0 %v8460_v36 }
0x1598   :  { %8425 = vmatmul.f32.gmra.mxu3 %v8361_v57  ;;  %v8458_v57 = vld [vmem:[#allocation5 + $0x60] sm:$0xff] }
0x1599   :  { %8507 = vmatpush.msrb.mxu0 %v8459_v21 }
0x159b   :  { %v9904_v0 = vpop.eup %9903  ;;  %8508 = vmatpush.msrb.mxu0 %v8458_v57 }
0x159c   :  { %v8338_v51 = vadd.f32 1.0, %v9904_v0 }
0x159e   :  { %v8362_v37 = vmul.f32 %v8338_v51, %v8170_v32 }
0x15a0   :  { %8428 = vmatmul.f32.gmra.mxu3 %v8362_v37 }
0x15b5   :  { %v8139_v16 = vpop.f32.mrf.mxu1 }
0x15b6   :  { %v8140_v54 = vadd.f32 %v14716_v3, %v8139_v16 }
0x15b8   :  { %v8195_v22 = vmul.f32 0.044715, %v8140_v54  ;;  %v8171_v52 = vmul.f32 0.5, %v8140_v54 }
0x15ba   :  { %v8219_v56 = vmul.f32 %v8195_v22, %v8140_v54 }
0x15bc   :  { %v8243_v30 = vmul.f32 %v8219_v56, %v8140_v54 }
0x15bd   :  { %v8142_v24 = vpop.f32.mrf.mxu1 }
0x15be   :  { %v8143_v8 = vadd.f32 %v14716_v3, %v8142_v24  ;;  %v8267_v39 = vadd.f32 %v8243_v30, %v8140_v54 }
0x15c0   :  { %v8196_v2 = vmul.f32 0.044715, %v8143_v8  ;;  %v8291_v28 = vmul.f32 0.7978846, %v8267_v39  ;;  %v8172_v55 = vmul.f32 0.5, %v8143_v8 }
0x15c2   :  { %9905 = vtanh.f32 %v8291_v28  ;;  %v8220_v33 = vmul.f32 %v8196_v2, %v8143_v8 }
0x15c4   :  { %v8244_v61 = vmul.f32 %v8220_v33, %v8143_v8 }
0x15c6   :  { %v8268_v58 = vadd.f32 %v8244_v61, %v8143_v8  ;;  %v7338_v14 = vpop.permute.xlu2 %7337 }
0x15c7   :  { %v7386_v41 = vsel %vm1057_vm12, %v13869_v5, %v7338_v14 }
0x15c8   :  { %v9906_v59 = vpop.eup %9905  ;;  %v8292_v63 = vmul.f32 0.7978846, %v8268_v58  ;;  %v7410_v11 = vadd.f32 %v7386_v41, %v15059_v43 }
0x15c9   :  { %v8339_v35 = vadd.f32 1.0, %v9906_v59 }
0x15ca   :  { %9907 = vtanh.f32 %v8292_v63  ;;  %v7480_v9 = vsel %vm300_vm1, %v7410_v11, 0.0 }
0x15cb   :  { %v8363_v6 = vmul.f32 %v8339_v35, %v8171_v52 }
0x15cd   :  { %8430 = vmatmul.f32.gmra.mxu3 %v8363_v6 }
0x15d0   :  { %v9908_v31 = vpop.eup %9907 }
0x15d1   :  { %v8340_v13 = vadd.f32 1.0, %v9908_v31 }
0x15d3   :  { %v8364_v47 = vmul.f32 %v8340_v13, %v8172_v55 }
0x15d5   :  { %8432 = vmatmul.f32.gmra.mxu3 %v8364_v47 }
0x15d6   :  { %v7336_v46 = vpop.permute.xlu0 %7335 }
0x15d7   :  { %v7385_v60 = vsel %vm1057_vm12, %v13867_v12, %v7336_v46  ;;  %v8453_v12 = vadd.f32 %v14697_v42, %v8444_v19  ;;  %vm8484_vm12 = vcmask 1045509  }
0x15d8   :  { %v7409_v29 = vadd.f32 %v7385_v60, %v15058_v20 }
0x15d9   :  { %v8480_v34 = vrot.slane %v8453_v12, 4 }
0x15da   :  { %v7477_v44 = vsel %vm300_vm1, %v7409_v29, 0.0 }
0x15db   :  { %7478 = vadd.xlane.f32.xlu1 %v7477_v44  ;;  %v8482_v27 = vsel %vm8481_vm6, %v8480_v34, %v14723_v23 }
0x15dc   :  { %v8415_v49 = vpop.f32.mrf.mxu3 }
0x15e3   :  { %7481 = vadd.xlane.f32.xlu1 %v7480_v9 }
0x15e4   :  { %v8417_v53 = vpop.f32.mrf.mxu3 }
0x1603   :  { %v8419_v40 = vpop.f32.mrf.mxu3 }
0x1604   :  { %v8445_v62 = vadd.f32 %v8419_v40, %v14337_v7  ;;  %v8457_v7 = vld [vmem:[#allocation5 + $0x58] sm:$0xff] }
0x1605   :  { %8509 = vmatpush.msrb.mxu0 %v8457_v7 }
0x1606   :  { %v8454_v50 = vadd.f32 %v14697_v42, %v8445_v62 }
0x1608   :  { %v8483_v5 = vrot.slane %v8454_v50, 3 }
0x160a   :  { %v8485_v38 = vsel %vm8484_vm12, %v8483_v5, %v8482_v27 }
0x160b   :  { %v8422_v45 = vpop.f32.mrf.mxu3 }
0x1613   :  { %v8424_v15 = vpop.f32.mrf.mxu3 }
0x161b   :  { %v8426_v1 = vpop.f32.mrf.mxu3 }
0x161c   :  { %v8446_v23 = vadd.f32 %v8426_v1, %v14364_v18 }
0x161e   :  { %v8455_v22 = vadd.f32 %v14697_v42, %v8446_v23 }
0x1620   :  { %v8486_v2 = vrot.slane %v8455_v22, 2 }
0x1622   :  { %v8488_v58 = vsel %vm8487_vm7, %v8486_v2, %v8485_v38 }
0x1623   :  { %v8429_v17 = vpop.f32.mrf.mxu3 }
0x164e   :  { %v7479_v0 = vpop.xlane.xlu1 %7478 }
0x164f   :  { %v7505_v32 = vmul.f32 %v7479_v0, %v15044_v48 }
0x1650   :  { %v8431_v51 = vpop.f32.mrf.mxu3 }
0x1651   :  { %v7529_v37 = vsub.f32 %v7409_v29, %v7505_v32 }
0x1653   :  { %v7553_v16 = vmul.f32 %v7529_v37, %v7529_v37 }
0x1655   :  { %v7621_v54 = vsel %vm300_vm1, %v7553_v16, 0.0 }
0x1656   :  { %7622 = vadd.xlane.f32.xlu0 %v7621_v54  ;;  %v7482_v56 = vpop.xlane.xlu1 %7481 }
0x1657   :  { %v7506_v30 = vmul.f32 %v7482_v56, %v15044_v48 }
0x1658   :  { %v8433_v24 = vpop.f32.mrf.mxu3 }
0x1659   :  { %v7530_v8 = vsub.f32 %v7410_v11, %v7506_v30  ;;  %v8447_v39 = vadd.f32 %v8433_v24, %v14393_v4 }
0x165b   :  { %v8456_v28 = vadd.f32 %v14697_v42, %v8447_v39  ;;  %v7554_v33 = vmul.f32 %v7530_v8, %v7530_v8 }
0x165d   :  { %v8489_v18 = vrot.slane %v8456_v28, 1  ;;  %v7624_v61 = vsel %vm300_vm1, %v7554_v33, 0.0 }
0x165e   :  { %7625 = vadd.xlane.f32.xlu1 %v7624_v61 }
0x165f   :  { %v8491_v59 = vsel %vm8490_vm8, %v8489_v18, %v8488_v58 }
0x1660   :  { %8963 = vmatmul.msk.f32.vlgmr.msrb.gmra.mxu0 %vm300_vm1, %v8491_v59 }
0x16c9   :  { %v7623_v63 = vpop.xlane.xlu0 %7622 }
0x16ca   :  { %v7649_v52 = vmul.f32 %v7623_v63, %v15044_v48 }
0x16cc   :  { %v7673_v35 = vadd.f32 1e-05, %v7649_v52 }
0x16ce   :  { %9909 = vrsqrt.f32 %v7673_v35  ;;  %vm7901_vm10 = vweird.f32 %v7673_v35 }
0x16d1   :  { %v7626_v4 = vpop.xlane.xlu1 %7625 }
0x16d2   :  { %v7650_v6 = vmul.f32 %v7626_v4, %v15044_v48 }
0x16d4   :  { %v9910_v31 = vpop.eup %9909  ;;  %v7674_v42 = vadd.f32 1e-05, %v7650_v6 }
0x16d5   :  { %v7896_v55 = vmul.f32 %v9910_v31, %v7673_v35  ;;  %vm7902_vm9 = vweird.f32 %v9910_v31 }
0x16d6   :  { %9911 = vrsqrt.f32 %v7674_v42  ;;  %vm7903_vm11 = vmor %vm7901_vm10, %vm7902_vm9  ;;  %vm7911_vm14 = vweird.f32 %v7674_v42 }
0x16d7   :  { %v7897_v13 = vmul.f32 %v9910_v31, %v7896_v55 }
0x16d9   :  { %v7898_v47 = vmul.f32 0.5, %v7897_v13 }
0x16db   :  { %v7899_v46 = vsub.f32 1.5, %v7898_v47 }
0x16dc   :  { %v9912_v60 = vpop.eup %9911 }
0x16dd   :  { %v7900_v14 = vmul.f32 %v9910_v31, %v7899_v46  ;;  %v7906_v20 = vmul.f32 %v9912_v60, %v7674_v42  ;;  %v8511_v29 = vpop.f32.mrf.mxu0  ;;  %vm7912_vm13 = vweird.f32 %v9912_v60 }
0x16de   :  { %v8512_v44 = vadd.f32 %v9242_v10, %v8511_v29  ;;  %vm7913_vm15 = vmor %vm7911_vm14, %vm7912_vm13 }
0x16df   :  { %v7904_v41 = vsel %vm7903_vm11, %v9910_v31, %v7900_v14  ;;  %v7907_v49 = vmul.f32 %v9912_v60, %v7906_v20 }
0x16e0   :  { %v7937_v43 = vmul.f32 %v7904_v41, %v7529_v37  ;;  %8514 = vmax.xlane.f32.xlu2 %v8512_v44 }
0x16e1   :  { %v7908_v48 = vmul.f32 0.5, %v7907_v49 }
0x16e2   :  { %v7962_v11 = vmul.f32 %v14650_v25, %v7937_v43 }
0x16e3   :  { %v7909_v9 = vsub.f32 1.5, %v7908_v48 }
0x16e4   :  { %v7987_v53 = vadd.f32 %v14661_v26, %v7962_v11 }
0x16e5   :  { %v7910_v19 = vmul.f32 %v9912_v60, %v7909_v9 }
0x16e6   :  { %8961 = vmatmul.msk.f32.gmra.mxu1 %vm300_vm1, %v7987_v53 }
0x16e7   :  { %v7914_v12 = vsel %vm7913_vm15, %v9912_v60, %v7910_v19 }
0x16e8   :  { %v7938_v40 = vmul.f32 %v7914_v12, %v7530_v8 }
0x16ea   :  { %v7963_v62 = vmul.f32 %v14650_v25, %v7938_v40 }
0x16ec   :  { %v7988_v34 = vadd.f32 %v14661_v26, %v7963_v62 }
0x16ee   :  { %8962 = vmatmul.msk.f32.gmra.mxu1 %vm300_vm1, %v7988_v34 }
0x1753   :  { %v8515_v50 = vpop.xlane.xlu2 %8514 }
0x1754   :  { %v8516_v5 = vsub.f32 %v8512_v44, %v8515_v50 }
0x1756   :  { %v8517_v27 = vmul.f32 1.442695, %v8516_v5 }
0x1758   :  { %9913 = vpow2.f32 %v8517_v27 }
0x175e   :  { %v9914_v38 = vpop.eup %9913 }
0x175f   :  { %8519 = vadd.xlane.f32.xlu1 %v9914_v38 }
0x1763   :  { %v8145_v45 = vpop.f32.mrf.mxu1 }
0x1764   :  { %v8146_v15 = vadd.f32 %v14716_v3, %v8145_v45 }
0x1766   :  { %v8197_v1 = vmul.f32 0.044715, %v8146_v15  ;;  %v8173_v16 = vmul.f32 0.5, %v8146_v15 }
0x1768   :  { %v8221_v17 = vmul.f32 %v8197_v1, %v8146_v15 }
0x176a   :  { %v8245_v36 = vmul.f32 %v8221_v17, %v8146_v15 }
0x176b   :  { %v8148_v21 = vpop.f32.mrf.mxu1 }
0x176c   :  { %v8149_v57 = vadd.f32 %v14716_v3, %v8148_v21  ;;  %v8269_v25 = vadd.f32 %v8245_v36, %v8146_v15 }
0x176e   :  { %v8198_v7 = vmul.f32 0.044715, %v8149_v57  ;;  %v8293_v26 = vmul.f32 0.7978846, %v8269_v25  ;;  %v8174_v30 = vmul.f32 0.5, %v8149_v57 }
0x1770   :  { %9915 = vtanh.f32 %v8293_v26  ;;  %v8222_v0 = vmul.f32 %v8198_v7, %v8149_v57 }
0x1772   :  { %v8246_v32 = vmul.f32 %v8222_v0, %v8149_v57 }
0x1774   :  { %v8270_v51 = vadd.f32 %v8246_v32, %v8149_v57 }
0x1776   :  { %v9916_v37 = vpop.eup %9915  ;;  %v8294_v23 = vmul.f32 0.7978846, %v8270_v51 }
0x1777   :  { %v8341_v54 = vadd.f32 1.0, %v9916_v37 }
0x1778   :  { %9917 = vtanh.f32 %v8294_v23 }
0x1779   :  { %v8365_v22 = vmul.f32 %v8341_v54, %v8173_v16 }
0x177b   :  { %8435 = vmatmul.f32.gmra.mxu3 %v8365_v22 }
0x177e   :  { %v9918_v56 = vpop.eup %9917 }
0x177f   :  { %v8342_v24 = vadd.f32 1.0, %v9918_v56 }
0x1781   :  { %v8366_v8 = vmul.f32 %v8342_v24, %v8174_v30 }
0x1783   :  { %8437 = vmatmul.f32.gmra.mxu3 %v8366_v8 }
0x17d2   :  { %v8520_v3 = vpop.xlane.xlu1 %8519 }
0x17d3   :  { %9919 = vrcp.f32 %v8520_v3  ;;  %v8532_v33 = vand.u32 2147483648, %v8520_v3  ;;  %v8530_v61 = vand.u32 2147483647, %v8520_v3  ;;  %vm8526_vm0 = vweird.f32 %v8520_v3 }
0x17d5   :  { %v8533_v59 = vor.u32 1.1754944e-38, %v8532_v33  ;;  %vm8531_vm2 = vcmp.eq.f32.partialorder %v8530_v61, 8.507059e+37 }
0x17d9   :  { %v9920_v39 = vpop.eup %9919 }
0x17da   :  { %v8522_v2 = vmul.f32 %v9920_v39, %v8520_v3  ;;  %vm8527_vm1 = vweird.f32 %v9920_v39 }
0x17db   :  { %vm8528_vm3 = vmor %vm8526_vm0, %vm8527_vm1 }
0x17dc   :  { %v8523_v28 = vsub.f32 1.0, %v8522_v2 }
0x17de   :  { %v8524_v18 = vmul.f32 %v9920_v39, %v8523_v28 }
0x17e0   :  { %v8525_v58 = vadd.f32 %v9920_v39, %v8524_v18 }
0x17e2   :  { %v8529_v63 = vsel %vm8528_vm3, %v9920_v39, %v8525_v58 }
0x17e3   :  { %v8534_v52 = vsel %vm8531_vm2, %v8533_v59, %v8529_v63 }
0x17e4   :  { %v8535_v35 = vmul.f32 %v9914_v38, %v8534_v52 }
0x17e6   :  { %8536 = vst [vmem:[#allocation7] sm:$0xff] %v8535_v35 }
0x17e7   :  { %8547 = dma.vmem_to_hbm [thread:$0]  %s8543_s26, 128, %s8545_s29, [#allocation4]  }
0x17fe   :  { %v8436_v4 = vpop.f32.mrf.mxu3 }
0x1806   :  { %v8438_v6 = vpop.f32.mrf.mxu3 }
0x1807   :  { %10009 = dma.done.wait [#allocation4], 128  }
0x1808   :  { %10010 = vsyncadd [#allocation4], 4294967168 }
0x1809   :  { %8552 = vsyncpa [#allocation3], 1 }
0x180a   :  { %8553 = vsyncpa [#allocation6], 1 }
0x180b   :  { %8554 = vsyncpa [#allocation4], 1 }

</bundles_post_ra>
